<compile_context>
chip_gen: v6e
topology: v6e:2x2x1
jax: 0.10.0
libtpu: 0.0.40
codegen_flags: <defaults>
</compile_context>

<pallas_src>
import numpy as np
import jax
import jax.numpy as jnp
from jax.experimental import pallas as pl
from jax.experimental.pallas import tpu as pltpu

EPS = 1e-5          # nn.InstanceNorm2d default eps
NEG_SLOPE = 0.01    # F.leaky_relu default negative_slope
STRIDES = (1, 2, 1, 2)


def _make_kernel(cnt1,
                 off2, p2, cin2, cnt2,
                 off3, p3, cin3, cnt3,
                 off4, p4, cin4, cnt4):
    """Build the fused 4-layer kernel.  All geometry args are static Python ints."""

    def norm_lrelu(y, mask, count):
        # InstanceNorm2d (biased variance, eps inside rsqrt) over the `count`
        # valid rows (mask==1), then LeakyReLU.  Entirely in f32.
        inv = 1.0 / float(count)
        ym = y if mask is None else y * mask
        mean = jnp.sum(ym, axis=0, keepdims=True) * inv
        cent = y - mean
        c2 = cent * cent if mask is None else cent * cent * mask
        var = jnp.sum(c2, axis=0, keepdims=True) * inv
        yn = cent * jax.lax.rsqrt(var + EPS)
        return jnp.where(yn >= 0.0, yn, NEG_SLOPE * yn)

    def conv9(a_bf, w_ref, offs, p, cin):
        # 3x3 conv as 9 accumulated (p, cin) x (cin, cout) MXU matmuls over
        # contiguous static slices of the flattened activation; f32 accumulate.
        w = w_ref[...]
        acc = None
        for t, off in enumerate(offs):
            part = jnp.dot(a_bf[off:off + p, :], w[t * cin:(t + 1) * cin, :],
                           preferred_element_type=jnp.float32)
            acc = part if acc is None else acc + part
        return acc

    def kernel(x_ref, w1_ref, w2_ref, w3_ref, w4_ref, sel_ref,
               m2_ref, m3_ref, m4_ref, o_ref):
        # Layer 1: host-built (phase-major) im2col -> single K=9*Cin matmul.
        y1 = jnp.dot(x_ref[0], w1_ref[...], preferred_element_type=jnp.float32)
        a1 = norm_lrelu(y1, None, cnt1).astype(jnp.bfloat16)

        # Layer 2 (stride 2): contiguous-slice taps on the phase-major layout.
        y2 = conv9(a1, w2_ref, off2, p2, cin2)
        a2 = norm_lrelu(y2, m2_ref[...], cnt2).astype(jnp.bfloat16)

        # Layer 3 (stride 1): works directly on layer-2's padded pseudo grid.
        y3 = conv9(a2, w3_ref, off3, p3, cin3)
        a3 = norm_lrelu(y3, m3_ref[...], cnt3).astype(jnp.bfloat16)
        # Tiny one-hot reorder into a 2x2 space-to-depth layout so layer 4's
        # stride-2 taps are contiguous slices again (applied post-norm -> exact).
        a3c = jnp.dot(sel_ref[...], a3,
                      preferred_element_type=jnp.float32).astype(jnp.bfloat16)

        # Layer 4 (stride 2).
        y4 = conv9(a3c, w4_ref, off4, p4, cin4)
        a4 = norm_lrelu(y4, m4_ref[...], cnt4)
        o_ref[0] = a4.astype(o_ref.dtype)

    return kernel


@jax.jit
def smallnet_forward(x_nchw, params):
    """SmallNet forward. Input NCHW (PyTorch convention), output NCHW."""
    n, c0, h, w = x_nchw.shape

    # ---- static geometry ---------------------------------------------------
    h1, w1 = h - 2, w - 2                       # layer-1 output (stride 1)
    assert h1 % 2 == 0 and w1 % 2 == 0, "need even 3x3-valid dims for the phase split"
    ph1, pw1 = h1 // 2, w1 // 2                 # per-phase grid of layer-1 output
    h2, w2 = (h1 - 3) // 2 + 1, (w1 - 3) // 2 + 1
    h3, w3 = h2 - 2, w2 - 2
    assert h3 % 2 == 0 and w3 % 2 == 0          # TODO(synk): pad for odd sizes
    ph3, pw3 = h3 // 2, w3 // 2
    h4, w4 = (h3 - 3) // 2 + 1, (w3 - 3) // 2 + 1

    p1 = h1 * w1                                # = 4 * ph1 * pw1
    p2 = (h2 - 1) * pw1 + w2                    # layer-2 pseudo rows (h2*w2 valid)
    p3 = (h3 - 1) * pw1 + w3
    p4 = (h4 - 1) * pw3 + w4

    def s2_offsets(phh, pww):                   # taps of a stride-2 layer on a
        return tuple((2 * (dh % 2) + (dw % 2)) * phh * pww    # phase-major layout
                     + (dh // 2) * pww + (dw // 2)
                     for dh in range(3) for dw in range(3))

    off2 = s2_offsets(ph1, pw1)
    off3 = tuple(dh * pw1 + dw for dh in range(3) for dw in range(3))
    off4 = s2_offsets(ph3, pw3)

    # ---- host-side layer-1 im2col, rows in 2x2 phase-major order -----------
    x_nhwc = jnp.transpose(x_nchw, (0, 2, 3, 1))
    taps = [x_nhwc[:, dh:dh + h1, dw:dw + w1, :]
            for dh in range(3) for dw in range(3)]
    pat = jnp.concatenate(taps, axis=-1)                      # (n, h1, w1, 9*c0)
    pat = pat.reshape(n, ph1, 2, pw1, 2, 9 * c0)
    pat = jnp.transpose(pat, (0, 2, 4, 1, 3, 5))              # (n, py, px, a, b, K)
    pat = pat.reshape(n, p1, 9 * c0).astype(jnp.bfloat16)

    # ---- weights: (Cout,Cin,3,3) -> (9*Cin, Cout) bf16 (bias cancels in norm)
    wm = [jnp.transpose(wgt, (2, 3, 1, 0)).reshape(9 * wgt.shape[1], wgt.shape[0])
          .astype(jnp.bfloat16) for wgt, _b in params]
    c1o, c2o, c3o, c4o = (p[0].shape[0] for p in params)

    # ---- tiny constants: valid-row masks + layer-3 -> layer-4 reorder ------
    def col_mask(p, width, valid_w):
        r = np.arange(p)
        return jnp.asarray(((r % width) < valid_w).astype(np.float32)[:, None])

    m2 = col_mask(p2, pw1, w2)
    m3 = col_mask(p3, pw1, w3)
    m4 = col_mask(p4, pw3, w4)

    sel = np.zeros((h3 * w3, p3), np.float32)
    for py in range(2):
        for px in range(2):
            for a in range(ph3):
                for b in range(pw3):
                    dst = ((2 * py + px) * ph3 + a) * pw3 + b
                    src = (2 * a + py) * pw1 + (2 * b + px)
                    sel[dst, src] = 1.0
    sel = jnp.asarray(sel).astype(jnp.bfloat16)

    kernel = _make_kernel(p1,
                          off2, p2, c1o, h2 * w2,
                          off3, p3, c2o, h3 * w3,
                          off4, p4, c3o, h4 * w4)

    out_unc = pl.pallas_call(
        kernel,
        out_shape=jax.ShapeDtypeStruct((n, p4, c4o), jnp.float32),
        grid=(n,),
        in_specs=[
            pl.BlockSpec((1, p1, 9 * c0), lambda i: (i, 0, 0)),
            pl.BlockSpec(wm[0].shape, lambda i: (0, 0)),
            pl.BlockSpec(wm[1].shape, lambda i: (0, 0)),
            pl.BlockSpec(wm[2].shape, lambda i: (0, 0)),
            pl.BlockSpec(wm[3].shape, lambda i: (0, 0)),
            pl.BlockSpec(sel.shape, lambda i: (0, 0)),
            pl.BlockSpec(m2.shape, lambda i: (0, 0)),
            pl.BlockSpec(m3.shape, lambda i: (0, 0)),
            pl.BlockSpec(m4.shape, lambda i: (0, 0)),
        ],
        out_specs=pl.BlockSpec((1, p4, c4o), lambda i: (i, 0, 0)),
        compiler_params=pltpu.CompilerParams(
            dimension_semantics=("parallel",)),
    )(pat, *wm, sel, m2, m3, m4)

    # ---- drop the padded pseudo columns of the final grid (host side) ------
    rows = (np.arange(h4)[:, None] * pw3 + np.arange(w4)[None, :]).reshape(-1)
    out = jnp.take(out_unc, jnp.asarray(rows.astype(np.int32)), axis=1)
    out = out.reshape(n, h4, w4, c4o)
    return jnp.transpose(out, (0, 3, 1, 2))                   # -> NCHW


def init_smallnet_params(input_channel, output_channel, key):
    """Deterministic synthetic parameters with PyTorch conv shapes."""
    shapes = [
        (32, input_channel, 3, 3),
        (32, 32, 3, 3),
        (64, 32, 3, 3),
        (output_channel, 64, 3, 3),
    ]
    params = []
    for i, s in enumerate(shapes):
        kw_, kb_ = jax.random.split(jax.random.fold_in(key, i))
        fan_in = s[1] * s[2] * s[3]
        bound = 1.0 / jnp.sqrt(fan_in)
        wgt = jax.random.uniform(kw_, s, jnp.float32, -bound, bound)
        b = jax.random.uniform(kb_, (s[0],), jnp.float32, -bound, bound)
        params.append((wgt, b))
    return params


def reference_forward(x_nchw, params):
    """Pure-XLA f32 reference matching the PyTorch module (bias included)."""
    out = x_nchw.astype(jnp.float32)
    for (wgt, b), s in zip(params, STRIDES):
        out = jax.lax.conv_general_dilated(
            out, wgt, window_strides=(s, s), padding="VALID",
            dimension_numbers=("NCHW", "OIHW", "NCHW"))
        out = out + b.reshape(1, -1, 1, 1)
        mean = jnp.mean(out, axis=(2, 3), keepdims=True)
        var = jnp.mean((out - mean) ** 2, axis=(2, 3), keepdims=True)
        out = (out - mean) * jax.lax.rsqrt(var + EPS)
        out = jnp.where(out >= 0.0, out, NEG_SLOPE * out)
    return out


if __name__ == "__main__":
    key = jax.random.PRNGKey(0)
    k_x, k_p = jax.random.split(key)

    # batch=2, RGB-like input_channel=3, spatial 32x32, output_channel=64.
    # Valid 3x3 convs with strides 1,2,1,2 -> 30, 14, 12, 5.
    N, CIN, H, W = 2, 3, 32, 32
    COUT = 64
    x = jax.random.normal(k_x, (N, CIN, H, W), jnp.float32)
    params = init_smallnet_params(CIN, COUT, k_p)

    out = jax.block_until_ready(smallnet_forward(x, params))
    assert out.shape == (N, COUT, 5, 5), out.shape
    assert bool(jnp.all(jnp.isfinite(out)))

    # Check against the f32 XLA reference (bf16 matmul operands, f32 everywhere
    # else -> loose-ish tolerance; accumulation/norm now stay f32 end to end).
    ref = jax.block_until_ready(reference_forward(x, params))
    err = float(jnp.max(jnp.abs(out - ref)))
    assert err < 0.3, f"max abs err vs reference: {err}"

    print("KERNEL_OK")
</pallas_src>

<mosaic_0001>
module attributes {stable_mosaic.version = 11 : i64} {
  func.func @kernel(%arg0: i32, %arg1: memref<1x900x27xbf16, #tpu.memory_space<vmem>>, %arg2: memref<27x32xbf16, #tpu.memory_space<vmem>>, %arg3: memref<288x32xbf16, #tpu.memory_space<vmem>>, %arg4: memref<288x64xbf16, #tpu.memory_space<vmem>>, %arg5: memref<576x64xbf16, #tpu.memory_space<vmem>>, %arg6: memref<144x177xbf16, #tpu.memory_space<vmem>>, %arg7: memref<209x1xf32, #tpu.memory_space<vmem>>, %arg8: memref<177x1xf32, #tpu.memory_space<vmem>>, %arg9: memref<29x1xf32, #tpu.memory_space<vmem>>, %arg10: memref<1x29x64xf32, #tpu.memory_space<vmem>>) attributes {dimension_semantics = [#tpu.dimension_semantics<parallel>], iteration_bounds = array<i64: 2>, scalar_prefetch = 0 : i64, scratch_operands = 0 : i64, tpu.core_type = #tpu.core_type<tc>, window_params = [{transform_indices = @transform_0, window_bounds = array<i64: 1, 900, 27>}, {pipeline_mode = #tpu.pipeline_mode<synchronous>, transform_indices = @transform_1, window_bounds = array<i64: 27, 32>}, {pipeline_mode = #tpu.pipeline_mode<synchronous>, transform_indices = @transform_2, window_bounds = array<i64: 288, 32>}, {pipeline_mode = #tpu.pipeline_mode<synchronous>, transform_indices = @transform_3, window_bounds = array<i64: 288, 64>}, {pipeline_mode = #tpu.pipeline_mode<synchronous>, transform_indices = @transform_4, window_bounds = array<i64: 576, 64>}, {pipeline_mode = #tpu.pipeline_mode<synchronous>, transform_indices = @transform_5, window_bounds = array<i64: 144, 177>}, {pipeline_mode = #tpu.pipeline_mode<synchronous>, transform_indices = @transform_6, window_bounds = array<i64: 209, 1>}, {pipeline_mode = #tpu.pipeline_mode<synchronous>, transform_indices = @transform_7, window_bounds = array<i64: 177, 1>}, {pipeline_mode = #tpu.pipeline_mode<synchronous>, transform_indices = @transform_8, window_bounds = array<i64: 29, 1>}, {transform_indices = @transform_9, window_bounds = array<i64: 1, 29, 64>}]} {
    %c0 = arith.constant 0 : index
    %c0_0 = arith.constant 0 : index
    %c0_1 = arith.constant 0 : index
    %0 = vector.load %arg1[%c0, %c0_0, %c0_1] : memref<1x900x27xbf16, #tpu.memory_space<vmem>>, vector<1x900x27xbf16>
    %1 = vector.shape_cast %0 : vector<1x900x27xbf16> to vector<900x27xbf16>
    %c0_2 = arith.constant 0 : index
    %c0_3 = arith.constant 0 : index
    %2 = vector.load %arg2[%c0_2, %c0_3] : memref<27x32xbf16, #tpu.memory_space<vmem>>, vector<27x32xbf16>
    %cst = arith.constant dense<0.000000e+00> : vector<900x32xf32>
    %3 = tpu.matmul %1, %2, %cst {dimension_numbers = #tpu.dot_dimension_numbers<[1], [0], [0], [1], [0, 0, 1, 1], [], []>} : vector<900x27xbf16>, vector<27x32xbf16>, vector<900x32xf32> -> vector<900x32xf32>
    %cst_4 = arith.constant dense<0.000000e+00> : vector<32xf32>
    %4 = vector.multi_reduction <add>, %3, %cst_4 [0] : vector<900x32xf32> to vector<32xf32>
    %5 = vector.shape_cast %4 : vector<32xf32> to vector<1x32xf32>
    %cst_5 = arith.constant 0.00111111114 : f32
    %6 = vector.broadcast %cst_5 : f32 to vector<1x32xf32>
    %7 = arith.mulf %5, %6 : vector<1x32xf32>
    %8 = vector.broadcast %7 : vector<1x32xf32> to vector<900x32xf32>
    %9 = arith.subf %3, %8 : vector<900x32xf32>
    %10 = arith.mulf %9, %9 : vector<900x32xf32>
    %cst_6 = arith.constant dense<0.000000e+00> : vector<32xf32>
    %11 = vector.multi_reduction <add>, %10, %cst_6 [0] : vector<900x32xf32> to vector<32xf32>
    %12 = vector.shape_cast %11 : vector<32xf32> to vector<1x32xf32>
    %cst_7 = arith.constant 0.00111111114 : f32
    %13 = vector.broadcast %cst_7 : f32 to vector<1x32xf32>
    %14 = arith.mulf %12, %13 : vector<1x32xf32>
    %cst_8 = arith.constant 9.99999974E-6 : f32
    %15 = vector.broadcast %cst_8 : f32 to vector<1x32xf32>
    %16 = arith.addf %14, %15 : vector<1x32xf32>
    %17 = math.rsqrt %16 : vector<1x32xf32>
    %18 = vector.broadcast %17 : vector<1x32xf32> to vector<900x32xf32>
    %19 = arith.mulf %9, %18 : vector<900x32xf32>
    %cst_9 = arith.constant 0.000000e+00 : f32
    %20 = vector.broadcast %cst_9 : f32 to vector<900x32xf32>
    %21 = arith.cmpf oge, %19, %20 : vector<900x32xf32>
    %cst_10 = arith.constant 0.00999999977 : f32
    %22 = vector.broadcast %cst_10 : f32 to vector<900x32xf32>
    %23 = arith.mulf %22, %19 : vector<900x32xf32>
    %24 = arith.select %21, %19, %23 : vector<900x32xi1>, vector<900x32xf32>
    %25 = arith.truncf %24 : vector<900x32xf32> to vector<900x32xbf16>
    %c0_11 = arith.constant 0 : index
    %c0_12 = arith.constant 0 : index
    %26 = vector.load %arg3[%c0_11, %c0_12] : memref<288x32xbf16, #tpu.memory_space<vmem>>, vector<288x32xbf16>
    %27 = vector.extract_strided_slice %25 {offsets = [0, 0], sizes = [209, 32], strides = [1, 1]} : vector<900x32xbf16> to vector<209x32xbf16>
    %28 = vector.extract_strided_slice %26 {offsets = [0, 0], sizes = [32, 32], strides = [1, 1]} : vector<288x32xbf16> to vector<32x32xbf16>
    %cst_13 = arith.constant dense<0.000000e+00> : vector<209x32xf32>
    %29 = tpu.matmul %27, %28, %cst_13 {dimension_numbers = #tpu.dot_dimension_numbers<[1], [0], [0], [1], [0, 0, 1, 1], [], []>} : vector<209x32xbf16>, vector<32x32xbf16>, vector<209x32xf32> -> vector<209x32xf32>
    %30 = vector.extract_strided_slice %25 {offsets = [225, 0], sizes = [209, 32], strides = [1, 1]} : vector<900x32xbf16> to vector<209x32xbf16>
    %31 = vector.extract_strided_slice %26 {offsets = [32, 0], sizes = [32, 32], strides = [1, 1]} : vector<288x32xbf16> to vector<32x32xbf16>
    %cst_14 = arith.constant dense<0.000000e+00> : vector<209x32xf32>
    %32 = tpu.matmul %30, %31, %cst_14 {dimension_numbers = #tpu.dot_dimension_numbers<[1], [0], [0], [1], [0, 0, 1, 1], [], []>} : vector<209x32xbf16>, vector<32x32xbf16>, vector<209x32xf32> -> vector<209x32xf32>
    %33 = arith.addf %29, %32 : vector<209x32xf32>
    %34 = vector.extract_strided_slice %25 {offsets = [1, 0], sizes = [209, 32], strides = [1, 1]} : vector<900x32xbf16> to vector<209x32xbf16>
    %35 = vector.extract_strided_slice %26 {offsets = [64, 0], sizes = [32, 32], strides = [1, 1]} : vector<288x32xbf16> to vector<32x32xbf16>
    %cst_15 = arith.constant dense<0.000000e+00> : vector<209x32xf32>
    %36 = tpu.matmul %34, %35, %cst_15 {dimension_numbers = #tpu.dot_dimension_numbers<[1], [0], [0], [1], [0, 0, 1, 1], [], []>} : vector<209x32xbf16>, vector<32x32xbf16>, vector<209x32xf32> -> vector<209x32xf32>
    %37 = arith.addf %33, %36 : vector<209x32xf32>
    %38 = vector.extract_strided_slice %25 {offsets = [450, 0], sizes = [209, 32], strides = [1, 1]} : vector<900x32xbf16> to vector<209x32xbf16>
    %39 = vector.extract_strided_slice %26 {offsets = [96, 0], sizes = [32, 32], strides = [1, 1]} : vector<288x32xbf16> to vector<32x32xbf16>
    %cst_16 = arith.constant dense<0.000000e+00> : vector<209x32xf32>
    %40 = tpu.matmul %38, %39, %cst_16 {dimension_numbers = #tpu.dot_dimension_numbers<[1], [0], [0], [1], [0, 0, 1, 1], [], []>} : vector<209x32xbf16>, vector<32x32xbf16>, vector<209x32xf32> -> vector<209x32xf32>
    %41 = arith.addf %37, %40 : vector<209x32xf32>
    %42 = vector.extract_strided_slice %25 {offsets = [675, 0], sizes = [209, 32], strides = [1, 1]} : vector<900x32xbf16> to vector<209x32xbf16>
    %43 = vector.extract_strided_slice %26 {offsets = [128, 0], sizes = [32, 32], strides = [1, 1]} : vector<288x32xbf16> to vector<32x32xbf16>
    %cst_17 = arith.constant dense<0.000000e+00> : vector<209x32xf32>
    %44 = tpu.matmul %42, %43, %cst_17 {dimension_numbers = #tpu.dot_dimension_numbers<[1], [0], [0], [1], [0, 0, 1, 1], [], []>} : vector<209x32xbf16>, vector<32x32xbf16>, vector<209x32xf32> -> vector<209x32xf32>
    %45 = arith.addf %41, %44 : vector<209x32xf32>
    %46 = vector.extract_strided_slice %25 {offsets = [451, 0], sizes = [209, 32], strides = [1, 1]} : vector<900x32xbf16> to vector<209x32xbf16>
    %47 = vector.extract_strided_slice %26 {offsets = [160, 0], sizes = [32, 32], strides = [1, 1]} : vector<288x32xbf16> to vector<32x32xbf16>
    %cst_18 = arith.constant dense<0.000000e+00> : vector<209x32xf32>
    %48 = tpu.matmul %46, %47, %cst_18 {dimension_numbers = #tpu.dot_dimension_numbers<[1], [0], [0], [1], [0, 0, 1, 1], [], []>} : vector<209x32xbf16>, vector<32x32xbf16>, vector<209x32xf32> -> vector<209x32xf32>
    %49 = arith.addf %45, %48 : vector<209x32xf32>
    %50 = vector.extract_strided_slice %25 {offsets = [15, 0], sizes = [209, 32], strides = [1, 1]} : vector<900x32xbf16> to vector<209x32xbf16>
    %51 = vector.extract_strided_slice %26 {offsets = [192, 0], sizes = [32, 32], strides = [1, 1]} : vector<288x32xbf16> to vector<32x32xbf16>
    %cst_19 = arith.constant dense<0.000000e+00> : vector<209x32xf32>
    %52 = tpu.matmul %50, %51, %cst_19 {dimension_numbers = #tpu.dot_dimension_numbers<[1], [0], [0], [1], [0, 0, 1, 1], [], []>} : vector<209x32xbf16>, vector<32x32xbf16>, vector<209x32xf32> -> vector<209x32xf32>
    %53 = arith.addf %49, %52 : vector<209x32xf32>
    %54 = vector.extract_strided_slice %25 {offsets = [240, 0], sizes = [209, 32], strides = [1, 1]} : vector<900x32xbf16> to vector<209x32xbf16>
    %55 = vector.extract_strided_slice %26 {offsets = [224, 0], sizes = [32, 32], strides = [1, 1]} : vector<288x32xbf16> to vector<32x32xbf16>
    %cst_20 = arith.constant dense<0.000000e+00> : vector<209x32xf32>
    %56 = tpu.matmul %54, %55, %cst_20 {dimension_numbers = #tpu.dot_dimension_numbers<[1], [0], [0], [1], [0, 0, 1, 1], [], []>} : vector<209x32xbf16>, vector<32x32xbf16>, vector<209x32xf32> -> vector<209x32xf32>
    %57 = arith.addf %53, %56 : vector<209x32xf32>
    %58 = vector.extract_strided_slice %25 {offsets = [16, 0], sizes = [209, 32], strides = [1, 1]} : vector<900x32xbf16> to vector<209x32xbf16>
    %59 = vector.extract_strided_slice %26 {offsets = [256, 0], sizes = [32, 32], strides = [1, 1]} : vector<288x32xbf16> to vector<32x32xbf16>
    %cst_21 = arith.constant dense<0.000000e+00> : vector<209x32xf32>
    %60 = tpu.matmul %58, %59, %cst_21 {dimension_numbers = #tpu.dot_dimension_numbers<[1], [0], [0], [1], [0, 0, 1, 1], [], []>} : vector<209x32xbf16>, vector<32x32xbf16>, vector<209x32xf32> -> vector<209x32xf32>
    %61 = arith.addf %57, %60 : vector<209x32xf32>
    %c0_22 = arith.constant 0 : index
    %c0_23 = arith.constant 0 : index
    %62 = vector.load %arg7[%c0_22, %c0_23] : memref<209x1xf32, #tpu.memory_space<vmem>>, vector<209x1xf32>
    %63 = vector.broadcast %62 : vector<209x1xf32> to vector<209x32xf32>
    %64 = arith.mulf %61, %63 : vector<209x32xf32>
    %cst_24 = arith.constant dense<0.000000e+00> : vector<32xf32>
    %65 = vector.multi_reduction <add>, %64, %cst_24 [0] : vector<209x32xf32> to vector<32xf32>
    %66 = vector.shape_cast %65 : vector<32xf32> to vector<1x32xf32>
    %cst_25 = arith.constant 0.00510204071 : f32
    %67 = vector.broadcast %cst_25 : f32 to vector<1x32xf32>
    %68 = arith.mulf %66, %67 : vector<1x32xf32>
    %69 = vector.broadcast %68 : vector<1x32xf32> to vector<209x32xf32>
    %70 = arith.subf %61, %69 : vector<209x32xf32>
    %71 = arith.mulf %70, %70 : vector<209x32xf32>
    %72 = vector.broadcast %62 : vector<209x1xf32> to vector<209x32xf32>
    %73 = arith.mulf %71, %72 : vector<209x32xf32>
    %cst_26 = arith.constant dense<0.000000e+00> : vector<32xf32>
    %74 = vector.multi_reduction <add>, %73, %cst_26 [0] : vector<209x32xf32> to vector<32xf32>
    %75 = vector.shape_cast %74 : vector<32xf32> to vector<1x32xf32>
    %cst_27 = arith.constant 0.00510204071 : f32
    %76 = vector.broadcast %cst_27 : f32 to vector<1x32xf32>
    %77 = arith.mulf %75, %76 : vector<1x32xf32>
    %cst_28 = arith.constant 9.99999974E-6 : f32
    %78 = vector.broadcast %cst_28 : f32 to vector<1x32xf32>
    %79 = arith.addf %77, %78 : vector<1x32xf32>
    %80 = math.rsqrt %79 : vector<1x32xf32>
    %81 = vector.broadcast %80 : vector<1x32xf32> to vector<209x32xf32>
    %82 = arith.mulf %70, %81 : vector<209x32xf32>
    %cst_29 = arith.constant 0.000000e+00 : f32
    %83 = vector.broadcast %cst_29 : f32 to vector<209x32xf32>
    %84 = arith.cmpf oge, %82, %83 : vector<209x32xf32>
    %cst_30 = arith.constant 0.00999999977 : f32
    %85 = vector.broadcast %cst_30 : f32 to vector<209x32xf32>
    %86 = arith.mulf %85, %82 : vector<209x32xf32>
    %87 = arith.select %84, %82, %86 : vector<209x32xi1>, vector<209x32xf32>
    %88 = arith.truncf %87 : vector<209x32xf32> to vector<209x32xbf16>
    %c0_31 = arith.constant 0 : index
    %c0_32 = arith.constant 0 : index
    %89 = vector.load %arg4[%c0_31, %c0_32] : memref<288x64xbf16, #tpu.memory_space<vmem>>, vector<288x64xbf16>
    %90 = vector.extract_strided_slice %88 {offsets = [0, 0], sizes = [177, 32], strides = [1, 1]} : vector<209x32xbf16> to vector<177x32xbf16>
    %91 = vector.extract_strided_slice %89 {offsets = [0, 0], sizes = [32, 64], strides = [1, 1]} : vector<288x64xbf16> to vector<32x64xbf16>
    %cst_33 = arith.constant dense<0.000000e+00> : vector<177x64xf32>
    %92 = tpu.matmul %90, %91, %cst_33 {dimension_numbers = #tpu.dot_dimension_numbers<[1], [0], [0], [1], [0, 0, 1, 1], [], []>} : vector<177x32xbf16>, vector<32x64xbf16>, vector<177x64xf32> -> vector<177x64xf32>
    %93 = vector.extract_strided_slice %88 {offsets = [1, 0], sizes = [177, 32], strides = [1, 1]} : vector<209x32xbf16> to vector<177x32xbf16>
    %94 = vector.extract_strided_slice %89 {offsets = [32, 0], sizes = [32, 64], strides = [1, 1]} : vector<288x64xbf16> to vector<32x64xbf16>
    %cst_34 = arith.constant dense<0.000000e+00> : vector<177x64xf32>
    %95 = tpu.matmul %93, %94, %cst_34 {dimension_numbers = #tpu.dot_dimension_numbers<[1], [0], [0], [1], [0, 0, 1, 1], [], []>} : vector<177x32xbf16>, vector<32x64xbf16>, vector<177x64xf32> -> vector<177x64xf32>
    %96 = arith.addf %92, %95 : vector<177x64xf32>
    %97 = vector.extract_strided_slice %88 {offsets = [2, 0], sizes = [177, 32], strides = [1, 1]} : vector<209x32xbf16> to vector<177x32xbf16>
    %98 = vector.extract_strided_slice %89 {offsets = [64, 0], sizes = [32, 64], strides = [1, 1]} : vector<288x64xbf16> to vector<32x64xbf16>
    %cst_35 = arith.constant dense<0.000000e+00> : vector<177x64xf32>
    %99 = tpu.matmul %97, %98, %cst_35 {dimension_numbers = #tpu.dot_dimension_numbers<[1], [0], [0], [1], [0, 0, 1, 1], [], []>} : vector<177x32xbf16>, vector<32x64xbf16>, vector<177x64xf32> -> vector<177x64xf32>
    %100 = arith.addf %96, %99 : vector<177x64xf32>
    %101 = vector.extract_strided_slice %88 {offsets = [15, 0], sizes = [177, 32], strides = [1, 1]} : vector<209x32xbf16> to vector<177x32xbf16>
    %102 = vector.extract_strided_slice %89 {offsets = [96, 0], sizes = [32, 64], strides = [1, 1]} : vector<288x64xbf16> to vector<32x64xbf16>
    %cst_36 = arith.constant dense<0.000000e+00> : vector<177x64xf32>
    %103 = tpu.matmul %101, %102, %cst_36 {dimension_numbers = #tpu.dot_dimension_numbers<[1], [0], [0], [1], [0, 0, 1, 1], [], []>} : vector<177x32xbf16>, vector<32x64xbf16>, vector<177x64xf32> -> vector<177x64xf32>
    %104 = arith.addf %100, %103 : vector<177x64xf32>
    %105 = vector.extract_strided_slice %88 {offsets = [16, 0], sizes = [177, 32], strides = [1, 1]} : vector<209x32xbf16> to vector<177x32xbf16>
    %106 = vector.extract_strided_slice %89 {offsets = [128, 0], sizes = [32, 64], strides = [1, 1]} : vector<288x64xbf16> to vector<32x64xbf16>
    %cst_37 = arith.constant dense<0.000000e+00> : vector<177x64xf32>
    %107 = tpu.matmul %105, %106, %cst_37 {dimension_numbers = #tpu.dot_dimension_numbers<[1], [0], [0], [1], [0, 0, 1, 1], [], []>} : vector<177x32xbf16>, vector<32x64xbf16>, vector<177x64xf32> -> vector<177x64xf32>
    %108 = arith.addf %104, %107 : vector<177x64xf32>
    %109 = vector.extract_strided_slice %88 {offsets = [17, 0], sizes = [177, 32], strides = [1, 1]} : vector<209x32xbf16> to vector<177x32xbf16>
    %110 = vector.extract_strided_slice %89 {offsets = [160, 0], sizes = [32, 64], strides = [1, 1]} : vector<288x64xbf16> to vector<32x64xbf16>
    %cst_38 = arith.constant dense<0.000000e+00> : vector<177x64xf32>
    %111 = tpu.matmul %109, %110, %cst_38 {dimension_numbers = #tpu.dot_dimension_numbers<[1], [0], [0], [1], [0, 0, 1, 1], [], []>} : vector<177x32xbf16>, vector<32x64xbf16>, vector<177x64xf32> -> vector<177x64xf32>
    %112 = arith.addf %108, %111 : vector<177x64xf32>
    %113 = vector.extract_strided_slice %88 {offsets = [30, 0], sizes = [177, 32], strides = [1, 1]} : vector<209x32xbf16> to vector<177x32xbf16>
    %114 = vector.extract_strided_slice %89 {offsets = [192, 0], sizes = [32, 64], strides = [1, 1]} : vector<288x64xbf16> to vector<32x64xbf16>
    %cst_39 = arith.constant dense<0.000000e+00> : vector<177x64xf32>
    %115 = tpu.matmul %113, %114, %cst_39 {dimension_numbers = #tpu.dot_dimension_numbers<[1], [0], [0], [1], [0, 0, 1, 1], [], []>} : vector<177x32xbf16>, vector<32x64xbf16>, vector<177x64xf32> -> vector<177x64xf32>
    %116 = arith.addf %112, %115 : vector<177x64xf32>
    %117 = vector.extract_strided_slice %88 {offsets = [31, 0], sizes = [177, 32], strides = [1, 1]} : vector<209x32xbf16> to vector<177x32xbf16>
    %118 = vector.extract_strided_slice %89 {offsets = [224, 0], sizes = [32, 64], strides = [1, 1]} : vector<288x64xbf16> to vector<32x64xbf16>
    %cst_40 = arith.constant dense<0.000000e+00> : vector<177x64xf32>
    %119 = tpu.matmul %117, %118, %cst_40 {dimension_numbers = #tpu.dot_dimension_numbers<[1], [0], [0], [1], [0, 0, 1, 1], [], []>} : vector<177x32xbf16>, vector<32x64xbf16>, vector<177x64xf32> -> vector<177x64xf32>
    %120 = arith.addf %116, %119 : vector<177x64xf32>
    %121 = vector.extract_strided_slice %88 {offsets = [32, 0], sizes = [177, 32], strides = [1, 1]} : vector<209x32xbf16> to vector<177x32xbf16>
    %122 = vector.extract_strided_slice %89 {offsets = [256, 0], sizes = [32, 64], strides = [1, 1]} : vector<288x64xbf16> to vector<32x64xbf16>
    %cst_41 = arith.constant dense<0.000000e+00> : vector<177x64xf32>
    %123 = tpu.matmul %121, %122, %cst_41 {dimension_numbers = #tpu.dot_dimension_numbers<[1], [0], [0], [1], [0, 0, 1, 1], [], []>} : vector<177x32xbf16>, vector<32x64xbf16>, vector<177x64xf32> -> vector<177x64xf32>
    %124 = arith.addf %120, %123 : vector<177x64xf32>
    %c0_42 = arith.constant 0 : index
    %c0_43 = arith.constant 0 : index
    %125 = vector.load %arg8[%c0_42, %c0_43] : memref<177x1xf32, #tpu.memory_space<vmem>>, vector<177x1xf32>
    %126 = vector.broadcast %125 : vector<177x1xf32> to vector<177x64xf32>
    %127 = arith.mulf %124, %126 : vector<177x64xf32>
    %cst_44 = arith.constant dense<0.000000e+00> : vector<64xf32>
    %128 = vector.multi_reduction <add>, %127, %cst_44 [0] : vector<177x64xf32> to vector<64xf32>
    %129 = vector.shape_cast %128 : vector<64xf32> to vector<1x64xf32>
    %cst_45 = arith.constant 0.0069444445 : f32
    %130 = vector.broadcast %cst_45 : f32 to vector<1x64xf32>
    %131 = arith.mulf %129, %130 : vector<1x64xf32>
    %132 = vector.broadcast %131 : vector<1x64xf32> to vector<177x64xf32>
    %133 = arith.subf %124, %132 : vector<177x64xf32>
    %134 = arith.mulf %133, %133 : vector<177x64xf32>
    %135 = vector.broadcast %125 : vector<177x1xf32> to vector<177x64xf32>
    %136 = arith.mulf %134, %135 : vector<177x64xf32>
    %cst_46 = arith.constant dense<0.000000e+00> : vector<64xf32>
    %137 = vector.multi_reduction <add>, %136, %cst_46 [0] : vector<177x64xf32> to vector<64xf32>
    %138 = vector.shape_cast %137 : vector<64xf32> to vector<1x64xf32>
    %cst_47 = arith.constant 0.0069444445 : f32
    %139 = vector.broadcast %cst_47 : f32 to vector<1x64xf32>
    %140 = arith.mulf %138, %139 : vector<1x64xf32>
    %cst_48 = arith.constant 9.99999974E-6 : f32
    %141 = vector.broadcast %cst_48 : f32 to vector<1x64xf32>
    %142 = arith.addf %140, %141 : vector<1x64xf32>
    %143 = math.rsqrt %142 : vector<1x64xf32>
    %144 = vector.broadcast %143 : vector<1x64xf32> to vector<177x64xf32>
    %145 = arith.mulf %133, %144 : vector<177x64xf32>
    %cst_49 = arith.constant 0.000000e+00 : f32
    %146 = vector.broadcast %cst_49 : f32 to vector<177x64xf32>
    %147 = arith.cmpf oge, %145, %146 : vector<177x64xf32>
    %cst_50 = arith.constant 0.00999999977 : f32
    %148 = vector.broadcast %cst_50 : f32 to vector<177x64xf32>
    %149 = arith.mulf %148, %145 : vector<177x64xf32>
    %150 = arith.select %147, %145, %149 : vector<177x64xi1>, vector<177x64xf32>
    %151 = arith.truncf %150 : vector<177x64xf32> to vector<177x64xbf16>
    %c0_51 = arith.constant 0 : index
    %c0_52 = arith.constant 0 : index
    %152 = vector.load %arg6[%c0_51, %c0_52] : memref<144x177xbf16, #tpu.memory_space<vmem>>, vector<144x177xbf16>
    %cst_53 = arith.constant dense<0.000000e+00> : vector<144x64xf32>
    %153 = tpu.matmul %152, %151, %cst_53 {dimension_numbers = #tpu.dot_dimension_numbers<[1], [0], [0], [1], [0, 0, 1, 1], [], []>} : vector<144x177xbf16>, vector<177x64xbf16>, vector<144x64xf32> -> vector<144x64xf32>
    %154 = arith.truncf %153 : vector<144x64xf32> to vector<144x64xbf16>
    %c0_54 = arith.constant 0 : index
    %c0_55 = arith.constant 0 : index
    %155 = vector.load %arg5[%c0_54, %c0_55] : memref<576x64xbf16, #tpu.memory_space<vmem>>, vector<576x64xbf16>
    %156 = vector.extract_strided_slice %154 {offsets = [0, 0], sizes = [29, 64], strides = [1, 1]} : vector<144x64xbf16> to vector<29x64xbf16>
    %157 = vector.extract_strided_slice %155 {offsets = [0, 0], sizes = [64, 64], strides = [1, 1]} : vector<576x64xbf16> to vector<64x64xbf16>
    %cst_56 = arith.constant dense<0.000000e+00> : vector<29x64xf32>
    %158 = tpu.matmul %156, %157, %cst_56 {dimension_numbers = #tpu.dot_dimension_numbers<[1], [0], [0], [1], [0, 0, 1, 1], [], []>} : vector<29x64xbf16>, vector<64x64xbf16>, vector<29x64xf32> -> vector<29x64xf32>
    %159 = vector.extract_strided_slice %154 {offsets = [36, 0], sizes = [29, 64], strides = [1, 1]} : vector<144x64xbf16> to vector<29x64xbf16>
    %160 = vector.extract_strided_slice %155 {offsets = [64, 0], sizes = [64, 64], strides = [1, 1]} : vector<576x64xbf16> to vector<64x64xbf16>
    %cst_57 = arith.constant dense<0.000000e+00> : vector<29x64xf32>
    %161 = tpu.matmul %159, %160, %cst_57 {dimension_numbers = #tpu.dot_dimension_numbers<[1], [0], [0], [1], [0, 0, 1, 1], [], []>} : vector<29x64xbf16>, vector<64x64xbf16>, vector<29x64xf32> -> vector<29x64xf32>
    %162 = arith.addf %158, %161 : vector<29x64xf32>
    %163 = vector.extract_strided_slice %154 {offsets = [1, 0], sizes = [29, 64], strides = [1, 1]} : vector<144x64xbf16> to vector<29x64xbf16>
    %164 = vector.extract_strided_slice %155 {offsets = [128, 0], sizes = [64, 64], strides = [1, 1]} : vector<576x64xbf16> to vector<64x64xbf16>
    %cst_58 = arith.constant dense<0.000000e+00> : vector<29x64xf32>
    %165 = tpu.matmul %163, %164, %cst_58 {dimension_numbers = #tpu.dot_dimension_numbers<[1], [0], [0], [1], [0, 0, 1, 1], [], []>} : vector<29x64xbf16>, vector<64x64xbf16>, vector<29x64xf32> -> vector<29x64xf32>
    %166 = arith.addf %162, %165 : vector<29x64xf32>
    %167 = vector.extract_strided_slice %154 {offsets = [72, 0], sizes = [29, 64], strides = [1, 1]} : vector<144x64xbf16> to vector<29x64xbf16>
    %168 = vector.extract_strided_slice %155 {offsets = [192, 0], sizes = [64, 64], strides = [1, 1]} : vector<576x64xbf16> to vector<64x64xbf16>
    %cst_59 = arith.constant dense<0.000000e+00> : vector<29x64xf32>
    %169 = tpu.matmul %167, %168, %cst_59 {dimension_numbers = #tpu.dot_dimension_numbers<[1], [0], [0], [1], [0, 0, 1, 1], [], []>} : vector<29x64xbf16>, vector<64x64xbf16>, vector<29x64xf32> -> vector<29x64xf32>
    %170 = arith.addf %166, %169 : vector<29x64xf32>
    %171 = vector.extract_strided_slice %154 {offsets = [108, 0], sizes = [29, 64], strides = [1, 1]} : vector<144x64xbf16> to vector<29x64xbf16>
    %172 = vector.extract_strided_slice %155 {offsets = [256, 0], sizes = [64, 64], strides = [1, 1]} : vector<576x64xbf16> to vector<64x64xbf16>
    %cst_60 = arith.constant dense<0.000000e+00> : vector<29x64xf32>
    %173 = tpu.matmul %171, %172, %cst_60 {dimension_numbers = #tpu.dot_dimension_numbers<[1], [0], [0], [1], [0, 0, 1, 1], [], []>} : vector<29x64xbf16>, vector<64x64xbf16>, vector<29x64xf32> -> vector<29x64xf32>
    %174 = arith.addf %170, %173 : vector<29x64xf32>
    %175 = vector.extract_strided_slice %154 {offsets = [73, 0], sizes = [29, 64], strides = [1, 1]} : vector<144x64xbf16> to vector<29x64xbf16>
    %176 = vector.extract_strided_slice %155 {offsets = [320, 0], sizes = [64, 64], strides = [1, 1]} : vector<576x64xbf16> to vector<64x64xbf16>
    %cst_61 = arith.constant dense<0.000000e+00> : vector<29x64xf32>
    %177 = tpu.matmul %175, %176, %cst_61 {dimension_numbers = #tpu.dot_dimension_numbers<[1], [0], [0], [1], [0, 0, 1, 1], [], []>} : vector<29x64xbf16>, vector<64x64xbf16>, vector<29x64xf32> -> vector<29x64xf32>
    %178 = arith.addf %174, %177 : vector<29x64xf32>
    %179 = vector.extract_strided_slice %154 {offsets = [6, 0], sizes = [29, 64], strides = [1, 1]} : vector<144x64xbf16> to vector<29x64xbf16>
    %180 = vector.extract_strided_slice %155 {offsets = [384, 0], sizes = [64, 64], strides = [1, 1]} : vector<576x64xbf16> to vector<64x64xbf16>
    %cst_62 = arith.constant dense<0.000000e+00> : vector<29x64xf32>
    %181 = tpu.matmul %179, %180, %cst_62 {dimension_numbers = #tpu.dot_dimension_numbers<[1], [0], [0], [1], [0, 0, 1, 1], [], []>} : vector<29x64xbf16>, vector<64x64xbf16>, vector<29x64xf32> -> vector<29x64xf32>
    %182 = arith.addf %178, %181 : vector<29x64xf32>
    %183 = vector.extract_strided_slice %154 {offsets = [42, 0], sizes = [29, 64], strides = [1, 1]} : vector<144x64xbf16> to vector<29x64xbf16>
    %184 = vector.extract_strided_slice %155 {offsets = [448, 0], sizes = [64, 64], strides = [1, 1]} : vector<576x64xbf16> to vector<64x64xbf16>
    %cst_63 = arith.constant dense<0.000000e+00> : vector<29x64xf32>
    %185 = tpu.matmul %183, %184, %cst_63 {dimension_numbers = #tpu.dot_dimension_numbers<[1], [0], [0], [1], [0, 0, 1, 1], [], []>} : vector<29x64xbf16>, vector<64x64xbf16>, vector<29x64xf32> -> vector<29x64xf32>
    %186 = arith.addf %182, %185 : vector<29x64xf32>
    %187 = vector.extract_strided_slice %154 {offsets = [7, 0], sizes = [29, 64], strides = [1, 1]} : vector<144x64xbf16> to vector<29x64xbf16>
    %188 = vector.extract_strided_slice %155 {offsets = [512, 0], sizes = [64, 64], strides = [1, 1]} : vector<576x64xbf16> to vector<64x64xbf16>
    %cst_64 = arith.constant dense<0.000000e+00> : vector<29x64xf32>
    %189 = tpu.matmul %187, %188, %cst_64 {dimension_numbers = #tpu.dot_dimension_numbers<[1], [0], [0], [1], [0, 0, 1, 1], [], []>} : vector<29x64xbf16>, vector<64x64xbf16>, vector<29x64xf32> -> vector<29x64xf32>
    %190 = arith.addf %186, %189 : vector<29x64xf32>
    %c0_65 = arith.constant 0 : index
    %c0_66 = arith.constant 0 : index
    %191 = vector.load %arg9[%c0_65, %c0_66] : memref<29x1xf32, #tpu.memory_space<vmem>>, vector<29x1xf32>
    %192 = vector.broadcast %191 : vector<29x1xf32> to vector<29x64xf32>
    %193 = arith.mulf %190, %192 : vector<29x64xf32>
    %cst_67 = arith.constant dense<0.000000e+00> : vector<64xf32>
    %194 = vector.multi_reduction <add>, %193, %cst_67 [0] : vector<29x64xf32> to vector<64xf32>
    %195 = vector.shape_cast %194 : vector<64xf32> to vector<1x64xf32>
    %cst_68 = arith.constant 4.000000e-02 : f32
    %196 = vector.broadcast %cst_68 : f32 to vector<1x64xf32>
    %197 = arith.mulf %195, %196 : vector<1x64xf32>
    %198 = vector.broadcast %197 : vector<1x64xf32> to vector<29x64xf32>
    %199 = arith.subf %190, %198 : vector<29x64xf32>
    %200 = arith.mulf %199, %199 : vector<29x64xf32>
    %201 = vector.broadcast %191 : vector<29x1xf32> to vector<29x64xf32>
    %202 = arith.mulf %200, %201 : vector<29x64xf32>
    %cst_69 = arith.constant dense<0.000000e+00> : vector<64xf32>
    %203 = vector.multi_reduction <add>, %202, %cst_69 [0] : vector<29x64xf32> to vector<64xf32>
    %204 = vector.shape_cast %203 : vector<64xf32> to vector<1x64xf32>
    %cst_70 = arith.constant 4.000000e-02 : f32
    %205 = vector.broadcast %cst_70 : f32 to vector<1x64xf32>
    %206 = arith.mulf %204, %205 : vector<1x64xf32>
    %cst_71 = arith.constant 9.99999974E-6 : f32
    %207 = vector.broadcast %cst_71 : f32 to vector<1x64xf32>
    %208 = arith.addf %206, %207 : vector<1x64xf32>
    %209 = math.rsqrt %208 : vector<1x64xf32>
    %210 = vector.broadcast %209 : vector<1x64xf32> to vector<29x64xf32>
    %211 = arith.mulf %199, %210 : vector<29x64xf32>
    %cst_72 = arith.constant 0.000000e+00 : f32
    %212 = vector.broadcast %cst_72 : f32 to vector<29x64xf32>
    %213 = arith.cmpf oge, %211, %212 : vector<29x64xf32>
    %cst_73 = arith.constant 0.00999999977 : f32
    %214 = vector.broadcast %cst_73 : f32 to vector<29x64xf32>
    %215 = arith.mulf %214, %211 : vector<29x64xf32>
    %216 = arith.select %213, %211, %215 : vector<29x64xi1>, vector<29x64xf32>
    %c0_74 = arith.constant 0 : index
    %c0_75 = arith.constant 0 : index
    %c0_76 = arith.constant 0 : index
    %217 = vector.load %arg10[%c0_74, %c0_75, %c0_76] : memref<1x29x64xf32, #tpu.memory_space<vmem>>, vector<1x29x64xf32>
    %218 = vector.shape_cast %217 : vector<1x29x64xf32> to vector<29x64xf32>
    %219 = vector.shape_cast %216 : vector<29x64xf32> to vector<1x29x64xf32>
    tpu.vector_store %arg10[%c0_74, %c0_75, %c0_76], %219 {strides = array<i32>} : memref<1x29x64xf32, #tpu.memory_space<vmem>>, vector<1x29x64xf32>,
    return
  }
  func.func @transform_0(%arg0: i32) -> (i32, i32, i32) {
    %c0_i32 = arith.constant 0 : i32
    %c0_i32_0 = arith.constant 0 : i32
    %c0_i32_1 = arith.constant 0 : i32
    return %arg0, %c0_i32, %c0_i32_0 : i32, i32, i32
  }
  func.func @transform_1(%arg0: i32) -> (i32, i32) {
    %c0_i32 = arith.constant 0 : i32
    %c0_i32_0 = arith.constant 0 : i32
    %c0_i32_1 = arith.constant 0 : i32
    return %c0_i32, %c0_i32_0 : i32, i32
  }
  func.func @transform_2(%arg0: i32) -> (i32, i32) {
    %c0_i32 = arith.constant 0 : i32
    %c0_i32_0 = arith.constant 0 : i32
    %c0_i32_1 = arith.constant 0 : i32
    return %c0_i32, %c0_i32_0 : i32, i32
  }
  func.func @transform_3(%arg0: i32) -> (i32, i32) {
    %c0_i32 = arith.constant 0 : i32
    %c0_i32_0 = arith.constant 0 : i32
    %c0_i32_1 = arith.constant 0 : i32
    return %c0_i32, %c0_i32_0 : i32, i32
  }
  func.func @transform_4(%arg0: i32) -> (i32, i32) {
    %c0_i32 = arith.constant 0 : i32
    %c0_i32_0 = arith.constant 0 : i32
    %c0_i32_1 = arith.constant 0 : i32
    return %c0_i32, %c0_i32_0 : i32, i32
  }
  func.func @transform_5(%arg0: i32) -> (i32, i32) {
    %c0_i32 = arith.constant 0 : i32
    %c0_i32_0 = arith.constant 0 : i32
    %c0_i32_1 = arith.constant 0 : i32
    return %c0_i32, %c0_i32_0 : i32, i32
  }
  func.func @transform_6(%arg0: i32) -> (i32, i32) {
    %c0_i32 = arith.constant 0 : i32
    %c0_i32_0 = arith.constant 0 : i32
    %c0_i32_1 = arith.constant 0 : i32
    return %c0_i32, %c0_i32_0 : i32, i32
  }
  func.func @transform_7(%arg0: i32) -> (i32, i32) {
    %c0_i32 = arith.constant 0 : i32
    %c0_i32_0 = arith.constant 0 : i32
    %c0_i32_1 = arith.constant 0 : i32
    return %c0_i32, %c0_i32_0 : i32, i32
  }
  func.func @transform_8(%arg0: i32) -> (i32, i32) {
    %c0_i32 = arith.constant 0 : i32
    %c0_i32_0 = arith.constant 0 : i32
    %c0_i32_1 = arith.constant 0 : i32
    return %c0_i32, %c0_i32_0 : i32, i32
  }
  func.func @transform_9(%arg0: i32) -> (i32, i32, i32) {
    %c0_i32 = arith.constant 0 : i32
    %c0_i32_0 = arith.constant 0 : i32
    %c0_i32_1 = arith.constant 0 : i32
    return %arg0, %c0_i32, %c0_i32_0 : i32, i32, i32
  }
}

</mosaic_0001>

<bundles_post_ra>
// kernel: smallnet_forward.1
= control target key start
LH: loop header
LB: loop body
LE: loop exit
PB: predicated region body
PF: predicated region fallthrough
CT: control target
= control target key end

     0   :  { %s11186_s30 = smov 0   ;;  %s17308_s0 = inlined_call_operand.vmem [shape: bf16[2,900,27], index: 0, kind: input, shape index: {}]   ;;  %s17309_s1 = inlined_call_operand.vmem [shape: bf16[27,32], index: 1, kind: input, shape index: {}]   ;;  %s17310_s2 = inlined_call_operand.vmem [shape: bf16[288,32], index: 2, kind: input, shape index: {}]   ;;  %s17311_s3 = inlined_call_operand.vmem [shape: bf16[288,64], index: 3, kind: input, shape index: {}]   ;;  %s17312_s4 = inlined_call_operand.vmem [shape: bf16[576,64], index: 4, kind: input, shape index: {}]   ;;  %s17313_s5 = inlined_call_operand.vmem [shape: bf16[144,177], index: 5, kind: input, shape index: {}]   ;;  %s17314_s6 = inlined_call_operand.vmem [shape: f32[209,1], index: 6, kind: input, shape index: {}]   ;;  %s17315_s7 = inlined_call_operand.vmem [shape: f32[177,1], index: 7, kind: input, shape index: {}]   ;;  %s17316_s8 = inlined_call_operand.vmem [shape: f32[29,1], index: 8, kind: input, shape index: {}]   ;;  %s17317_s9 = inlined_call_operand.vmem [shape: f32[2,29,64], index: 9, kind: output, shape index: {}]  }
   0x1 LB: > { %s9202_s10 = sadd.s32 4294967295, %s11130_s30   ;;  %p9206_p0 = scmp.ge.s32.totalorder %s11130_s30, 1  ;;  %s11130_s30 = sphi %s11186_s30, %s19_s30  }
   0x2   : > { %p287_p1 = scmp.lt.s32.totalorder %s11130_s30, 3 }
   0x4   : > { %p288_p2 = pnand %p9206_p0, %p287_p1 }
   0x6   : > { %291 = sbr.rel (%p288_p2) target bundleno = 3047 (0xbe7), region = 56 }
   0xb   : > { %vm17483_vm0 = vcmask 1044480   ;;  %v17320_v0 = vmov 0.0   ;;  %v10958_v1 = vld [vmem:[%s17309_s1 + $0x8] sm:$0x3f]   ;;  %vm17491_vm1 = vcmask 1045504   ;;  %v11133_v2 = vmov 65535  }
   0xc   : > { %10063 = vmatprep.subr.bf16.mxu0 %v17320_v0  ;;  %v919_v3 = vsel %vm17483_vm0, 4294967295, %v11133_v2  ;;  %p323_p3 = scmp.lt.s32.totalorder %s9202_s10, 1  ;;  %vm11134_vm2 = vmmov 0   ;;  %v10959_v6 = vld [vmem:[%s17309_s1] sm:$0xff]   ;;  %vm745_vm3 = vcmask 220160   ;;  %vm17492_vm4 = vcmask 261120  }
   0xd   : > { %v920_v4 = vsel %vm17491_vm1, %v919_v3, 0  ;;  %10067 = vmatprep.mubr.msk.bf16.mxu0 %vm11134_vm2, %v17320_v0  ;;  %vm1636_vm5 = vcmask 257024  }
   0xe   : > { %v922_v5 = vand.u32 %v10958_v1, %v920_v4  ;;  %s18507_s10 = smov (!%p323_p3, %s9202_s10), 1 }
   0xf   : > { %s10943_s15 = smul.u32 452, %s18507_s10  ;;  %s9679_s22 = sshll.u32 %s18507_s10, 5 }
  0x10   : > { %10064 = vmatpush3.bf16.msra.mxu0 %v922_v5  ;;  %s332_s25 = scalar_lea.vmem %s17317_s9, %s9679_s22 }
  0x11   : > { %10065 = vmatprep.subr.bf16.mxu0 %v17320_v0  ;;  %s11212_s18 = scalar_lea.vmem %s17308_s0, %s10943_s15 }
  0x12   : > { %v10960_v7 = vld [vmem:[%s11212_s18] sm:$0xff]   ;;  %v10961_v8 = vld [vmem:[%s11212_s18 + $0x8] sm:$0xff]   ;;  %v10962_v9 = vld [vmem:[%s11212_s18 + $0x10] sm:$0xff]  }
  0x13   : > { %v10963_v10 = vld [vmem:[%s11212_s18 + $0x18] sm:$0xff]   ;;  %v10964_v11 = vld [vmem:[%s11212_s18 + $0x20] sm:$0xff]   ;;  %v10965_v12 = vld [vmem:[%s11212_s18 + $0x28] sm:$0xff]  }
  0x14   : > { %10066 = vmatpush3.bf16.msra.mxu0 %v10959_v6  ;;  %v10966_v13 = vld [vmem:[%s11212_s18 + $0x30] sm:$0xff]   ;;  %v10967_v14 = vld [vmem:[%s11212_s18 + $0x38] sm:$0xff]   ;;  %v10968_v15 = vld [vmem:[%s11212_s18 + $0x40] sm:$0xff]  }
  0x15   : > { %v10969_v16 = vld [vmem:[%s11212_s18 + $0x48] sm:$0xff]   ;;  %v10970_v17 = vld [vmem:[%s11212_s18 + $0x50] sm:$0xff]   ;;  %v10971_v18 = vld [vmem:[%s11212_s18 + $0x58] sm:$0xff]  }
  0x16   : > { %v10972_v19 = vld [vmem:[%s11212_s18 + $0x60] sm:$0xff]   ;;  %v10973_v20 = vld [vmem:[%s11212_s18 + $0x68] sm:$0xff]   ;;  %v10974_v21 = vld [vmem:[%s11212_s18 + $0x70] sm:$0xff]  }
  0x17   : > { %10068 = vmatmul.mubr.msk.bf16.vlgmr.msra.gmra.mxu0 %vm745_vm3, %v10960_v7  ;;  %v10975_v22 = vld [vmem:[%s11212_s18 + $0x78] sm:$0xff]   ;;  %v10976_v23 = vld [vmem:[%s11212_s18 + $0x80] sm:$0xff]   ;;  %v10977_v24 = vld [vmem:[%s11212_s18 + $0x88] sm:$0xff]  }
  0x18   : > { %10071 = vmatprep.mubr.msk.bf16.mxu0 %vm11134_vm2, %v17320_v0  ;;  %v10978_v25 = vld [vmem:[%s11212_s18 + $0x90] sm:$0xff]   ;;  %v10979_v26 = vld [vmem:[%s11212_s18 + $0x98] sm:$0xff]   ;;  %v10980_v27 = vld [vmem:[%s11212_s18 + $0xa0] sm:$0xff]  }
  0x19   : > { %v10981_v28 = vld [vmem:[%s11212_s18 + $0xa8] sm:$0xff]   ;;  %v10982_v29 = vld [vmem:[%s11212_s18 + $0xb0] sm:$0xff]   ;;  %v10983_v30 = vld [vmem:[%s11212_s18 + $0xb8] sm:$0xff]  }
  0x1a   : > { %v10984_v31 = vld [vmem:[%s11212_s18 + $0xc0] sm:$0xff]   ;;  %v10985_v35 = vld [vmem:[%s11212_s18 + $0xc8] sm:$0xff]   ;;  %v10986_v40 = vld [vmem:[%s11212_s18 + $0xd0] sm:$0xff]  }
  0x1b   : > { %v10987_v45 = vld [vmem:[%s11212_s18 + $0xd8] sm:$0xff]   ;;  %v10988_v50 = vld [vmem:[%s11212_s18 + $0xe0] sm:$0xff]   ;;  %v10989_v55 = vld [vmem:[%s11212_s18 + $0xe8] sm:$0xff]  }
  0x1c   : > { %v10990_v60 = vld [vmem:[%s11212_s18 + $0xf0] sm:$0xff]   ;;  %v10991_v2 = vld [vmem:[%s11212_s18 + $0xf8] sm:$0xff]   ;;  %v10992_v7 = vld [vmem:[%s11212_s18 + $0x100] sm:$0xff]  }
  0x1f   : > { %10072 = vmatmul.mubr.msk.bf16.gmra.mxu0 %vm745_vm3, %v10961_v8 }
  0x20   : > { %10075 = vmatprep.mubr.msk.bf16.mxu0 %vm11134_vm2, %v17320_v0 }
  0x27   : > { %10076 = vmatmul.mubr.msk.bf16.gmra.mxu0 %vm745_vm3, %v10962_v9 }
  0x28   : > { %10079 = vmatprep.mubr.msk.bf16.mxu0 %vm11134_vm2, %v17320_v0 }
  0x2f   : > { %10080 = vmatmul.mubr.msk.bf16.gmra.mxu0 %vm745_vm3, %v10963_v10 }
  0x30   : > { %10083 = vmatprep.mubr.msk.bf16.mxu0 %vm11134_vm2, %v17320_v0 }
  0x37   : > { %10084 = vmatmul.mubr.msk.bf16.gmra.mxu0 %vm745_vm3, %v10964_v11 }
  0x38   : > { %10087 = vmatprep.mubr.msk.bf16.mxu0 %vm11134_vm2, %v17320_v0 }
  0x3f   : > { %10088 = vmatmul.mubr.msk.bf16.gmra.mxu0 %vm745_vm3, %v10965_v12  ;;  %v10993_v12 = vld [vmem:[%s11212_s18 + $0x108] sm:$0xff]  }
  0x40   : > { %10091 = vmatprep.mubr.msk.bf16.mxu0 %vm11134_vm2, %v17320_v0 }
  0x47   : > { %10092 = vmatmul.mubr.msk.bf16.gmra.mxu0 %vm745_vm3, %v10966_v13 }
  0x48   : > { %10095 = vmatprep.mubr.msk.bf16.mxu0 %vm11134_vm2, %v17320_v0 }
  0x4f   : > { %10096 = vmatmul.mubr.msk.bf16.gmra.mxu0 %vm745_vm3, %v10967_v14 }
  0x50   : > { %10099 = vmatprep.mubr.msk.bf16.mxu0 %vm11134_vm2, %v17320_v0 }
  0x57   : > { %10100 = vmatmul.mubr.msk.bf16.gmra.mxu0 %vm745_vm3, %v10968_v15 }
  0x58   : > { %10103 = vmatprep.mubr.msk.bf16.mxu0 %vm11134_vm2, %v17320_v0 }
  0x5f   : > { %10104 = vmatmul.mubr.msk.bf16.gmra.mxu0 %vm745_vm3, %v10969_v16 }
  0x60   : > { %10107 = vmatprep.mubr.msk.bf16.mxu0 %vm11134_vm2, %v17320_v0 }
  0x67   : > { %10108 = vmatmul.mubr.msk.bf16.gmra.mxu0 %vm745_vm3, %v10970_v17  ;;  %v10994_v17 = vld [vmem:[%s11212_s18 + $0x110] sm:$0xff]  }
  0x68   : > { %10111 = vmatprep.mubr.msk.bf16.mxu0 %vm11134_vm2, %v17320_v0 }
  0x6f   : > { %10112 = vmatmul.mubr.msk.bf16.gmra.mxu0 %vm745_vm3, %v10971_v18 }
  0x70   : > { %10115 = vmatprep.mubr.msk.bf16.mxu0 %vm11134_vm2, %v17320_v0 }
  0x77   : > { %10116 = vmatmul.mubr.msk.bf16.gmra.mxu0 %vm745_vm3, %v10972_v19 }
  0x78   : > { %10119 = vmatprep.mubr.msk.bf16.mxu0 %vm11134_vm2, %v17320_v0 }
  0x7f   : > { %10120 = vmatmul.mubr.msk.bf16.gmra.mxu0 %vm745_vm3, %v10973_v20 }
  0x80   : > { %10123 = vmatprep.mubr.msk.bf16.mxu0 %vm11134_vm2, %v17320_v0 }
  0x87   : > { %10124 = vmatmul.mubr.msk.bf16.gmra.mxu0 %vm745_vm3, %v10974_v21 }
  0x88   : > { %10127 = vmatprep.mubr.msk.bf16.mxu0 %vm11134_vm2, %v17320_v0 }
  0x8f   : > { %10128 = vmatmul.mubr.msk.bf16.gmra.mxu0 %vm745_vm3, %v10975_v22  ;;  %v10995_v22 = vld [vmem:[%s11212_s18 + $0x118] sm:$0xff]  }
  0x90   : > { %10131 = vmatprep.mubr.msk.bf16.mxu0 %vm11134_vm2, %v17320_v0 }
  0x97   : > { %10132 = vmatmul.mubr.msk.bf16.gmra.mxu0 %vm745_vm3, %v10976_v23 }
  0x98   : > { %10135 = vmatprep.mubr.msk.bf16.mxu0 %vm11134_vm2, %v17320_v0 }
  0x9f   : > { %10136 = vmatmul.mubr.msk.bf16.gmra.mxu0 %vm745_vm3, %v10977_v24 }
  0xa0   : > { %10139 = vmatprep.mubr.msk.bf16.mxu0 %vm11134_vm2, %v17320_v0 }
  0xa7   : > { %10140 = vmatmul.mubr.msk.bf16.gmra.mxu0 %vm745_vm3, %v10978_v25 }
  0xa8   : > { %10143 = vmatprep.mubr.msk.bf16.mxu0 %vm11134_vm2, %v17320_v0 }
  0xaf   : > { %10144 = vmatmul.mubr.msk.bf16.gmra.mxu0 %vm745_vm3, %v10979_v26 }
  0xb0   : > { %10147 = vmatprep.mubr.msk.bf16.mxu0 %vm11134_vm2, %v17320_v0 }
  0xb7   : > { %10148 = vmatmul.mubr.msk.bf16.gmra.mxu0 %vm745_vm3, %v10980_v27  ;;  %v10996_v27 = vld [vmem:[%s11212_s18 + $0x120] sm:$0xff]  }
  0xb8   : > { %10151 = vmatprep.mubr.msk.bf16.mxu0 %vm11134_vm2, %v17320_v0 }
  0xbf   : > { %10152 = vmatmul.mubr.msk.bf16.gmra.mxu0 %vm745_vm3, %v10981_v28 }
  0xc0   : > { %10155 = vmatprep.mubr.msk.bf16.mxu0 %vm11134_vm2, %v17320_v0 }
  0xc7   : > { %10156 = vmatmul.mubr.msk.bf16.gmra.mxu0 %vm745_vm3, %v10982_v29 }
  0xc8   : > { %10159 = vmatprep.mubr.msk.bf16.mxu0 %vm11134_vm2, %v17320_v0 }
  0xcf   : > { %10160 = vmatmul.mubr.msk.bf16.gmra.mxu0 %vm745_vm3, %v10983_v30 }
  0xd0   : > { %10163 = vmatprep.mubr.msk.bf16.mxu0 %vm11134_vm2, %v17320_v0 }
  0xd7   : > { %v11311_v32 = vpop.f32.mrf.mxu0  ;;  %10164 = vmatmul.mubr.msk.bf16.gmra.mxu0 %vm745_vm3, %v10984_v31 }
  0xd8   : > { %17560 = vst [vmem:[#allocation2_spill] sm:$0xff] %v11311_v32  ;;  %10167 = vmatprep.mubr.msk.bf16.mxu0 %vm11134_vm2, %v17320_v0 }
  0xd9   : > { %v10069_v33 = vpop.f32.mrf.mxu0 }
  0xda   : > { %v10997_v33 = vld [vmem:[%s11212_s18 + $0x128] sm:$0xff]  }
  0xdb   : > { %v11316_v34 = vpop.f32.mrf.mxu0 }
  0xdc   : > { %17561 = vst [vmem:[#allocation3_spill] sm:$0xff] %v11316_v34 }
  0xdd   : > { %v10070_v36 = vpop.f32.mrf.mxu0 }
  0xdf   : > { %v11319_v37 = vpop.f32.mrf.mxu0  ;;  %10168 = vmatmul.mubr.msk.bf16.gmra.mxu0 %vm745_vm3, %v10985_v35 }
  0xe0   : > { %17562 = vst [vmem:[#allocation4_spill] sm:$0xff] %v11319_v37  ;;  %10171 = vmatprep.mubr.msk.bf16.mxu0 %vm11134_vm2, %v17320_v0 }
  0xe1   : > { %v10073_v38 = vpop.f32.mrf.mxu0 }
  0xe3   : > { %v11324_v39 = vpop.f32.mrf.mxu0 }
  0xe4   : > { %17563 = vst [vmem:[#allocation5_spill] sm:$0xff] %v11324_v39 }
  0xe5   : > { %v10074_v41 = vpop.f32.mrf.mxu0 }
  0xe6   : > { %v10998_v41 = vld [vmem:[%s11212_s18 + $0x130] sm:$0xff]  }
  0xe7   : > { %v11327_v42 = vpop.f32.mrf.mxu0  ;;  %10172 = vmatmul.mubr.msk.bf16.gmra.mxu0 %vm745_vm3, %v10986_v40 }
  0xe8   : > { %17564 = vst [vmem:[#allocation6_spill] sm:$0xff] %v11327_v42  ;;  %10175 = vmatprep.mubr.msk.bf16.mxu0 %vm11134_vm2, %v17320_v0 }
  0xe9   : > { %v10077_v43 = vpop.f32.mrf.mxu0 }
  0xeb   : > { %v11332_v44 = vpop.f32.mrf.mxu0 }
  0xec   : > { %17565 = vst [vmem:[#allocation7_spill] sm:$0xff] %v11332_v44 }
  0xed   : > { %v10078_v46 = vpop.f32.mrf.mxu0 }
  0xef   : > { %v11335_v47 = vpop.f32.mrf.mxu0  ;;  %10176 = vmatmul.mubr.msk.bf16.gmra.mxu0 %vm745_vm3, %v10987_v45 }
  0xf0   : > { %10179 = vmatprep.mubr.msk.bf16.mxu0 %vm11134_vm2, %v17320_v0 }
  0xf1   : > { %v10081_v48 = vpop.f32.mrf.mxu0 }
  0xf3   : > { %v11340_v49 = vpop.f32.mrf.mxu0 }
  0xf5   : > { %v10082_v51 = vpop.f32.mrf.mxu0 }
  0xf7   : > { %v11343_v52 = vpop.f32.mrf.mxu0  ;;  %10180 = vmatmul.mubr.msk.bf16.gmra.mxu0 %vm745_vm3, %v10988_v50  ;;  %v10999_v50 = vld [vmem:[%s11212_s18 + $0x138] sm:$0xff]  }
  0xf8   : > { %17566 = vst [vmem:[#allocation8_spill] sm:$0xff] %v11343_v52  ;;  %10183 = vmatprep.mubr.msk.bf16.mxu0 %vm11134_vm2, %v17320_v0 }
  0xf9   : > { %v10085_v53 = vpop.f32.mrf.mxu0 }
  0xfb   : > { %v11348_v54 = vpop.f32.mrf.mxu0 }
  0xfc   : > { %17567 = vst [vmem:[#allocation9_spill] sm:$0xff] %v11348_v54 }
  0xfd   : > { %v10086_v56 = vpop.f32.mrf.mxu0 }
  0xff   : > { %v11351_v57 = vpop.f32.mrf.mxu0  ;;  %10184 = vmatmul.mubr.msk.bf16.gmra.mxu0 %vm745_vm3, %v10989_v55 }
 0x100   : > { %10187 = vmatprep.mubr.msk.bf16.mxu0 %vm11134_vm2, %v17320_v0 }
 0x101   : > { %v10089_v58 = vpop.f32.mrf.mxu0 }
 0x102   : > { %v11000_v58 = vld [vmem:[%s11212_s18 + $0x140] sm:$0xff]  }
 0x103   : > { %v11356_v59 = vpop.f32.mrf.mxu0 }
 0x105   : > { %v10090_v61 = vpop.f32.mrf.mxu0 }
 0x107   : > { %v11359_v62 = vpop.f32.mrf.mxu0  ;;  %10188 = vmatmul.mubr.msk.bf16.gmra.mxu0 %vm745_vm3, %v10990_v60 }
 0x108   : > { %17568 = vst [vmem:[#allocation10_spill] sm:$0xff] %v11359_v62  ;;  %10191 = vmatprep.mubr.msk.bf16.mxu0 %vm11134_vm2, %v17320_v0 }
 0x109   : > { %v10093_v63 = vpop.f32.mrf.mxu0 }
 0x10b   : > { %v11364_v1 = vpop.f32.mrf.mxu0 }
 0x10c   : > { %17569 = vst [vmem:[#allocation11_spill] sm:$0xff] %v11364_v1 }
 0x10d   : > { %v10094_v3 = vpop.f32.mrf.mxu0 }
 0x10e   : > { %v11001_v3 = vld [vmem:[%s11212_s18 + $0x148] sm:$0xff]  }
 0x10f   : > { %v11367_v4 = vpop.f32.mrf.mxu0  ;;  %10192 = vmatmul.mubr.msk.bf16.gmra.mxu0 %vm745_vm3, %v10991_v2 }
 0x110   : > { %10195 = vmatprep.mubr.msk.bf16.mxu0 %vm11134_vm2, %v17320_v0 }
 0x111   : > { %v10097_v5 = vpop.f32.mrf.mxu0 }
 0x113   : > { %v11372_v6 = vpop.f32.mrf.mxu0 }
 0x115   : > { %v10098_v8 = vpop.f32.mrf.mxu0 }
 0x117   : > { %v11375_v9 = vpop.f32.mrf.mxu0  ;;  %10196 = vmatmul.mubr.msk.bf16.gmra.mxu0 %vm745_vm3, %v10992_v7 }
 0x118   : > { %17570 = vst [vmem:[#allocation12_spill] sm:$0xff] %v11375_v9  ;;  %10199 = vmatprep.mubr.msk.bf16.mxu0 %vm11134_vm2, %v17320_v0 }
 0x119   : > { %v10101_v10 = vpop.f32.mrf.mxu0 }
 0x11b   : > { %v11380_v11 = vpop.f32.mrf.mxu0 }
 0x11c   : > { %17571 = vst [vmem:[#allocation13_spill] sm:$0xff] %v11380_v11 }
 0x11d   : > { %v10102_v13 = vpop.f32.mrf.mxu0 }
 0x11f   : > { %v11383_v14 = vpop.f32.mrf.mxu0  ;;  %10200 = vmatmul.mubr.msk.bf16.gmra.mxu0 %vm745_vm3, %v10993_v12  ;;  %v11002_v12 = vld [vmem:[%s11212_s18 + $0x150] sm:$0xff]  }
 0x120   : > { %10203 = vmatprep.mubr.msk.bf16.mxu0 %vm11134_vm2, %v17320_v0 }
 0x121   : > { %v10105_v15 = vpop.f32.mrf.mxu0 }
 0x123   : > { %v11388_v16 = vpop.f32.mrf.mxu0 }
 0x125   : > { %v10106_v18 = vpop.f32.mrf.mxu0 }
 0x127   : > { %v11391_v19 = vpop.f32.mrf.mxu0  ;;  %10204 = vmatmul.mubr.msk.bf16.gmra.mxu0 %vm745_vm3, %v10994_v17 }
 0x128   : > { %10207 = vmatprep.mubr.msk.bf16.mxu0 %vm11134_vm2, %v17320_v0 }
 0x129   : > { %v10109_v20 = vpop.f32.mrf.mxu0 }
 0x12a   : > { %v11003_v20 = vld [vmem:[%s11212_s18 + $0x158] sm:$0xff]  }
 0x12b   : > { %v11396_v21 = vpop.f32.mrf.mxu0 }
 0x12d   : > { %v10110_v23 = vpop.f32.mrf.mxu0 }
 0x12f   : > { %v11399_v24 = vpop.f32.mrf.mxu0  ;;  %10208 = vmatmul.mubr.msk.bf16.gmra.mxu0 %vm745_vm3, %v10995_v22 }
 0x130   : > { %17572 = vst [vmem:[#allocation14_spill] sm:$0xff] %v11399_v24  ;;  %10211 = vmatprep.mubr.msk.bf16.mxu0 %vm11134_vm2, %v17320_v0 }
 0x131   : > { %v10113_v25 = vpop.f32.mrf.mxu0 }
 0x133   : > { %v11404_v26 = vpop.f32.mrf.mxu0 }
 0x135   : > { %v10114_v28 = vpop.f32.mrf.mxu0 }
 0x136   : > { %v11004_v28 = vld [vmem:[%s11212_s18 + $0x160] sm:$0xff]  }
 0x137   : > { %v11407_v29 = vpop.f32.mrf.mxu0  ;;  %10212 = vmatmul.mubr.msk.bf16.gmra.mxu0 %vm745_vm3, %v10996_v27 }
 0x138   : > { %17573 = vst [vmem:[#allocation15_spill] sm:$0xff] %v11407_v29  ;;  %10215 = vmatprep.mubr.msk.bf16.mxu0 %vm11134_vm2, %v17320_v0 }
 0x139   : > { %v10117_v30 = vpop.f32.mrf.mxu0 }
 0x13b   : > { %v11412_v31 = vpop.f32.mrf.mxu0 }
 0x13d   : > { %v10118_v35 = vpop.f32.mrf.mxu0 }
 0x13f   : > { %v11415_v36 = vpop.f32.mrf.mxu0  ;;  %10216 = vmatmul.mubr.msk.bf16.gmra.mxu0 %vm745_vm3, %v10997_v33 }
 0x140   : > { %17574 = vst [vmem:[#allocation16_spill] sm:$0xff] %v11415_v36  ;;  %10219 = vmatprep.mubr.msk.bf16.mxu0 %vm11134_vm2, %v17320_v0 }
 0x141   : > { %v10121_v38 = vpop.f32.mrf.mxu0 }
 0x143   : > { %v11420_v40 = vpop.f32.mrf.mxu0 }
 0x145   : > { %v10122_v43 = vpop.f32.mrf.mxu0 }
 0x147   : > { %v11423_v45 = vpop.f32.mrf.mxu0  ;;  %10220 = vmatmul.mubr.msk.bf16.gmra.mxu0 %vm745_vm3, %v10998_v41  ;;  %v11005_v41 = vld [vmem:[%s11212_s18 + $0x168] sm:$0xff]  }
 0x148   : > { %17575 = vst [vmem:[#allocation17_spill] sm:$0xff] %v11423_v45  ;;  %10223 = vmatprep.mubr.msk.bf16.mxu0 %vm11134_vm2, %v17320_v0 }
 0x149   : > { %v10125_v46 = vpop.f32.mrf.mxu0 }
 0x14b   : > { %v11428_v48 = vpop.f32.mrf.mxu0 }
 0x14d   : > { %v10126_v51 = vpop.f32.mrf.mxu0 }
 0x14f   : > { %v11431_v53 = vpop.f32.mrf.mxu0  ;;  %10224 = vmatmul.mubr.msk.bf16.gmra.mxu0 %vm745_vm3, %v10999_v50 }
 0x150   : > { %17576 = vst [vmem:[#allocation18_spill] sm:$0xff] %v11431_v53  ;;  %10227 = vmatprep.mubr.msk.bf16.mxu0 %vm11134_vm2, %v17320_v0 }
 0x151   : > { %v10129_v55 = vpop.f32.mrf.mxu0 }
 0x152   : > { %v11006_v55 = vld [vmem:[%s11212_s18 + $0x170] sm:$0xff]  }
 0x153   : > { %v11436_v56 = vpop.f32.mrf.mxu0 }
 0x155   : > { %v10130_v60 = vpop.f32.mrf.mxu0 }
 0x157   : > { %v11439_v61 = vpop.f32.mrf.mxu0  ;;  %10228 = vmatmul.mubr.msk.bf16.gmra.mxu0 %vm745_vm3, %v11000_v58 }
 0x158   : > { %17577 = vst [vmem:[#allocation19_spill] sm:$0xff] %v11439_v61  ;;  %10231 = vmatprep.mubr.msk.bf16.mxu0 %vm11134_vm2, %v17320_v0 }
 0x159   : > { %v10133_v63 = vpop.f32.mrf.mxu0 }
 0x15b   : > { %v11444_v2 = vpop.f32.mrf.mxu0 }
 0x15d   : > { %v10134_v5 = vpop.f32.mrf.mxu0 }
 0x15e   : > { %v11007_v5 = vld [vmem:[%s11212_s18 + $0x178] sm:$0xff]  }
 0x15f   : > { %v11447_v7 = vpop.f32.mrf.mxu0  ;;  %10232 = vmatmul.mubr.msk.bf16.gmra.mxu0 %vm745_vm3, %v11001_v3 }
 0x160   : > { %17578 = vst [vmem:[#allocation20_spill] sm:$0xff] %v11447_v7  ;;  %10235 = vmatprep.mubr.msk.bf16.mxu0 %vm11134_vm2, %v17320_v0 }
 0x161   : > { %v10137_v8 = vpop.f32.mrf.mxu0 }
 0x163   : > { %v11452_v10 = vpop.f32.mrf.mxu0 }
 0x165   : > { %v10138_v13 = vpop.f32.mrf.mxu0 }
 0x167   : > { %v11455_v15 = vpop.f32.mrf.mxu0  ;;  %10236 = vmatmul.mubr.msk.bf16.gmra.mxu0 %vm745_vm3, %v11002_v12 }
 0x168   : > { %17579 = vst [vmem:[#allocation21_spill] sm:$0xff] %v11455_v15  ;;  %10239 = vmatprep.mubr.msk.bf16.mxu0 %vm11134_vm2, %v17320_v0 }
 0x169   : > { %v10141_v17 = vpop.f32.mrf.mxu0 }
 0x16b   : > { %v11460_v18 = vpop.f32.mrf.mxu0 }
 0x16d   : > { %v10142_v22 = vpop.f32.mrf.mxu0 }
 0x16f   : > { %v11463_v23 = vpop.f32.mrf.mxu0  ;;  %10240 = vmatmul.mubr.msk.bf16.gmra.mxu0 %vm745_vm3, %v11003_v20  ;;  %v11008_v20 = vld [vmem:[%s11212_s18 + $0x180] sm:$0xff]  }
 0x170   : > { %17580 = vst [vmem:[#allocation22_spill] sm:$0xff] %v11463_v23  ;;  %10243 = vmatprep.mubr.msk.bf16.mxu0 %vm11134_vm2, %v17320_v0 }
 0x171   : > { %v10145_v25 = vpop.f32.mrf.mxu0 }
 0x173   : > { %v11468_v27 = vpop.f32.mrf.mxu0 }
 0x175   : > { %v10146_v30 = vpop.f32.mrf.mxu0 }
 0x177   : > { %v11471_v33 = vpop.f32.mrf.mxu0  ;;  %10244 = vmatmul.mubr.msk.bf16.gmra.mxu0 %vm745_vm3, %v11004_v28 }
 0x178   : > { %17581 = vst [vmem:[#allocation23_spill] sm:$0xff] %v11471_v33  ;;  %10247 = vmatprep.mubr.msk.bf16.mxu0 %vm11134_vm2, %v17320_v0 }
 0x179   : > { %v10149_v35 = vpop.f32.mrf.mxu0 }
 0x17a   : > { %v11009_v35 = vld [vmem:[%s11212_s18 + $0x188] sm:$0xff]  }
 0x17b   : > { %v11476_v38 = vpop.f32.mrf.mxu0 }
 0x17d   : > { %v10150_v43 = vpop.f32.mrf.mxu0 }
 0x17f   : > { %v11479_v46 = vpop.f32.mrf.mxu0  ;;  %10248 = vmatmul.mubr.msk.bf16.gmra.mxu0 %vm745_vm3, %v11005_v41 }
 0x180   : > { %17582 = vst [vmem:[#allocation24_spill] sm:$0xff] %v11479_v46  ;;  %10251 = vmatprep.mubr.msk.bf16.mxu0 %vm11134_vm2, %v17320_v0 }
 0x181   : > { %v10153_v50 = vpop.f32.mrf.mxu0 }
 0x183   : > { %v11484_v51 = vpop.f32.mrf.mxu0 }
 0x185   : > { %v10154_v58 = vpop.f32.mrf.mxu0 }
 0x186   : > { %v11010_v58 = vld [vmem:[%s11212_s18 + $0x190] sm:$0xff]  }
 0x187   : > { %v11487_v60 = vpop.f32.mrf.mxu0  ;;  %10252 = vmatmul.mubr.msk.bf16.gmra.mxu0 %vm745_vm3, %v11006_v55 }
 0x188   : > { %17583 = vst [vmem:[#allocation25_spill] sm:$0xff] %v11487_v60  ;;  %10255 = vmatprep.mubr.msk.bf16.mxu0 %vm11134_vm2, %v17320_v0 }
 0x189   : > { %v10157_v63 = vpop.f32.mrf.mxu0 }
 0x18b   : > { %v11492_v3 = vpop.f32.mrf.mxu0 }
 0x18d   : > { %v10158_v8 = vpop.f32.mrf.mxu0 }
 0x18f   : > { %v11495_v12 = vpop.f32.mrf.mxu0  ;;  %10256 = vmatmul.mubr.msk.bf16.gmra.mxu0 %vm745_vm3, %v11007_v5 }
 0x190   : > { %17584 = vst [vmem:[#allocation26_spill] sm:$0xff] %v11495_v12  ;;  %10259 = vmatprep.mubr.msk.bf16.mxu0 %vm11134_vm2, %v17320_v0 }
 0x191   : > { %v10161_v13 = vpop.f32.mrf.mxu0 }
 0x193   : > { %v11500_v17 = vpop.f32.mrf.mxu0 }
 0x194   : > { %17585 = vst [vmem:[#allocation27_spill] sm:$0xff] %v11500_v17 }
 0x195   : > { %v10162_v22 = vpop.f32.mrf.mxu0 }
 0x197   : > { %v11503_v25 = vpop.f32.mrf.mxu0  ;;  %10260 = vmatmul.mubr.msk.bf16.gmra.mxu0 %vm745_vm3, %v11008_v20  ;;  %v11011_v20 = vld [vmem:[%s11212_s18 + $0x198] sm:$0xff]  }
 0x198   : > { %17586 = vst [vmem:[#allocation28_spill] sm:$0xff] %v11503_v25  ;;  %10263 = vmatprep.mubr.msk.bf16.mxu0 %vm11134_vm2, %v17320_v0 }
 0x199   : > { %v10165_v28 = vpop.f32.mrf.mxu0 }
 0x19b   : > { %v11508_v30 = vpop.f32.mrf.mxu0 }
 0x19c   : > { %17587 = vst [vmem:[#allocation29_spill] sm:$0xff] %v11508_v30 }
 0x19d   : > { %v10166_v41 = vpop.f32.mrf.mxu0 }
 0x19f   : > { %v11511_v43 = vpop.f32.mrf.mxu0  ;;  %10264 = vmatmul.mubr.msk.bf16.gmra.mxu0 %vm745_vm3, %v11009_v35  ;;  %v1414_v35 = vsel %vm17492_vm4, %v11316_v34, 0.0 }
 0x1a0   : > { %17588 = vst [vmem:[#allocation30_spill] sm:$0xff] %v11511_v43  ;;  %10267 = vmatprep.mubr.msk.bf16.mxu0 %vm11134_vm2, %v17320_v0 }
 0x1a1   : > { %v10169_v50 = vpop.f32.mrf.mxu0 }
 0x1a2   : > { %v1413_v50 = vsel %vm17492_vm4, %v11311_v32, 0.0 }
 0x1a3   : > { %v11516_v55 = vpop.f32.mrf.mxu0 }
 0x1a4   : > { %17589 = vst [vmem:[#allocation31_spill] sm:$0xff] %v11516_v55 }
 0x1a5   : > { %v10170_v63 = vpop.f32.mrf.mxu0 }
 0x1a6   : > { %v1415_v63 = vadd.f32 %v1414_v35, %v1413_v50  ;;  %v1422_v35 = vsel %vm17492_vm4, %v11332_v44, 0.0  ;;  %v17594_v50 = vmov 0.0   ;;  %v1428_v44 = vsel %vm17492_vm4, %v11343_v52, 0.0 }
 0x1a7   : > { %v11519_v5 = vpop.f32.mrf.mxu0  ;;  %10268 = vmatmul.mubr.msk.bf16.gmra.mxu0 %vm745_vm3, %v11010_v58  ;;  %v1416_v58 = vsel %vm17492_vm4, %v11319_v37, 0.0 }
 0x1a8   : > { %17590 = vst [vmem:[#allocation32_spill] sm:$0xff] %v11519_v5  ;;  %10271 = vmatprep.mubr.msk.bf16.mxu0 %vm11134_vm2, %v17320_v0 }
 0x1a9   : > { %v10173_v8 = vpop.f32.mrf.mxu0 }
 0x1ab   : > { %v11524_v13 = vpop.f32.mrf.mxu0 }
 0x1ac   : > { %17591 = vst [vmem:[#allocation33_spill] sm:$0xff] %v11524_v13 }
 0x1ad   : > { %v10174_v22 = vpop.f32.mrf.mxu0 }
 0x1ae   : > { %v11012_v22 = vld [vmem:[%s11212_s18 + $0x1a0] sm:$0xff]  }
 0x1af   : > { %v11527_v28 = vpop.f32.mrf.mxu0  ;;  %10272 = vmatmul.mubr.msk.bf16.gmra.mxu0 %vm745_vm3, %v11011_v20  ;;  %v1418_v20 = vsel %vm17492_vm4, %v11324_v39, 0.0 }
 0x1b0   : > { %17592 = vst [vmem:[#allocation34_spill] sm:$0xff] %v11527_v28  ;;  %10275 = vmatprep.mubr.msk.bf16.mxu0 %vm11134_vm2, %v17320_v0  ;;  %v1417_v28 = vadd.f32 %v1416_v58, %v1415_v63  ;;  %v1420_v0 = vsel %vm17492_vm4, %v11327_v42, 0.0  ;;  %v1424_v58 = vsel %vm17492_vm4, %v11335_v47, 0.0 }
 0x1b1   : > { %v10177_v41 = vpop.f32.mrf.mxu0 }
 0x1b2   : > { %v1419_v41 = vadd.f32 %v1418_v20, %v1417_v28  ;;  %v11013_v28 = vld [vmem:[%s11212_s18 + $0x1a8] sm:$0xff]   ;;  %v1426_v20 = vsel %vm17492_vm4, %v11340_v49, 0.0 }
 0x1b3   : > { %v11538_v8 = vpop.f32.mrf.mxu0 }
 0x1b4   : > { %v1421_v37 = vadd.f32 %v1420_v0, %v1419_v41  ;;  %v1430_v0 = vsel %vm17492_vm4, %v11348_v54, 0.0  ;;  %v1432_v41 = vsel %vm17492_vm4, %v11351_v57, 0.0 }
 0x1b5   : > { %v10178_v34 = vpop.f32.mrf.mxu0 }
 0x1b6   : > { %v1423_v34 = vadd.f32 %v1422_v35, %v1421_v37 }
 0x1b7   : > { %v11545_v13 = vpop.f32.mrf.mxu0  ;;  %10276 = vmatmul.mubr.msk.bf16.gmra.mxu0 %vm745_vm3, %v11012_v22 }
 0x1b8   : > { %17593 = vst [vmem:[#allocation35_spill] sm:$0xff] %v11545_v13  ;;  %10279 = vmatprep.mubr.msk.bf16.mxu0 %vm11134_vm2, %v17594_v50  ;;  %v1425_v22 = vadd.f32 %v1424_v58, %v1423_v34  ;;  %v11014_v58 = vld [vmem:[%s11212_s18 + $0x1b0] sm:$0xff]   ;;  %v1434_v34 = vsel %vm17492_vm4, %v11356_v59, 0.0 }
 0x1b9   : > { %v10181_v32 = vpop.f32.mrf.mxu0 }
 0x1ba   : > { %v1427_v39 = vadd.f32 %v1426_v20, %v1425_v22  ;;  %v1436_v22 = vsel %vm17492_vm4, %v11359_v62, 0.0 }
 0x1bb   : > { %v11554_v63 = vpop.f32.mrf.mxu0 }
 0x1bc   : > { %v1429_v32 = vadd.f32 %v1428_v44, %v1427_v39  ;;  %v1438_v39 = vsel %vm17492_vm4, %v11364_v1, 0.0 }
 0x1bd   : > { %v10182_v42 = vpop.f32.mrf.mxu0 }
 0x1be   : > { %v1431_v42 = vadd.f32 %v1430_v0, %v1429_v32  ;;  %v1440_v32 = vsel %vm17492_vm4, %v11367_v4, 0.0 }
 0x1bf   : > { %v11561_v13 = vpop.f32.mrf.mxu0  ;;  %10280 = vmatmul.mubr.msk.bf16.gmra.mxu0 %vm745_vm3, %v11013_v28 }
 0x1c0   : > { %17595 = vst [vmem:[#allocation36_spill] sm:$0xff] %v11561_v13  ;;  %10283 = vmatprep.mubr.msk.bf16.mxu0 %vm11134_vm2, %v17594_v50  ;;  %v1433_v28 = vadd.f32 %v1432_v41, %v1431_v42  ;;  %v11015_v42 = vld [vmem:[%s11212_s18 + $0x1b8] sm:$0xff]  }
 0x1c1   : > { %v10185_v37 = vpop.f32.mrf.mxu0 }
 0x1c2   : > { %v1435_v54 = vadd.f32 %v1434_v34, %v1433_v28  ;;  %v1442_v34 = vsel %vm17492_vm4, %v11372_v6, 0.0 }
 0x1c3   : > { %v11570_v35 = vpop.f32.mrf.mxu0 }
 0x1c4   : > { %v1437_v44 = vadd.f32 %v1436_v22, %v1435_v54  ;;  %v1446_v54 = vsel %vm17492_vm4, %v11380_v11, 0.0 }
 0x1c5   : > { %v10186_v20 = vpop.f32.mrf.mxu0 }
 0x1c6   : > { %v1439_v37 = vadd.f32 %v1438_v39, %v1437_v44  ;;  %v1444_v20 = vsel %vm17492_vm4, %v11375_v9, 0.0  ;;  %v1448_v44 = vsel %vm17492_vm4, %v11383_v14, 0.0 }
 0x1c7   : > { %v11577_v52 = vpop.f32.mrf.mxu0  ;;  %10284 = vmatmul.mubr.msk.bf16.gmra.mxu0 %vm745_vm3, %v11014_v58 }
 0x1c8   : > { %17596 = vst [vmem:[#allocation37_spill] sm:$0xff] %v11577_v52  ;;  %10287 = vmatprep.mubr.msk.bf16.mxu0 %vm11134_vm2, %v17594_v50  ;;  %v1441_v58 = vadd.f32 %v1440_v32, %v1439_v37  ;;  %v11016_v37 = vld [vmem:[%s11212_s18 + $0x1c0] ss:$0 sps:$4 sm:$0x33]  }
 0x1c9   : > { %v10189_v0 = vpop.f32.mrf.mxu0 }
 0x1ca   : > { %v1443_v1 = vadd.f32 %v1442_v34, %v1441_v58  ;;  %v1450_v34 = vsel %vm17492_vm4, %v11388_v16, 0.0 }
 0x1cb   : > { %v11586_v41 = vpop.f32.mrf.mxu0 }
 0x1cc   : > { %v1445_v22 = vadd.f32 %v1444_v20, %v1443_v1  ;;  %v1454_v1 = vsel %vm17492_vm4, %v11396_v21, 0.0 }
 0x1cd   : > { %v10190_v28 = vpop.f32.mrf.mxu0 }
 0x1ce   : > { %v1447_v0 = vadd.f32 %v1446_v54, %v1445_v22  ;;  %v1452_v28 = vsel %vm17492_vm4, %v11391_v19, 0.0  ;;  %v1456_v54 = vsel %vm17492_vm4, %v11399_v24, 0.0 }
 0x1cf   : > { %v11593_v62 = vpop.f32.mrf.mxu0  ;;  %10288 = vmatmul.mubr.msk.bf16.gmra.mxu0 %vm745_vm3, %v11015_v42 }
 0x1d0   : > { %17597 = vst [vmem:[#allocation38_spill] sm:$0xff] %v11593_v62  ;;  %10291 = vmatprep.mubr.msk.bf16.mxu0 %vm11134_vm2, %v17594_v50  ;;  %v1449_v58 = vadd.f32 %v1448_v44, %v1447_v0  ;;  %v1458_v44 = vsel %vm17492_vm4, %v11404_v26, 0.0 }
 0x1d1   : > { %v10193_v39 = vpop.f32.mrf.mxu0 }
 0x1d2   : > { %v1451_v11 = vadd.f32 %v1450_v34, %v1449_v58  ;;  %v1460_v58 = vsel %vm17492_vm4, %v11407_v29, 0.0 }
 0x1d3   : > { %v11602_v32 = vpop.f32.mrf.mxu0 }
 0x1d4   : > { %v1453_v50 = vadd.f32 %v1452_v28, %v1451_v11  ;;  %v1462_v11 = vsel %vm17492_vm4, %v11412_v31, 0.0 }
 0x1d5   : > { %v10194_v42 = vpop.f32.mrf.mxu0 }
 0x1d6   : > { %v1455_v22 = vadd.f32 %v1454_v1, %v1453_v50  ;;  %v1464_v1 = vsel %vm17492_vm4, %v11415_v36, 0.0 }
 0x1d7   : > { %v11609_v9 = vpop.f32.mrf.mxu0  ;;  %10292 = vmatmul.mubr.msk.bf16.gmra.mxu0 %vm745_vm3, %v11016_v37 }
 0x1d8   : > { %17598 = vst [vmem:[#allocation39_spill] sm:$0xff] %v11609_v9  ;;  %v1457_v0 = vadd.f32 %v1456_v54, %v1455_v22  ;;  %v1466_v54 = vsel %vm17492_vm4, %v11420_v40, 0.0 }
 0x1d9   : > { %v10197_v20 = vpop.f32.mrf.mxu0 }
 0x1da   : > { %v1459_v37 = vadd.f32 %v1458_v44, %v1457_v0  ;;  %v1468_v44 = vsel %vm17492_vm4, %v11423_v45, 0.0 }
 0x1db   : > { %v11616_v39 = vpop.f32.mrf.mxu0 }
 0x1dc   : > { %v1461_v28 = vadd.f32 %v1460_v58, %v1459_v37  ;;  %v1470_v58 = vsel %vm17492_vm4, %v11428_v48, 0.0 }
 0x1dd   : > { %v10198_v34 = vpop.f32.mrf.mxu0 }
 0x1de   : > { %v1463_v50 = vadd.f32 %v1462_v11, %v1461_v28  ;;  %v1472_v11 = vsel %vm17492_vm4, %v11431_v53, 0.0 }
 0x1df   : > { %v11622_v42 = vpop.f32.mrf.mxu0 }
 0x1e0   : > { %17599 = vst [vmem:[#allocation40_spill] sm:$0xff] %v11622_v42  ;;  %v1465_v22 = vadd.f32 %v1464_v1, %v1463_v50  ;;  %v1474_v1 = vsel %vm17492_vm4, %v11436_v56, 0.0 }
 0x1e1   : > { %v10201_v20 = vpop.f32.mrf.mxu0 }
 0x1e2   : > { %v1467_v0 = vadd.f32 %v1466_v54, %v1465_v22  ;;  %v1476_v54 = vsel %vm17492_vm4, %v11439_v61, 0.0 }
 0x1e3   : > { %v11628_v24 = vpop.f32.mrf.mxu0 }
 0x1e4   : > { %v1469_v37 = vadd.f32 %v1468_v44, %v1467_v0  ;;  %v1478_v44 = vsel %vm17492_vm4, %v11444_v2, 0.0 }
 0x1e5   : > { %v10202_v34 = vpop.f32.mrf.mxu0 }
 0x1e6   : > { %v1471_v28 = vadd.f32 %v1470_v58, %v1469_v37  ;;  %v1480_v58 = vsel %vm17492_vm4, %v11447_v7, 0.0 }
 0x1e7   : > { %v11634_v29 = vpop.f32.mrf.mxu0 }
 0x1e8   : > { %17600 = vst [vmem:[#allocation41_spill] sm:$0xff] %v11634_v29  ;;  %v1473_v50 = vadd.f32 %v1472_v11, %v1471_v28  ;;  %v1482_v11 = vsel %vm17492_vm4, %v11452_v10, 0.0 }
 0x1e9   : > { %v10205_v20 = vpop.f32.mrf.mxu0 }
 0x1ea   : > { %v1475_v22 = vadd.f32 %v1474_v1, %v1473_v50  ;;  %v1484_v1 = vsel %vm17492_vm4, %v11455_v15, 0.0 }
 0x1eb   : > { %v11640_v36 = vpop.f32.mrf.mxu0 }
 0x1ec   : > { %v1477_v0 = vadd.f32 %v1476_v54, %v1475_v22  ;;  %v1486_v54 = vsel %vm17492_vm4, %v11460_v18, 0.0 }
 0x1ed   : > { %v10206_v34 = vpop.f32.mrf.mxu0 }
 0x1ee   : > { %v1479_v37 = vadd.f32 %v1478_v44, %v1477_v0  ;;  %v1488_v44 = vsel %vm17492_vm4, %v11463_v23, 0.0 }
 0x1ef   : > { %v11646_v45 = vpop.f32.mrf.mxu0 }
 0x1f0   : > { %17601 = vst [vmem:[#allocation42_spill] sm:$0xff] %v11646_v45  ;;  %v1481_v28 = vadd.f32 %v1480_v58, %v1479_v37  ;;  %v1490_v58 = vsel %vm17492_vm4, %v11468_v27, 0.0 }
 0x1f1   : > { %v10209_v20 = vpop.f32.mrf.mxu0 }
 0x1f2   : > { %v1483_v50 = vadd.f32 %v1482_v11, %v1481_v28  ;;  %v1492_v11 = vsel %vm17492_vm4, %v11471_v33, 0.0 }
 0x1f3   : > { %v11652_v53 = vpop.f32.mrf.mxu0 }
 0x1f4   : > { %v1485_v22 = vadd.f32 %v1484_v1, %v1483_v50  ;;  %v1494_v1 = vsel %vm17492_vm4, %v11476_v38, 0.0 }
 0x1f5   : > { %v10210_v34 = vpop.f32.mrf.mxu0 }
 0x1f6   : > { %v1487_v0 = vadd.f32 %v1486_v54, %v1485_v22  ;;  %v1496_v54 = vsel %vm17492_vm4, %v11479_v46, 0.0 }
 0x1f7   : > { %v11658_v61 = vpop.f32.mrf.mxu0 }
 0x1f8   : > { %17602 = vst [vmem:[#allocation43_spill] sm:$0xff] %v11658_v61  ;;  %v1489_v37 = vadd.f32 %v1488_v44, %v1487_v0  ;;  %v1498_v44 = vsel %vm17492_vm4, %v11484_v51, 0.0 }
 0x1f9   : > { %v10213_v20 = vpop.f32.mrf.mxu0 }
 0x1fa   : > { %v1491_v28 = vadd.f32 %v1490_v58, %v1489_v37  ;;  %v1500_v58 = vsel %vm17492_vm4, %v11487_v60, 0.0 }
 0x1fb   : > { %v11664_v7 = vpop.f32.mrf.mxu0 }
 0x1fc   : > { %v1493_v50 = vadd.f32 %v1492_v11, %v1491_v28  ;;  %v1502_v11 = vsel %vm17492_vm4, %v11492_v3, 0.0 }
 0x1fd   : > { %v10214_v34 = vpop.f32.mrf.mxu0 }
 0x1fe   : > { %v1495_v22 = vadd.f32 %v1494_v1, %v1493_v50  ;;  %v1504_v1 = vsel %vm17492_vm4, %v11495_v12, 0.0 }
 0x1ff   : > { %v11670_v15 = vpop.f32.mrf.mxu0 }
 0x200   : > { %17603 = vst [vmem:[#allocation44_spill] sm:$0xff] %v11670_v15  ;;  %v1497_v0 = vadd.f32 %v1496_v54, %v1495_v22  ;;  %v1506_v54 = vsel %vm17492_vm4, %v11500_v17, 0.0 }
 0x201   : > { %v10217_v20 = vpop.f32.mrf.mxu0 }
 0x202   : > { %v1499_v37 = vadd.f32 %v1498_v44, %v1497_v0  ;;  %v1508_v44 = vsel %vm17492_vm4, %v11503_v25, 0.0 }
 0x203   : > { %v11676_v23 = vpop.f32.mrf.mxu0 }
 0x204   : > { %v1501_v28 = vadd.f32 %v1500_v58, %v1499_v37  ;;  %v1510_v58 = vsel %vm17492_vm4, %v11508_v30, 0.0  ;;  %v17607_v30 = vld [vmem:[#allocation33_spill] sm:$0xff] }
 0x205   : > { %v10218_v34 = vpop.f32.mrf.mxu0 }
 0x206   : > { %v1503_v50 = vadd.f32 %v1502_v11, %v1501_v28  ;;  %v1512_v11 = vsel %vm17492_vm4, %v11511_v43, 0.0  ;;  %v17608_v43 = vld [vmem:[#allocation34_spill] sm:$0xff] }
 0x207   : > { %v11682_v33 = vpop.f32.mrf.mxu0 }
 0x208   : > { %17604 = vst [vmem:[#allocation45_spill] sm:$0xff] %v11682_v33  ;;  %v1505_v22 = vadd.f32 %v1504_v1, %v1503_v50  ;;  %v1514_v1 = vsel %vm17492_vm4, %v11516_v55, 0.0 }
 0x209   : > { %v10221_v20 = vpop.f32.mrf.mxu0 }
 0x20a   : > { %v1507_v0 = vadd.f32 %v1506_v54, %v1505_v22  ;;  %v1516_v54 = vsel %vm17492_vm4, %v11519_v5, 0.0  ;;  %v17609_v5 = vld [vmem:[#allocation35_spill] sm:$0xff] }
 0x20b   : > { %v11688_v46 = vpop.f32.mrf.mxu0 }
 0x20c   : > { %v1509_v37 = vadd.f32 %v1508_v44, %v1507_v0  ;;  %v1518_v44 = vsel %vm17492_vm4, %v17607_v30, 0.0 }
 0x20d   : > { %v10222_v34 = vpop.f32.mrf.mxu0 }
 0x20e   : > { %v1511_v28 = vadd.f32 %v1510_v58, %v1509_v37  ;;  %v1520_v58 = vsel %vm17492_vm4, %v17608_v43, 0.0 }
 0x20f   : > { %v11694_v60 = vpop.f32.mrf.mxu0 }
 0x210   : > { %17605 = vst [vmem:[#allocation46_spill] sm:$0xff] %v11694_v60  ;;  %v1513_v50 = vadd.f32 %v1512_v11, %v1511_v28  ;;  %v1522_v11 = vsel %vm17492_vm4, %v11538_v8, 0.0 }
 0x211   : > { %v10225_v20 = vpop.f32.mrf.mxu0 }
 0x212   : > { %v1515_v22 = vadd.f32 %v1514_v1, %v1513_v50  ;;  %v1524_v1 = vsel %vm17492_vm4, %v17609_v5, 0.0 }
 0x213   : > { %v11700_v12 = vpop.f32.mrf.mxu0 }
 0x214   : > { %v1517_v0 = vadd.f32 %v1516_v54, %v1515_v22  ;;  %v1526_v54 = vsel %vm17492_vm4, %v11554_v63, 0.0 }
 0x215   : > { %v10226_v34 = vpop.f32.mrf.mxu0 }
 0x216   : > { %v1519_v37 = vadd.f32 %v1518_v44, %v1517_v0  ;;  %v1528_v44 = vsel %vm17492_vm4, %v11561_v13, 0.0 }
 0x217   : > { %v11706_v25 = vpop.f32.mrf.mxu0 }
 0x218   : > { %17606 = vst [vmem:[#allocation47_spill] sm:$0xff] %v11706_v25  ;;  %v1521_v28 = vadd.f32 %v1520_v58, %v1519_v37  ;;  %v1530_v58 = vsel %vm17492_vm4, %v11570_v35, 0.0 }
 0x219   : > { %v10229_v20 = vpop.f32.mrf.mxu0 }
 0x21a   : > { %v1523_v50 = vadd.f32 %v1522_v11, %v1521_v28  ;;  %v1532_v11 = vsel %vm17492_vm4, %v11577_v52, 0.0 }
 0x21b   : > { %v11712_v17 = vpop.f32.mrf.mxu0 }
 0x21c   : > { %v1525_v22 = vadd.f32 %v1524_v1, %v1523_v50  ;;  %v1534_v1 = vsel %vm17492_vm4, %v11586_v41, 0.0 }
 0x21d   : > { %v10230_v34 = vpop.f32.mrf.mxu0 }
 0x21e   : > { %v1527_v0 = vadd.f32 %v1526_v54, %v1525_v22  ;;  %v1536_v54 = vsel %vm17492_vm4, %v11593_v62, 0.0 }
 0x21f   : > { %v11718_v55 = vpop.f32.mrf.mxu0 }
 0x220   : > { %17610 = vst [vmem:[#allocation33_spill] sm:$0xff] %v11718_v55  ;;  %v1529_v37 = vadd.f32 %v1528_v44, %v1527_v0  ;;  %v1538_v44 = vsel %vm17492_vm4, %v11602_v32, 0.0 }
 0x221   : > { %v10233_v20 = vpop.f32.mrf.mxu0 }
 0x222   : > { %v1531_v28 = vadd.f32 %v1530_v58, %v1529_v37  ;;  %v1540_v58 = vsel %vm17492_vm4, %v11609_v9, 0.0 }
 0x223   : > { %v11724_v43 = vpop.f32.mrf.mxu0 }
 0x224   : > { %v1533_v50 = vadd.f32 %v1532_v11, %v1531_v28  ;;  %v1542_v11 = vsel %vm17492_vm4, %v11616_v39, 0.0 }
 0x225   : > { %v10234_v34 = vpop.f32.mrf.mxu0 }
 0x226   : > { %v1535_v22 = vadd.f32 %v1534_v1, %v1533_v50  ;;  %v1544_v1 = vsel %vm17492_vm4, %v11622_v42, 0.0 }
 0x227   : > { %v11730_v5 = vpop.f32.mrf.mxu0 }
 0x228   : > { %17611 = vst [vmem:[#allocation48_spill] sm:$0xff] %v11730_v5  ;;  %v1537_v0 = vadd.f32 %v1536_v54, %v1535_v22  ;;  %v1546_v54 = vsel %vm17492_vm4, %v11628_v24, 0.0 }
 0x229   : > { %v10237_v20 = vpop.f32.mrf.mxu0 }
 0x22a   : > { %v1539_v37 = vadd.f32 %v1538_v44, %v1537_v0  ;;  %v1548_v44 = vsel %vm17492_vm4, %v11634_v29, 0.0 }
 0x22b   : > { %v11736_v13 = vpop.f32.mrf.mxu0 }
 0x22c   : > { %v1541_v28 = vadd.f32 %v1540_v58, %v1539_v37  ;;  %v1550_v58 = vsel %vm17492_vm4, %v11640_v36, 0.0 }
 0x22d   : > { %v10238_v34 = vpop.f32.mrf.mxu0 }
 0x22e   : > { %v1543_v50 = vadd.f32 %v1542_v11, %v1541_v28  ;;  %v1552_v11 = vsel %vm17492_vm4, %v11646_v45, 0.0 }
 0x22f   : > { %v11742_v52 = vpop.f32.mrf.mxu0 }
 0x230   : > { %17612 = vst [vmem:[#allocation49_spill] sm:$0xff] %v11742_v52  ;;  %v1545_v22 = vadd.f32 %v1544_v1, %v1543_v50  ;;  %v1554_v1 = vsel %vm17492_vm4, %v11652_v53, 0.0 }
 0x231   : > { %v10241_v20 = vpop.f32.mrf.mxu0 }
 0x232   : > { %v1547_v0 = vadd.f32 %v1546_v54, %v1545_v22  ;;  %v1556_v54 = vsel %vm17492_vm4, %v11658_v61, 0.0 }
 0x233   : > { %v11748_v62 = vpop.f32.mrf.mxu0 }
 0x234   : > { %v1549_v37 = vadd.f32 %v1548_v44, %v1547_v0  ;;  %v1558_v44 = vsel %vm17492_vm4, %v11664_v7, 0.0 }
 0x235   : > { %v10242_v34 = vpop.f32.mrf.mxu0 }
 0x236   : > { %v1551_v28 = vadd.f32 %v1550_v58, %v1549_v37  ;;  %v1560_v58 = vsel %vm17492_vm4, %v11670_v15, 0.0 }
 0x237   : > { %v11754_v9 = vpop.f32.mrf.mxu0 }
 0x238   : > { %17613 = vst [vmem:[#allocation50_spill] sm:$0xff] %v11754_v9  ;;  %v1553_v50 = vadd.f32 %v1552_v11, %v1551_v28  ;;  %v1562_v11 = vsel %vm17492_vm4, %v11676_v23, 0.0 }
 0x239   : > { %v10245_v20 = vpop.f32.mrf.mxu0 }
 0x23a   : > { %v1555_v22 = vadd.f32 %v1554_v1, %v1553_v50  ;;  %v1564_v1 = vsel %vm17492_vm4, %v11682_v33, 0.0 }
 0x23b   : > { %v11760_v42 = vpop.f32.mrf.mxu0 }
 0x23c   : > { %v1557_v0 = vadd.f32 %v1556_v54, %v1555_v22  ;;  %v1566_v54 = vsel %vm17492_vm4, %v11688_v46, 0.0 }
 0x23d   : > { %v10246_v34 = vpop.f32.mrf.mxu0 }
 0x23e   : > { %v1559_v37 = vadd.f32 %v1558_v44, %v1557_v0  ;;  %v1568_v44 = vsel %vm17492_vm4, %v11694_v60, 0.0 }
 0x23f   : > { %v11766_v29 = vpop.f32.mrf.mxu0 }
 0x240   : > { %17614 = vst [vmem:[#allocation51_spill] sm:$0xff] %v11766_v29  ;;  %v1561_v28 = vadd.f32 %v1560_v58, %v1559_v37  ;;  %v1570_v58 = vsel %vm17492_vm4, %v11700_v12, 0.0 }
 0x241   : > { %v10249_v20 = vpop.f32.mrf.mxu0 }
 0x242   : > { %v1563_v50 = vadd.f32 %v1562_v11, %v1561_v28  ;;  %v1572_v11 = vsel %vm17492_vm4, %v11706_v25, 0.0 }
 0x243   : > { %v11772_v45 = vpop.f32.mrf.mxu0 }
 0x244   : > { %17615 = vst [vmem:[#allocation52_spill] sm:$0xff] %v11772_v45  ;;  %v1565_v22 = vadd.f32 %v1564_v1, %v1563_v50  ;;  %v1574_v1 = vsel %vm17492_vm4, %v11712_v17, 0.0 }
 0x245   : > { %v10250_v34 = vpop.f32.mrf.mxu0 }
 0x246   : > { %v1567_v0 = vadd.f32 %v1566_v54, %v1565_v22  ;;  %v1576_v54 = vsel %vm17492_vm4, %v11718_v55, 0.0 }
 0x247   : > { %v11778_v61 = vpop.f32.mrf.mxu0 }
 0x248   : > { %17616 = vst [vmem:[#allocation53_spill] sm:$0xff] %v11778_v61  ;;  %v1569_v37 = vadd.f32 %v1568_v44, %v1567_v0  ;;  %v1578_v44 = vsel %vm17492_vm4, %v11724_v43, 0.0 }
 0x249   : > { %v10253_v20 = vpop.f32.mrf.mxu0 }
 0x24a   : > { %v1571_v28 = vadd.f32 %v1570_v58, %v1569_v37  ;;  %v1580_v58 = vsel %vm17492_vm4, %v11730_v5, 0.0 }
 0x24b   : > { %v11784_v15 = vpop.f32.mrf.mxu0 }
 0x24c   : > { %17617 = vst [vmem:[#allocation54_spill] sm:$0xff] %v11784_v15  ;;  %v1573_v50 = vadd.f32 %v1572_v11, %v1571_v28  ;;  %v1582_v11 = vsel %vm17492_vm4, %v11736_v13, 0.0 }
 0x24d   : > { %v10254_v34 = vpop.f32.mrf.mxu0 }
 0x24e   : > { %v1575_v22 = vadd.f32 %v1574_v1, %v1573_v50  ;;  %v1584_v1 = vsel %vm17492_vm4, %v11742_v52, 0.0 }
 0x24f   : > { %v11790_v33 = vpop.f32.mrf.mxu0 }
 0x250   : > { %17618 = vst [vmem:[#allocation55_spill] sm:$0xff] %v11790_v33  ;;  %v1577_v0 = vadd.f32 %v1576_v54, %v1575_v22  ;;  %v1586_v54 = vsel %vm17492_vm4, %v11748_v62, 0.0 }
 0x251   : > { %v10257_v20 = vpop.f32.mrf.mxu0 }
 0x252   : > { %v1579_v37 = vadd.f32 %v1578_v44, %v1577_v0  ;;  %v1588_v44 = vsel %vm17492_vm4, %v11754_v9, 0.0 }
 0x253   : > { %v11796_v60 = vpop.f32.mrf.mxu0 }
 0x254   : > { %17619 = vst [vmem:[#allocation56_spill] sm:$0xff] %v11796_v60  ;;  %v1581_v28 = vadd.f32 %v1580_v58, %v1579_v37  ;;  %v1590_v58 = vsel %vm17492_vm4, %v11760_v42, 0.0 }
 0x255   : > { %v10258_v34 = vpop.f32.mrf.mxu0 }
 0x256   : > { %v1583_v50 = vadd.f32 %v1582_v11, %v1581_v28  ;;  %v1592_v11 = vsel %vm17492_vm4, %v11766_v29, 0.0 }
 0x257   : > { %v11802_v25 = vpop.f32.mrf.mxu0 }
 0x258   : > { %17620 = vst [vmem:[#allocation57_spill] sm:$0xff] %v11802_v25  ;;  %v1585_v22 = vadd.f32 %v1584_v1, %v1583_v50  ;;  %v1594_v1 = vsel %vm17492_vm4, %v11772_v45, 0.0 }
 0x259   : > { %v10261_v20 = vpop.f32.mrf.mxu0 }
 0x25a   : > { %v1587_v0 = vadd.f32 %v1586_v54, %v1585_v22  ;;  %v1596_v54 = vsel %vm17492_vm4, %v11778_v61, 0.0 }
 0x25b   : > { %v11808_v55 = vpop.f32.mrf.mxu0 }
 0x25c   : > { %17621 = vst [vmem:[#allocation58_spill] sm:$0xff] %v11808_v55  ;;  %v1589_v37 = vadd.f32 %v1588_v44, %v1587_v0  ;;  %v1598_v44 = vsel %vm17492_vm4, %v11784_v15, 0.0 }
 0x25d   : > { %v10262_v34 = vpop.f32.mrf.mxu0 }
 0x25e   : > { %v1591_v28 = vadd.f32 %v1590_v58, %v1589_v37  ;;  %v1600_v58 = vsel %vm17492_vm4, %v11790_v33, 0.0 }
 0x25f   : > { %v11814_v5 = vpop.f32.mrf.mxu0 }
 0x260   : > { %17622 = vst [vmem:[#allocation59_spill] sm:$0xff] %v11814_v5  ;;  %v1593_v50 = vadd.f32 %v1592_v11, %v1591_v28  ;;  %v1602_v11 = vsel %vm17492_vm4, %v11796_v60, 0.0 }
 0x261   : > { %v10265_v20 = vpop.f32.mrf.mxu0 }
 0x262   : > { %v1595_v22 = vadd.f32 %v1594_v1, %v1593_v50  ;;  %v1604_v1 = vsel %vm17492_vm4, %v11802_v25, 0.0 }
 0x263   : > { %v11820_v52 = vpop.f32.mrf.mxu0 }
 0x264   : > { %17623 = vst [vmem:[#allocation60_spill] sm:$0xff] %v11820_v52  ;;  %v1597_v0 = vadd.f32 %v1596_v54, %v1595_v22  ;;  %v1606_v54 = vsel %vm17492_vm4, %v11808_v55, 0.0 }
 0x265   : > { %v10266_v34 = vpop.f32.mrf.mxu0 }
 0x266   : > { %v1599_v37 = vadd.f32 %v1598_v44, %v1597_v0  ;;  %v1608_v44 = vsel %vm17492_vm4, %v11814_v5, 0.0 }
 0x267   : > { %v11826_v9 = vpop.f32.mrf.mxu0 }
 0x268   : > { %17624 = vst [vmem:[#allocation61_spill] sm:$0xff] %v11826_v9  ;;  %v1601_v28 = vadd.f32 %v1600_v58, %v1599_v37  ;;  %v1610_v58 = vsel %vm17492_vm4, %v11820_v52, 0.0 }
 0x269   : > { %v10269_v20 = vpop.f32.mrf.mxu0 }
 0x26a   : > { %v1603_v50 = vadd.f32 %v1602_v11, %v1601_v28  ;;  %v1612_v11 = vsel %vm17492_vm4, %v11826_v9, 0.0 }
 0x26b   : > { %v11832_v29 = vpop.f32.mrf.mxu0 }
 0x26c   : > { %17625 = vst [vmem:[#allocation62_spill] sm:$0xff] %v11832_v29  ;;  %v1605_v22 = vadd.f32 %v1604_v1, %v1603_v50  ;;  %v1614_v1 = vsel %vm17492_vm4, %v11832_v29, 0.0 }
 0x26d   : > { %v10270_v34 = vpop.f32.mrf.mxu0 }
 0x26e   : > { %v1607_v0 = vadd.f32 %v1606_v54, %v1605_v22 }
 0x26f   : > { %v11838_v61 = vpop.f32.mrf.mxu0 }
 0x270   : > { %17626 = vst [vmem:[#allocation63_spill] sm:$0xff] %v11838_v61  ;;  %v1609_v37 = vadd.f32 %v1608_v44, %v1607_v0  ;;  %v1616_v54 = vsel %vm17492_vm4, %v11838_v61, 0.0 }
 0x271   : > { %v10273_v20 = vpop.f32.mrf.mxu0 }
 0x272   : > { %v1611_v28 = vadd.f32 %v1610_v58, %v1609_v37 }
 0x273   : > { %v11844_v33 = vpop.f32.mrf.mxu0 }
 0x274   : > { %17627 = vst [vmem:[#allocation64_spill] sm:$0xff] %v11844_v33  ;;  %v1613_v50 = vadd.f32 %v1612_v11, %v1611_v28  ;;  %v1618_v44 = vsel %vm17492_vm4, %v11844_v33, 0.0 }
 0x275   : > { %v10274_v34 = vpop.f32.mrf.mxu0 }
 0x276   : > { %v1615_v22 = vadd.f32 %v1614_v1, %v1613_v50 }
 0x277   : > { %v11850_v25 = vpop.f32.mrf.mxu0 }
 0x278   : > { %17628 = vst [vmem:[#allocation65_spill] sm:$0xff] %v11850_v25  ;;  %v1617_v0 = vadd.f32 %v1616_v54, %v1615_v22  ;;  %v1620_v58 = vsel %vm17492_vm4, %v11850_v25, 0.0 }
 0x279   : > { %v10277_v20 = vpop.f32.mrf.mxu0 }
 0x27a   : > { %v1619_v37 = vadd.f32 %v1618_v44, %v1617_v0 }
 0x27b   : > { %v11856_v5 = vpop.f32.mrf.mxu0 }
 0x27c   : > { %17629 = vst [vmem:[#allocation66_spill] sm:$0xff] %v11856_v5  ;;  %v1622_v11 = vsel %vm17492_vm4, %v11856_v5, 0.0  ;;  %v1621_v28 = vadd.f32 %v1620_v58, %v1619_v37 }
 0x27d   : > { %v10278_v34 = vpop.f32.mrf.mxu0 }
 0x27e   : > { %v1623_v50 = vadd.f32 %v1622_v11, %v1621_v28 }
 0x27f   : > { %v11862_v9 = vpop.f32.mrf.mxu0 }
 0x280   : > { %17630 = vst [vmem:[#allocation67_spill] sm:$0xff] %v11862_v9  ;;  %v1624_v1 = vsel %vm17492_vm4, %v11862_v9, 0.0 }
 0x281   : > { %v10281_v20 = vpop.f32.mrf.mxu0  ;;  %v1625_v54 = vadd.f32 %v1624_v1, %v1623_v50 }
 0x283   : > { %v1385_v61 = vpop.f32.mrf.mxu0 }
 0x284   : > { %v1626_v33 = vsel %vm17492_vm4, %v1385_v61, 0.0 }
 0x285   : > { %v10282_v22 = vpop.f32.mrf.mxu0  ;;  %v1627_v34 = vadd.f32 %v1626_v33, %v1625_v54 }
 0x287   : > { %v1390_v29 = vpop.f32.mrf.mxu0 }
 0x288   : > { %v1628_v44 = vsel %vm17492_vm4, %v1390_v29, 0.0 }
 0x289   : > { %v1629_v0 = vadd.f32 %v1628_v44, %v1627_v34  ;;  %v10285_v25 = vpop.f32.mrf.mxu0 }
 0x28b   : > { %v1393_v52 = vpop.f32.mrf.mxu0 }
 0x28c   : > { %v1630_v5 = vsel %vm17492_vm4, %v1393_v52, 0.0 }
 0x28d   : > { %v1631_v58 = vadd.f32 %v1630_v5, %v1629_v0  ;;  %v10286_v37 = vpop.f32.mrf.mxu0 }
 0x28f   : > { %v1398_v20 = vpop.f32.mrf.mxu0 }
 0x290   : > { %v1632_v9 = vsel %vm17492_vm4, %v1398_v20, 0.0 }
 0x291   : > { %v1633_v11 = vadd.f32 %v1632_v9, %v1631_v58  ;;  %v10289_v28 = vpop.f32.mrf.mxu0 }
 0x293   : > { %v1401_v55 = vpop.f32.mrf.mxu0 }
 0x294   : > { %v1634_v1 = vsel %vm17492_vm4, %v1401_v55, 0.0 }
 0x295   : > { %v1635_v50 = vadd.f32 %v1634_v1, %v1633_v11  ;;  %v10290_v33 = vpop.f32.mrf.mxu0 }
 0x297   : > { %v1406_v54 = vpop.f32.mrf.mxu0 }
 0x298   : > { %v1637_v22 = vsel %vm1636_vm5, %v1406_v54, 0.0 }
 0x299   : > { %v1638_v25 = vadd.f32 %v1637_v22, %v1635_v50  ;;  %v10293_v34 = vpop.f32.mrf.mxu0 }
 0x29a   : > { %v17642_v34 = vld [vmem:[#allocation6_spill] sm:$0xff] }
 0x29b   : > { %v1409_v44 = vpop.f32.mrf.mxu0  ;;  %v1639_v5 = vrot.slane %v1638_v25, 4 }
 0x29d   : > { %v10294_v60 = vpop.f32.mrf.mxu0  ;;  %v1640_v0 = vadd.f32 %v1639_v5, %v1638_v25 }
 0x29f   : > { %v1641_v37 = vrot.slane %v1640_v0, 2 }
 0x2a1   : > { %v1642_v15 = vadd.f32 %v1641_v37, %v1640_v0  ;;  %v17644_v0 = vld [vmem:[#allocation7_spill] sm:$0xff] }
 0x2a3   : > { %v1643_v45 = vrot.slane %v1642_v15, 1 }
 0x2a5   : > { %v1644_v9 = vadd.f32 %v1643_v45, %v1642_v15  ;;  %v17636_v45 = vld [vmem:[#allocation2_spill] sm:$0xff] }
 0x2a7   : > { %v11874_v58 = vmul.f32 0.0011111111, %v1644_v9 }
 0x2a9   : > { %v11877_v28 = vsub.f32 %v1385_v61, %v11874_v58  ;;  %v11880_v11 = vsub.f32 %v1390_v29, %v11874_v58  ;;  %v11883_v1 = vsub.f32 %v1393_v52, %v11874_v58  ;;  %v11886_v50 = vsub.f32 %v1398_v20, %v11874_v58  ;;  %v17637_v61 = vld [vmem:[#allocation3_spill] sm:$0xff]  ;;  %v17639_v52 = vld [vmem:[#allocation4_spill] sm:$0xff]  ;;  %v17641_v20 = vld [vmem:[#allocation5_spill] sm:$0xff] }
 0x2aa   : > { %v11889_v60 = vsub.f32 %v1401_v55, %v11874_v58  ;;  %v11892_v33 = vsub.f32 %v1406_v54, %v11874_v58  ;;  %v11896_v15 = vsub.f32 %v17636_v45, %v11874_v58  ;;  %v11900_v29 = vsub.f32 %v17637_v61, %v11874_v58 }
 0x2ab   : > { %17631 = vst [vmem:[#allocation68_spill] sm:$0xff] %v11877_v28  ;;  %17632 = vst [vmem:[#allocation69_spill] sm:$0xff] %v11880_v11  ;;  %v11904_v22 = vsub.f32 %v17639_v52, %v11874_v58  ;;  %v11908_v25 = vsub.f32 %v17641_v20, %v11874_v58  ;;  %v11916_v44 = vsub.f32 %v17642_v34, %v11874_v58 }
 0x2ac   : > { %17633 = vst [vmem:[#allocation70_spill] sm:$0xff] %v11883_v1  ;;  %17634 = vst [vmem:[#allocation71_spill] sm:$0xff] %v11886_v50  ;;  %v1759_v55 = vmul.f32 %v11896_v15, %v11896_v15  ;;  %v1760_v54 = vmul.f32 %v11900_v29, %v11900_v29  ;;  %v11922_v37 = vsub.f32 %v17644_v0, %v11874_v58 }
 0x2ad   : > { %17635 = vst [vmem:[#allocation72_spill] sm:$0xff] %v11889_v60  ;;  %17638 = vst [vmem:[#allocation2_spill] sm:$0xff] %v11900_v29  ;;  %v1761_v5 = vmul.f32 %v11904_v22, %v11904_v22  ;;  %v1762_v9 = vmul.f32 %v11908_v25, %v11908_v25  ;;  %v11930_v20 = vsub.f32 %v11335_v47, %v11874_v58 }
 0x2ae   : > { %17640 = vst [vmem:[#allocation3_spill] sm:$0xff] %v11904_v22  ;;  %17643 = vst [vmem:[#allocation4_spill] sm:$0xff] %v11916_v44  ;;  %v1872_v45 = vsel %vm17492_vm4, %v1759_v55, 0.0  ;;  %v1873_v61 = vsel %vm17492_vm4, %v1760_v54, 0.0  ;;  %v1763_v34 = vmul.f32 %v11916_v44, %v11916_v44  ;;  %v11937_v0 = vsub.f32 %v11340_v49, %v11874_v58 }
 0x2af   : > { %17645 = vst [vmem:[#allocation5_spill] sm:$0xff] %v11922_v37  ;;  %v1874_v52 = vadd.f32 %v1873_v61, %v1872_v45  ;;  %v1875_v22 = vsel %vm17492_vm4, %v1761_v5, 0.0  ;;  %v1764_v55 = vmul.f32 %v11922_v37, %v11922_v37  ;;  %v1877_v54 = vsel %vm17492_vm4, %v1762_v9, 0.0  ;;  %v17646_v61 = vld [vmem:[#allocation8_spill] sm:$0xff] }
 0x2b0   : > { %v11944_v47 = vsub.f32 %v17646_v61, %v11874_v58  ;;  %v1765_v44 = vmul.f32 %v11930_v20, %v11930_v20  ;;  %v1879_v5 = vsel %vm17492_vm4, %v1763_v34, 0.0  ;;  %v1766_v37 = vmul.f32 %v11937_v0, %v11937_v0 }
 0x2b1   : > { %v1876_v29 = vadd.f32 %v1875_v22, %v1874_v52  ;;  %v17648_v52 = vld [vmem:[#allocation9_spill] sm:$0xff]  ;;  %v1881_v9 = vsel %vm17492_vm4, %v1764_v55, 0.0 }
 0x2b2   : > { %17647 = vst [vmem:[#allocation6_spill] sm:$0xff] %v11944_v47  ;;  %v11951_v49 = vsub.f32 %v17648_v52, %v11874_v58  ;;  %v1767_v61 = vmul.f32 %v11944_v47, %v11944_v47  ;;  %v1883_v34 = vsel %vm17492_vm4, %v1765_v44, 0.0  ;;  %v1885_v55 = vsel %vm17492_vm4, %v1766_v37, 0.0 }
 0x2b3   : > { %v1878_v45 = vadd.f32 %v1877_v54, %v1876_v29  ;;  %v11958_v54 = vsub.f32 %v11351_v57, %v11874_v58 }
 0x2b4   : > { %17649 = vst [vmem:[#allocation7_spill] sm:$0xff] %v11951_v49  ;;  %v1768_v52 = vmul.f32 %v11951_v49, %v11951_v49  ;;  %v1887_v44 = vsel %vm17492_vm4, %v1767_v61, 0.0 }
 0x2b5   : > { %v1880_v22 = vadd.f32 %v1879_v5, %v1878_v45  ;;  %v11965_v5 = vsub.f32 %v11356_v59, %v11874_v58  ;;  %v1769_v47 = vmul.f32 %v11958_v54, %v11958_v54 }
 0x2b6   : > { %v1889_v37 = vsel %vm17492_vm4, %v1768_v52, 0.0 }
 0x2b7   : > { %v1882_v29 = vadd.f32 %v1881_v9, %v1880_v22  ;;  %v17650_v9 = vld [vmem:[#allocation10_spill] sm:$0xff]  ;;  %v1770_v49 = vmul.f32 %v11965_v5, %v11965_v5  ;;  %v1891_v61 = vsel %vm17492_vm4, %v1769_v47, 0.0 }
 0x2b8   : > { %v11972_v57 = vsub.f32 %v17650_v9, %v11874_v58 }
 0x2b9   : > { %v1884_v45 = vadd.f32 %v1883_v34, %v1882_v29  ;;  %v17652_v34 = vld [vmem:[#allocation11_spill] sm:$0xff]  ;;  %v1893_v52 = vsel %vm17492_vm4, %v1770_v49, 0.0 }
 0x2ba   : > { %17651 = vst [vmem:[#allocation8_spill] sm:$0xff] %v11972_v57  ;;  %v11979_v59 = vsub.f32 %v17652_v34, %v11874_v58  ;;  %v1771_v9 = vmul.f32 %v11972_v57, %v11972_v57 }
 0x2bb   : > { %v1886_v22 = vadd.f32 %v1885_v55, %v1884_v45  ;;  %v11986_v55 = vsub.f32 %v11367_v4, %v11874_v58 }
 0x2bc   : > { %17653 = vst [vmem:[#allocation9_spill] sm:$0xff] %v11979_v59  ;;  %v1772_v34 = vmul.f32 %v11979_v59, %v11979_v59  ;;  %v1895_v47 = vsel %vm17492_vm4, %v1771_v9, 0.0 }
 0x2bd   : > { %v1888_v29 = vadd.f32 %v1887_v44, %v1886_v22  ;;  %v11993_v44 = vsub.f32 %v11372_v6, %v11874_v58  ;;  %v1773_v57 = vmul.f32 %v11986_v55, %v11986_v55 }
 0x2be   : > { %v1897_v49 = vsel %vm17492_vm4, %v1772_v34, 0.0 }
 0x2bf   : > { %v1890_v45 = vadd.f32 %v1889_v37, %v1888_v29  ;;  %v17654_v37 = vld [vmem:[#allocation12_spill] sm:$0xff]  ;;  %v1774_v59 = vmul.f32 %v11993_v44, %v11993_v44  ;;  %v1899_v9 = vsel %vm17492_vm4, %v1773_v57, 0.0 }
 0x2c0   : > { %v12000_v4 = vsub.f32 %v17654_v37, %v11874_v58 }
 0x2c1   : > { %v1892_v22 = vadd.f32 %v1891_v61, %v1890_v45  ;;  %v17655_v61 = vld [vmem:[#allocation13_spill] sm:$0xff]  ;;  %v1901_v34 = vsel %vm17492_vm4, %v1774_v59, 0.0 }
 0x2c2   : > { %v12007_v6 = vsub.f32 %v17655_v61, %v11874_v58  ;;  %v1775_v37 = vmul.f32 %v12000_v4, %v12000_v4 }
 0x2c3   : > { %v1894_v29 = vadd.f32 %v1893_v52, %v1892_v22  ;;  %v12014_v52 = vsub.f32 %v11383_v14, %v11874_v58  ;;  %v12028_v14 = vsub.f32 %v11391_v19, %v11874_v58 }
 0x2c4   : > { %v1776_v61 = vmul.f32 %v12007_v6, %v12007_v6  ;;  %v1903_v57 = vsel %vm17492_vm4, %v1775_v37, 0.0 }
 0x2c5   : > { %v1896_v45 = vadd.f32 %v1895_v47, %v1894_v29  ;;  %17656 = vst [vmem:[#allocation10_spill] sm:$0xff] %v12014_v52  ;;  %v12021_v47 = vsub.f32 %v11388_v16, %v11874_v58  ;;  %17657 = vst [vmem:[#allocation11_spill] sm:$0xff] %v12028_v14  ;;  %v12035_v16 = vsub.f32 %v11396_v21, %v11874_v58 }
 0x2c6   : > { %v1905_v59 = vsel %vm17492_vm4, %v1776_v61, 0.0  ;;  %v12049_v21 = vsub.f32 %v11404_v26, %v11874_v58  ;;  %v12063_v26 = vsub.f32 %v11412_v31, %v11874_v58  ;;  %v12077_v31 = vsub.f32 %v11420_v40, %v11874_v58 }
 0x2c7   : > { %v1898_v22 = vadd.f32 %v1897_v49, %v1896_v45  ;;  %v1777_v49 = vmul.f32 %v12014_v52, %v12014_v52  ;;  %v1779_v52 = vmul.f32 %v12028_v14, %v12028_v14  ;;  %v12091_v40 = vsub.f32 %v11428_v48, %v11874_v58 }
 0x2c8   : > { %v12105_v48 = vsub.f32 %v11436_v56, %v11874_v58  ;;  %v12119_v56 = vsub.f32 %v11444_v2, %v11874_v58  ;;  %v12133_v2 = vsub.f32 %v11452_v10, %v11874_v58  ;;  %v12147_v10 = vsub.f32 %v11460_v18, %v11874_v58 }
 0x2c9   : > { %v1900_v29 = vadd.f32 %v1899_v9, %v1898_v22  ;;  %v1778_v9 = vmul.f32 %v12021_v47, %v12021_v47  ;;  %v1907_v37 = vsel %vm17492_vm4, %v1777_v49, 0.0  ;;  %v1911_v49 = vsel %vm17492_vm4, %v1779_v52, 0.0 }
 0x2ca   : > { %v12161_v18 = vsub.f32 %v11468_v27, %v11874_v58  ;;  %v12175_v27 = vsub.f32 %v11476_v38, %v11874_v58  ;;  %v12189_v38 = vsub.f32 %v11484_v51, %v11874_v58  ;;  %v12203_v51 = vsub.f32 %v11492_v3, %v11874_v58 }
 0x2cb   : > { %v1902_v45 = vadd.f32 %v1901_v34, %v1900_v29  ;;  %v17658_v34 = vld [vmem:[#allocation14_spill] sm:$0xff]  ;;  %v1909_v61 = vsel %vm17492_vm4, %v1778_v9, 0.0 }
 0x2cc   : > { %v12042_v19 = vsub.f32 %v17658_v34, %v11874_v58 }
 0x2cd   : > { %v1904_v22 = vadd.f32 %v1903_v57, %v1902_v45  ;;  %v1780_v57 = vmul.f32 %v12035_v16, %v12035_v16 }
 0x2ce   : > { %17659 = vst [vmem:[#allocation12_spill] sm:$0xff] %v12042_v19  ;;  %v1781_v14 = vmul.f32 %v12042_v19, %v12042_v19 }
 0x2cf   : > { %v1906_v29 = vadd.f32 %v1905_v59, %v1904_v22  ;;  %v17660_v59 = vld [vmem:[#allocation15_spill] sm:$0xff]  ;;  %v1913_v9 = vsel %vm17492_vm4, %v1780_v57, 0.0 }
 0x2d0   : > { %v12056_v34 = vsub.f32 %v17660_v59, %v11874_v58  ;;  %v1915_v52 = vsel %vm17492_vm4, %v1781_v14, 0.0 }
 0x2d1   : > { %v1908_v45 = vadd.f32 %v1907_v37, %v1906_v29  ;;  %v1782_v37 = vmul.f32 %v12049_v21, %v12049_v21 }
 0x2d2   : > { %17661 = vst [vmem:[#allocation13_spill] sm:$0xff] %v12056_v34  ;;  %v1783_v19 = vmul.f32 %v12056_v34, %v12056_v34 }
 0x2d3   : > { %v1910_v22 = vadd.f32 %v1909_v61, %v1908_v45  ;;  %v17662_v61 = vld [vmem:[#allocation16_spill] sm:$0xff]  ;;  %v1917_v57 = vsel %vm17492_vm4, %v1782_v37, 0.0 }
 0x2d4   : > { %v12070_v59 = vsub.f32 %v17662_v61, %v11874_v58  ;;  %v1919_v14 = vsel %vm17492_vm4, %v1783_v19, 0.0 }
 0x2d5   : > { %v1912_v29 = vadd.f32 %v1911_v49, %v1910_v22  ;;  %v1784_v49 = vmul.f32 %v12063_v26, %v12063_v26 }
 0x2d6   : > { %17663 = vst [vmem:[#allocation14_spill] sm:$0xff] %v12070_v59  ;;  %v1785_v34 = vmul.f32 %v12070_v59, %v12070_v59 }
 0x2d7   : > { %v1914_v45 = vadd.f32 %v1913_v9, %v1912_v29  ;;  %v17664_v9 = vld [vmem:[#allocation17_spill] sm:$0xff]  ;;  %v1921_v37 = vsel %vm17492_vm4, %v1784_v49, 0.0 }
 0x2d8   : > { %v12084_v61 = vsub.f32 %v17664_v9, %v11874_v58  ;;  %v1923_v19 = vsel %vm17492_vm4, %v1785_v34, 0.0 }
 0x2d9   : > { %v1916_v22 = vadd.f32 %v1915_v52, %v1914_v45  ;;  %v1786_v52 = vmul.f32 %v12077_v31, %v12077_v31 }
 0x2da   : > { %17665 = vst [vmem:[#allocation15_spill] sm:$0xff] %v12084_v61  ;;  %v1787_v59 = vmul.f32 %v12084_v61, %v12084_v61 }
 0x2db   : > { %v1918_v29 = vadd.f32 %v1917_v57, %v1916_v22  ;;  %v17666_v57 = vld [vmem:[#allocation18_spill] sm:$0xff]  ;;  %v1925_v49 = vsel %vm17492_vm4, %v1786_v52, 0.0 }
 0x2dc   : > { %v12098_v9 = vsub.f32 %v17666_v57, %v11874_v58  ;;  %v1927_v34 = vsel %vm17492_vm4, %v1787_v59, 0.0 }
 0x2dd   : > { %v1920_v45 = vadd.f32 %v1919_v14, %v1918_v29  ;;  %v1788_v14 = vmul.f32 %v12091_v40, %v12091_v40 }
 0x2de   : > { %17667 = vst [vmem:[#allocation16_spill] sm:$0xff] %v12098_v9  ;;  %v1789_v61 = vmul.f32 %v12098_v9, %v12098_v9 }
 0x2df   : > { %v1922_v22 = vadd.f32 %v1921_v37, %v1920_v45  ;;  %v17668_v37 = vld [vmem:[#allocation19_spill] sm:$0xff]  ;;  %v1929_v52 = vsel %vm17492_vm4, %v1788_v14, 0.0 }
 0x2e0   : > { %v12112_v57 = vsub.f32 %v17668_v37, %v11874_v58  ;;  %v1931_v59 = vsel %vm17492_vm4, %v1789_v61, 0.0 }
 0x2e1   : > { %v1924_v29 = vadd.f32 %v1923_v19, %v1922_v22  ;;  %v1790_v19 = vmul.f32 %v12105_v48, %v12105_v48 }
 0x2e2   : > { %17669 = vst [vmem:[#allocation17_spill] sm:$0xff] %v12112_v57  ;;  %v1791_v9 = vmul.f32 %v12112_v57, %v12112_v57 }
 0x2e3   : > { %v1926_v45 = vadd.f32 %v1925_v49, %v1924_v29  ;;  %v17670_v49 = vld [vmem:[#allocation20_spill] sm:$0xff]  ;;  %v1933_v14 = vsel %vm17492_vm4, %v1790_v19, 0.0 }
 0x2e4   : > { %v12126_v37 = vsub.f32 %v17670_v49, %v11874_v58  ;;  %v1935_v61 = vsel %vm17492_vm4, %v1791_v9, 0.0 }
 0x2e5   : > { %v1928_v22 = vadd.f32 %v1927_v34, %v1926_v45  ;;  %v1792_v34 = vmul.f32 %v12119_v56, %v12119_v56 }
 0x2e6   : > { %17671 = vst [vmem:[#allocation18_spill] sm:$0xff] %v12126_v37  ;;  %v1793_v57 = vmul.f32 %v12126_v37, %v12126_v37 }
 0x2e7   : > { %v1930_v29 = vadd.f32 %v1929_v52, %v1928_v22  ;;  %v17672_v52 = vld [vmem:[#allocation21_spill] sm:$0xff]  ;;  %v1937_v19 = vsel %vm17492_vm4, %v1792_v34, 0.0 }
 0x2e8   : > { %v12140_v49 = vsub.f32 %v17672_v52, %v11874_v58  ;;  %v1939_v9 = vsel %vm17492_vm4, %v1793_v57, 0.0 }
 0x2e9   : > { %v1932_v45 = vadd.f32 %v1931_v59, %v1930_v29  ;;  %v1794_v59 = vmul.f32 %v12133_v2, %v12133_v2 }
 0x2ea   : > { %17673 = vst [vmem:[#allocation19_spill] sm:$0xff] %v12140_v49  ;;  %v1795_v37 = vmul.f32 %v12140_v49, %v12140_v49 }
 0x2eb   : > { %v1934_v22 = vadd.f32 %v1933_v14, %v1932_v45  ;;  %v17674_v14 = vld [vmem:[#allocation22_spill] sm:$0xff]  ;;  %v1941_v34 = vsel %vm17492_vm4, %v1794_v59, 0.0 }
 0x2ec   : > { %v12154_v52 = vsub.f32 %v17674_v14, %v11874_v58  ;;  %v1943_v57 = vsel %vm17492_vm4, %v1795_v37, 0.0 }
 0x2ed   : > { %v1936_v29 = vadd.f32 %v1935_v61, %v1934_v22  ;;  %v1796_v61 = vmul.f32 %v12147_v10, %v12147_v10 }
 0x2ee   : > { %17675 = vst [vmem:[#allocation20_spill] sm:$0xff] %v12154_v52  ;;  %v1797_v49 = vmul.f32 %v12154_v52, %v12154_v52 }
 0x2ef   : > { %v1938_v45 = vadd.f32 %v1937_v19, %v1936_v29  ;;  %v17676_v19 = vld [vmem:[#allocation23_spill] sm:$0xff]  ;;  %v1945_v59 = vsel %vm17492_vm4, %v1796_v61, 0.0 }
 0x2f0   : > { %v12168_v14 = vsub.f32 %v17676_v19, %v11874_v58  ;;  %v1947_v37 = vsel %vm17492_vm4, %v1797_v49, 0.0  ;;  %17680 = vst [vmem:[#allocation23_spill] sm:$0xff] %v12189_v38 }
 0x2f1   : > { %v1940_v22 = vadd.f32 %v1939_v9, %v1938_v45  ;;  %v1798_v9 = vmul.f32 %v12161_v18, %v12161_v18 }
 0x2f2   : > { %17677 = vst [vmem:[#allocation21_spill] sm:$0xff] %v12168_v14  ;;  %v1799_v52 = vmul.f32 %v12168_v14, %v12168_v14 }
 0x2f3   : > { %v1942_v29 = vadd.f32 %v1941_v34, %v1940_v22  ;;  %v17678_v34 = vld [vmem:[#allocation24_spill] sm:$0xff]  ;;  %v1949_v61 = vsel %vm17492_vm4, %v1798_v9, 0.0 }
 0x2f4   : > { %v12182_v19 = vsub.f32 %v17678_v34, %v11874_v58  ;;  %v1951_v49 = vsel %vm17492_vm4, %v1799_v52, 0.0 }
 0x2f5   : > { %v1944_v45 = vadd.f32 %v1943_v57, %v1942_v29  ;;  %v1800_v57 = vmul.f32 %v12175_v27, %v12175_v27 }
 0x2f6   : > { %17679 = vst [vmem:[#allocation22_spill] sm:$0xff] %v12182_v19  ;;  %v1801_v14 = vmul.f32 %v12182_v19, %v12182_v19 }
 0x2f7   : > { %v1946_v22 = vadd.f32 %v1945_v59, %v1944_v45  ;;  %v17681_v59 = vld [vmem:[#allocation25_spill] sm:$0xff]  ;;  %v1953_v9 = vsel %vm17492_vm4, %v1800_v57, 0.0 }
 0x2f8   : > { %v12196_v34 = vsub.f32 %v17681_v59, %v11874_v58  ;;  %17683 = vst [vmem:[#allocation25_spill] sm:$0xff] %v12203_v51  ;;  %v1955_v52 = vsel %vm17492_vm4, %v1801_v14, 0.0 }
 0x2f9   : > { %v1948_v29 = vadd.f32 %v1947_v37, %v1946_v22  ;;  %v1802_v37 = vmul.f32 %v12189_v38, %v12189_v38  ;;  %v1804_v38 = vmul.f32 %v12203_v51, %v12203_v51 }
 0x2fa   : > { %17682 = vst [vmem:[#allocation24_spill] sm:$0xff] %v12196_v34  ;;  %v1803_v19 = vmul.f32 %v12196_v34, %v12196_v34 }
 0x2fb   : > { %v1950_v45 = vadd.f32 %v1949_v61, %v1948_v29  ;;  %v17684_v61 = vld [vmem:[#allocation26_spill] sm:$0xff]  ;;  %v1957_v57 = vsel %vm17492_vm4, %v1802_v37, 0.0  ;;  %v1961_v37 = vsel %vm17492_vm4, %v1804_v38, 0.0 }
 0x2fc   : > { %v12210_v59 = vsub.f32 %v17684_v61, %v11874_v58  ;;  %v1959_v14 = vsel %vm17492_vm4, %v1803_v19, 0.0 }
 0x2fd   : > { %v1952_v22 = vadd.f32 %v1951_v49, %v1950_v45  ;;  %v17686_v49 = vld [vmem:[#allocation27_spill] sm:$0xff] }
 0x2fe   : > { %17685 = vst [vmem:[#allocation26_spill] sm:$0xff] %v12210_v59  ;;  %v12217_v3 = vsub.f32 %v17686_v49, %v11874_v58  ;;  %v1805_v34 = vmul.f32 %v12210_v59, %v12210_v59 }
 0x2ff   : > { %v1954_v29 = vadd.f32 %v1953_v9, %v1952_v22  ;;  %v17688_v9 = vld [vmem:[#allocation28_spill] sm:$0xff] }
 0x300   : > { %17687 = vst [vmem:[#allocation27_spill] sm:$0xff] %v12217_v3  ;;  %v12224_v61 = vsub.f32 %v17688_v9, %v11874_v58  ;;  %v1806_v51 = vmul.f32 %v12217_v3, %v12217_v3  ;;  %v1963_v19 = vsel %vm17492_vm4, %v1805_v34, 0.0 }
 0x301   : > { %v1956_v45 = vadd.f32 %v1955_v52, %v1954_v29  ;;  %v17690_v52 = vld [vmem:[#allocation29_spill] sm:$0xff] }
 0x302   : > { %17689 = vst [vmem:[#allocation28_spill] sm:$0xff] %v12224_v61  ;;  %v12231_v49 = vsub.f32 %v17690_v52, %v11874_v58  ;;  %v1807_v59 = vmul.f32 %v12224_v61, %v12224_v61  ;;  %v1965_v38 = vsel %vm17492_vm4, %v1806_v51, 0.0 }
 0x303   : > { %v1958_v22 = vadd.f32 %v1957_v57, %v1956_v45  ;;  %v17691_v57 = vld [vmem:[#allocation30_spill] sm:$0xff] }
 0x304   : > { %v12238_v9 = vsub.f32 %v17691_v57, %v11874_v58  ;;  %v1808_v3 = vmul.f32 %v12231_v49, %v12231_v49  ;;  %v1967_v34 = vsel %vm17492_vm4, %v1807_v59, 0.0 }
 0x305   : > { %v1960_v29 = vadd.f32 %v1959_v14, %v1958_v22  ;;  %v17693_v14 = vld [vmem:[#allocation31_spill] sm:$0xff] }
 0x306   : > { %17692 = vst [vmem:[#allocation29_spill] sm:$0xff] %v12238_v9  ;;  %v12245_v52 = vsub.f32 %v17693_v14, %v11874_v58  ;;  %v1809_v61 = vmul.f32 %v12238_v9, %v12238_v9  ;;  %v1969_v51 = vsel %vm17492_vm4, %v1808_v3, 0.0 }
 0x307   : > { %v1962_v45 = vadd.f32 %v1961_v37, %v1960_v29  ;;  %v17694_v37 = vld [vmem:[#allocation32_spill] sm:$0xff] }
 0x308   : > { %v12252_v57 = vsub.f32 %v17694_v37, %v11874_v58  ;;  %v1810_v14 = vmul.f32 %v12245_v52, %v12245_v52  ;;  %v1971_v59 = vsel %vm17492_vm4, %v1809_v61, 0.0 }
 0x309   : > { %v1964_v22 = vadd.f32 %v1963_v19, %v1962_v45  ;;  %v12259_v19 = vsub.f32 %v17607_v30, %v11874_v58  ;;  %v12273_v30 = vsub.f32 %v11538_v8, %v11874_v58  ;;  %v12287_v8 = vsub.f32 %v11554_v63, %v11874_v58 }
 0x30a   : > { %17695 = vst [vmem:[#allocation30_spill] sm:$0xff] %v12252_v57  ;;  %v1811_v9 = vmul.f32 %v12252_v57, %v12252_v57  ;;  %v1973_v3 = vsel %vm17492_vm4, %v1810_v14, 0.0  ;;  %v12301_v63 = vsub.f32 %v11570_v35, %v11874_v58  ;;  %v12315_v35 = vsub.f32 %v11586_v41, %v11874_v58 }
 0x30b   : > { %v1966_v29 = vadd.f32 %v1965_v38, %v1964_v22  ;;  %v17696_v38 = vld [vmem:[#allocation34_spill] sm:$0xff]  ;;  %v12329_v41 = vsub.f32 %v11602_v32, %v11874_v58  ;;  %v12343_v32 = vsub.f32 %v11616_v39, %v11874_v58  ;;  %v12357_v39 = vsub.f32 %v11628_v24, %v11874_v58 }
 0x30c   : > { %v12266_v37 = vsub.f32 %v17696_v38, %v11874_v58  ;;  %v1975_v61 = vsel %vm17492_vm4, %v1811_v9, 0.0  ;;  %17700 = vst [vmem:[#allocation34_spill] sm:$0xff] %v12287_v8  ;;  %v12371_v24 = vsub.f32 %v11640_v36, %v11874_v58  ;;  %v12385_v36 = vsub.f32 %v11652_v53, %v11874_v58 }
 0x30d   : > { %v1968_v45 = vadd.f32 %v1967_v34, %v1966_v29  ;;  %v1812_v34 = vmul.f32 %v12259_v19, %v12259_v19  ;;  %v12399_v53 = vsub.f32 %v11664_v7, %v11874_v58  ;;  %v12413_v7 = vsub.f32 %v11676_v23, %v11874_v58 }
 0x30e   : > { %17697 = vst [vmem:[#allocation31_spill] sm:$0xff] %v12266_v37  ;;  %v1813_v57 = vmul.f32 %v12266_v37, %v12266_v37 }
 0x30f   : > { %v1970_v22 = vadd.f32 %v1969_v51, %v1968_v45  ;;  %v17698_v51 = vld [vmem:[#allocation35_spill] sm:$0xff]  ;;  %v1977_v14 = vsel %vm17492_vm4, %v1812_v34, 0.0  ;;  %v1834_v23 = vmul.f32 %v12413_v7, %v12413_v7 }
 0x310   : > { %v12280_v38 = vsub.f32 %v17698_v51, %v11874_v58  ;;  %v1979_v9 = vsel %vm17492_vm4, %v1813_v57, 0.0 }
 0x311   : > { %v1972_v29 = vadd.f32 %v1971_v59, %v1970_v22  ;;  %v1814_v59 = vmul.f32 %v12273_v30, %v12273_v30 }
 0x312   : > { %17699 = vst [vmem:[#allocation32_spill] sm:$0xff] %v12280_v38  ;;  %v1815_v37 = vmul.f32 %v12280_v38, %v12280_v38 }
 0x313   : > { %v1974_v45 = vadd.f32 %v1973_v3, %v1972_v29  ;;  %v17701_v3 = vld [vmem:[#allocation36_spill] sm:$0xff]  ;;  %v1981_v34 = vsel %vm17492_vm4, %v1814_v59, 0.0 }
 0x314   : > { %v12294_v51 = vsub.f32 %v17701_v3, %v11874_v58  ;;  %v1983_v57 = vsel %vm17492_vm4, %v1815_v37, 0.0 }
 0x315   : > { %v1976_v22 = vadd.f32 %v1975_v61, %v1974_v45  ;;  %v1816_v61 = vmul.f32 %v12287_v8, %v12287_v8 }
 0x316   : > { %v1817_v38 = vmul.f32 %v12294_v51, %v12294_v51 }
 0x317   : > { %v1978_v29 = vadd.f32 %v1977_v14, %v1976_v22  ;;  %v17702_v14 = vld [vmem:[#allocation37_spill] sm:$0xff]  ;;  %v1985_v59 = vsel %vm17492_vm4, %v1816_v61, 0.0 }
 0x318   : > { %v12308_v3 = vsub.f32 %v17702_v14, %v11874_v58  ;;  %v1987_v37 = vsel %vm17492_vm4, %v1817_v38, 0.0 }
 0x319   : > { %v1980_v45 = vadd.f32 %v1979_v9, %v1978_v29  ;;  %v1818_v9 = vmul.f32 %v12301_v63, %v12301_v63 }
 0x31a   : > { %17703 = vst [vmem:[#allocation35_spill] sm:$0xff] %v12308_v3  ;;  %v1819_v8 = vmul.f32 %v12308_v3, %v12308_v3 }
 0x31b   : > { %v1982_v22 = vadd.f32 %v1981_v34, %v1980_v45  ;;  %v17704_v34 = vld [vmem:[#allocation38_spill] sm:$0xff]  ;;  %v1989_v61 = vsel %vm17492_vm4, %v1818_v9, 0.0 }
 0x31c   : > { %v12322_v14 = vsub.f32 %v17704_v34, %v11874_v58  ;;  %v1991_v38 = vsel %vm17492_vm4, %v1819_v8, 0.0 }
 0x31d   : > { %v1984_v29 = vadd.f32 %v1983_v57, %v1982_v22  ;;  %v1820_v57 = vmul.f32 %v12315_v35, %v12315_v35 }
 0x31e   : > { %17705 = vst [vmem:[#allocation36_spill] sm:$0xff] %v12322_v14  ;;  %v1821_v3 = vmul.f32 %v12322_v14, %v12322_v14 }
 0x31f   : > { %v1986_v45 = vadd.f32 %v1985_v59, %v1984_v29  ;;  %v17706_v59 = vld [vmem:[#allocation39_spill] sm:$0xff]  ;;  %v1993_v9 = vsel %vm17492_vm4, %v1820_v57, 0.0 }
 0x320   : > { %v12336_v34 = vsub.f32 %v17706_v59, %v11874_v58  ;;  %v1995_v8 = vsel %vm17492_vm4, %v1821_v3, 0.0 }
 0x321   : > { %v1988_v22 = vadd.f32 %v1987_v37, %v1986_v45  ;;  %v1822_v37 = vmul.f32 %v12329_v41, %v12329_v41 }
 0x322   : > { %17707 = vst [vmem:[#allocation37_spill] sm:$0xff] %v12336_v34  ;;  %v1823_v14 = vmul.f32 %v12336_v34, %v12336_v34 }
 0x323   : > { %v1990_v29 = vadd.f32 %v1989_v61, %v1988_v22  ;;  %v17708_v61 = vld [vmem:[#allocation40_spill] sm:$0xff]  ;;  %v1997_v57 = vsel %vm17492_vm4, %v1822_v37, 0.0 }
 0x324   : > { %v12350_v59 = vsub.f32 %v17708_v61, %v11874_v58  ;;  %v1999_v3 = vsel %vm17492_vm4, %v1823_v14, 0.0 }
 0x325   : > { %v1992_v45 = vadd.f32 %v1991_v38, %v1990_v29  ;;  %v1824_v38 = vmul.f32 %v12343_v32, %v12343_v32 }
 0x326   : > { %17709 = vst [vmem:[#allocation38_spill] sm:$0xff] %v12350_v59  ;;  %v1825_v34 = vmul.f32 %v12350_v59, %v12350_v59 }
 0x327   : > { %v1994_v22 = vadd.f32 %v1993_v9, %v1992_v45  ;;  %v17710_v9 = vld [vmem:[#allocation41_spill] sm:$0xff]  ;;  %v2001_v37 = vsel %vm17492_vm4, %v1824_v38, 0.0 }
 0x328   : > { %v12364_v61 = vsub.f32 %v17710_v9, %v11874_v58  ;;  %v2003_v14 = vsel %vm17492_vm4, %v1825_v34, 0.0  ;;  %17714 = vst [vmem:[#allocation41_spill] sm:$0xff] %v12385_v36 }
 0x329   : > { %v1996_v29 = vadd.f32 %v1995_v8, %v1994_v22  ;;  %v1826_v8 = vmul.f32 %v12357_v39, %v12357_v39 }
 0x32a   : > { %17711 = vst [vmem:[#allocation39_spill] sm:$0xff] %v12364_v61  ;;  %v1827_v59 = vmul.f32 %v12364_v61, %v12364_v61 }
 0x32b   : > { %v1998_v45 = vadd.f32 %v1997_v57, %v1996_v29  ;;  %v17712_v57 = vld [vmem:[#allocation42_spill] sm:$0xff]  ;;  %v2005_v38 = vsel %vm17492_vm4, %v1826_v8, 0.0 }
 0x32c   : > { %v12378_v9 = vsub.f32 %v17712_v57, %v11874_v58  ;;  %v2007_v34 = vsel %vm17492_vm4, %v1827_v59, 0.0 }
 0x32d   : > { %v2000_v22 = vadd.f32 %v1999_v3, %v1998_v45  ;;  %v1828_v3 = vmul.f32 %v12371_v24, %v12371_v24 }
 0x32e   : > { %17713 = vst [vmem:[#allocation40_spill] sm:$0xff] %v12378_v9  ;;  %v1829_v61 = vmul.f32 %v12378_v9, %v12378_v9 }
 0x32f   : > { %v2002_v29 = vadd.f32 %v2001_v37, %v2000_v22  ;;  %v17715_v37 = vld [vmem:[#allocation43_spill] sm:$0xff]  ;;  %v2009_v8 = vsel %vm17492_vm4, %v1828_v3, 0.0 }
 0x330   : > { %v12392_v57 = vsub.f32 %v17715_v37, %v11874_v58  ;;  %v2011_v59 = vsel %vm17492_vm4, %v1829_v61, 0.0 }
 0x331   : > { %v2004_v45 = vadd.f32 %v2003_v14, %v2002_v29  ;;  %v1830_v14 = vmul.f32 %v12385_v36, %v12385_v36 }
 0x332   : > { %17716 = vst [vmem:[#allocation42_spill] sm:$0xff] %v12392_v57  ;;  %v1831_v9 = vmul.f32 %v12392_v57, %v12392_v57 }
 0x333   : > { %v2006_v22 = vadd.f32 %v2005_v38, %v2004_v45  ;;  %v17717_v38 = vld [vmem:[#allocation44_spill] sm:$0xff]  ;;  %v2013_v3 = vsel %vm17492_vm4, %v1830_v14, 0.0  ;;  %v12430_v14 = vsub.f32 %v11688_v46, %v11874_v58 }
 0x334   : > { %v12406_v37 = vsub.f32 %v17717_v38, %v11874_v58  ;;  %v2015_v61 = vsel %vm17492_vm4, %v1831_v9, 0.0 }
 0x335   : > { %v2008_v29 = vadd.f32 %v2007_v34, %v2006_v22  ;;  %v1832_v34 = vmul.f32 %v12399_v53, %v12399_v53 }
 0x336   : > { %17718 = vst [vmem:[#allocation43_spill] sm:$0xff] %v12406_v37  ;;  %v1833_v57 = vmul.f32 %v12406_v37, %v12406_v37  ;;  %v2021_v37 = vsel %vm17492_vm4, %v1834_v23, 0.0  ;;  %v17721_v23 = vld [vmem:[#allocation47_spill] sm:$0xff] }
 0x337   : > { %v2010_v45 = vadd.f32 %v2009_v8, %v2008_v29  ;;  %v17719_v8 = vld [vmem:[#allocation45_spill] sm:$0xff] }
 0x338   : > { %v12420_v38 = vsub.f32 %v17719_v8, %v11874_v58 }
 0x339   : > { %v2012_v22 = vadd.f32 %v2011_v59, %v2010_v45  ;;  %v2017_v59 = vsel %vm17492_vm4, %v1832_v34, 0.0  ;;  %v1836_v34 = vmul.f32 %v12430_v14, %v12430_v14 }
 0x33b   : > { %v2014_v29 = vadd.f32 %v2013_v3, %v2012_v22  ;;  %v1835_v22 = vmul.f32 %v12420_v38, %v12420_v38  ;;  %v2019_v3 = vsel %vm17492_vm4, %v1833_v57, 0.0  ;;  %v2025_v57 = vsel %vm17492_vm4, %v1836_v34, 0.0 }
 0x33d   : > { %v2016_v45 = vadd.f32 %v2015_v61, %v2014_v29  ;;  %v17720_v29 = vld [vmem:[#allocation46_spill] sm:$0xff] }
 0x33e   : > { %v12438_v61 = vsub.f32 %v17720_v29, %v11874_v58 }
 0x33f   : > { %v2018_v36 = vadd.f32 %v2017_v59, %v2016_v45  ;;  %v2023_v45 = vsel %vm17492_vm4, %v1835_v22, 0.0  ;;  %v12445_v59 = vsub.f32 %v11700_v12, %v11874_v58  ;;  %v12459_v12 = vsub.f32 %v11712_v17, %v11874_v58 }
 0x340   : > { %v12473_v17 = vsub.f32 %v11724_v43, %v11874_v58  ;;  %v12487_v43 = vsub.f32 %v11736_v13, %v11874_v58  ;;  %v12501_v13 = vsub.f32 %v11748_v62, %v11874_v58  ;;  %v12515_v62 = vsub.f32 %v11760_v42, %v11874_v58 }
 0x341   : > { %v2020_v8 = vadd.f32 %v2019_v3, %v2018_v36  ;;  %v1837_v36 = vmul.f32 %v12438_v61, %v12438_v61  ;;  %v12452_v3 = vsub.f32 %v17721_v23, %v11874_v58  ;;  %17722 = vst [vmem:[#allocation44_spill] sm:$0xff] %v12459_v12  ;;  %v1840_v23 = vmul.f32 %v12459_v12, %v12459_v12 }
 0x342   : > { %17724 = vst [vmem:[#allocation45_spill] sm:$0xff] %v12473_v17  ;;  %v1842_v12 = vmul.f32 %v12473_v17, %v12473_v17  ;;  %17727 = vst [vmem:[#allocation47_spill] sm:$0xff] %v12487_v43  ;;  %v1844_v17 = vmul.f32 %v12487_v43, %v12487_v43  ;;  %v1846_v43 = vmul.f32 %v12501_v13, %v12501_v13 }
 0x343   : > { %v2022_v9 = vadd.f32 %v2021_v37, %v2020_v8  ;;  %v1838_v8 = vmul.f32 %v12445_v59, %v12445_v59  ;;  %v2027_v22 = vsel %vm17492_vm4, %v1837_v36, 0.0  ;;  %v1839_v29 = vmul.f32 %v12452_v3, %v12452_v3 }
 0x345   : > { %v2024_v46 = vadd.f32 %v2023_v45, %v2022_v9  ;;  %v2029_v34 = vsel %vm17492_vm4, %v1838_v8, 0.0  ;;  %v2031_v36 = vsel %vm17492_vm4, %v1839_v29, 0.0  ;;  %v2033_v8 = vsel %vm17492_vm4, %v1840_v23, 0.0 }
 0x346   : > { %v2037_v23 = vsel %vm17492_vm4, %v1842_v12, 0.0  ;;  %v2041_v12 = vsel %vm17492_vm4, %v1844_v17, 0.0  ;;  %v2045_v17 = vsel %vm17492_vm4, %v1846_v43, 0.0 }
 0x347   : > { %v2026_v37 = vadd.f32 %v2025_v57, %v2024_v46  ;;  %v17723_v46 = vld [vmem:[#allocation33_spill] sm:$0xff] }
 0x348   : > { %v12466_v57 = vsub.f32 %v17723_v46, %v11874_v58 }
 0x349   : > { %v2028_v9 = vadd.f32 %v2027_v22, %v2026_v37 }
 0x34a   : > { %v1841_v22 = vmul.f32 %v12466_v57, %v12466_v57 }
 0x34b   : > { %v2030_v45 = vadd.f32 %v2029_v34, %v2028_v9  ;;  %v17725_v34 = vld [vmem:[#allocation48_spill] sm:$0xff] }
 0x34c   : > { %v12480_v46 = vsub.f32 %v17725_v34, %v11874_v58  ;;  %v2035_v29 = vsel %vm17492_vm4, %v1841_v22, 0.0  ;;  %17730 = vst [vmem:[#allocation48_spill] sm:$0xff] %v12501_v13  ;;  %v1848_v13 = vmul.f32 %v12515_v62, %v12515_v62 }
 0x34d   : > { %v2032_v37 = vadd.f32 %v2031_v36, %v2030_v45 }
 0x34e   : > { %17726 = vst [vmem:[#allocation46_spill] sm:$0xff] %v12480_v46  ;;  %v1843_v36 = vmul.f32 %v12480_v46, %v12480_v46  ;;  %v2049_v43 = vsel %vm17492_vm4, %v1848_v13, 0.0  ;;  %v17792_v46 = vld [vmem:[#allocation17_spill] sm:$0xff] }
 0x34f   : > { %v2034_v9 = vadd.f32 %v2033_v8, %v2032_v37  ;;  %v17728_v8 = vld [vmem:[#allocation49_spill] sm:$0xff] }
 0x350   : > { %v12494_v34 = vsub.f32 %v17728_v8, %v11874_v58  ;;  %v2039_v22 = vsel %vm17492_vm4, %v1843_v36, 0.0 }
 0x351   : > { %v2036_v45 = vadd.f32 %v2035_v29, %v2034_v9 }
 0x352   : > { %17729 = vst [vmem:[#allocation33_spill] sm:$0xff] %v12494_v34  ;;  %v1845_v29 = vmul.f32 %v12494_v34, %v12494_v34  ;;  %v17791_v34 = vld [vmem:[#allocation16_spill] sm:$0xff] }
 0x353   : > { %v2038_v37 = vadd.f32 %v2037_v23, %v2036_v45  ;;  %v17731_v23 = vld [vmem:[#allocation50_spill] sm:$0xff] }
 0x354   : > { %v12508_v8 = vsub.f32 %v17731_v23, %v11874_v58  ;;  %v2043_v36 = vsel %vm17492_vm4, %v1845_v29, 0.0  ;;  %17733 = vst [vmem:[#allocation50_spill] sm:$0xff] %v12515_v62 }
 0x355   : > { %v2040_v9 = vadd.f32 %v2039_v22, %v2038_v37 }
 0x356   : > { %17732 = vst [vmem:[#allocation49_spill] sm:$0xff] %v12508_v8  ;;  %v1847_v22 = vmul.f32 %v12508_v8, %v12508_v8 }
 0x357   : > { %v2042_v45 = vadd.f32 %v2041_v12, %v2040_v9  ;;  %v17734_v12 = vld [vmem:[#allocation51_spill] sm:$0xff] }
 0x358   : > { %v12522_v23 = vsub.f32 %v17734_v12, %v11874_v58  ;;  %v2047_v29 = vsel %vm17492_vm4, %v1847_v22, 0.0 }
 0x359   : > { %v2044_v37 = vadd.f32 %v2043_v36, %v2042_v45  ;;  %v17736_v36 = vld [vmem:[#allocation52_spill] sm:$0xff] }
 0x35a   : > { %17735 = vst [vmem:[#allocation51_spill] sm:$0xff] %v12522_v23  ;;  %v12529_v42 = vsub.f32 %v17736_v36, %v11874_v58  ;;  %v1849_v8 = vmul.f32 %v12522_v23, %v12522_v23 }
 0x35b   : > { %v2046_v9 = vadd.f32 %v2045_v17, %v2044_v37  ;;  %v17738_v17 = vld [vmem:[#allocation53_spill] sm:$0xff] }
 0x35c   : > { %17737 = vst [vmem:[#allocation52_spill] sm:$0xff] %v12529_v42  ;;  %v12536_v12 = vsub.f32 %v17738_v17, %v11874_v58  ;;  %v1850_v62 = vmul.f32 %v12529_v42, %v12529_v42  ;;  %v2051_v22 = vsel %vm17492_vm4, %v1849_v8, 0.0 }
 0x35d   : > { %v2048_v45 = vadd.f32 %v2047_v29, %v2046_v9  ;;  %v17740_v29 = vld [vmem:[#allocation54_spill] sm:$0xff] }
 0x35e   : > { %17739 = vst [vmem:[#allocation53_spill] sm:$0xff] %v12536_v12  ;;  %v12543_v36 = vsub.f32 %v17740_v29, %v11874_v58  ;;  %v1851_v23 = vmul.f32 %v12536_v12, %v12536_v12  ;;  %v2053_v13 = vsel %vm17492_vm4, %v1850_v62, 0.0 }
 0x35f   : > { %v2050_v37 = vadd.f32 %v2049_v43, %v2048_v45  ;;  %v17742_v43 = vld [vmem:[#allocation55_spill] sm:$0xff] }
 0x360   : > { %17741 = vst [vmem:[#allocation54_spill] sm:$0xff] %v12543_v36  ;;  %v12550_v17 = vsub.f32 %v17742_v43, %v11874_v58  ;;  %v1852_v42 = vmul.f32 %v12543_v36, %v12543_v36  ;;  %v2055_v8 = vsel %vm17492_vm4, %v1851_v23, 0.0 }
 0x361   : > { %v2052_v9 = vadd.f32 %v2051_v22, %v2050_v37  ;;  %v17744_v22 = vld [vmem:[#allocation56_spill] sm:$0xff] }
 0x362   : > { %17743 = vst [vmem:[#allocation55_spill] sm:$0xff] %v12550_v17  ;;  %v12557_v29 = vsub.f32 %v17744_v22, %v11874_v58  ;;  %v1853_v12 = vmul.f32 %v12550_v17, %v12550_v17  ;;  %v2057_v62 = vsel %vm17492_vm4, %v1852_v42, 0.0 }
 0x363   : > { %v2054_v45 = vadd.f32 %v2053_v13, %v2052_v9  ;;  %v17746_v13 = vld [vmem:[#allocation57_spill] sm:$0xff] }
 0x364   : > { %17745 = vst [vmem:[#allocation56_spill] sm:$0xff] %v12557_v29  ;;  %v12564_v43 = vsub.f32 %v17746_v13, %v11874_v58  ;;  %v1854_v36 = vmul.f32 %v12557_v29, %v12557_v29  ;;  %v2059_v23 = vsel %vm17492_vm4, %v1853_v12, 0.0 }
 0x365   : > { %v2056_v37 = vadd.f32 %v2055_v8, %v2054_v45  ;;  %v17748_v8 = vld [vmem:[#allocation58_spill] sm:$0xff] }
 0x366   : > { %17747 = vst [vmem:[#allocation57_spill] sm:$0xff] %v12564_v43  ;;  %v12571_v22 = vsub.f32 %v17748_v8, %v11874_v58  ;;  %v1855_v17 = vmul.f32 %v12564_v43, %v12564_v43  ;;  %v2061_v42 = vsel %vm17492_vm4, %v1854_v36, 0.0 }
 0x367   : > { %v2058_v9 = vadd.f32 %v2057_v62, %v2056_v37  ;;  %v17750_v62 = vld [vmem:[#allocation59_spill] sm:$0xff] }
 0x368   : > { %17749 = vst [vmem:[#allocation58_spill] sm:$0xff] %v12571_v22  ;;  %v12578_v13 = vsub.f32 %v17750_v62, %v11874_v58  ;;  %v1856_v29 = vmul.f32 %v12571_v22, %v12571_v22  ;;  %v2063_v12 = vsel %vm17492_vm4, %v1855_v17, 0.0 }
 0x369   : > { %v2060_v45 = vadd.f32 %v2059_v23, %v2058_v9  ;;  %v17752_v23 = vld [vmem:[#allocation60_spill] sm:$0xff] }
 0x36a   : > { %17751 = vst [vmem:[#allocation59_spill] sm:$0xff] %v12578_v13  ;;  %v12585_v8 = vsub.f32 %v17752_v23, %v11874_v58  ;;  %v1857_v43 = vmul.f32 %v12578_v13, %v12578_v13  ;;  %v2065_v36 = vsel %vm17492_vm4, %v1856_v29, 0.0 }
 0x36b   : > { %v2062_v37 = vadd.f32 %v2061_v42, %v2060_v45  ;;  %v17754_v42 = vld [vmem:[#allocation61_spill] sm:$0xff] }
 0x36c   : > { %17753 = vst [vmem:[#allocation60_spill] sm:$0xff] %v12585_v8  ;;  %v12592_v62 = vsub.f32 %v17754_v42, %v11874_v58  ;;  %v1858_v22 = vmul.f32 %v12585_v8, %v12585_v8  ;;  %v2067_v17 = vsel %vm17492_vm4, %v1857_v43, 0.0 }
 0x36d   : > { %v2064_v9 = vadd.f32 %v2063_v12, %v2062_v37  ;;  %v17756_v12 = vld [vmem:[#allocation62_spill] sm:$0xff] }
 0x36e   : > { %17755 = vst [vmem:[#allocation61_spill] sm:$0xff] %v12592_v62  ;;  %v12599_v23 = vsub.f32 %v17756_v12, %v11874_v58  ;;  %v1859_v13 = vmul.f32 %v12592_v62, %v12592_v62  ;;  %v2069_v29 = vsel %vm17492_vm4, %v1858_v22, 0.0 }
 0x36f   : > { %v2066_v45 = vadd.f32 %v2065_v36, %v2064_v9  ;;  %v17758_v36 = vld [vmem:[#allocation63_spill] sm:$0xff] }
 0x370   : > { %17757 = vst [vmem:[#allocation62_spill] sm:$0xff] %v12599_v23  ;;  %v12606_v42 = vsub.f32 %v17758_v36, %v11874_v58  ;;  %v1860_v8 = vmul.f32 %v12599_v23, %v12599_v23  ;;  %v2071_v43 = vsel %vm17492_vm4, %v1859_v13, 0.0  ;;  %v17762_v36 = vld [vmem:[#allocation65_spill] sm:$0xff] }
 0x371   : > { %v2068_v37 = vadd.f32 %v2067_v17, %v2066_v45  ;;  %v17760_v17 = vld [vmem:[#allocation64_spill] sm:$0xff]  ;;  %v12623_v13 = vsub.f32 %v17762_v36, %v11874_v58  ;;  %v17766_v36 = vld [vmem:[#allocation67_spill] sm:$0xff] }
 0x372   : > { %17759 = vst [vmem:[#allocation63_spill] sm:$0xff] %v12606_v42  ;;  %v12613_v12 = vsub.f32 %v17760_v17, %v11874_v58  ;;  %v1861_v62 = vmul.f32 %v12606_v42, %v12606_v42  ;;  %v2073_v22 = vsel %vm17492_vm4, %v1860_v8, 0.0  ;;  %v11018_v8 = vld [vmem:[%s17310_s2 + $0x10] sm:$0xff]   ;;  %v17764_v42 = vld [vmem:[#allocation66_spill] sm:$0xff] }
 0x373   : > { %v2070_v9 = vadd.f32 %v2069_v29, %v2068_v37  ;;  %v11017_v37 = vld [vmem:[%s17310_s2 + $0x18] sm:$0xff]   ;;  %17763 = vst [vmem:[#allocation65_spill] sm:$0xff] %v12623_v13  ;;  %v12633_v23 = vsub.f32 %v17764_v42, %v11874_v58 }
 0x374   : > { %17761 = vst [vmem:[#allocation64_spill] sm:$0xff] %v12613_v12  ;;  %10295 = vmatprep.subr.bf16.mxu1 %v11017_v37 }
 0x375   : > { %v2072_v45 = vadd.f32 %v2071_v43, %v2070_v9  ;;  %10296 = vmatpush3.bf16.msra.mxu1 %v11017_v37  ;;  %v1862_v9 = vmul.f32 %v12613_v12, %v12613_v12  ;;  %v2075_v43 = vsel %vm17492_vm4, %v1861_v62, 0.0  ;;  %17765 = vst [vmem:[#allocation66_spill] sm:$0xff] %v12633_v23  ;;  %v12640_v62 = vsub.f32 %v17766_v36, %v11874_v58 }
 0x376   : > { %10297 = vmatprep.subr.bf16.mxu1 %v11018_v8  ;;  %v1866_v58 = vmul.f32 %v11877_v28, %v11877_v28 }
 0x377   : > { %v2074_v29 = vadd.f32 %v2073_v22, %v2072_v45  ;;  %v1863_v45 = vmul.f32 %v12623_v13, %v12623_v13  ;;  %v2077_v22 = vsel %vm17492_vm4, %v1862_v9, 0.0  ;;  %17767 = vst [vmem:[#allocation67_spill] sm:$0xff] %v12640_v62  ;;  %v1865_v42 = vmul.f32 %v12640_v62, %v12640_v62  ;;  %v12651_v9 = vld [vmem:[%s17310_s2 + $0x8] sm:$0xff]  }
 0x378   : > { %17768 = vst [vmem:[#allocation73_spill] sm:$0xff] %v12651_v9 }
 0x379   : > { %v2076_v17 = vadd.f32 %v2075_v43, %v2074_v29  ;;  %10298 = vmatpush3.bf16.msra.mxu1 %v11018_v8  ;;  %v1864_v29 = vmul.f32 %v12633_v23, %v12633_v23  ;;  %v2079_v43 = vsel %vm17492_vm4, %v1863_v45, 0.0  ;;  %v2083_v8 = vsel %vm17492_vm4, %v1865_v42, 0.0  ;;  %v17790_v23 = vld [vmem:[#allocation15_spill] sm:$0xff] }
 0x37a   : > { %10327 = vmatprep.subr.bf16.mxu1 %v12651_v9  ;;  %v1870_v42 = vmul.f32 %v11889_v60, %v11889_v60  ;;  %v17793_v9 = vld [vmem:[#allocation18_spill] sm:$0xff] }
 0x37b   : > { %v2078_v37 = vadd.f32 %v2077_v22, %v2076_v17  ;;  %v2081_v13 = vsel %vm17492_vm4, %v1864_v29, 0.0  ;;  %v1867_v22 = vmul.f32 %v11880_v11, %v11880_v11  ;;  %v1868_v29 = vmul.f32 %v11883_v1, %v11883_v1 }
 0x37d   : > { %v2080_v12 = vadd.f32 %v2079_v43, %v2078_v37  ;;  %v2085_v37 = vsel %vm17492_vm4, %v1866_v58, 0.0  ;;  %v2087_v43 = vsel %vm17492_vm4, %v1867_v22, 0.0  ;;  %v2089_v28 = vsel %vm17492_vm4, %v1868_v29, 0.0 }
 0x37e   : > { %v1871_v58 = vmul.f32 %v11892_v33, %v11892_v33 }
 0x37f   : > { %v2082_v17 = vadd.f32 %v2081_v13, %v2080_v12  ;;  %v1869_v13 = vmul.f32 %v11886_v50, %v11886_v50 }
 0x380   : > { %v2095_v22 = vsel %vm1636_vm5, %v1871_v58, 0.0 }
 0x381   : > { %v2084_v45 = vadd.f32 %v2083_v8, %v2082_v17  ;;  %v2091_v17 = vsel %vm17492_vm4, %v1869_v13, 0.0 }
 0x383   : > { %v2086_v36 = vadd.f32 %v2085_v37, %v2084_v45  ;;  %v2093_v45 = vsel %vm17492_vm4, %v1870_v42, 0.0 }
 0x385   : > { %v2088_v12 = vadd.f32 %v2087_v43, %v2086_v36 }
 0x387   : > { %v2090_v62 = vadd.f32 %v2089_v28, %v2088_v12 }
 0x389   : > { %v2092_v8 = vadd.f32 %v2091_v17, %v2090_v62  ;;  %v17770_v62 = vld [vmem:[#allocation2_spill] sm:$0xff]  ;;  %v17771_v17 = vld [vmem:[#allocation3_spill] sm:$0xff] }
 0x38b   : > { %v2094_v37 = vadd.f32 %v2093_v45, %v2092_v8 }
 0x38d   : > { %v2096_v36 = vadd.f32 %v2095_v22, %v2094_v37  ;;  %v17774_v37 = vld [vmem:[#allocation6_spill] sm:$0xff]  ;;  %v17775_v22 = vld [vmem:[#allocation7_spill] sm:$0xff] }
 0x38f   : > { %v2097_v43 = vrot.slane %v2096_v36, 4 }
 0x391   : > { %v2098_v50 = vadd.f32 %v2097_v43, %v2096_v36 }
 0x393   : > { %v2099_v1 = vrot.slane %v2098_v50, 2 }
 0x395   : > { %v2100_v29 = vadd.f32 %v2099_v1, %v2098_v50 }
 0x397   : > { %v2101_v28 = vrot.slane %v2100_v29, 1 }
 0x399   : > { %v2102_v12 = vadd.f32 %v2101_v28, %v2100_v29  ;;  %v17776_v29 = vld [vmem:[#allocation8_spill] sm:$0xff]  ;;  %v17777_v28 = vld [vmem:[#allocation9_spill] sm:$0xff] }
 0x39b   : > { %v2103_v11 = vmul.f32 0.0011111111, %v2102_v12 }
 0x39d   : > { %v2104_v60 = vadd.f32 1e-05, %v2103_v11  ;;  %v17772_v11 = vld [vmem:[#allocation4_spill] sm:$0xff] }
 0x39f   : > { %11116 = vrsqrt.f32 %v2104_v60  ;;  %v17773_v60 = vld [vmem:[#allocation5_spill] sm:$0xff] }
 0x3ac   : > { %v12673_v13 = vpop.eup %11116 }
 0x3ad   : > { %17769 = vst [vmem:[#allocation74_spill] sm:$0xff] %v12673_v13  ;;  %v12677_v33 = vmul.f32 %v12673_v13, %v11896_v15  ;;  %v12681_v42 = vmul.f32 %v12673_v13, %v17770_v62  ;;  %v12685_v8 = vmul.f32 %v12673_v13, %v17771_v17  ;;  %v12689_v1 = vmul.f32 %v12673_v13, %v11908_v25 }
 0x3ae   : > { %v12693_v50 = vmul.f32 %v12673_v13, %v17772_v11  ;;  %v12697_v15 = vmul.f32 %v12673_v13, %v17773_v60  ;;  %v12701_v58 = vmul.f32 %v12673_v13, %v11930_v20  ;;  %v12705_v45 = vmul.f32 %v12673_v13, %v11937_v0  ;;  %v17778_v11 = vld [vmem:[#allocation10_spill] sm:$0xff] }
 0x3af   : > { %v12709_v25 = vmul.f32 %v12673_v13, %v17774_v37  ;;  %v12713_v36 = vmul.f32 %v12673_v13, %v17775_v22  ;;  %v12717_v43 = vmul.f32 %v12673_v13, %v11958_v54  ;;  %v12721_v20 = vmul.f32 %v12673_v13, %v11965_v5  ;;  %v17779_v37 = vld [vmem:[#allocation11_spill] sm:$0xff]  ;;  %v17781_v22 = vld [vmem:[#allocation12_spill] sm:$0xff] }
 0x3b0   : > { %v12725_v0 = vmul.f32 %v12673_v13, %v17776_v29  ;;  %v12729_v12 = vmul.f32 %v12673_v13, %v17777_v28  ;;  %v12733_v62 = vmul.f32 %v12673_v13, %v11986_v55  ;;  %v12737_v54 = vmul.f32 %v12673_v13, %v11993_v44  ;;  %v17784_v28 = vld [vmem:[#allocation13_spill] sm:$0xff] }
 0x3b1   : > { %v12741_v5 = vmul.f32 %v12673_v13, %v12000_v4  ;;  %v12745_v17 = vmul.f32 %v12673_v13, %v12007_v6  ;;  %v12749_v60 = vmul.f32 %v12673_v13, %v17778_v11  ;;  %v12753_v55 = vmul.f32 %v12673_v13, %v12021_v47 }
 0x3b2   : > { %v12757_v44 = vmul.f32 %v12673_v13, %v17779_v37  ;;  %v12761_v4 = vmul.f32 %v12673_v13, %v12035_v16  ;;  %v12765_v6 = vmul.f32 %v12673_v13, %v17781_v22  ;;  %v12769_v29 = vmul.f32 %v12673_v13, %v12049_v21  ;;  %v17787_v37 = vld [vmem:[#allocation14_spill] sm:$0xff] }
 0x3b3   : > { %v12773_v47 = vmul.f32 %v12673_v13, %v17784_v28  ;;  %v12777_v11 = vmul.f32 %v12673_v13, %v12063_v26  ;;  %v12781_v16 = vmul.f32 %v12673_v13, %v17787_v37  ;;  %v12785_v22 = vmul.f32 %v12673_v13, %v12077_v31 }
 0x3b4   : > { %17780 = vst [vmem:[#allocation2_spill] sm:$0xff] %v12761_v4  ;;  %17782 = vst [vmem:[#allocation3_spill] sm:$0xff] %v12765_v6  ;;  %v12789_v21 = vmul.f32 %v12673_v13, %v17790_v23  ;;  %v12793_v28 = vmul.f32 %v12673_v13, %v12091_v40  ;;  %v12797_v26 = vmul.f32 %v12673_v13, %v17791_v34  ;;  %v17802_v6 = vld [vmem:[#allocation24_spill] sm:$0xff]  ;;  %v17804_v4 = vld [vmem:[#allocation25_spill] sm:$0xff]  ;;  %vm2218_vm6 = vcmp.ge.f32.partialorder %v12677_v33, 0.0 }
 0x3b5   : > { %17783 = vst [vmem:[#allocation4_spill] sm:$0xff] %v12769_v29  ;;  %17785 = vst [vmem:[#allocation5_spill] sm:$0xff] %v12773_v47  ;;  %v12801_v37 = vmul.f32 %v12673_v13, %v12105_v48  ;;  %v12805_v31 = vmul.f32 %v12673_v13, %v17792_v46  ;;  %v12809_v23 = vmul.f32 %v12673_v13, %v12119_v56  ;;  %v17799_v47 = vld [vmem:[#allocation22_spill] sm:$0xff]  ;;  %v17801_v29 = vld [vmem:[#allocation23_spill] sm:$0xff]  ;;  %vm2219_vm7 = vcmp.ge.f32.partialorder %v12681_v42, 0.0 }
 0x3b6   : > { %17786 = vst [vmem:[#allocation6_spill] sm:$0xff] %v12777_v11  ;;  %17788 = vst [vmem:[#allocation7_spill] sm:$0xff] %v12781_v16  ;;  %v12813_v40 = vmul.f32 %v12673_v13, %v17793_v9  ;;  %v12817_v34 = vmul.f32 %v12673_v13, %v12133_v2  ;;  %v12825_v46 = vmul.f32 %v12673_v13, %v12147_v10  ;;  %v17795_v16 = vld [vmem:[#allocation20_spill] sm:$0xff]  ;;  %v17796_v11 = vld [vmem:[#allocation21_spill] sm:$0xff]  ;;  %vm2220_vm8 = vcmp.ge.f32.partialorder %v12685_v8, 0.0 }
 0x3b7   : > { %17789 = vst [vmem:[#allocation8_spill] sm:$0xff] %v12785_v22  ;;  %v17794_v22 = vld [vmem:[#allocation19_spill] sm:$0xff]  ;;  %v12829_v56 = vmul.f32 %v12673_v13, %v17795_v16  ;;  %v12833_v9 = vmul.f32 %v12673_v13, %v12161_v18  ;;  %v12837_v2 = vmul.f32 %v12673_v13, %v17796_v11  ;;  %v12845_v10 = vmul.f32 %v12673_v13, %v17799_v47 }
 0x3b8   : > { %v12821_v48 = vmul.f32 %v12673_v13, %v17794_v22  ;;  %v12841_v22 = vmul.f32 %v12673_v13, %v12175_v27  ;;  %v12849_v16 = vmul.f32 %v12673_v13, %v17801_v29  ;;  %v12853_v18 = vmul.f32 %v12673_v13, %v17802_v6 }
 0x3b9   : > { %17797 = vst [vmem:[#allocation9_spill] sm:$0xff] %v12837_v2  ;;  %17800 = vst [vmem:[#allocation11_spill] sm:$0xff] %v12845_v10  ;;  %v12857_v11 = vmul.f32 %v12673_v13, %v17804_v4  ;;  %v17805_v2 = vld [vmem:[#allocation26_spill] sm:$0xff]  ;;  %v17808_v10 = vld [vmem:[#allocation28_spill] sm:$0xff]  ;;  %v12873_v6 = vmul.f32 %v12673_v13, %v12231_v49  ;;  %vm2221_vm9 = vcmp.ge.f32.partialorder %v12689_v1, 0.0  ;;  %vm2246_vm10 = vcmp.ge.f32.partialorder %v12789_v21, 0.0 }
 0x3ba   : > { %17798 = vst [vmem:[#allocation10_spill] sm:$0xff] %v12841_v22  ;;  %17803 = vst [vmem:[#allocation12_spill] sm:$0xff] %v12853_v18  ;;  %v12861_v27 = vmul.f32 %v12673_v13, %v17805_v2  ;;  %v17807_v22 = vld [vmem:[#allocation27_spill] sm:$0xff]  ;;  %v12869_v29 = vmul.f32 %v12673_v13, %v17808_v10  ;;  %v17810_v18 = vld [vmem:[#allocation29_spill] sm:$0xff]  ;;  %v12881_v2 = vmul.f32 %v12673_v13, %v12245_v52  ;;  %vm2247_vm11 = vcmp.ge.f32.partialorder %v12793_v28, 0.0 }
 0x3bb   : > { %v12865_v47 = vmul.f32 %v12673_v13, %v17807_v22  ;;  %v12877_v4 = vmul.f32 %v12673_v13, %v17810_v18  ;;  %v12889_v10 = vmul.f32 %v12673_v13, %v12259_v19  ;;  %v12897_v18 = vmul.f32 %v12673_v13, %v12273_v30 }
 0x3bc   : > { %17806 = vst [vmem:[#allocation13_spill] sm:$0xff] %v12861_v27  ;;  %17809 = vst [vmem:[#allocation14_spill] sm:$0xff] %v12869_v29  ;;  %v17811_v27 = vld [vmem:[#allocation30_spill] sm:$0xff]  ;;  %v17814_v29 = vld [vmem:[#allocation31_spill] sm:$0xff]  ;;  %v12901_v52 = vmul.f32 %v12673_v13, %v12294_v51  ;;  %v12921_v51 = vmul.f32 %v12673_v13, %v12329_v41  ;;  %vm2248_vm12 = vcmp.ge.f32.partialorder %v12797_v26, 0.0  ;;  %vm2249_vm13 = vcmp.ge.f32.partialorder %v12801_v37, 0.0 }
 0x3bd   : > { %v12885_v22 = vmul.f32 %v12673_v13, %v17811_v27  ;;  %17813 = vst [vmem:[#allocation16_spill] sm:$0xff] %v12889_v10  ;;  %v12893_v49 = vmul.f32 %v12673_v13, %v17814_v29  ;;  %17816 = vst [vmem:[#allocation18_spill] sm:$0xff] %v12897_v18  ;;  %v12905_v27 = vmul.f32 %v12673_v13, %v12301_v63  ;;  %vm2250_vm14 = vcmp.ge.f32.partialorder %v12805_v31, 0.0 }
 0x3be   : > { %17817 = vst [vmem:[#allocation19_spill] sm:$0xff] %v12901_v52  ;;  %v12913_v29 = vmul.f32 %v12673_v13, %v12315_v35  ;;  %17824 = vst [vmem:[#allocation24_spill] sm:$0xff] %v12921_v51  ;;  %v17825_v52 = vld [vmem:[#allocation37_spill] sm:$0xff]  ;;  %vm2251_vm15 = vcmp.ge.f32.partialorder %v12809_v23, 0.0  ;;  %vm2222_vm2 = vcmp.ge.f32.partialorder %v12693_v50, 0.0  ;;  %vm2223_vm3 = vcmp.ge.f32.partialorder %v12697_v15, 0.0 }
 0x3bf   : > { %17812 = vst [vmem:[#allocation15_spill] sm:$0xff] %v12885_v22  ;;  %17815 = vst [vmem:[#allocation17_spill] sm:$0xff] %v12893_v49  ;;  %v17819_v22 = vld [vmem:[#allocation35_spill] sm:$0xff]  ;;  %v17822_v49 = vld [vmem:[#allocation36_spill] sm:$0xff]  ;;  %v12925_v63 = vmul.f32 %v12673_v13, %v17825_v52  ;;  %v12945_v52 = vmul.f32 %v12673_v13, %v12371_v24  ;;  %vm2254_vm4 = vcmp.ge.f32.partialorder %v12821_v48, 0.0  ;;  %vm2225_vm5 = vcmp.ge.f32.partialorder %v12705_v45, 0.0 }
 0x3c0   : > { %17818 = vst [vmem:[#allocation20_spill] sm:$0xff] %v12905_v27  ;;  %v12909_v19 = vmul.f32 %v12673_v13, %v17819_v22  ;;  %17821 = vst [vmem:[#allocation22_spill] sm:$0xff] %v12913_v29  ;;  %v12917_v30 = vmul.f32 %v12673_v13, %v17822_v49  ;;  %v12929_v22 = vmul.f32 %v12673_v13, %v12343_v32  ;;  %vm2226_vm1 = vcmp.ge.f32.partialorder %v12709_v25, 0.0 }
 0x3c1   : > { %17826 = vst [vmem:[#allocation25_spill] sm:$0xff] %v12925_v63  ;;  %v12937_v49 = vmul.f32 %v12673_v13, %v12357_v39  ;;  %17833 = vst [vmem:[#allocation30_spill] sm:$0xff] %v12945_v52  ;;  %v17834_v63 = vld [vmem:[#allocation40_spill] sm:$0xff]  ;;  %v2358_v51 = vmul.f32 0.01, %v12789_v21  ;;  %vm2257_vm0 = vcmp.ge.f32.partialorder %v12833_v9, 0.0 }
 0x3c2   : > { %17820 = vst [vmem:[#allocation21_spill] sm:$0xff] %v12909_v19  ;;  %17823 = vst [vmem:[#allocation23_spill] sm:$0xff] %v12917_v30  ;;  %v17828_v19 = vld [vmem:[#allocation38_spill] sm:$0xff]  ;;  %v17831_v30 = vld [vmem:[#allocation39_spill] sm:$0xff]  ;;  %v12949_v32 = vmul.f32 %v12673_v13, %v17834_v63  ;;  %v12969_v63 = vmul.f32 %v12673_v13, %v12413_v7  ;;  %v2330_v7 = vmul.f32 0.01, %v12677_v33 }
 0x3c3   : > { %17827 = vst [vmem:[#allocation26_spill] sm:$0xff] %v12929_v22  ;;  %v12933_v35 = vmul.f32 %v12673_v13, %v17828_v19  ;;  %17830 = vst [vmem:[#allocation28_spill] sm:$0xff] %v12937_v49  ;;  %v12941_v41 = vmul.f32 %v12673_v13, %v17831_v30  ;;  %v17836_v22 = vld [vmem:[#allocation41_spill] sm:$0xff]  ;;  %v12961_v30 = vmul.f32 %v12673_v13, %v12399_v53  ;;  %v13059_v49 = vmul.f32 0.01, %v12741_v5 }
 0x3c4   : > { %17835 = vst [vmem:[#allocation31_spill] sm:$0xff] %v12949_v32  ;;  %v12953_v19 = vmul.f32 %v12673_v13, %v17836_v22  ;;  %17843 = vst [vmem:[#allocation39_spill] sm:$0xff] %v12969_v63  ;;  %v12973_v22 = vmul.f32 %v12673_v13, %v12420_v38  ;;  %v12981_v53 = vmul.f32 %v12673_v13, %v12438_v61  ;;  %v2331_v38 = vmul.f32 0.01, %v12681_v42  ;;  %v17849_v63 = vld [vmem:[#allocation44_spill] sm:$0xff]  ;;  %v17852_v32 = vld [vmem:[#allocation45_spill] sm:$0xff] }
 0x3c5   : > { %17829 = vst [vmem:[#allocation27_spill] sm:$0xff] %v12933_v35  ;;  %17832 = vst [vmem:[#allocation29_spill] sm:$0xff] %v12941_v41  ;;  %v17838_v35 = vld [vmem:[#allocation42_spill] sm:$0xff]  ;;  %v17841_v41 = vld [vmem:[#allocation43_spill] sm:$0xff]  ;;  %v2332_v61 = vmul.f32 0.01, %v12685_v8  ;;  %v13048_v52 = vmul.f32 %v12673_v13, %v17852_v32 }
 0x3c6   : > { %17837 = vst [vmem:[#allocation35_spill] sm:$0xff] %v12953_v19  ;;  %v12957_v39 = vmul.f32 %v12673_v13, %v17838_v35  ;;  %17840 = vst [vmem:[#allocation37_spill] sm:$0xff] %v12961_v30  ;;  %v12965_v24 = vmul.f32 %v12673_v13, %v17841_v41  ;;  %v12977_v35 = vmul.f32 %v12673_v13, %v12430_v14  ;;  %v2333_v41 = vmul.f32 0.01, %v12689_v1 }
 0x3c7   : > { %17844 = vst [vmem:[#allocation40_spill] sm:$0xff] %v12973_v22  ;;  %17846 = vst [vmem:[#allocation42_spill] sm:$0xff] %v12981_v53  ;;  %v12997_v14 = vmul.f32 %v12673_v13, %v12445_v59  ;;  %v2334_v53 = vmul.f32 0.01, %v12693_v50  ;;  %v2335_v59 = vmul.f32 0.01, %v12697_v15 }
 0x3c8   : > { %17839 = vst [vmem:[#allocation36_spill] sm:$0xff] %v12957_v39  ;;  %17842 = vst [vmem:[#allocation38_spill] sm:$0xff] %v12965_v24  ;;  %v13015_v22 = vmul.f32 0.01, %v12705_v45  ;;  %v13019_v24 = vmul.f32 %v12673_v13, %v17849_v63  ;;  %v13028_v30 = vmul.f32 0.01, %v12717_v43  ;;  %v13032_v39 = vmul.f32 %v12673_v13, %v12466_v57 }
 0x3c9   : > { %17845 = vst [vmem:[#allocation41_spill] sm:$0xff] %v12977_v35  ;;  %17847 = vst [vmem:[#allocation43_spill] sm:$0xff] %v12997_v14  ;;  %v13005_v35 = vmul.f32 %v12673_v13, %v12452_v3  ;;  %v13012_v14 = vmul.f32 0.01, %v12701_v58  ;;  %v13022_v3 = vmul.f32 0.01, %v12709_v25 }
 0x3ca   : > { %17850 = vst [vmem:[#allocation44_spill] sm:$0xff] %v13019_v24  ;;  %17851 = vst [vmem:[#allocation76_spill] sm:$0xff] %v13032_v39  ;;  %v13038_v63 = vmul.f32 0.01, %v12721_v20  ;;  %v13041_v24 = vmul.f32 0.01, %v12725_v0 }
 0x3cb   : > { %17848 = vst [vmem:[#allocation75_spill] sm:$0xff] %v13005_v35  ;;  %v13025_v35 = vmul.f32 0.01, %v12713_v36  ;;  %v13044_v19 = vmul.f32 0.01, %v12729_v12  ;;  %17853 = vst [vmem:[#allocation45_spill] sm:$0xff] %v13048_v52  ;;  %v13068_v52 = vsel %vm2218_vm6, %v12677_v33, %v2330_v7  ;;  %v13090_v7 = vsel %vm2220_vm8, %v12685_v8, %v2332_v61 }
 0x3cc   : > { %v13053_v57 = vmul.f32 0.01, %v12733_v62  ;;  %v13056_v39 = vmul.f32 0.01, %v12737_v54  ;;  %17855 = vst [vmem:[#allocation78_spill] sm:$0xff] %v13059_v49  ;;  %17856 = vst [vmem:[#allocation79_spill] sm:$0xff] %v13068_v52  ;;  %v13076_v49 = vsel %vm2219_vm7, %v12681_v42, %v2331_v38 }
 0x3cd   : > { %v2359_v32 = vmul.f32 0.01, %v12793_v28  ;;  %v2360_v13 = vmul.f32 0.01, %v12797_v26  ;;  %v2361_v29 = vmul.f32 0.01, %v12801_v37 }
 0x3ce   : > { %17854 = vst [vmem:[#allocation77_spill] sm:$0xff] %v13056_v39  ;;  %v2362_v27 = vmul.f32 0.01, %v12805_v31  ;;  %v2363_v18 = vmul.f32 0.01, %v12809_v23  ;;  %17857 = vst [vmem:[#allocation80_spill] sm:$0xff] %v13076_v49  ;;  %v13100_v49 = vsel %vm2221_vm9, %v12689_v1, %v2333_v41 }
 0x3cf   : > { %v13079_v39 = vmul.f32 0.01, %v12745_v17  ;;  %v13082_v10 = vmul.f32 0.01, %v12749_v60  ;;  %v13085_v33 = vmul.f32 0.01, %v12753_v55  ;;  %v2472_v1 = vsel %vm2248_vm12, %v12797_v26, %v2360_v13 }
 0x3d0   : > { %17860 = vst [vmem:[#allocation83_spill] sm:$0xff] %v13090_v7  ;;  %v13093_v52 = vmul.f32 0.01, %v12757_v44  ;;  %v2364_v42 = vmul.f32 0.01, %v12813_v40  ;;  %17862 = vst [vmem:[#allocation85_spill] sm:$0xff] %v13100_v49  ;;  %v2470_v7 = vsel %vm2246_vm10, %v12789_v21, %v2358_v51  ;;  %v2473_v41 = vsel %vm2249_vm13, %v12801_v37, %v2361_v29 }
 0x3d1   : > { %17858 = vst [vmem:[#allocation81_spill] sm:$0xff] %v13082_v10  ;;  %17859 = vst [vmem:[#allocation82_spill] sm:$0xff] %v13085_v33  ;;  %v2365_v38 = vmul.f32 0.01, %v12817_v34  ;;  %vm2228_vm6 = vcmp.ge.f32.partialorder %v12717_v43, 0.0  ;;  %vm2256_vm7 = vcmp.ge.f32.partialorder %v12829_v56, 0.0  ;;  %v2474_v49 = vsel %vm2250_vm14, %v12805_v31, %v2362_v27 }
 0x3d2   : > { %17861 = vst [vmem:[#allocation84_spill] sm:$0xff] %v13093_v52  ;;  %v2366_v8 = vmul.f32 0.01, %v12821_v48  ;;  %v2367_v61 = vmul.f32 0.01, %v12825_v46  ;;  %v2471_v52 = vsel %vm2247_vm11, %v12793_v28, %v2359_v32  ;;  %v2475_v21 = vsel %vm2251_vm15, %v12809_v23, %v2363_v18  ;;  %v17863_v51 = vld [vmem:[#allocation9_spill] sm:$0xff] }
 0x3d3   : > { %vm2258_vm8 = vcmp.ge.f32.partialorder %v17863_v51, 0.0  ;;  %v17864_v33 = vld [vmem:[#allocation10_spill] sm:$0xff]  ;;  %v17867_v13 = vld [vmem:[#allocation3_spill] sm:$0xff]  ;;  %v17869_v10 = vld [vmem:[#allocation4_spill] sm:$0xff]  ;;  %v13139_v31 = vsel %vm2222_vm2, %v12693_v50, %v2334_v53  ;;  %v13147_v18 = vsel %vm2223_vm3, %v12697_v15, %v2335_v59  ;;  %vm17873_vm10 = vcmp.ge.f32.partialorder %v12813_v40, 0.0 }
 0x3d4   : > { %vm2259_vm9 = vcmp.ge.f32.partialorder %v17864_v33, 0.0  ;;  %v17865_v28 = vld [vmem:[#allocation2_spill] sm:$0xff]  ;;  %v13131_v26 = vmul.f32 0.01, %v17867_v13  ;;  %v13134_v37 = vmul.f32 0.01, %v17869_v10  ;;  %v2476_v29 = vsel %vm17873_vm10, %v12813_v40, %v2364_v42 }
 0x3d5   : > { %v13128_v32 = vmul.f32 0.01, %v17865_v28  ;;  %v17871_v27 = vld [vmem:[#allocation5_spill] sm:$0xff]  ;;  %vm17874_vm11 = vcmp.ge.f32.partialorder %v12817_v34, 0.0  ;;  %vm2229_vm12 = vcmp.ge.f32.partialorder %v12721_v20, 0.0  ;;  %v17875_v50 = vld [vmem:[#allocation6_spill] sm:$0xff]  ;;  %v13188_v42 = vsel %vm2225_vm5, %v12705_v45, %v13015_v22 }
 0x3d6   : > { %17868 = vst [vmem:[#allocation10_spill] sm:$0xff] %v13131_v26  ;;  %17870 = vst [vmem:[#allocation2_spill] sm:$0xff] %v13134_v37  ;;  %v13142_v23 = vmul.f32 0.01, %v17871_v27  ;;  %v2477_v37 = vsel %vm17874_vm11, %v12817_v34, %v2365_v38  ;;  %v13157_v53 = vmul.f32 0.01, %v17875_v50  ;;  %v13159_v26 = vpack.c.bf16 %v2471_v52, %v2470_v7 }
 0x3d7   : > { %17866 = vst [vmem:[#allocation9_spill] sm:$0xff] %v13128_v32  ;;  %v13163_v32 = vpack.c.bf16 %v2475_v21, %v2474_v49  ;;  %v17879_v15 = vld [vmem:[#allocation7_spill] sm:$0xff]  ;;  %vm17880_vm13 = vcmp.ge.f32.partialorder %v12701_v58, 0.0  ;;  %v2478_v34 = vsel %vm2254_vm4, %v12821_v48, %v2366_v8  ;;  %vm17882_vm14 = vcmp.ge.f32.partialorder %v12825_v46, 0.0  ;;  %v17883_v49 = vld [vmem:[#allocation8_spill] sm:$0xff] }
 0x3d8   : > { %17872 = vst [vmem:[#allocation3_spill] sm:$0xff] %v13142_v23  ;;  %17876 = vst [vmem:[#allocation4_spill] sm:$0xff] %v13159_v26  ;;  %v13161_v23 = vpack.c.bf16 %v2473_v41, %v2472_v1  ;;  %v13166_v59 = vmul.f32 0.01, %v17879_v15  ;;  %v13172_v40 = vsel %vm17880_vm13, %v12701_v58, %v13012_v14  ;;  %v2479_v52 = vsel %vm17882_vm14, %v12825_v46, %v2367_v61  ;;  %v17891_v21 = vld [vmem:[#allocation12_spill] sm:$0xff] }
 0x3d9   : > { %17878 = vst [vmem:[#allocation6_spill] sm:$0xff] %v13163_v32  ;;  %17881 = vst [vmem:[#allocation7_spill] sm:$0xff] %v13172_v40  ;;  %vm2230_vm15 = vcmp.ge.f32.partialorder %v12725_v0, 0.0  ;;  %v13182_v7 = vmul.f32 0.01, %v17883_v49  ;;  %v13194_v58 = vsel %vm2226_vm1, %v12709_v25, %v13022_v3  ;;  %v13196_v48 = vpack.c.bf16 %v2477_v37, %v2476_v29  ;;  %v17889_v25 = vld [vmem:[#allocation11_spill] sm:$0xff] }
 0x3da   : > { %17877 = vst [vmem:[#allocation5_spill] sm:$0xff] %v13161_v23  ;;  %17884 = vst [vmem:[#allocation8_spill] sm:$0xff] %v13188_v42  ;;  %vm2231_vm4 = vcmp.ge.f32.partialorder %v12729_v12, 0.0  ;;  %v2368_v46 = vmul.f32 0.01, %v12829_v56  ;;  %vm17887_vm2 = vcmp.ge.f32.partialorder %v12713_v36, 0.0  ;;  %v13211_v22 = vpack.c.bf16 %v2479_v52, %v2478_v34 }
 0x3db   : > { %17885 = vst [vmem:[#allocation86_spill] sm:$0xff] %v13194_v58  ;;  %17886 = vst [vmem:[#allocation87_spill] sm:$0xff] %v13196_v48  ;;  %v2369_v14 = vmul.f32 0.01, %v12833_v9  ;;  %v2370_v38 = vmul.f32 0.01, %v17863_v51  ;;  %v13206_v45 = vsel %vm17887_vm2, %v12713_v36, %v13025_v35 }
 0x3dc   : > { %17888 = vst [vmem:[#allocation88_spill] sm:$0xff] %v13206_v45  ;;  %vm2232_vm3 = vcmp.ge.f32.partialorder %v12733_v62, 0.0  ;;  %vm2260_vm1 = vcmp.ge.f32.partialorder %v17889_v25, 0.0  ;;  %vm2261_vm5 = vcmp.ge.f32.partialorder %v12849_v16, 0.0  ;;  %17890 = vst [vmem:[#allocation11_spill] sm:$0xff] %v13211_v22  ;;  %v2650_v3 = vshll.u32 %v13159_v26, 16 }
 0x3dd   : > { %v2655_v8 = vshll.u32 %v13161_v23, 16  ;;  %v2663_v61 = vshll.u32 %v13163_v32, 16  ;;  %v2371_v1 = vmul.f32 0.01, %v17864_v33  ;;  %v2648_v41 = vshrl.u32 %v13159_v26, 16  ;;  %v17945_v58 = vld [vmem:[#allocation31_spill] sm:$0xff] }
 0x3de   : > { %v2659_v36 = vshrl.u32 %v13161_v23, 16  ;;  %v2667_v35 = vshrl.u32 %v13163_v32, 16  ;;  %vm2233_vm10 = vcmp.ge.f32.partialorder %v12737_v54, 0.0  ;;  %vm2262_vm11 = vcmp.ge.f32.partialorder %v17891_v21, 0.0 }
 0x3df   : > { %v2652_v37 = vrot.slane %v2650_v3, 1  ;;  %v2657_v29 = vrot.slane %v2655_v8, 1  ;;  %v2665_v34 = vrot.slane %v2663_v61, 1  ;;  %v2671_v52 = vshll.u32 %v13196_v48, 16 }
 0x3e0   : > { %v13228_v26 = vsel %vm2228_vm6, %v12717_v43, %v13028_v30  ;;  %v2480_v32 = vsel %vm2256_vm7, %v12829_v56, %v2368_v46  ;;  %v2481_v23 = vsel %vm2257_vm0, %v12833_v9, %v2369_v14  ;;  %vm2646_vm14 = vsmask.f32 7424 }
 0x3e1   : > { %17892 = vst [vmem:[#allocation12_spill] sm:$0xff] %v13228_v26  ;;  %vm2234_vm2 = vcmp.ge.f32.partialorder %v12741_v5, 0.0  ;;  %v2653_v3 = vor.u32 %v2652_v37, %v2648_v41  ;;  %v2661_v8 = vor.u32 %v2659_v36, %v2657_v29  ;;  %v2669_v61 = vor.u32 %v2667_v35, %v2665_v34  ;;  %v11020_v35 = vld [vmem:[%s17310_s2] sm:$0xff]  }
 0x3e2   : > { %v2679_v42 = vshll.u32 %v13211_v22, 16  ;;  %vm2235_vm13 = vcmp.ge.f32.partialorder %v12745_v17, 0.0  ;;  %v2372_v43 = vmul.f32 0.01, %v17889_v25  ;;  %v2373_v30 = vmul.f32 0.01, %v12849_v16 }
 0x3e3   : > { %v2482_v56 = vsel %vm2258_vm8, %v17863_v51, %v2370_v38  ;;  %v2483_v9 = vsel %vm2259_vm9, %v17864_v33, %v2371_v1  ;;  %v13247_v46 = vpack.c.bf16 %v2481_v23, %v2480_v32  ;;  %v2658_v14 = vsel %vm2646_vm14, %v2653_v3, %v2657_v29  ;;  %v17894_v38 = vld [vmem:[#allocation13_spill] sm:$0xff] }
 0x3e4   : > { %v2666_v41 = vsel %vm2646_vm14, %v2661_v8, %v2665_v34  ;;  %v2673_v36 = vrot.slane %v2671_v52, 1  ;;  %vm2236_vm0 = vcmp.ge.f32.partialorder %v12749_v60, 0.0  ;;  %v2374_v37 = vmul.f32 0.01, %v17891_v21  ;;  %v17899_v34 = vld [vmem:[#allocation14_spill] sm:$0xff]  ;;  %v17902_v3 = vld [vmem:[#allocation73_spill] sm:$0xff] }
 0x3e5   : > { %17893 = vst [vmem:[#allocation89_spill] sm:$0xff] %v13247_v46  ;;  %v2375_v51 = vmul.f32 0.01, %v12857_v11  ;;  %v13258_v26 = vmul.f32 0.01, %v17894_v38  ;;  %v13264_v33 = vsel %vm2229_vm12, %v12721_v20, %v13038_v63  ;;  %vm17896_vm6 = vcmask 261120  }
 0x3e6   : > { %17895 = vst [vmem:[#allocation13_spill] sm:$0xff] %v13264_v33  ;;  %10299 = vmatprep.mubr.msk.bf16.mxu1 %vm17896_vm6, %v2658_v14  ;;  %vm2264_vm7 = vcmp.ge.f32.partialorder %v17894_v38, 0.0  ;;  %v13270_v32 = vmul.f32 0.01, %v12865_v47  ;;  %v13272_v23 = vpack.c.bf16 %v2483_v9, %v2482_v56  ;;  %vm17898_vm9 = vmmov %vm17896_vm6  ;;  %v2674_v1 = vsel %vm2646_vm14, %v2669_v61, %v2673_v36  ;;  %v13308_v56 = vld [vmem:[%s17310_s2 + $0x28] sm:$0xff]  }
 0x3e7   : > { %10300 = vmatmul.mubr.msk.bf16.vlgmr.msra.gmra.mxu1 %vm17898_vm9, %v2666_v41  ;;  %v2681_v29 = vrot.slane %v2679_v42, 1  ;;  %v13277_v52 = vmul.f32 0.01, %v17899_v34  ;;  %v13280_v20 = vmul.f32 0.01, %v12873_v6  ;;  %v13286_v63 = vsel %vm2230_vm15, %v12725_v0, %v13041_v24  ;;  %vm17901_vm12 = vmmov %vm17896_vm6  ;;  %17904 = vst [vmem:[#allocation91_spill] sm:$0xff] %v13308_v56 }
 0x3e8   : > { %17897 = vst [vmem:[#allocation90_spill] sm:$0xff] %v13272_v23  ;;  %17900 = vst [vmem:[#allocation14_spill] sm:$0xff] %v13286_v63  ;;  %10303 = vmatprep.mubr.msk.bf16.mxu1 %vm17901_vm12, %v2674_v1  ;;  %10328 = vmatpush3.bf16.msra.mxu1 %v17902_v3  ;;  %v2675_v8 = vshrl.u32 %v13196_v48, 16  ;;  %vm2237_vm6 = vcmp.ge.f32.partialorder %v12753_v55, 0.0  ;;  %vm2266_vm9 = vcmp.ge.f32.partialorder %v17899_v34, 0.0  ;;  %vm2267_vm8 = vcmp.ge.f32.partialorder %v12873_v6, 0.0 }
 0x3e9   : > { %v13295_v42 = vmul.f32 0.01, %v12877_v4  ;;  %v13301_v0 = vsel %vm2231_vm4, %v12729_v12, %v13044_v19  ;;  %v2683_v24 = vshrl.u32 %v13211_v22, 16  ;;  %v2687_v61 = vshll.u32 %v13247_v46, 16  ;;  %10329 = vmatprep.subr.bf16.mxu1 %v11020_v35  ;;  %v17906_v1 = vld [vmem:[#allocation15_spill] sm:$0xff]  ;;  %v17932_v63 = vld [vmem:[#allocation82_spill] sm:$0xff] }
 0x3ea   : > { %17903 = vst [vmem:[#allocation73_spill] sm:$0xff] %v13301_v0  ;;  %v13314_v9 = vsel %vm2232_vm3, %v12733_v62, %v13053_v57  ;;  %v2484_v12 = vsel %vm2260_vm1, %v17889_v25, %v2372_v43  ;;  %v2485_v19 = vsel %vm2261_vm5, %v12849_v16, %v2373_v30  ;;  %v2677_v14 = vor.u32 %v2675_v8, %v2673_v36  ;;  %v17907_v62 = vld [vmem:[#allocation16_spill] sm:$0xff]  ;;  %v17908_v25 = vld [vmem:[#allocation77_spill] sm:$0xff] }
 0x3eb   : > { %17905 = vst [vmem:[#allocation92_spill] sm:$0xff] %v13314_v9  ;;  %v13323_v41 = vmul.f32 0.01, %v12881_v2  ;;  %v13326_v3 = vmul.f32 0.01, %v17906_v1  ;;  %v2685_v22 = vor.u32 %v2683_v24, %v2681_v29  ;;  %v2695_v48 = vshll.u32 %v13272_v23, 16 }
 0x3ec   : > { %vm2238_vm15 = vcmp.ge.f32.partialorder %v12757_v44, 0.0  ;;  %v13331_v57 = vmul.f32 0.01, %v17907_v62  ;;  %v13337_v16 = vsel %vm2233_vm10, %v12737_v54, %v17908_v25  ;;  %v2486_v43 = vsel %vm2262_vm11, %v17891_v21, %v2374_v37  ;;  %10330 = vmatpush3.bf16.msra.mxu1 %v11020_v35  ;;  %v17911_v36 = vld [vmem:[#allocation17_spill] sm:$0xff]  ;;  %v17912_v24 = vld [vmem:[#allocation18_spill] sm:$0xff]  ;;  %v17914_v54 = vld [vmem:[#allocation19_spill] sm:$0xff] }
 0x3ed   : > { %17909 = vst [vmem:[#allocation15_spill] sm:$0xff] %v13337_v16  ;;  %vm17910_vm4 = vcmp.ge.f32.partialorder %v12857_v11, 0.0  ;;  %v13346_v8 = vmul.f32 0.01, %v17911_v36  ;;  %v13349_v9 = vmul.f32 0.01, %v17912_v24  ;;  %v13351_v33 = vpack.c.bf16 %v2485_v19, %v2484_v12  ;;  %10359 = vmatprep.subr.bf16.mxu1 %v13308_v56  ;;  %vm17920_vm10 = vmmov %vm17901_vm12 }
 0x3ee   : > { %v2487_v30 = vsel %vm17910_vm4, %v12857_v11, %v2375_v51  ;;  %v2689_v40 = vrot.slane %v2687_v61, 1  ;;  %vm2239_vm3 = vcmp.ge.f32.partialorder %v17865_v28, 0.0  ;;  %v13356_v21 = vmul.f32 0.01, %v17914_v54  ;;  %v17915_v37 = vld [vmem:[#allocation20_spill] sm:$0xff]  ;;  %v17916_v11 = vld [vmem:[#allocation78_spill] sm:$0xff]  ;;  %vm17923_vm11 = vmmov %vm17920_vm10 }
 0x3ef   : > { %17913 = vst [vmem:[#allocation16_spill] sm:$0xff] %v13351_v33  ;;  %v13359_v25 = vmul.f32 0.01, %v17915_v37  ;;  %v13365_v35 = vsel %vm2234_vm2, %v12741_v5, %v17916_v11  ;;  %v2682_v51 = vsel %vm2646_vm14, %v2677_v14, %v2681_v29  ;;  %vm2268_vm1 = vcmp.ge.f32.partialorder %v12877_v4, 0.0  ;;  %v17921_v11 = vld [vmem:[#allocation21_spill] sm:$0xff]  ;;  %v17922_v29 = vld [vmem:[#allocation22_spill] sm:$0xff] }
 0x3f0   : > { %17917 = vst [vmem:[#allocation77_spill] sm:$0xff] %v13365_v35  ;;  %vm2269_vm5 = vcmp.ge.f32.partialorder %v12881_v2, 0.0  ;;  %v13374_v61 = vsel %vm2235_vm13, %v12745_v17, %v13079_v39  ;;  %v13376_v12 = vpack.c.bf16 %v2487_v30, %v2486_v43  ;;  %10304 = vmatmul.mubr.msk.bf16.gmra.mxu1 %vm17920_vm10, %v2682_v51  ;;  %v2690_v19 = vsel %vm2646_vm14, %v2685_v22, %v2689_v40  ;;  %v17925_v39 = vld [vmem:[#allocation23_spill] sm:$0xff]  ;;  %v17926_v22 = vld [vmem:[#allocation81_spill] sm:$0xff] }
 0x3f1   : > { %17918 = vst [vmem:[#allocation17_spill] sm:$0xff] %v13374_v61  ;;  %v2697_v5 = vrot.slane %v2695_v48, 1  ;;  %v13381_v56 = vmul.f32 0.01, %v17921_v11  ;;  %v13384_v14 = vmul.f32 0.01, %v17922_v29  ;;  %10307 = vmatprep.mubr.msk.bf16.mxu1 %vm17923_vm11, %v2690_v19  ;;  %v13390_v17 = vpack.c.bf16 %v13147_v18, %v13139_v31  ;;  %vm17943_vm11 = vmmov %vm17920_vm10 }
 0x3f2   : > { %17919 = vst [vmem:[#allocation18_spill] sm:$0xff] %v13376_v12  ;;  %v2691_v16 = vshrl.u32 %v13247_v46, 16  ;;  %vm2240_vm13 = vcmp.ge.f32.partialorder %v17867_v13, 0.0  ;;  %vm2270_vm2 = vcmp.ge.f32.partialorder %v17906_v1, 0.0  ;;  %vm2271_vm12 = vcmp.ge.f32.partialorder %v17907_v62, 0.0  ;;  %v17928_v18 = vld [vmem:[#allocation24_spill] sm:$0xff] }
 0x3f3   : > { %17924 = vst [vmem:[#allocation19_spill] sm:$0xff] %v13390_v17  ;;  %v13396_v48 = vmul.f32 0.01, %v17925_v39  ;;  %v13402_v43 = vsel %vm2236_vm0, %v12749_v60, %v17926_v22  ;;  %v2699_v30 = vshrl.u32 %v13272_v23, 16  ;;  %v2703_v31 = vshll.u32 %v13351_v33, 16  ;;  %v17930_v60 = vld [vmem:[#allocation25_spill] sm:$0xff] }
 0x3f4   : > { %17927 = vst [vmem:[#allocation20_spill] sm:$0xff] %v13402_v43  ;;  %v13407_v51 = vmul.f32 0.01, %v17928_v18  ;;  %v2488_v19 = vsel %vm2264_vm7, %v17894_v38, %v13258_v26  ;;  %vm17929_vm4 = vcmp.ge.f32.partialorder %v12865_v47, 0.0  ;;  %v2693_v61 = vor.u32 %v2691_v16, %v2689_v40  ;;  %v17931_v23 = vld [vmem:[#allocation26_spill] sm:$0xff] }
 0x3f5   : > { %v2489_v46 = vsel %vm17929_vm4, %v12865_v47, %v13270_v32  ;;  %vm2241_vm0 = vcmp.ge.f32.partialorder %v17869_v10, 0.0  ;;  %v13419_v22 = vmul.f32 0.01, %v17930_v60  ;;  %v13422_v43 = vmul.f32 0.01, %v17931_v23  ;;  %v17934_v32 = vld [vmem:[#allocation27_spill] sm:$0xff] }
 0x3f6   : > { %v2701_v35 = vor.u32 %v2699_v30, %v2697_v5  ;;  %v2711_v0 = vshll.u32 %v13376_v12, 16  ;;  %v13429_v26 = vsel %vm2237_vm6, %v12753_v55, %v17932_v63  ;;  %v2490_v47 = vsel %vm2266_vm9, %v17899_v34, %v13277_v52  ;;  %v17935_v30 = vld [vmem:[#allocation28_spill] sm:$0xff]  ;;  %v17937_v34 = vld [vmem:[#allocation29_spill] sm:$0xff] }
 0x3f7   : > { %17933 = vst [vmem:[#allocation78_spill] sm:$0xff] %v13429_v26  ;;  %v2491_v40 = vsel %vm2267_vm8, %v12873_v6, %v13280_v20  ;;  %v17515_v38 = vshrl.u32 %v13390_v17, 16  ;;  %vm2242_vm7 = vcmp.ge.f32.partialorder %v17871_v27, 0.0  ;;  %v13442_v16 = vmul.f32 0.01, %v17934_v32 }
 0x3f8   : > { %v13445_v55 = vmul.f32 0.01, %v17935_v30  ;;  %v13447_v63 = vpack.c.bf16 %v2489_v46, %v2488_v19  ;;  %v2705_v26 = vrot.slane %v2703_v31, 1  ;;  %vm2243_vm6 = vcmp.ge.f32.partialorder %v17875_v50, 0.0  ;;  %v17940_v46 = vld [vmem:[#allocation84_spill] sm:$0xff] }
 0x3f9   : > { %v13451_v52 = vmul.f32 0.01, %v17937_v34  ;;  %v2698_v6 = vsel %vm2646_vm14, %v2693_v61, %v2697_v5  ;;  %v13457_v45 = vrot.slane %v17515_v38, 7  ;;  %vm2272_vm9 = vcmp.ge.f32.partialorder %v17911_v36, 0.0  ;;  %v17944_v38 = vld [vmem:[#allocation30_spill] sm:$0xff] }
 0x3fa   : > { %17936 = vst [vmem:[#allocation21_spill] sm:$0xff] %v13447_v63  ;;  %v13466_v31 = vsel %vm2238_vm15, %v12757_v44, %v17940_v46  ;;  %v13468_v19 = vpack.c.bf16 %v2491_v40, %v2490_v47  ;;  %10308 = vmatmul.mubr.msk.bf16.gmra.mxu1 %vm17943_vm11, %v2698_v6  ;;  %v2706_v61 = vsel %vm2646_vm14, %v2701_v35, %v2705_v26  ;;  %v2713_v5 = vrot.slane %v2711_v0, 1  ;;  %v17948_v0 = vld [vmem:[#allocation35_spill] sm:$0xff]  ;;  %v17949_v6 = vld [vmem:[#allocation9_spill] sm:$0xff] }
 0x3fb   : > { %17938 = vst [vmem:[#allocation22_spill] sm:$0xff] %v13451_v52  ;;  %17939 = vst [vmem:[#allocation23_spill] sm:$0xff] %v13457_v45  ;;  %v13475_v20 = vmul.f32 0.01, %v17944_v38  ;;  %v13478_v52 = vmul.f32 0.01, %v17945_v58  ;;  %10311 = vmatprep.mubr.msk.bf16.mxu1 %vm17920_vm10, %v2706_v61  ;;  %v13498_v46 = vsel %vm2239_vm3, %v17865_v28, %v17949_v6  ;;  %v2493_v28 = vsel %vm2269_vm5, %v12881_v2, %v13323_v41 }
 0x3fc   : > { %17941 = vst [vmem:[#allocation81_spill] sm:$0xff] %v13466_v31  ;;  %17942 = vst [vmem:[#allocation24_spill] sm:$0xff] %v13468_v19  ;;  %v2707_v44 = vshrl.u32 %v13351_v33, 16  ;;  %v17946_v47 = vshll.u32 %v13390_v17, 16  ;;  %vm2277_vm15 = vcmp.ge.f32.partialorder %v17915_v37, 0.0  ;;  %vm2279_vm8 = vcmp.ge.f32.partialorder %v17922_v29, 0.0 }
 0x3fd   : > { %vm2280_vm4 = vcmp.ge.f32.partialorder %v17925_v39, 0.0  ;;  %v13492_v35 = vmul.f32 0.01, %v17948_v0  ;;  %17950 = vst [vmem:[#allocation26_spill] sm:$0xff] %v13498_v46  ;;  %v2715_v61 = vshrl.u32 %v13376_v12, 16  ;;  %v17951_v33 = vld [vmem:[#allocation36_spill] sm:$0xff] }
 0x3fe   : > { %v13485_v40 = vor.u32 %v13457_v45, %v17946_v47  ;;  %v2719_v47 = vshll.u32 %v13447_v63, 16  ;;  %v13505_v45 = vmul.f32 0.01, %v17951_v33  ;;  %v2709_v6 = vor.u32 %v2707_v44, %v2705_v26  ;;  %v17953_v12 = vld [vmem:[#allocation37_spill] sm:$0xff]  ;;  %v17955_v46 = vld [vmem:[#allocation38_spill] sm:$0xff]  ;;  %v17957_v2 = vld [vmem:[#allocation39_spill] sm:$0xff] }
 0x3ff   : > { %vm2283_vm3 = vcmp.ge.f32.partialorder %v17931_v23, 0.0  ;;  %vm2284_vm10 = vcmp.ge.f32.partialorder %v17934_v32, 0.0  ;;  %v13519_v17 = vmul.f32 0.01, %v17953_v12  ;;  %v13522_v31 = vmul.f32 0.01, %v17955_v46 }
 0x400   : > { %17947 = vst [vmem:[#allocation25_spill] sm:$0xff] %v13485_v40  ;;  %17952 = vst [vmem:[#allocation82_spill] sm:$0xff] %v13505_v45  ;;  %v2492_v40 = vsel %vm2268_vm1, %v12877_v4, %v13295_v42  ;;  %v2717_v45 = vor.u32 %v2715_v61, %v2713_v5  ;;  %v2727_v4 = vshll.u32 %v13468_v19, 16  ;;  %v13528_v42 = vmul.f32 0.01, %v17957_v2  ;;  %v17959_v41 = vld [vmem:[#allocation10_spill] sm:$0xff] }
 0x401   : > { %17954 = vst [vmem:[#allocation27_spill] sm:$0xff] %v13519_v17  ;;  %17956 = vst [vmem:[#allocation28_spill] sm:$0xff] %v13522_v31  ;;  %v13534_v26 = vsel %vm2240_vm13, %v17867_v13, %v17959_v41  ;;  %v2494_v44 = vsel %vm2270_vm2, %v17906_v1, %v13326_v3  ;;  %v2495_v61 = vsel %vm2271_vm12, %v17907_v62, %v13331_v57  ;;  %vm2288_vm5 = vcmp.ge.f32.partialorder %v17945_v58, 0.0  ;;  %v17963_v13 = vld [vmem:[#allocation41_spill] sm:$0xff]  ;;  %v17966_v3 = vld [vmem:[#allocation42_spill] sm:$0xff] }
 0x402   : > { %17958 = vst [vmem:[#allocation29_spill] sm:$0xff] %v13528_v42  ;;  %17960 = vst [vmem:[#allocation84_spill] sm:$0xff] %v13534_v26  ;;  %v17961_v42 = vld [vmem:[#allocation40_spill] sm:$0xff]  ;;  %v13551_v41 = vmul.f32 0.01, %v17963_v13  ;;  %v13553_v26 = vpack.c.bf16 %v2493_v28, %v2492_v40  ;;  %v2721_v1 = vrot.slane %v2719_v47, 1  ;;  %v2714_v40 = vsel %vm2646_vm14, %v2709_v6, %v2713_v5 }
 0x403   : > { %v13548_v31 = vmul.f32 0.01, %v17961_v42  ;;  %v13558_v62 = vmul.f32 0.01, %v17966_v3  ;;  %v17968_v57 = vld [vmem:[#allocation43_spill] sm:$0xff]  ;;  %v17970_v33 = vld [vmem:[#allocation2_spill] sm:$0xff]  ;;  %vm17974_vm2 = vmmov %vm17943_vm11 }
 0x404   : > { %17964 = vst [vmem:[#allocation31_spill] sm:$0xff] %v13551_v41  ;;  %17965 = vst [vmem:[#allocation35_spill] sm:$0xff] %v13553_v26  ;;  %v13561_v17 = vmul.f32 0.01, %v17968_v57  ;;  %vm2293_vm12 = vcmp.ge.f32.partialorder %v17957_v2, 0.0  ;;  %v17972_v47 = vld [vmem:[#allocation75_spill] sm:$0xff]  ;;  %v13575_v41 = vpack.c.bf16 %v2495_v61, %v2494_v44  ;;  %10312 = vmatmul.mubr.msk.bf16.gmra.mxu1 %vm17974_vm2, %v2714_v40 }
 0x405   : > { %17962 = vst [vmem:[#allocation30_spill] sm:$0xff] %v13548_v31  ;;  %17967 = vst [vmem:[#allocation9_spill] sm:$0xff] %v13558_v62  ;;  %v13567_v31 = vsel %vm2241_vm0, %v17869_v10, %v17970_v33  ;;  %v13573_v28 = vmul.f32 0.01, %v17972_v47  ;;  %v2729_v62 = vrot.slane %v2727_v4, 1  ;;  %v17975_v10 = vld [vmem:[#allocation44_spill] sm:$0xff] }
 0x406   : > { %17969 = vst [vmem:[#allocation37_spill] sm:$0xff] %v13561_v17  ;;  %17971 = vst [vmem:[#allocation38_spill] sm:$0xff] %v13567_v31  ;;  %v2722_v17 = vsel %vm2646_vm14, %v2717_v45, %v2721_v1  ;;  %v2411_v33 = vmul.f32 0.01, %v17975_v10  ;;  %v17976_v5 = vld [vmem:[#allocation76_spill] sm:$0xff]  ;;  %v17977_v31 = vld [vmem:[#allocation3_spill] sm:$0xff] }
 0x407   : > { %17973 = vst [vmem:[#allocation39_spill] sm:$0xff] %v13575_v41  ;;  %v2412_v6 = vmul.f32 0.01, %v17976_v5  ;;  %v13588_v44 = vsel %vm2242_vm7, %v17871_v27, %v17977_v31  ;;  %10315 = vmatprep.mubr.msk.bf16.mxu1 %vm17974_vm2, %v2722_v17  ;;  %v2723_v45 = vshrl.u32 %v13447_v63, 16  ;;  %vm2298_vm11 = vcmp.ge.f32.partialorder %v17972_v47, 0.0  ;;  %v17978_v4 = vld [vmem:[#allocation45_spill] sm:$0xff] }
 0x408   : > { %vm2299_vm0 = vcmp.ge.f32.partialorder %v17975_v10, 0.0  ;;  %vm2300_vm1 = vcmp.ge.f32.partialorder %v17976_v5, 0.0  ;;  %vm2301_vm13 = vcmp.ge.f32.partialorder %v17978_v4, 0.0  ;;  %v2413_v61 = vmul.f32 0.01, %v17978_v4 }
 0x409   : > { %v13601_v27 = vsel %vm2243_vm6, %v17875_v50, %v13157_v53  ;;  %v2731_v17 = vshrl.u32 %v13468_v19, 16  ;;  %v2735_v31 = vshll.u32 %v13553_v26, 16  ;;  %vm17979_vm7 = vcmp.ge.f32.partialorder %v17879_v15, 0.0 }
 0x40a   : > { %v13609_v40 = vsel %vm17979_vm7, %v17879_v15, %v13166_v59  ;;  %v2496_v63 = vsel %vm2272_vm9, %v17911_v36, %v13346_v8  ;;  %vm17980_vm6 = vcmp.ge.f32.partialorder %v17912_v24, 0.0  ;;  %v2725_v53 = vor.u32 %v2723_v45, %v2721_v1 }
 0x40b   : > { %v2497_v50 = vsel %vm17980_vm6, %v17912_v24, %v13349_v9  ;;  %vm17981_vm2 = vcmp.ge.f32.partialorder %v17883_v49, 0.0  ;;  %vm17982_vm7 = vcmp.ge.f32.partialorder %v17914_v54, 0.0  ;;  %v2733_v59 = vor.u32 %v2731_v17, %v2729_v62 }
 0x40c   : > { %v13623_v19 = vsel %vm17981_vm2, %v17883_v49, %v13182_v7  ;;  %v2500_v15 = vsel %vm17982_vm7, %v17914_v54, %v13356_v21  ;;  %v2743_v36 = vshll.u32 %v13575_v41, 16  ;;  %v2501_v9 = vsel %vm2277_vm15, %v17915_v37, %v13359_v25  ;;  %v18006_v45 = vld [vmem:[#allocation9_spill] sm:$0xff] }
 0x40d   : > { %vm17983_vm9 = vcmp.ge.f32.partialorder %v17921_v11, 0.0  ;;  %v2503_v49 = vsel %vm2279_vm8, %v17922_v29, %v13384_v14  ;;  %v2504_v7 = vsel %vm2280_vm4, %v17925_v39, %v13396_v48  ;;  %vm17984_vm6 = vcmp.ge.f32.partialorder %v17928_v18, 0.0  ;;  %v17988_v14 = vld [vmem:[#allocation22_spill] sm:$0xff] }
 0x40e   : > { %v2502_v8 = vsel %vm17983_vm9, %v17921_v11, %v13381_v56  ;;  %v2505_v24 = vsel %vm17984_vm6, %v17928_v18, %v13407_v51  ;;  %vm17985_vm15 = vcmp.ge.f32.partialorder %v17930_v60, 0.0  ;;  %v13654_v54 = vpack.c.bf16 %v2497_v50, %v2496_v63 }
 0x40f   : > { %v2506_v56 = vsel %vm17985_vm15, %v17930_v60, %v13419_v22  ;;  %v2737_v21 = vrot.slane %v2735_v31, 1  ;;  %v2507_v37 = vsel %vm2283_vm3, %v17931_v23, %v13422_v43  ;;  %v2508_v25 = vsel %vm2284_vm10, %v17934_v32, %v13442_v16  ;;  %v17993_v60 = vld [vmem:[#allocation82_spill] sm:$0xff]  ;;  %v17994_v22 = vld [vmem:[#allocation36_spill] sm:$0xff]  ;;  %v17997_v16 = vld [vmem:[#allocation27_spill] sm:$0xff] }
 0x410   : > { %17986 = vst [vmem:[#allocation10_spill] sm:$0xff] %v13654_v54  ;;  %vm17987_vm8 = vcmp.ge.f32.partialorder %v17935_v30, 0.0  ;;  %v2730_v29 = vsel %vm2646_vm14, %v2725_v53, %v2729_v62  ;;  %vm17989_vm4 = vcmp.ge.f32.partialorder %v17937_v34, 0.0  ;;  %vm17990_vm3 = vcmp.ge.f32.partialorder %v17944_v38, 0.0  ;;  %v18004_v62 = vld [vmem:[#allocation31_spill] sm:$0xff]  ;;  %v18008_v31 = vld [vmem:[#allocation37_spill] sm:$0xff] }
 0x411   : > { %v2509_v11 = vsel %vm17987_vm8, %v17935_v30, %v13445_v55  ;;  %v2510_v39 = vsel %vm17989_vm4, %v17937_v34, %v17988_v14  ;;  %v2511_v23 = vsel %vm17990_vm3, %v17944_v38, %v13475_v20  ;;  %vm17991_vm2 = vcmask 261120   ;;  %v18019_v14 = vld [vmem:[#allocation80_spill] sm:$0xff] }
 0x412   : > { %10316 = vmatmul.mubr.msk.bf16.gmra.mxu1 %vm17991_vm2, %v2730_v29  ;;  %v2738_v48 = vsel %vm2646_vm14, %v2733_v59, %v2737_v21  ;;  %v2745_v43 = vrot.slane %v2743_v36, 1  ;;  %v2512_v18 = vsel %vm2288_vm5, %v17945_v58, %v13478_v52  ;;  %vm17992_vm10 = vcmp.ge.f32.partialorder %v17948_v0, 0.0  ;;  %vm17996_vm9 = vmmov %vm17991_vm2  ;;  %v17999_v58 = vld [vmem:[#allocation28_spill] sm:$0xff]  ;;  %v18001_v52 = vld [vmem:[#allocation29_spill] sm:$0xff] }
 0x413   : > { %v2513_v51 = vsel %vm17992_vm10, %v17948_v0, %v13492_v35  ;;  %vm17995_vm7 = vcmp.ge.f32.partialorder %v17994_v22, 0.0  ;;  %10319 = vmatprep.mubr.msk.bf16.mxu1 %vm17996_vm9, %v2738_v48  ;;  %v2739_v32 = vshrl.u32 %v13553_v26, 16  ;;  %vm17998_vm6 = vcmp.ge.f32.partialorder %v17953_v12, 0.0  ;;  %v18002_v0 = vld [vmem:[#allocation30_spill] sm:$0xff]  ;;  %v18010_v59 = vld [vmem:[#allocation83_spill] sm:$0xff]  ;;  %v18021_v48 = vld [vmem:[#allocation73_spill] sm:$0xff] }
 0x414   : > { %v2514_v38 = vsel %vm17995_vm7, %v17994_v22, %v17993_v60  ;;  %v2515_v30 = vsel %vm17998_vm6, %v17953_v12, %v17997_v16  ;;  %vm18000_vm5 = vcmp.ge.f32.partialorder %v17955_v46, 0.0  ;;  %v2747_v63 = vshrl.u32 %v13575_v41, 16  ;;  %v18018_v29 = vld [vmem:[#allocation79_spill] sm:$0xff]  ;;  %v18024_v22 = vld [vmem:[#allocation8_spill] sm:$0xff]  ;;  %v18027_v16 = vld [vmem:[#allocation17_spill] sm:$0xff] }
 0x415   : > { %v2516_v55 = vsel %vm18000_vm5, %v17955_v46, %v17999_v58  ;;  %v2751_v34 = vshll.u32 %v13654_v54, 16  ;;  %v2517_v20 = vsel %vm2293_vm12, %v17957_v2, %v18001_v52  ;;  %vm18003_vm15 = vcmp.ge.f32.partialorder %v17961_v42, 0.0  ;;  %v18023_v60 = vld [vmem:[#allocation7_spill] sm:$0xff] }
 0x416   : > { %v2518_v35 = vsel %vm18003_vm15, %v17961_v42, %v18002_v0  ;;  %v13711_v12 = vpack.c.bf16 %v2503_v49, %v2502_v8  ;;  %v2741_v1 = vor.u32 %v2739_v32, %v2737_v21  ;;  %vm18005_vm8 = vcmp.ge.f32.partialorder %v17963_v13, 0.0  ;;  %v18026_v32 = vld [vmem:[#allocation77_spill] sm:$0xff]  ;;  %v18032_v0 = vld [vmem:[#allocation92_spill] sm:$0xff] }
 0x417   : > { %v2519_v46 = vsel %vm18005_vm8, %v17963_v13, %v18004_v62  ;;  %vm18007_vm4 = vcmp.ge.f32.partialorder %v17966_v3, 0.0  ;;  %vm18009_vm12 = vcmp.ge.f32.partialorder %v17968_v57, 0.0  ;;  %v2749_v50 = vor.u32 %v2747_v63, %v2745_v43  ;;  %v18029_v63 = vld [vmem:[#allocation12_spill] sm:$0xff] }
 0x418   : > { %v2520_v17 = vsel %vm18007_vm4, %v17966_v3, %v18006_v45  ;;  %v2521_v2 = vsel %vm18009_vm12, %v17968_v57, %v18008_v31  ;;  %v2522_v42 = vsel %vm2298_vm11, %v17972_v47, %v13573_v28  ;;  %v2523_v13 = vsel %vm2299_vm0, %v17975_v10, %v2411_v33  ;;  %v18011_v57 = vld [vmem:[#allocation85_spill] sm:$0xff]  ;;  %vm18013_vm11 = vmmov %vm17991_vm2  ;;  %v18035_v62 = vld [vmem:[#allocation20_spill] sm:$0xff] }
 0x419   : > { %v2524_v53 = vsel %vm2300_vm1, %v17976_v5, %v2412_v6  ;;  %v2525_v3 = vsel %vm2301_vm13, %v17978_v4, %v2413_v61  ;;  %v13740_v36 = vpack.c.bf16 %v18011_v57, %v18010_v59  ;;  %v13742_v8 = vpack.c.bf16 %v2501_v9, %v2500_v15  ;;  %v18014_v15 = vld [vmem:[#allocation86_spill] sm:$0xff]  ;;  %v18015_v9 = vld [vmem:[#allocation88_spill] sm:$0xff]  ;;  %vm18017_vm1 = vmmov %vm17991_vm2 }
 0x41a   : > { %v13744_v49 = vpack.c.bf16 %v2505_v24, %v2504_v7  ;;  %v2753_v47 = vrot.slane %v2751_v34, 1  ;;  %v13746_v28 = vpack.c.bf16 %v2507_v37, %v2506_v56  ;;  %v13748_v10 = vpack.c.bf16 %v2509_v11, %v2508_v25  ;;  %v18030_v34 = vld [vmem:[#allocation13_spill] sm:$0xff]  ;;  %v18039_v31 = vld [vmem:[#allocation26_spill] sm:$0xff]  ;;  %vm18046_vm13 = vmmov %vm18017_vm1 }
 0x41b   : > { %18012 = vst [vmem:[#allocation40_spill] sm:$0xff] %v13740_v36  ;;  %v4110_v33 = vshrl.u32 %v13711_v12, 16  ;;  %v2746_v5 = vsel %vm2646_vm14, %v2741_v1, %v2745_v43  ;;  %v13752_v6 = vpack.c.bf16 %v2511_v23, %v2510_v39  ;;  %v4113_v4 = vshll.u32 %v13711_v12, 16  ;;  %v18020_v23 = vld [vmem:[#allocation14_spill] sm:$0xff]  ;;  %vm18047_vm0 = vmmov %vm18017_vm1 }
 0x41c   : > { %10320 = vmatmul.mubr.msk.bf16.gmra.mxu1 %vm18013_vm11, %v2746_v5  ;;  %v2754_v61 = vsel %vm2646_vm14, %v2749_v50, %v2753_v47  ;;  %v13759_v7 = vpack.c.bf16 %v18015_v9, %v18014_v15  ;;  %v13761_v24 = vpack.c.bf16 %v2513_v51, %v2512_v18  ;;  %v13763_v56 = vpack.c.bf16 %v2515_v30, %v2514_v38  ;;  %v18041_v50 = vld [vmem:[#allocation84_spill] sm:$0xff]  ;;  %vm18048_vm2 = vmmov %vm18047_vm0 }
 0x41d   : > { %v13765_v21 = vpack.c.bf16 %v2517_v20, %v2516_v55  ;;  %v13767_v37 = vpack.c.bf16 %v2519_v46, %v2518_v35  ;;  %10323 = vmatprep.mubr.msk.bf16.mxu1 %vm18017_vm1, %v2754_v61  ;;  %v13770_v25 = vpack.c.bf16 %v2521_v2, %v2520_v17  ;;  %v13772_v11 = vpack.c.bf16 %v2523_v13, %v2522_v42  ;;  %v18033_v35 = vld [vmem:[#allocation15_spill] sm:$0xff]  ;;  %v18036_v46 = vld [vmem:[#allocation78_spill] sm:$0xff]  ;;  %v18038_v17 = vld [vmem:[#allocation81_spill] sm:$0xff] }
 0x41e   : > { %18016 = vst [vmem:[#allocation41_spill] sm:$0xff] %v13759_v7  ;;  %v13776_v39 = vpack.c.bf16 %v18019_v14, %v18018_v29  ;;  %v13780_v43 = vpack.c.bf16 %v18021_v48, %v18020_v23  ;;  %v13782_v18 = vpack.c.bf16 %v2525_v3, %v2524_v53  ;;  %v4112_v51 = vrot.slane %v4110_v33, 1  ;;  %v18042_v42 = vld [vmem:[#allocation38_spill] sm:$0xff]  ;;  %vm18050_vm10 = vmmov %vm18047_vm0 }
 0x41f   : > { %v13786_v38 = vpack.c.bf16 %v18024_v22, %v18023_v60  ;;  %v13790_v30 = vpack.c.bf16 %v18027_v16, %v18026_v32  ;;  %v4115_v58 = vrot.slane %v4113_v4, 2  ;;  %v2755_v55 = vshrl.u32 %v13654_v54, 16  ;;  %vm18053_vm7 = vmmov %vm18047_vm0 }
 0x420   : > { %18022 = vst [vmem:[#allocation42_spill] sm:$0xff] %v13780_v43  ;;  %v13795_v52 = vpack.c.bf16 %v18030_v34, %v18029_v63  ;;  %v17526_v20 = vshrl.u32 %v13759_v7, 16  ;;  %v13800_v1 = vpack.c.bf16 %v18033_v35, %v18032_v0  ;;  %v13804_v45 = vpack.c.bf16 %v18036_v46, %v18035_v62  ;;  %vm18054_vm9 = vmmov %vm18047_vm0 }
 0x421   : > { %18025 = vst [vmem:[#allocation43_spill] sm:$0xff] %v13786_v38  ;;  %18028 = vst [vmem:[#allocation2_spill] sm:$0xff] %v13790_v30  ;;  %v13808_v2 = vpack.c.bf16 %v18039_v31, %v18038_v17  ;;  %v13812_v13 = vpack.c.bf16 %v18042_v42, %v18041_v50  ;;  %v13816_v53 = vpack.c.bf16 %v13601_v27, %v13588_v44  ;;  %v17525_v57 = vshrl.u32 %v13780_v43, 16  ;;  %v11022_v50 = vld [vmem:[%s17310_s2 + $0x20] sm:$0xff]  }
 0x422   : > { %18031 = vst [vmem:[#allocation75_spill] sm:$0xff] %v13795_v52  ;;  %18034 = vst [vmem:[#allocation44_spill] sm:$0xff] %v13800_v1  ;;  %v13820_v3 = vpack.c.bf16 %v13623_v19, %v13609_v40  ;;  %v17524_v4 = vshrl.u32 %v13790_v30, 16  ;;  %v13834_v40 = vrot.slane %v17526_v20, 7  ;;  %v4101_v0 = vshrl.u32 %v13742_v8, 16 }
 0x423   : > { %18037 = vst [vmem:[#allocation76_spill] sm:$0xff] %v13804_v45  ;;  %18040 = vst [vmem:[#allocation3_spill] sm:$0xff] %v13808_v2  ;;  %v17527_v29 = vshrl.u32 %v13808_v2, 16  ;;  %v13844_v14 = vrot.slane %v17525_v57, 7  ;;  %v17528_v34 = vshrl.u32 %v13816_v53, 16  ;;  %v4104_v35 = vshll.u32 %v13742_v8, 16 }
 0x424   : > { %18043 = vst [vmem:[#allocation45_spill] sm:$0xff] %v13812_v13  ;;  %18044 = vst [vmem:[#allocation22_spill] sm:$0xff] %v13816_v53  ;;  %10324 = vmatmul.mubr.msk.bf16.gmra.mxu1 %vm18046_vm13, %v2755_v55  ;;  %v13851_v22 = vrot.slane %v17524_v4, 7  ;;  %v17529_v31 = vshrl.u32 %v13820_v3, 16  ;;  %v4103_v42 = vrot.slane %v4101_v0, 1  ;;  %v4116_v57 = vor.u32 %v4115_v58, %v4112_v51  ;;  %v18049_v58 = vld [vmem:[#allocation19_spill] sm:$0xff] }
 0x425   : > { %18045 = vst [vmem:[#allocation82_spill] sm:$0xff] %v13820_v3  ;;  %10331 = vmatprep.mubr.msk.bf16.mxu1 %vm18047_vm0, %v13776_v39  ;;  %v13862_v62 = vrot.slane %v17527_v29, 7  ;;  %v4106_v4 = vrot.slane %v4104_v35, 2  ;;  %v4119_v20 = vshrl.u32 %v13744_v49, 16  ;;  %vm3741_vm3 = vsmask.f32 6400  ;;  %vm18063_vm5 = vmmov %vm18047_vm0 }
 0x426   : > { %v4122_v55 = vshll.u32 %v13744_v49, 16  ;;  %v4128_v29 = vshrl.u32 %v13746_v28, 16  ;;  %v4131_v46 = vshll.u32 %v13746_v28, 16  ;;  %v13878_v17 = vrot.slane %v17528_v34, 7  ;;  %v18051_v35 = vld [vmem:[#allocation91_spill] sm:$0xff]  ;;  %v13890_v34 = vld [vmem:[%s17310_s2 + $0x38] sm:$0xff]   ;;  %vm18067_vm15 = vmmov %vm18047_vm0 }
 0x427   : > { %v13880_v60 = vor.u32 %v4106_v4, %v4103_v42  ;;  %v4121_v0 = vrot.slane %v4119_v20, 1  ;;  %v4137_v51 = vshrl.u32 %v13748_v10, 16  ;;  %v4140_v32 = vshll.u32 %v13748_v10, 16  ;;  %vm18096_vm8 = vmmov %vm18047_vm0 }
 0x428   : > { %v4124_v63 = vrot.slane %v4122_v55, 2  ;;  %v4130_v16 = vrot.slane %v4128_v29, 1  ;;  %v4133_v9 = vrot.slane %v4131_v46, 2  ;;  %v13894_v20 = vrot.slane %v17529_v31, 7  ;;  %vm18100_vm4 = vmmov %vm18047_vm0 }
 0x429   : > { %v13898_v4 = vsel %vm3741_vm3, %v13880_v60, %v4116_v57  ;;  %v4139_v42 = vrot.slane %v4137_v51, 1  ;;  %v4146_v29 = vshrl.u32 %v13752_v6, 16  ;;  %v4149_v48 = vshll.u32 %v13752_v6, 16  ;;  %vm18102_vm12 = vmmov %vm18047_vm0 }
 0x42a   : > { %18052 = vst [vmem:[#allocation36_spill] sm:$0xff] %v13894_v20  ;;  %v4125_v55 = vor.u32 %v4124_v63, %v4121_v0  ;;  %v4134_v46 = vor.u32 %v4133_v9, %v4130_v16  ;;  %v4155_v15 = vshrl.u32 %v13761_v24, 16  ;;  %v4158_v19 = vshll.u32 %v13761_v24, 16  ;;  %vm18103_vm11 = vmmov %vm18047_vm0 }
 0x42b   : > { %v4148_v23 = vrot.slane %v4146_v29, 1  ;;  %v4164_v31 = vshrl.u32 %v13763_v56, 16  ;;  %v4151_v63 = vrot.slane %v4149_v48, 2  ;;  %v4167_v0 = vshll.u32 %v13763_v56, 16  ;;  %vm18104_vm1 = vmmov %vm18047_vm0 }
 0x42c   : > { %10332 = vmatmul.mubr.msk.bf16.vlgmr.msra.gmra.mxu1 %vm18048_vm2, %v13740_v36  ;;  %v13906_v5 = vsel %vm3741_vm3, %v4116_v57, %v4125_v55  ;;  %v13909_v51 = vsel %vm3741_vm3, %v4125_v55, %v4134_v46  ;;  %v4157_v9 = vrot.slane %v4155_v15, 1  ;;  %v4176_v57 = vshll.u32 %v13765_v21, 16  ;;  %vm18105_vm13 = vmmov %vm18047_vm0 }
 0x42d   : > { %10335 = vmatprep.mubr.msk.bf16.mxu1 %vm18050_vm10, %v18049_v58  ;;  %10360 = vmatpush3.bf16.msra.mxu1 %v18051_v35  ;;  %v4142_v35 = vrot.slane %v4140_v32, 2  ;;  %v4160_v32 = vrot.slane %v4158_v19, 2  ;;  %v4166_v16 = vrot.slane %v4164_v31, 1  ;;  %v4152_v61 = vor.u32 %v4151_v63, %v4148_v23  ;;  %vm18109_vm2 = vmmov %vm18047_vm0 }
 0x42e   : > { %10361 = vmatprep.subr.bf16.mxu1 %v11022_v50  ;;  %v4169_v48 = vrot.slane %v4167_v0, 2  ;;  %v4182_v55 = vshrl.u32 %v13767_v37, 16  ;;  %v4185_v19 = vshll.u32 %v13767_v37, 16  ;;  %v4178_v31 = vrot.slane %v4176_v57, 2  ;;  %vm18113_vm10 = vmmov %vm18047_vm0 }
 0x42f   : > { %v4143_v47 = vor.u32 %v4142_v35, %v4139_v42  ;;  %v4161_v42 = vor.u32 %v4160_v32, %v4157_v9  ;;  %v4194_v44 = vshll.u32 %v13770_v25, 16  ;;  %v4200_v33 = vshrl.u32 %v13772_v11, 16 }
 0x430   : > { %v4170_v63 = vor.u32 %v4169_v48, %v4166_v16  ;;  %v4184_v9 = vrot.slane %v4182_v55, 1  ;;  %v4187_v32 = vrot.slane %v4185_v19, 2  ;;  %v4209_v57 = vshrl.u32 %v13782_v18, 16 }
 0x431   : > { %10362 = vmatpush3.bf16.msra.mxu1 %v11022_v50  ;;  %v13914_v29 = vsel %vm3741_vm3, %v4134_v46, %v4143_v47  ;;  %v4173_v50 = vshrl.u32 %v13765_v21, 16  ;;  %v13925_v15 = vsel %vm3741_vm3, %v4143_v47, %v4152_v61  ;;  %v4191_v46 = vshrl.u32 %v13770_v25, 16 }
 0x432   : > { %10391 = vmatprep.subr.bf16.mxu1 %v13890_v34  ;;  %18055 = vst [vmem:[#allocation27_spill] sm:$0xff] %v13925_v15  ;;  %v13929_v35 = vsel %vm3741_vm3, %v4152_v61, %v4161_v42  ;;  %v13934_v59 = vsel %vm3741_vm3, %v4161_v42, %v4170_v63  ;;  %v4188_v47 = vor.u32 %v4187_v32, %v4184_v9  ;;  %v4196_v16 = vrot.slane %v4194_v44, 2 }
 0x433   : > { %v4175_v23 = vrot.slane %v4173_v50, 1  ;;  %18056 = vst [vmem:[#allocation28_spill] sm:$0xff] %v13929_v35  ;;  %v4193_v27 = vrot.slane %v4191_v46, 1  ;;  %18057 = vst [vmem:[#allocation29_spill] sm:$0xff] %v13934_v59  ;;  %v4203_v50 = vshll.u32 %v13772_v11, 16  ;;  %v4202_v48 = vrot.slane %v4200_v33, 1 }
 0x434   : > { %10336 = vmatmul.mubr.msk.bf16.gmra.mxu1 %vm18053_vm7, %v13786_v38  ;;  %v4212_v55 = vshll.u32 %v13782_v18, 16  ;;  %vm4442_vm6 = vsmask.f32 256  ;;  %v18061_v9 = vshrl.u32 %v13776_v39, 16  ;;  %v18062_v54 = vshrl.u32 %v13740_v36, 16  ;;  %vm18115_vm7 = vmmov %vm18047_vm0 }
 0x435   : > { %10339 = vmatprep.mubr.msk.bf16.mxu1 %vm18054_vm9, %v13759_v7  ;;  %v4179_v0 = vor.u32 %v4178_v31, %v4175_v23  ;;  %v4205_v23 = vrot.slane %v4203_v50, 2  ;;  %v13945_v31 = vrot.slane %v4209_v57, 1  ;;  %v4197_v42 = vor.u32 %v4196_v16, %v4193_v27  ;;  %vm18119_vm9 = vmmov %vm18047_vm0 }
 0x436   : > { %v4214_v46 = vrot.slane %v4212_v55, 2  ;;  %v4443_v32 = vrot.slane %v18061_v9, 7  ;;  %v18064_v44 = vshrl.u32 %v13786_v38, 16  ;;  %v18065_v50 = vshll.u32 %v13759_v7, 16  ;;  %v18070_v9 = vld [vmem:[#allocation25_spill] sm:$0xff] }
 0x437   : > { %v13939_v61 = vsel %vm3741_vm3, %v4170_v63, %v4179_v0  ;;  %v13943_v19 = vsel %vm3741_vm3, %v4179_v0, %v4188_v47  ;;  %18060 = vst [vmem:[#allocation9_spill] sm:$0xff] %v13945_v31  ;;  %v4444_v63 = vrot.slane %v18062_v54, 7  ;;  %v4206_v33 = vor.u32 %v4205_v23, %v4202_v48 }
 0x438   : > { %18058 = vst [vmem:[#allocation30_spill] sm:$0xff] %v13939_v61  ;;  %18059 = vst [vmem:[#allocation31_spill] sm:$0xff] %v13943_v19  ;;  %v4450_v0 = vrot.slane %v18064_v44, 7  ;;  %v4454_v57 = vor.u32 %v13834_v40, %v18065_v50  ;;  %v18066_v27 = vshrl.u32 %v13795_v52, 16  ;;  %v13963_v55 = vsel %vm3741_vm3, %v4188_v47, %v4197_v42  ;;  %v18195_v19 = vld [vmem:[#allocation72_spill] sm:$0xff] }
 0x439   : > { %18068 = vst [vmem:[#allocation37_spill] sm:$0xff] %v13963_v55  ;;  %v4215_v54 = vor.u32 %v4214_v46, %v13945_v31  ;;  %v18069_v48 = vshll.u32 %v13740_v36, 16  ;;  %v13970_v44 = vsel %vm4442_vm6, %v4444_v63, %v18070_v9  ;;  %v13973_v50 = vsel %vm3741_vm3, %v4197_v42, %v4206_v33 }
 0x43a   : > { %v4456_v16 = vrot.slane %v18066_v27, 7  ;;  %18071 = vst [vmem:[#allocation83_spill] sm:$0xff] %v13970_v44  ;;  %18072 = vst [vmem:[#allocation85_spill] sm:$0xff] %v13973_v50  ;;  %v18073_v27 = vshll.u32 %v13786_v38, 16  ;;  %v13978_v26 = vsel %vm4442_vm6, %v4450_v0, %v4454_v57  ;;  %v18075_v47 = vshll.u32 %v13795_v52, 16  ;;  %v18194_v50 = vld [vmem:[#allocation71_spill] sm:$0xff] }
 0x43b   : > { %v4445_v23 = vor.u32 %v4444_v63, %v18069_v48  ;;  %18074 = vst [vmem:[#allocation86_spill] sm:$0xff] %v13978_v26  ;;  %v13983_v46 = vsel %vm3741_vm3, %v4206_v33, %v4215_v54  ;;  %v18078_v63 = vshll.u32 %v13780_v43, 16  ;;  %v18079_v9 = vshrl.u32 %v13800_v1, 16 }
 0x43c   : > { %10340 = vmatmul.mubr.msk.bf16.gmra.mxu1 %vm18063_vm5, %v13795_v52  ;;  %v4451_v41 = vor.u32 %v4450_v0, %v18073_v27  ;;  %v4457_v55 = vor.u32 %v4456_v16, %v18075_v47  ;;  %18076 = vst [vmem:[#allocation88_spill] sm:$0xff] %v13983_v46  ;;  %v18080_v27 = vld [vmem:[#allocation23_spill] sm:$0xff]  ;;  %v18083_v33 = vshll.u32 %v13790_v30, 16  ;;  %v18084_v54 = vshrl.u32 %v13804_v45, 16  ;;  %vm18121_vm5 = vmmov %vm18047_vm0 }
 0x43d   : > { %10343 = vmatprep.mubr.msk.bf16.mxu1 %vm18067_vm15, %v13780_v43  ;;  %v13986_v48 = vsel %vm4442_vm6, %v4443_v32, %v4445_v23  ;;  %v4460_v42 = vor.u32 %v13844_v14, %v18078_v63  ;;  %v4462_v44 = vrot.slane %v18079_v9, 7  ;;  %v18086_v63 = vshll.u32 %v13800_v1, 16  ;;  %vm18125_vm15 = vmmov %vm18047_vm0 }
 0x43e   : > { %18077 = vst [vmem:[#allocation79_spill] sm:$0xff] %v13986_v48  ;;  %v13995_v0 = vsel %vm4442_vm6, %v18080_v27, %v4451_v41  ;;  %v13999_v57 = vsel %vm4442_vm6, %v13834_v40, %v4457_v55  ;;  %v4466_v32 = vor.u32 %v13851_v22, %v18083_v33  ;;  %v4468_v23 = vrot.slane %v18084_v54, 7  ;;  %v18189_v48 = vld [vmem:[#allocation68_spill] sm:$0xff] }
 0x43f   : > { %18081 = vst [vmem:[#allocation80_spill] sm:$0xff] %v13995_v0  ;;  %18082 = vst [vmem:[#allocation14_spill] sm:$0xff] %v13999_v57  ;;  %v14007_v47 = vsel %vm4442_vm6, %v4456_v16, %v4460_v42  ;;  %v4463_v9 = vor.u32 %v4462_v44, %v18086_v63  ;;  %v18087_v41 = vshll.u32 %v13808_v2, 16  ;;  %v18088_v40 = vshrl.u32 %v13812_v13, 16 }
 0x440   : > { %18085 = vst [vmem:[#allocation73_spill] sm:$0xff] %v14007_v47  ;;  %v14017_v57 = vsel %vm4442_vm6, %v4462_v44, %v4466_v32  ;;  %v18090_v33 = vshll.u32 %v13804_v45, 16  ;;  %v18091_v54 = vshll.u32 %v13816_v53, 16  ;;  %v18092_v42 = vshll.u32 %v13820_v3, 16 }
 0x441   : > { %v4472_v27 = vor.u32 %v13862_v62, %v18087_v41  ;;  %v4474_v55 = vrot.slane %v18088_v40, 7  ;;  %18089 = vst [vmem:[#allocation7_spill] sm:$0xff] %v14017_v57  ;;  %v14029_v41 = vsel %vm4442_vm6, %v13844_v14, %v4463_v9  ;;  %v18095_v44 = vshll.u32 %v13812_v13, 16  ;;  %v18183_v57 = vld [vmem:[#allocation64_spill] sm:$0xff] }
 0x442   : > { %v4469_v26 = vor.u32 %v4468_v23, %v18090_v33  ;;  %v4478_v16 = vor.u32 %v13878_v17, %v18091_v54  ;;  %v4481_v63 = vor.u32 %v13894_v20, %v18092_v42  ;;  %18093 = vst [vmem:[#allocation8_spill] sm:$0xff] %v14029_v41 }
 0x443   : > { %v14032_v40 = vsel %vm4442_vm6, %v4468_v23, %v4472_v27  ;;  %v4475_v32 = vor.u32 %v4474_v55, %v18095_v44 }
 0x444   : > { %18094 = vst [vmem:[#allocation77_spill] sm:$0xff] %v14032_v40  ;;  %10344 = vmatmul.mubr.msk.bf16.gmra.mxu1 %vm18096_vm8, %v13800_v1  ;;  %v14040_v33 = vsel %vm4442_vm6, %v13851_v22, %v4469_v26  ;;  %v14043_v54 = vsel %vm4442_vm6, %v4474_v55, %v4478_v16  ;;  %v14047_v14 = vsel %vm4442_vm6, %v13878_v17, %v4481_v63  ;;  %v3155_v26 = vshll.u32 %v13776_v39, 16  ;;  %vm18127_vm8 = vmmov %vm18047_vm0 }
 0x445   : > { %18097 = vst [vmem:[#allocation17_spill] sm:$0xff] %v14040_v33  ;;  %18098 = vst [vmem:[#allocation12_spill] sm:$0xff] %v14043_v54  ;;  %10347 = vmatprep.mubr.msk.bf16.mxu1 %vm18100_vm4, %v13790_v30  ;;  %v14053_v23 = vsel %vm4442_vm6, %v13862_v62, %v4475_v32  ;;  %v18106_v17 = vshrl.u32 %v13776_v39, 16  ;;  %v18107_v62 = vshll.u32 %v13740_v36, 16  ;;  %v18108_v16 = vshll.u32 %v18049_v58, 16 }
 0x446   : > { %18099 = vst [vmem:[#allocation13_spill] sm:$0xff] %v14047_v14  ;;  %18101 = vst [vmem:[#allocation92_spill] sm:$0xff] %v14053_v23  ;;  %v3157_v22 = vrot.slane %v3155_v26, 1  ;;  %v18110_v63 = vshrl.u32 %v13740_v36, 16  ;;  %v18111_v32 = vshrl.u32 %v18049_v58, 16  ;;  %v18112_v26 = vshll.u32 %v13786_v38, 16 }
 0x447   : > { %v3161_v27 = vrot.slane %v18107_v62, 1  ;;  %v3168_v42 = vrot.slane %v18108_v16, 1  ;;  %vm18131_vm4 = vmmov %vm18047_vm0  ;;  %v18174_v36 = vld [vmem:[#allocation57_spill] sm:$0xff] }
 0x448   : > { %v3158_v9 = vor.u32 %v3157_v22, %v18106_v17  ;;  %v3175_v22 = vrot.slane %v18112_v26, 1  ;;  %v11024_v17 = vld [vmem:[%s17310_s2 + $0x30] sm:$0xff]  }
 0x449   : > { %v3165_v44 = vor.u32 %v18110_v63, %v3161_v27  ;;  %v3172_v39 = vor.u32 %v18111_v32, %v3168_v42  ;;  %v18116_v63 = vshrl.u32 %v13786_v38, 16 }
 0x44a   : > { %v3162_v55 = vsel %vm2646_vm14, %v3158_v9, %v3161_v27  ;;  %v14093_v27 = vld [vmem:[%s17310_s2 + $0x48] sm:$0xff]  }
 0x44b   : > { %v3169_v9 = vsel %vm2646_vm14, %v3165_v44, %v3168_v42  ;;  %v3176_v62 = vsel %vm2646_vm14, %v3172_v39, %v3175_v22  ;;  %v3179_v42 = vor.u32 %v18116_v63, %v3175_v22  ;;  %v18117_v44 = vshrl.u32 %v13759_v7, 16 }
 0x44c   : > { %10348 = vmatmul.mubr.msk.bf16.gmra.mxu1 %vm18102_vm12, %v13804_v45  ;;  %v18118_v39 = vshll.u32 %v13795_v52, 16  ;;  %v18122_v22 = vshrl.u32 %v13795_v52, 16  ;;  %vm18133_vm12 = vmmov %vm18047_vm0 }
 0x44d   : > { %10351 = vmatprep.mubr.msk.bf16.mxu1 %vm18103_vm11, %v13808_v2  ;;  %vm18140_vm11 = vmmov %vm18047_vm0 }
 0x44e   : > { %v3189_v26 = vrot.slane %v18118_v39, 1  ;;  %v18124_v39 = vshll.u32 %v13800_v1, 16 }
 0x450   : > { %v3193_v63 = vor.u32 %v18122_v22, %v3189_v26 }
 0x454   : > { %10352 = vmatmul.mubr.msk.bf16.gmra.mxu1 %vm18104_vm1, %v13812_v13  ;;  %vm18142_vm1 = vmmov %vm18047_vm0 }
 0x455   : > { %10355 = vmatprep.mubr.msk.bf16.mxu1 %vm18105_vm13, %v13816_v53 }
 0x45c   : > { %10356 = vmatmul.mubr.msk.bf16.gmra.mxu1 %vm18047_vm0, %v13820_v3 }
 0x45d   : > { %10363 = vmatprep.mubr.msk.bf16.mxu1 %vm18109_vm2, %v3162_v55  ;;  %v18114_v55 = vshll.u32 %v13759_v7, 16  ;;  %v3203_v7 = vrot.slane %v18124_v39, 1  ;;  %vm18146_vm2 = vmmov %vm18142_vm1 }
 0x45f   : > { %v3182_v16 = vrot.slane %v18114_v55, 1 }
 0x461   : > { %v3186_v32 = vor.u32 %v18117_v44, %v3182_v16 }
 0x464   : > { %10364 = vmatmul.mubr.msk.bf16.vlgmr.msra.gmra.mxu1 %vm18113_vm10, %v3169_v9  ;;  %v3190_v9 = vsel %vm2646_vm14, %v3186_v32, %v3189_v26  ;;  %v18126_v32 = vshll.u32 %v13790_v30, 16  ;;  %vm18147_vm10 = vmmov %vm18142_vm1 }
 0x465   : > { %10367 = vmatprep.mubr.msk.bf16.mxu1 %vm18115_vm7, %v3176_v62  ;;  %10392 = vmatpush3.bf16.msra.mxu1 %v13890_v34  ;;  %v3183_v34 = vsel %vm2646_vm14, %v3179_v42, %v3182_v16  ;;  %v18120_v62 = vshll.u32 %v13780_v43, 16  ;;  %vm3488_vm7 = vcmask 1046528  }
 0x466   : > { %10393 = vmatprep.subr.bf16.mxu1 %v11024_v17 }
 0x467   : > { %v3196_v55 = vrot.slane %v18120_v62, 1  ;;  %v18129_v62 = vshrl.u32 %v13790_v30, 16  ;;  %v18137_v30 = vld [vmem:[#allocation74_spill] sm:$0xff] }
 0x468   : > { %v2213_v31 = vmul.f32 %v18137_v30, %v18189_v48 }
 0x469   : > { %10394 = vmatpush3.bf16.msra.mxu1 %v11024_v17  ;;  %v18123_v17 = vshrl.u32 %v13780_v43, 16  ;;  %v3197_v16 = vsel %vm2646_vm14, %v3193_v63, %v3196_v55 }
 0x46a   : > { %10423 = vmatprep.subr.bf16.mxu1 %v14093_v27 }
 0x46b   : > { %v3200_v44 = vor.u32 %v18123_v17, %v3196_v55  ;;  %v18130_v17 = vshll.u32 %v13804_v45, 16 }
 0x46c   : > { %10368 = vmatmul.mubr.msk.bf16.gmra.mxu1 %vm18119_vm9, %v3183_v34  ;;  %v3210_v34 = vrot.slane %v18126_v32, 1  ;;  %v18135_v32 = vshrl.u32 %v13808_v2, 16  ;;  %vm18149_vm9 = vmmov %vm18142_vm1 }
 0x46d   : > { %10371 = vmatprep.mubr.msk.bf16.mxu1 %vm18121_vm5, %v3190_v9  ;;  %v3204_v42 = vsel %vm2646_vm14, %v3200_v44, %v3203_v7  ;;  %v18128_v9 = vshrl.u32 %v13800_v1, 16  ;;  %v3217_v39 = vrot.slane %v18130_v17, 1  ;;  %v18132_v44 = vshll.u32 %v13808_v2, 16  ;;  %v18138_v1 = vld [vmem:[#allocation34_spill] sm:$0xff]  ;;  %vm18150_vm5 = vmmov %vm18142_vm1 }
 0x46e   : > { %v3214_v22 = vor.u32 %v18129_v62, %v3210_v34  ;;  %v18136_v62 = vld [vmem:[#allocation32_spill] sm:$0xff] }
 0x46f   : > { %v3207_v26 = vor.u32 %v18128_v9, %v3203_v7  ;;  %v2162_v17 = vmul.f32 %v18137_v30, %v18136_v62 }
 0x470   : > { %v3218_v63 = vsel %vm2646_vm14, %v3214_v22, %v3217_v39 }
 0x471   : > { %v3211_v55 = vsel %vm2646_vm14, %v3207_v26, %v3210_v34  ;;  %v2163_v34 = vmul.f32 %v18137_v30, %v18138_v1  ;;  %v18139_v26 = vshll.u32 %v13812_v13, 16  ;;  %vm2274_vm13 = vcmp.ge.f32.partialorder %v2162_v17, 0.0 }
 0x472   : > { %v18143_v1 = vshrl.u32 %v13812_v13, 16 }
 0x473   : > { %v3231_v22 = vrot.slane %v18139_v26, 1  ;;  %vm2275_vm0 = vcmp.ge.f32.partialorder %v2163_v34, 0.0  ;;  %v18144_v26 = vshrl.u32 %v13816_v53, 16 }
 0x474   : > { %10372 = vmatmul.mubr.msk.bf16.gmra.mxu1 %vm18125_vm15, %v3197_v16  ;;  %v3224_v16 = vrot.slane %v18132_v44, 1  ;;  %vm18151_vm15 = vmmov %vm18142_vm1 }
 0x475   : > { %10375 = vmatprep.mubr.msk.bf16.mxu1 %vm18127_vm8, %v3204_v42  ;;  %v18134_v42 = vshrl.u32 %v13804_v45, 16  ;;  %v3235_v62 = vor.u32 %v18143_v1, %v3231_v22  ;;  %v3490_v1 = vrot.slane %v13742_v8, 1  ;;  %vm18152_vm8 = vmmov %vm18142_vm1 }
 0x476   : > { %v3228_v9 = vor.u32 %v18135_v32, %v3224_v16  ;;  %v2387_v32 = vmul.f32 0.01, %v2163_v34 }
 0x477   : > { %v3221_v7 = vor.u32 %v18134_v42, %v3217_v39  ;;  %v18141_v39 = vshll.u32 %v13816_v53, 16  ;;  %v2386_v42 = vmul.f32 0.01, %v2162_v17 }
 0x479   : > { %v3238_v44 = vrot.slane %v18141_v39, 1 }
 0x47b   : > { %v3242_v2 = vor.u32 %v18144_v26, %v3238_v44  ;;  %v3239_v45 = vsel %vm2646_vm14, %v3235_v62, %v3238_v44  ;;  %v3492_v44 = vrot.slane %v13711_v12, 1  ;;  %v14180_v12 = vld [vmem:[%s17310_s2 + $0x58] sm:$0xff]  }
 0x47c   : > { %10376 = vmatmul.mubr.msk.bf16.gmra.mxu1 %vm18131_vm4, %v3211_v55  ;;  %v3225_v55 = vsel %vm2646_vm14, %v3221_v7, %v3224_v16  ;;  %v2498_v16 = vsel %vm2274_vm13, %v2162_v17, %v2386_v42  ;;  %v2499_v7 = vsel %vm2275_vm0, %v2163_v34, %v2387_v32  ;;  %v18148_v17 = vshrl.u32 %v13820_v3, 16  ;;  %vm18153_vm4 = vmmov %vm18142_vm1 }
 0x47d   : > { %10379 = vmatprep.mubr.msk.bf16.mxu1 %vm18133_vm12, %v3218_v63  ;;  %v3232_v63 = vsel %vm2646_vm14, %v3228_v9, %v3231_v22  ;;  %v14155_v39 = vpack.c.bf16 %v2499_v7, %v2498_v16  ;;  %v3493_v42 = vsel %vm3488_vm7, %v3490_v1, %v3492_v44  ;;  %v3498_v32 = vrot.slane %v13748_v10, 1  ;;  %vm18154_vm12 = vmmov %vm18142_vm1 }
 0x47e   : > { %v3502_v16 = vrot.slane %v13761_v24, 1  ;;  %v3504_v10 = vrot.slane %v13763_v56, 1  ;;  %vm18161_vm13 = vmmov %vm18142_vm1 }
 0x47f   : > { %v3489_v22 = vrot.slane %v14155_v39, 1  ;;  %vm18163_vm0 = vmmov %vm18142_vm1 }
 0x481   : > { %v3491_v34 = vsel %vm3488_vm7, %v3489_v22, %v3490_v1  ;;  %v18157_v22 = vld [vmem:[#allocation47_spill] sm:$0xff]  ;;  %v18158_v1 = vld [vmem:[#allocation33_spill] sm:$0xff] }
 0x482   : > { %v2192_v24 = vmul.f32 %v18137_v30, %v18158_v1  ;;  %v3510_v1 = vrot.slane %v13770_v25, 1 }
 0x484   : > { %10380 = vmatmul.mubr.msk.bf16.gmra.mxu1 %vm18140_vm11, %v3225_v55  ;;  %v18145_v55 = vshll.u32 %v13820_v3, 16  ;;  %vm18155_vm11 = vmmov %vm18142_vm1 }
 0x485   : > { %10383 = vmatprep.mubr.msk.bf16.mxu1 %vm18142_vm1, %v3232_v63 }
 0x486   : > { %v3245_v9 = vrot.slane %v18145_v55, 1  ;;  %v18156_v55 = vld [vmem:[#allocation46_spill] sm:$0xff] }
 0x488   : > { %v3246_v63 = vsel %vm2646_vm14, %v3242_v2, %v3245_v9  ;;  %v11026_v2 = vld [vmem:[%s17310_s2 + $0x40] sm:$0xff]   ;;  %v2190_v9 = vmul.f32 %v18137_v30, %v18156_v55  ;;  %v3508_v55 = vrot.slane %v13767_v37, 1 }
 0x48a   : > { %v2414_v56 = vmul.f32 0.01, %v2190_v9  ;;  %v3511_v25 = vsel %vm3488_vm7, %v3508_v55, %v3510_v1 }
 0x48c   : > { %10384 = vmatmul.mubr.msk.bf16.gmra.mxu1 %vm18146_vm2, %v3239_v45  ;;  %v3494_v45 = vrot.slane %v13744_v49, 1  ;;  %v3496_v49 = vrot.slane %v13746_v28, 1  ;;  %vm2302_vm2 = vcmp.ge.f32.partialorder %v2190_v9, 0.0 }
 0x48d   : > { %10387 = vmatprep.mubr.msk.bf16.mxu1 %vm18147_vm10, %v3246_v63  ;;  %v3506_v63 = vrot.slane %v13765_v21, 1 }
 0x48e   : > { %v3495_v8 = vsel %vm3488_vm7, %v3492_v44, %v3494_v45  ;;  %v3497_v62 = vsel %vm3488_vm7, %v3494_v45, %v3496_v49  ;;  %v3499_v26 = vsel %vm3488_vm7, %v3496_v49, %v3498_v32  ;;  %v3505_v44 = vsel %vm3488_vm7, %v3502_v16, %v3504_v10  ;;  %v18160_v45 = vld [vmem:[#allocation49_spill] sm:$0xff] }
 0x48f   : > { %v3507_v21 = vsel %vm3488_vm7, %v3504_v10, %v3506_v63 }
 0x494   : > { %10388 = vmatmul.mubr.msk.bf16.gmra.mxu1 %vm18149_vm9, %v18148_v17  ;;  %v18159_v17 = vld [vmem:[#allocation48_spill] sm:$0xff]  ;;  %vm2304_vm9 = vcmp.ge.f32.partialorder %v2192_v24, 0.0 }
 0x495   : > { %10395 = vmatprep.mubr.msk.bf16.mxu1 %vm18150_vm5, %v3491_v34  ;;  %v2193_v34 = vmul.f32 %v18137_v30, %v18159_v17  ;;  %v2526_v17 = vsel %vm2302_vm2, %v2190_v9, %v2414_v56  ;;  %v18168_v9 = vld [vmem:[#allocation53_spill] sm:$0xff] }
 0x497   : > { %vm2305_vm5 = vcmp.ge.f32.partialorder %v2193_v34, 0.0 }
 0x49c   : > { %10396 = vmatmul.mubr.msk.bf16.vlgmr.msra.gmra.mxu1 %vm18151_vm15, %v3493_v42 }
 0x49d   : > { %10399 = vmatprep.mubr.msk.bf16.mxu1 %vm18152_vm8, %v3495_v8  ;;  %10424 = vmatpush3.bf16.msra.mxu1 %v14093_v27  ;;  %v3500_v27 = vrot.slane %v13752_v6, 1  ;;  %v2191_v6 = vmul.f32 %v18137_v30, %v18157_v22  ;;  %v18162_v8 = vld [vmem:[#allocation50_spill] sm:$0xff] }
 0x49e   : > { %10425 = vmatprep.subr.bf16.mxu1 %v11026_v2  ;;  %v2195_v49 = vmul.f32 %v18137_v30, %v18162_v8 }
 0x49f   : > { %v3501_v7 = vsel %vm3488_vm7, %v3498_v32, %v3500_v27  ;;  %v3503_v28 = vsel %vm3488_vm7, %v3500_v27, %v3502_v16  ;;  %v2415_v32 = vmul.f32 0.01, %v2191_v6  ;;  %vm2303_vm10 = vcmp.ge.f32.partialorder %v2191_v6, 0.0  ;;  %v18164_v16 = vld [vmem:[#allocation51_spill] sm:$0xff] }
 0x4a0   : > { %vm2307_vm8 = vcmp.ge.f32.partialorder %v2195_v49, 0.0  ;;  %v2419_v3 = vmul.f32 0.01, %v2195_v49 }
 0x4a1   : > { %10426 = vmatpush3.bf16.msra.mxu1 %v11026_v2  ;;  %v2194_v2 = vmul.f32 %v18137_v30, %v18160_v45 }
 0x4a2   : > { %10455 = vmatprep.subr.bf16.mxu1 %v14180_v12 }
 0x4a3   : > { %vm2306_vm15 = vcmp.ge.f32.partialorder %v2194_v2, 0.0  ;;  %v2418_v8 = vmul.f32 0.01, %v2194_v2 }
 0x4a4   : > { %10400 = vmatmul.mubr.msk.bf16.gmra.mxu1 %vm18153_vm4, %v3497_v62  ;;  %v2416_v62 = vmul.f32 0.01, %v2192_v24 }
 0x4a5   : > { %10403 = vmatprep.mubr.msk.bf16.mxu1 %vm18154_vm12, %v3499_v26  ;;  %v2417_v26 = vmul.f32 0.01, %v2193_v34  ;;  %v2530_v56 = vsel %vm2306_vm15, %v2194_v2, %v2418_v8  ;;  %v18171_v8 = vld [vmem:[#allocation56_spill] sm:$0xff] }
 0x4a6   : > { %v2528_v45 = vsel %vm2304_vm9, %v2192_v24, %v2416_v62  ;;  %v18169_v24 = vld [vmem:[#allocation54_spill] sm:$0xff] }
 0x4a7   : > { %v14208_v42 = vpop.f32.mrf.mxu1 }
 0x4a9   : > { %v14215_v27 = vpop.f32.mrf.mxu1 }
 0x4ab   : > { %v14222_v22 = vpop.f32.mrf.mxu1 }
 0x4ac   : > { %10404 = vmatmul.mubr.msk.bf16.gmra.mxu1 %vm18155_vm11, %v3501_v7  ;;  %v2196_v7 = vmul.f32 %v18137_v30, %v18164_v16  ;;  %vm18166_vm11 = vmmov %vm18163_vm0 }
 0x4ad   : > { %10407 = vmatprep.mubr.msk.bf16.mxu1 %vm18142_vm1, %v3503_v28  ;;  %v18165_v28 = vld [vmem:[#allocation52_spill] sm:$0xff]  ;;  %v14225_v53 = vpop.f32.mrf.mxu1  ;;  %vm18167_vm1 = vmmov %vm18163_vm0 }
 0x4ae   : > { %v2197_v10 = vmul.f32 %v18137_v30, %v18165_v28  ;;  %vm2308_vm4 = vcmp.ge.f32.partialorder %v2196_v7, 0.0  ;;  %v2420_v16 = vmul.f32 0.01, %v2196_v7  ;;  %v3509_v28 = vsel %vm3488_vm7, %v3506_v63, %v3508_v55  ;;  %vm18172_vm2 = vmmov %vm18167_vm1 }
 0x4af   : > { %v2531_v63 = vsel %vm2307_vm8, %v2195_v49, %v2419_v3  ;;  %v3514_v55 = vrot.slane %v13782_v18, 1  ;;  %v2201_v3 = vmul.f32 %v18137_v30, %v18171_v8  ;;  %vm18178_vm8 = vmmov %vm18167_vm1 }
 0x4b0   : > { %v2421_v13 = vmul.f32 0.01, %v2197_v10  ;;  %vm2309_vm12 = vcmp.ge.f32.partialorder %v2197_v10, 0.0  ;;  %v14228_v52 = vpop.f32.mrf.mxu1  ;;  %v2532_v62 = vsel %vm2308_vm4, %v2196_v7, %v2420_v16 }
 0x4b1   : > { %v2425_v58 = vmul.f32 0.01, %v2201_v3 }
 0x4b4   : > { %10408 = vmatmul.mubr.msk.bf16.gmra.mxu1 %vm18161_vm13, %v3505_v44  ;;  %v2527_v44 = vsel %vm2303_vm10, %v2191_v6, %v2415_v32  ;;  %v2198_v6 = vmul.f32 %v18137_v30, %v18168_v9  ;;  %v14239_v32 = vpop.f32.mrf.mxu1  ;;  %v18170_v9 = vld [vmem:[#allocation55_spill] sm:$0xff]  ;;  %vm18173_vm10 = vmmov %vm18167_vm1 }
 0x4b5   : > { %10411 = vmatprep.mubr.msk.bf16.mxu1 %vm18163_vm0, %v3507_v21  ;;  %v2529_v21 = vsel %vm2305_vm5, %v2193_v34, %v2417_v26  ;;  %v2596_v37 = vpack.c.bf16 %v2527_v44, %v2526_v17  ;;  %v2199_v34 = vmul.f32 %v18137_v30, %v18169_v24  ;;  %v2533_v26 = vsel %vm2309_vm12, %v2197_v10, %v2421_v13  ;;  %vm18179_vm12 = vmmov %vm18167_vm1 }
 0x4b6   : > { %v2597_v43 = vpack.c.bf16 %v2529_v21, %v2528_v45  ;;  %v3512_v17 = vrot.slane %v13772_v11, 1  ;;  %v14244_v44 = vpop.f32.mrf.mxu1  ;;  %v2200_v2 = vmul.f32 %v18137_v30, %v18170_v9  ;;  %vm2310_vm13 = vcmp.ge.f32.partialorder %v2198_v6, 0.0 }
 0x4b7   : > { %v3743_v45 = vshrl.u32 %v2596_v37, 16  ;;  %v3746_v21 = vshll.u32 %v2596_v37, 16  ;;  %vm2311_vm0 = vcmp.ge.f32.partialorder %v2199_v34, 0.0  ;;  %v2422_v49 = vmul.f32 0.01, %v2198_v6 }
 0x4b8   : > { %v2423_v13 = vmul.f32 0.01, %v2199_v34  ;;  %v14250_v7 = vpop.f32.mrf.mxu1  ;;  %v2598_v11 = vpack.c.bf16 %v2531_v63, %v2530_v56  ;;  %v2599_v18 = vpack.c.bf16 %v2533_v26, %v2532_v62  ;;  %v3513_v10 = vsel %vm3488_vm7, %v3510_v1, %v3512_v17  ;;  %v18175_v63 = vld [vmem:[#allocation58_spill] sm:$0xff] }
 0x4b9   : > { %v3515_v16 = vsel %vm3488_vm7, %v3512_v17, %v3514_v55  ;;  %v3748_v24 = vrot.slane %v3746_v21, 2  ;;  %v2424_v38 = vmul.f32 0.01, %v2200_v2  ;;  %v2202_v56 = vmul.f32 %v18137_v30, %v18174_v36  ;;  %v18176_v36 = vld [vmem:[#allocation59_spill] sm:$0xff] }
 0x4ba   : > { %v14254_v37 = vpop.f32.mrf.mxu1  ;;  %v2203_v1 = vmul.f32 %v18137_v30, %v18175_v63  ;;  %vm2312_vm9 = vcmp.ge.f32.partialorder %v2200_v2, 0.0  ;;  %vm2313_vm5 = vcmp.ge.f32.partialorder %v2201_v3, 0.0  ;;  %v2534_v26 = vsel %vm2310_vm13, %v2198_v6, %v2422_v49  ;;  %v18177_v63 = vld [vmem:[#allocation60_spill] sm:$0xff] }
 0x4bb   : > { %v2535_v17 = vsel %vm2311_vm0, %v2199_v34, %v2423_v13  ;;  %v3763_v21 = vshll.u32 %v2598_v11, 16  ;;  %v3772_v20 = vshll.u32 %v2599_v18, 16  ;;  %v2204_v14 = vmul.f32 %v18137_v30, %v18176_v36  ;;  %vm18184_vm0 = vmmov %vm18172_vm2 }
 0x4bc   : > { %10412 = vmatmul.mubr.msk.bf16.gmra.mxu1 %vm18166_vm11, %v3509_v28  ;;  %v3751_v28 = vshrl.u32 %v2597_v43, 16  ;;  %v14262_v62 = vpop.f32.mrf.mxu1  ;;  %v2205_v54 = vmul.f32 %v18137_v30, %v18177_v63  ;;  %v2536_v23 = vsel %vm2312_vm9, %v2200_v2, %v2424_v38  ;;  %v2537_v40 = vsel %vm2313_vm5, %v2201_v3, %v2425_v58  ;;  %v18180_v2 = vld [vmem:[#allocation61_spill] sm:$0xff] }
 0x4bd   : > { %10415 = vmatprep.mubr.msk.bf16.mxu1 %vm18167_vm1, %v3511_v25  ;;  %v3754_v25 = vshll.u32 %v2597_v43, 16  ;;  %v3745_v43 = vrot.slane %v3743_v45, 1  ;;  %v3760_v45 = vshrl.u32 %v2598_v11, 16  ;;  %vm2314_vm15 = vcmp.ge.f32.partialorder %v2202_v56, 0.0 }
 0x4be   : > { %v3753_v9 = vrot.slane %v3751_v28, 1  ;;  %v14266_v28 = vpop.f32.mrf.mxu1  ;;  %v2426_v6 = vmul.f32 0.01, %v2202_v56  ;;  %v2427_v34 = vmul.f32 0.01, %v2203_v1  ;;  %v2600_v13 = vpack.c.bf16 %v2535_v17, %v2534_v26  ;;  %v18181_v26 = vld [vmem:[#allocation62_spill] sm:$0xff] }
 0x4bf   : > { %v3756_v8 = vrot.slane %v3754_v25, 2  ;;  %v3749_v25 = vor.u32 %v3748_v24, %v3745_v43  ;;  %v3762_v11 = vrot.slane %v3760_v45, 1  ;;  %v3765_v33 = vrot.slane %v3763_v21, 2 }
 0x4c0   : > { %v14272_v49 = vpop.f32.mrf.mxu1  ;;  %v2601_v43 = vpack.c.bf16 %v2537_v40, %v2536_v23  ;;  %vm2315_vm4 = vcmp.ge.f32.partialorder %v2203_v1, 0.0  ;;  %v2428_v38 = vmul.f32 0.01, %v2204_v14  ;;  %v2429_v58 = vmul.f32 0.01, %v2205_v54 }
 0x4c1   : > { %v2206_v3 = vmul.f32 %v18137_v30, %v18180_v2  ;;  %v2207_v17 = vmul.f32 %v18137_v30, %v18181_v26  ;;  %vm2316_vm11 = vcmp.ge.f32.partialorder %v2204_v14, 0.0  ;;  %vm2317_vm1 = vcmp.ge.f32.partialorder %v2205_v54, 0.0 }
 0x4c2   : > { %v2538_v23 = vsel %vm2314_vm15, %v2202_v56, %v2426_v6  ;;  %v3781_v45 = vshll.u32 %v2600_v13, 16  ;;  %v2539_v21 = vsel %vm2315_vm4, %v2203_v1, %v2427_v34  ;;  %v3787_v36 = vshrl.u32 %v2601_v43, 16 }
 0x4c3   : > { %v3790_v63 = vshll.u32 %v2601_v43, 16  ;;  %v2209_v26 = vmul.f32 %v18137_v30, %v18183_v57  ;;  %v2540_v41 = vsel %vm2316_vm11, %v2204_v14, %v2428_v38  ;;  %v2541_v47 = vsel %vm2317_vm1, %v2205_v54, %v2429_v58  ;;  %v18186_v58 = vld [vmem:[#allocation65_spill] sm:$0xff] }
 0x4c4   : > { %10416 = vmatmul.mubr.msk.bf16.gmra.mxu1 %vm18172_vm2, %v3513_v10  ;;  %v3757_v10 = vor.u32 %v3756_v8, %v3753_v9  ;;  %v14274_v24 = vpop.f32.mrf.mxu1  ;;  %v3774_v8 = vrot.slane %v3772_v20, 2  ;;  %v3766_v20 = vor.u32 %v3765_v33, %v3762_v11  ;;  %vm2318_vm13 = vcmp.ge.f32.partialorder %v2206_v3, 0.0  ;;  %v11028_v33 = vld [vmem:[%s17310_s2 + $0x50] sm:$0xff]  }
 0x4c5   : > { %10419 = vmatprep.mubr.msk.bf16.mxu1 %vm18173_vm10, %v3515_v16  ;;  %v3769_v16 = vshrl.u32 %v2599_v18, 16  ;;  %v2430_v0 = vmul.f32 0.01, %v2206_v3  ;;  %v2431_v56 = vmul.f32 0.01, %v2207_v17  ;;  %v2602_v1 = vpack.c.bf16 %v2539_v21, %v2538_v23  ;;  %vm18185_vm10 = vmmov %vm18184_vm0 }
 0x4c6   : > { %v3758_v18 = vsel %vm3741_vm3, %v3749_v25, %v3757_v10  ;;  %v14283_v40 = vpop.f32.mrf.mxu1  ;;  %v3767_v11 = vsel %vm3741_vm3, %v3757_v10, %v3766_v20  ;;  %v2603_v43 = vpack.c.bf16 %v2541_v47, %v2540_v41  ;;  %v3789_v54 = vrot.slane %v3787_v36, 1  ;;  %v18187_v10 = vld [vmem:[#allocation66_spill] sm:$0xff] }
 0x4c7   : > { %v3771_v9 = vrot.slane %v3769_v16, 1  ;;  %v3792_v14 = vrot.slane %v3790_v63, 2  ;;  %vm2319_vm2 = vcmp.ge.f32.partialorder %v2207_v17, 0.0  ;;  %v2433_v38 = vmul.f32 0.01, %v2209_v26 }
 0x4c8   : > { %v14286_v25 = vpop.f32.mrf.mxu1  ;;  %v2210_v23 = vmul.f32 %v18137_v30, %v18186_v58  ;;  %v2211_v47 = vmul.f32 %v18137_v30, %v18187_v10  ;;  %vm2321_vm5 = vcmp.ge.f32.partialorder %v2209_v26, 0.0  ;;  %v2543_v36 = vsel %vm2319_vm2, %v2207_v17, %v2431_v56  ;;  %v18188_v58 = vld [vmem:[#allocation67_spill] sm:$0xff] }
 0x4c9   : > { %v3775_v16 = vor.u32 %v3774_v8, %v3771_v9  ;;  %v2212_v10 = vmul.f32 %v18137_v30, %v18188_v58  ;;  %vm2325_vm1 = vcmp.ge.f32.partialorder %v2213_v31, 0.0 }
 0x4ca   : > { %v14292_v6 = vpop.f32.mrf.mxu1  ;;  %vm2322_vm15 = vcmp.ge.f32.partialorder %v2210_v23, 0.0  ;;  %vm2323_vm4 = vcmp.ge.f32.partialorder %v2211_v47, 0.0 }
 0x4cb   : > { %v3776_v57 = vsel %vm3741_vm3, %v3766_v20, %v3775_v16  ;;  %v3796_v20 = vshrl.u32 %v2602_v1, 16  ;;  %vm2324_vm11 = vcmp.ge.f32.partialorder %v2212_v10, 0.0 }
 0x4cc   : > { %10420 = vmatmul.mubr.msk.bf16.gmra.mxu1 %vm18178_vm8, %v3514_v55  ;;  %v3778_v55 = vshrl.u32 %v2600_v13, 16  ;;  %v3783_v13 = vrot.slane %v3781_v45, 2  ;;  %v2542_v45 = vsel %vm2318_vm13, %v2206_v3, %v2430_v0  ;;  %v2545_v0 = vsel %vm2321_vm5, %v2209_v26, %v2433_v38  ;;  %vm18190_vm8 = vmmov %vm18184_vm0  ;;  %v18192_v38 = vld [vmem:[#allocation69_spill] sm:$0xff] }
 0x4cd   : > { %10427 = vmatprep.mubr.msk.bf16.mxu1 %vm18179_vm12, %v3758_v18  ;;  %v18182_v18 = vld [vmem:[#allocation63_spill] sm:$0xff]  ;;  %v2434_v3 = vmul.f32 0.01, %v2210_v23  ;;  %v2604_v56 = vpack.c.bf16 %v2543_v36, %v2542_v45  ;;  %vm18191_vm12 = vmmov %vm18184_vm0  ;;  %v2214_v45 = vmul.f32 %v18137_v30, %v18192_v38  ;;  %v2216_v38 = vmul.f32 %v18137_v30, %v18194_v50 }
 0x4ce   : > { %v2208_v2 = vmul.f32 %v18137_v30, %v18182_v18  ;;  %v3780_v34 = vrot.slane %v3778_v55, 1  ;;  %v14313_v55 = vld [vmem:[%s17310_s2 + $0x68] sm:$0xff]   ;;  %v3793_v18 = vor.u32 %v3792_v14, %v3789_v54 }
 0x4cf   : > { %v3817_v36 = vshll.u32 %v2604_v56, 16  ;;  %vm2326_vm13 = vcmp.ge.f32.partialorder %v2214_v45, 0.0  ;;  %v2438_v35 = vmul.f32 0.01, %v2214_v45 }
 0x4d0   : > { %v2432_v8 = vmul.f32 0.01, %v2208_v2  ;;  %vm2320_vm9 = vcmp.ge.f32.partialorder %v2208_v2, 0.0  ;;  %v3784_v21 = vor.u32 %v3783_v13, %v3780_v34  ;;  %v3798_v34 = vrot.slane %v3796_v20, 1  ;;  %v18193_v20 = vld [vmem:[#allocation70_spill] sm:$0xff] }
 0x4d2   : > { %v14298_v9 = vpop.f32.mrf.mxu1  ;;  %v2544_v46 = vsel %vm2320_vm9, %v2208_v2, %v2432_v8  ;;  %v3794_v48 = vsel %vm3741_vm3, %v3784_v21, %v3793_v18  ;;  %v2437_v8 = vmul.f32 0.01, %v2213_v31  ;;  %vm2328_vm9 = vcmp.ge.f32.partialorder %v2216_v38, 0.0 }
 0x4d3   : > { %v2605_v54 = vpack.c.bf16 %v2545_v0, %v2544_v46 }
 0x4d4   : > { %10428 = vmatmul.mubr.msk.bf16.vlgmr.msra.gmra.mxu1 %vm18184_vm0, %v3767_v11  ;;  %v14308_v41 = vpop.f32.mrf.mxu1  ;;  %v3805_v11 = vshrl.u32 %v2603_v43, 16  ;;  %v2549_v59 = vsel %vm2325_vm1, %v2213_v31, %v2437_v8  ;;  %vm18204_vm1 = vmmov %vm18184_vm0 }
 0x4d5   : > { %10431 = vmatprep.mubr.msk.bf16.mxu1 %vm18185_vm10, %v3776_v57  ;;  %10456 = vmatpush3.bf16.msra.mxu1 %v14180_v12  ;;  %v3799_v12 = vshll.u32 %v2602_v1, 16  ;;  %v3808_v57 = vshll.u32 %v2603_v43, 16  ;;  %v2435_v1 = vmul.f32 0.01, %v2211_v47  ;;  %v3785_v43 = vsel %vm3741_vm3, %v3775_v16, %v3784_v21  ;;  %vm18197_vm10 = vmmov %vm18184_vm0 }
 0x4d6   : > { %10457 = vmatprep.subr.bf16.mxu1 %v11028_v33  ;;  %v14317_v63 = vpop.f32.mrf.mxu1  ;;  %v3807_v2 = vrot.slane %v3805_v11, 1  ;;  %v2215_v16 = vmul.f32 %v18137_v30, %v18193_v20  ;;  %v3814_v21 = vshrl.u32 %v2604_v56, 16  ;;  %v2217_v20 = vmul.f32 %v18137_v30, %v18195_v19 }
 0x4d7   : > { %v3801_v13 = vrot.slane %v3799_v12, 2  ;;  %v3810_v26 = vrot.slane %v3808_v57, 2  ;;  %v2546_v12 = vsel %vm2322_vm15, %v2210_v23, %v2434_v3  ;;  %v2547_v57 = vsel %vm2323_vm4, %v2211_v47, %v2435_v1  ;;  %vm18199_vm15 = vmmov %vm18184_vm0 }
 0x4d8   : > { %v14325_v17 = vpop.f32.mrf.mxu1  ;;  %v2439_v23 = vmul.f32 0.01, %v2215_v16  ;;  %v2606_v56 = vpack.c.bf16 %v2547_v57, %v2546_v12  ;;  %v3816_v47 = vrot.slane %v3814_v21, 1  ;;  %v3819_v1 = vrot.slane %v3817_v36, 2  ;;  %vm18201_vm4 = vmmov %vm18184_vm0 }
 0x4d9   : > { %10458 = vmatpush3.bf16.msra.mxu1 %v11028_v33  ;;  %v2436_v33 = vmul.f32 0.01, %v2212_v10  ;;  %v3802_v11 = vor.u32 %v3801_v13, %v3798_v34  ;;  %v3811_v0 = vor.u32 %v3810_v26, %v3807_v2  ;;  %v11033_v13 = vld [vmem:[%s17311_s3 + $0x18] sm:$0xff]   ;;  %vm2327_vm2 = vcmp.ge.f32.partialorder %v2215_v16, 0.0 }
 0x4da   : > { %10487 = vmatprep.subr.bf16.mxu1 %v14313_v55  ;;  %v2441_v2 = vmul.f32 0.01, %v2217_v20  ;;  %10583 = vmatprep.subr.bf16.mxu0 %v11033_v13  ;;  %vm2329_vm5 = vcmp.ge.f32.partialorder %v2217_v20, 0.0  ;;  %v3835_v26 = vshll.u32 %v2606_v56, 16  ;;  %v2551_v8 = vsel %vm2327_vm2, %v2215_v16, %v2439_v23  ;;  %vm18207_vm2 = vmmov %vm18184_vm0 }
 0x4db   : > { %v2548_v61 = vsel %vm2324_vm11, %v2212_v10, %v2436_v33  ;;  %v3803_v34 = vsel %vm3741_vm3, %v3793_v18, %v3802_v11  ;;  %v3812_v30 = vsel %vm3741_vm3, %v3802_v11, %v3811_v0  ;;  %v2440_v10 = vmul.f32 0.01, %v2216_v38  ;;  %10584 = vmatpush3.bf16.msra.mxu0 %v11033_v13  ;;  %vm18203_vm11 = vmmov %vm18184_vm0 }
 0x4dc   : > { %v14329_v14 = vpop.f32.mrf.mxu1  ;;  %10432 = vmatmul.mubr.msk.bf16.gmra.mxu1 %vm18190_vm8, %v3785_v43  ;;  %v3823_v43 = vshrl.u32 %v2605_v54, 16  ;;  %v2607_v50 = vpack.c.bf16 %v2549_v59, %v2548_v61  ;;  %v2550_v59 = vsel %vm2326_vm13, %v2214_v45, %v2438_v35  ;;  %v3832_v61 = vshrl.u32 %v2606_v56, 16  ;;  %vm18200_vm8 = vmmov %vm18184_vm0 }
 0x4dd   : > { %10435 = vmatprep.mubr.msk.bf16.mxu1 %vm18191_vm12, %v3794_v48  ;;  %v3826_v48 = vshll.u32 %v2605_v54, 16  ;;  %v3820_v33 = vor.u32 %v3819_v1, %v3816_v47  ;;  %v2552_v57 = vsel %vm2328_vm9, %v2216_v38, %v2440_v10  ;;  %vm18202_vm12 = vmmov %vm18184_vm0 }
 0x4de   : > { %v14338_v46 = vpop.f32.mrf.mxu1  ;;  %v3825_v19 = vrot.slane %v3823_v43, 1  ;;  %v3841_v36 = vshrl.u32 %v2607_v50, 16  ;;  %v3844_v11 = vshll.u32 %v2607_v50, 16  ;;  %v2553_v43 = vsel %vm2329_vm5, %v2217_v20, %v2441_v2  ;;  %vm18205_vm13 = vmmov %vm18184_vm0 }
 0x4df   : > { %v3828_v31 = vrot.slane %v3826_v48, 2  ;;  %v2609_v13 = vpack.c.bf16 %v2553_v43, %v2552_v57  ;;  %vm18209_vm9 = vmmov %vm18184_vm0 }
 0x4e0   : > { %v14341_v58 = vpop.f32.mrf.mxu1  ;;  %v3843_v45 = vrot.slane %v3841_v36, 1  ;;  %v3846_v16 = vrot.slane %v3844_v11, 2  ;;  %v4096_v11 = vshll.u32 %v14155_v39, 16  ;;  %vm18211_vm5 = vmmov %vm18184_vm0 }
 0x4e1   : > { %v3829_v21 = vor.u32 %v3828_v31, %v3825_v19  ;;  %v3859_v19 = vshrl.u32 %v2609_v13, 16  ;;  %v3862_v31 = vshll.u32 %v2609_v13, 16 }
 0x4e2   : > { %v14347_v3 = vpop.f32.mrf.mxu1  ;;  %v3847_v50 = vor.u32 %v3846_v16, %v3843_v45 }
 0x4e3   : > { %v3830_v35 = vsel %vm3741_vm3, %v3820_v33, %v3829_v21 }
 0x4e4   : > { %v14353_v54 = vpop.f32.mrf.mxu1  ;;  %10436 = vmatmul.mubr.msk.bf16.gmra.mxu1 %vm18184_vm0, %v3803_v34  ;;  %v2608_v34 = vpack.c.bf16 %v2551_v8, %v2550_v59 }
 0x4e5   : > { %18196 = vst [vmem:[#allocation15_spill] sm:$0xff] %v14353_v54  ;;  %10439 = vmatprep.mubr.msk.bf16.mxu1 %vm18197_vm10, %v3812_v30  ;;  %v3834_v30 = vrot.slane %v3832_v61, 1  ;;  %v3837_v54 = vrot.slane %v3835_v26, 2  ;;  %v3864_v26 = vrot.slane %v3862_v31, 2  ;;  %vm18208_vm10 = vmmov %vm18184_vm0 }
 0x4e6   : > { %v14358_v18 = vpop.f32.mrf.mxu1  ;;  %v3850_v20 = vshrl.u32 %v2608_v34, 16  ;;  %v3853_v56 = vshll.u32 %v2608_v34, 16 }
 0x4e7   : > { %18198 = vst [vmem:[#allocation20_spill] sm:$0xff] %v14358_v18  ;;  %v3821_v18 = vsel %vm3741_vm3, %v3811_v0, %v3820_v33  ;;  %v3838_v0 = vor.u32 %v3837_v54, %v3834_v30  ;;  %v3861_v54 = vrot.slane %v3859_v19, 1 }
 0x4e8   : > { %v10326_v12 = vpop.f32.mrf.mxu1 }
 0x4e9   : > { %v3839_v59 = vsel %vm3741_vm3, %v3829_v21, %v3838_v0  ;;  %v3865_v36 = vor.u32 %v3864_v26, %v3861_v54  ;;  %v4093_v21 = vshrl.u32 %v14155_v39, 16 }
 0x4ea   : > { %v14361_v48 = vpop.f32.mrf.mxu1 }
 0x4eb   : > { %v4095_v13 = vrot.slane %v4093_v21, 1  ;;  %v5108_v21 = vld [vmem:[%s17314_s6 + $0x20] sm:$0xff] }
 0x4ec   : > { %v10333_v15 = vpop.f32.mrf.mxu1  ;;  %10440 = vmatmul.mubr.msk.bf16.gmra.mxu1 %vm18199_vm15, %v3821_v18  ;;  %v3852_v18 = vrot.slane %v3850_v20, 1  ;;  %vm18214_vm15 = vmmov %vm18184_vm0 }
 0x4ed   : > { %v14367_v23 = vadd.f32 %v10333_v15, %v14208_v42  ;;  %10443 = vmatprep.mubr.msk.bf16.mxu1 %vm18200_vm8, %v3830_v35  ;;  %v3855_v15 = vrot.slane %v3853_v56, 2  ;;  %v4098_v35 = vrot.slane %v4096_v11, 2  ;;  %vm18217_vm8 = vmmov %vm18184_vm0 }
 0x4ee   : > { %v3043_v38 = vpop.f32.mrf.mxu1  ;;  %v18215_v11 = vld [vmem:[#allocation20_spill] sm:$0xff] }
 0x4ef   : > { %v14371_v47 = vadd.f32 %v3043_v38, %v14215_v27  ;;  %v3848_v27 = vsel %vm3741_vm3, %v3838_v0, %v3847_v50  ;;  %v4099_v38 = vor.u32 %v4098_v35, %v4095_v13 }
 0x4f0   : > { %v10334_v1 = vpop.f32.mrf.mxu1 }
 0x4f1   : > { %v14374_v10 = vadd.f32 %v10334_v1, %v14222_v22 }
 0x4f2   : > { %v3046_v2 = vpop.f32.mrf.mxu1 }
 0x4f3   : > { %v14377_v42 = vadd.f32 %v3046_v2, %v14225_v53  ;;  %v3856_v53 = vor.u32 %v3855_v15, %v3852_v18  ;;  %v11030_v2 = vld [vmem:[%s17310_s2 + $0x60] sm:$0xff]  }
 0x4f4   : > { %v10337_v61 = vpop.f32.mrf.mxu1  ;;  %10444 = vmatmul.mubr.msk.bf16.gmra.mxu1 %vm18201_vm4, %v3839_v59  ;;  %v17548_v59 = vmov 0   ;;  %vm18219_vm4 = vmmov %vm18184_vm0 }
 0x4f5   : > { %v14383_v33 = vadd.f32 %v10337_v61, %v14228_v52  ;;  %10447 = vmatprep.mubr.msk.bf16.mxu1 %vm18202_vm12, %v3848_v27  ;;  %v3857_v34 = vsel %vm3741_vm3, %v3847_v50, %v3856_v53  ;;  %10956 = vset.pattern.permute.xlu0 %v17548_v59  ;;  %vm18221_vm12 = vmmov %vm18184_vm0 }
 0x4f6   : > { %v3059_v22 = vpop.f32.mrf.mxu1  ;;  %10957 = vset.pattern.permute.xlu1 %v17548_v59 }
 0x4f7   : > { %v14387_v8 = vadd.f32 %v3059_v22, %v14239_v32  ;;  %v3866_v32 = vsel %vm3741_vm3, %v3856_v53, %v3865_v36  ;;  %v18210_v22 = vld [vmem:[#allocation27_spill] sm:$0xff]  ;;  %v5107_v36 = vld [vmem:[%s17314_s6 + $0x18] sm:$0xff] }
 0x4f8   : > { %v10338_v12 = vpop.f32.mrf.mxu1 }
 0x4f9   : > { %v14392_v57 = vadd.f32 %v10338_v12, %v14244_v44  ;;  %v18213_v12 = vld [vmem:[#allocation28_spill] sm:$0xff] }
 0x4fa   : > { %v3062_v43 = vpop.f32.mrf.mxu1 }
 0x4fb   : > { %v14395_v52 = vadd.f32 %v3062_v43, %v14250_v7 }
 0x4fc   : > { %v10341_v30 = vpop.f32.mrf.mxu1  ;;  %10448 = vmatmul.mubr.msk.bf16.gmra.mxu1 %vm18203_vm11, %v3857_v34  ;;  %vm18223_vm11 = vmmov %vm18184_vm0 }
 0x4fd   : > { %v14401_v45 = vadd.f32 %v10341_v30, %v14254_v37  ;;  %10451 = vmatprep.mubr.msk.bf16.mxu1 %vm18204_vm1, %v3866_v32  ;;  %v4108_v37 = vsel %vm3741_vm3, %v4099_v38, %v13880_v60  ;;  %vm18206_vm3 = vmmov %vm18184_vm0  ;;  %v5109_v30 = vld [vmem:[%s17314_s6 + $0x28] sm:$0xff]  ;;  %v5110_v32 = vld [vmem:[%s17314_s6 + $0x30] sm:$0xff] }
 0x4fe   : > { %v3075_v44 = vpop.f32.mrf.mxu1  ;;  %vm18225_vm1 = vmmov %vm18184_vm0 }
 0x4ff   : > { %v14405_v16 = vadd.f32 %v3075_v44, %v14262_v62 }
 0x500   : > { %v10342_v7 = vpop.f32.mrf.mxu1 }
 0x501   : > { %v14408_v20 = vadd.f32 %v10342_v7, %v14266_v28  ;;  %v18216_v7 = vld [vmem:[#allocation29_spill] sm:$0xff] }
 0x502   : > { %v3078_v56 = vpop.f32.mrf.mxu1 }
 0x503   : > { %v14411_v0 = vadd.f32 %v3078_v56, %v14272_v49  ;;  %v18218_v56 = vld [vmem:[#allocation30_spill] sm:$0xff] }
 0x504   : > { %v10345_v1 = vpop.f32.mrf.mxu1  ;;  %10452 = vmatmul.mubr.msk.bf16.gmra.mxu1 %vm18205_vm13, %v3861_v54  ;;  %vm18227_vm13 = vmmov %vm18184_vm0 }
 0x505   : > { %v14417_v50 = vadd.f32 %v10345_v1, %v14274_v24  ;;  %10459 = vmatprep.mubr.msk.bf16.mxu1 %vm18184_vm0, %v4108_v37  ;;  %v5111_v1 = vld [vmem:[%s17314_s6 + $0x38] sm:$0xff]  ;;  %v5112_v37 = vld [vmem:[%s17314_s6 + $0x40] sm:$0xff] }
 0x506   : > { %v3091_v62 = vpop.f32.mrf.mxu1 }
 0x507   : > { %v14421_v19 = vadd.f32 %v3091_v62, %v14283_v40 }
 0x508   : > { %v10346_v28 = vpop.f32.mrf.mxu1 }
 0x509   : > { %v14424_v31 = vadd.f32 %v10346_v28, %v14286_v25  ;;  %v14443_v25 = vld [vmem:[%s17310_s2 + $0x78] sm:$0xff]  }
 0x50a   : > { %v3094_v49 = vpop.f32.mrf.mxu1 }
 0x50b   : > { %v14430_v60 = vadd.f32 %v3094_v49, %v14292_v6  ;;  %v5113_v49 = vld [vmem:[%s17314_s6 + $0x48] sm:$0xff] }
 0x50c   : > { %v10349_v24 = vpop.f32.mrf.mxu1  ;;  %10460 = vmatmul.mubr.msk.bf16.vlgmr.msra.gmra.mxu1 %vm18206_vm3, %v13898_v4  ;;  %vm18230_vm3 = vmmov %vm18184_vm0 }
 0x50d   : > { %v14435_v18 = vadd.f32 %v10349_v24, %v14298_v9  ;;  %10463 = vmatprep.mubr.msk.bf16.mxu1 %vm18207_vm2, %v13906_v5  ;;  %10488 = vmatpush3.bf16.msra.mxu1 %v14313_v55  ;;  %vm18232_vm2 = vmmov %vm18184_vm0 }
 0x50e   : > { %v3107_v40 = vpop.f32.mrf.mxu1  ;;  %10489 = vmatprep.subr.bf16.mxu1 %v11030_v2 }
 0x50f   : > { %v14446_v6 = vadd.f32 %v3107_v40, %v14308_v41 }
 0x510   : > { %v10350_v15 = vpop.f32.mrf.mxu1 }
 0x511   : > { %v14449_v4 = vadd.f32 %v10350_v15, %v14317_v63  ;;  %10490 = vmatpush3.bf16.msra.mxu1 %v11030_v2  ;;  %v5104_v63 = vld [vmem:[%s17314_s6] sm:$0xff]  ;;  %v5114_v2 = vld [vmem:[%s17314_s6 + $0x50] sm:$0xff]  ;;  %v18220_v15 = vld [vmem:[#allocation31_spill] sm:$0xff] }
 0x512   : > { %v3110_v9 = vpop.f32.mrf.mxu1  ;;  %10519 = vmatprep.subr.bf16.mxu1 %v14443_v25  ;;  %5133 = vperm.xlu0 %10956, %v5104_v63   ;;  %v5116_v63 = vld [vmem:[%s17314_s6 + $0x60] sm:$0xff] }
 0x513   : > { %v14453_v5 = vadd.f32 %v3110_v9, %v14325_v17  ;;  %v18222_v9 = vld [vmem:[#allocation37_spill] sm:$0xff] }
 0x514   : > { %v10353_v55 = vpop.f32.mrf.mxu1  ;;  %10464 = vmatmul.mubr.msk.bf16.gmra.mxu1 %vm18208_vm10, %v13909_v51  ;;  %vm18234_vm10 = vmmov %vm18184_vm0 }
 0x515   : > { %v14459_v41 = vadd.f32 %v10353_v55, %v14329_v14  ;;  %10467 = vmatprep.mubr.msk.bf16.mxu1 %vm18209_vm9, %v13914_v29  ;;  %v5106_v14 = vld [vmem:[%s17314_s6 + $0x10] sm:$0xff]  ;;  %v5105_v29 = vld [vmem:[%s17314_s6 + $0x8] sm:$0xff]  ;;  %v5115_v55 = vld [vmem:[%s17314_s6 + $0x58] sm:$0xff] }
 0x516   : > { %v3123_v17 = vpop.f32.mrf.mxu1  ;;  %5143 = vperm.xlu1 %10957, %v5106_v14   ;;  %5138 = vperm.xlu0 %10956, %v5105_v29   ;;  %v5117_v14 = vld [vmem:[%s17314_s6 + $0x68] sm:$0xff]  ;;  %v5118_v29 = vld [vmem:[%s17314_s6 + $0x70] sm:$0xff]  ;;  %vm18236_vm9 = vmmov %vm18184_vm0 }
 0x517   : > { %v14468_v61 = vadd.f32 %v3123_v17, %v14338_v46 }
 0x518   : > { %v10354_v51 = vpop.f32.mrf.mxu1 }
 0x519   : > { %v14471_v27 = vadd.f32 %v10354_v51, %v14341_v58  ;;  %v18212_v58 = vld [vmem:[#allocation15_spill] sm:$0xff] }
 0x51a   : > { %v3126_v54 = vpop.f32.mrf.mxu1  ;;  %5148 = vperm.xlu1 %10957, %v5107_v36   ;;  %5153 = vperm.xlu0 %10956, %v5108_v21   ;;  %v5120_v36 = vld [vmem:[%s17314_s6 + $0x80] sm:$0xff] }
 0x51b   : > { %v14480_v26 = vadd.f32 %v3126_v54, %v14347_v3 }
 0x51c   : > { %v10357_v46 = vpop.f32.mrf.mxu1  ;;  %10468 = vmatmul.mubr.msk.bf16.gmra.mxu1 %vm18211_vm5, %v18210_v22  ;;  %v18224_v22 = vld [vmem:[#allocation85_spill] sm:$0xff]  ;;  %vm18238_vm5 = vmmov %vm18184_vm0 }
 0x51d   : > { %v14485_v53 = vadd.f32 %v10357_v46, %v18212_v58  ;;  %10471 = vmatprep.mubr.msk.bf16.mxu1 %vm18214_vm15, %v18213_v12  ;;  %v18226_v58 = vld [vmem:[#allocation88_spill] sm:$0xff]  ;;  %v5119_v12 = vld [vmem:[%s17314_s6 + $0x78] sm:$0xff]  ;;  %vm18240_vm15 = vmmov %vm18184_vm0 }
 0x51e   : > { %v3139_v3 = vpop.f32.mrf.mxu1  ;;  %5158 = vperm.xlu1 %10957, %v5109_v30   ;;  %5163 = vperm.xlu0 %10956, %v5110_v32  }
 0x51f   : > { %v14496_v43 = vadd.f32 %v3139_v3, %v18215_v11  ;;  %v5121_v11 = vld [vmem:[%s17314_s6 + $0x88] sm:$0xff] }
 0x520   : > { %v10358_v34 = vpop.f32.mrf.mxu1 }
 0x521   : > { %v5122_v34 = vld [vmem:[%s17314_s6 + $0x90] sm:$0xff] }
 0x522   : > { %v3142_v13 = vpop.f32.mrf.mxu1  ;;  %5168 = vperm.xlu1 %10957, %v5111_v1   ;;  %5173 = vperm.xlu0 %10956, %v5112_v37  }
 0x523   : > { %v14505_v35 = vadd.f32 %v3142_v13, %v14361_v48  ;;  %v18228_v13 = vld [vmem:[#allocation9_spill] sm:$0xff] }
 0x524   : > { %v10365_v44 = vpop.f32.mrf.mxu1  ;;  %10472 = vmatmul.mubr.msk.bf16.gmra.mxu1 %vm18217_vm8, %v18216_v7  ;;  %v5123_v7 = vld [vmem:[%s17314_s6 + $0x98] sm:$0xff]  ;;  %vm18242_vm8 = vmmov %vm18184_vm0 }
 0x525   : > { %v14510_v38 = vadd.f32 %v10365_v44, %v14367_v23  ;;  %10475 = vmatprep.mubr.msk.bf16.mxu1 %vm18219_vm4, %v18218_v56  ;;  %v18229_v44 = vld [vmem:[#allocation79_spill] sm:$0xff]  ;;  %v5124_v56 = vld [vmem:[%s17314_s6 + $0xa0] sm:$0xff]  ;;  %vm18244_vm4 = vmmov %vm18184_vm0 }
 0x526   : > { %v3337_v48 = vpop.f32.mrf.mxu1  ;;  %5178 = vperm.xlu1 %10957, %v5113_v49   ;;  %5183 = vperm.xlu0 %10956, %v5114_v2   ;;  %v11032_v2 = vld [vmem:[%s17310_s2 + $0x70] sm:$0xff]  }
 0x527   : > { %v14521_v62 = vadd.f32 %v3337_v48, %v14371_v47  ;;  %v5125_v48 = vld [vmem:[%s17314_s6 + $0xa8] sm:$0xff] }
 0x528   : > { %v10366_v28 = vpop.f32.mrf.mxu1 }
 0x529   : > { %v14524_v23 = vadd.f32 %v10366_v28, %v14374_v10  ;;  %v5126_v28 = vld [vmem:[%s17314_s6 + $0xb0] sm:$0xff] }
 0x52a   : > { %v3340_v24 = vpop.f32.mrf.mxu1  ;;  %5188 = vperm.xlu1 %10957, %v5115_v55   ;;  %5193 = vperm.xlu0 %10956, %v5116_v63  }
 0x52b   : > { %v14533_v40 = vadd.f32 %v3340_v24, %v14377_v42  ;;  %v18231_v24 = vld [vmem:[#allocation83_spill] sm:$0xff] }
 0x52c   : > { %v10369_v47 = vpop.f32.mrf.mxu1  ;;  %10476 = vmatmul.mubr.msk.bf16.gmra.mxu1 %vm18221_vm12, %v18220_v15  ;;  %v18233_v15 = vld [vmem:[#allocation80_spill] sm:$0xff]  ;;  %vm18246_vm12 = vmmov %vm18184_vm0 }
 0x52d   : > { %v14538_v10 = vadd.f32 %v10369_v47, %v14383_v33  ;;  %10479 = vmatprep.mubr.msk.bf16.mxu1 %vm18223_vm11, %v18222_v9  ;;  %v5127_v9 = vld [vmem:[%s17314_s6 + $0xb8] sm:$0xff]  ;;  %vm18248_vm11 = vmmov %vm18184_vm0 }
 0x52e   : > { %v3353_v42 = vpop.f32.mrf.mxu1  ;;  %5198 = vperm.xlu1 %10957, %v5117_v14   ;;  %5203 = vperm.xlu0 %10956, %v5118_v29  }
 0x52f   : > { %v14549_v17 = vadd.f32 %v3353_v42, %v14387_v8  ;;  %v5129_v42 = vld [vmem:[%s17314_s6 + $0xc8] sm:$0xff] }
 0x530   : > { %v10370_v51 = vpop.f32.mrf.mxu1 }
 0x531   : > { %v14552_v33 = vadd.f32 %v10370_v51, %v14392_v57  ;;  %v5130_v51 = vld [vmem:[%s17314_s6 + $0xd0] sm:$0x1] }
 0x532   : > { %v3356_v54 = vpop.f32.mrf.mxu1  ;;  %5208 = vperm.xlu1 %10957, %v5119_v12   ;;  %5213 = vperm.xlu0 %10956, %v5120_v36  }
 0x533   : > { %v14561_v46 = vadd.f32 %v3356_v54, %v14395_v52 }
 0x534   : > { %v10373_v8 = vpop.f32.mrf.mxu1  ;;  %10480 = vmatmul.mubr.msk.bf16.gmra.mxu1 %vm18225_vm1, %v18224_v22  ;;  %vm18250_vm1 = vmmov %vm18184_vm0 }
 0x535   : > { %v14566_v57 = vadd.f32 %v10373_v8, %v14401_v45  ;;  %10483 = vmatprep.mubr.msk.bf16.mxu1 %vm18227_vm13, %v18226_v58  ;;  %v18235_v8 = vld [vmem:[#allocation86_spill] sm:$0xff]  ;;  %vm18252_vm13 = vmmov %vm18184_vm0 }
 0x536   : > { %v3369_v52 = vpop.f32.mrf.mxu1  ;;  %5218 = vperm.xlu1 %10957, %v5121_v11   ;;  %5223 = vperm.xlu0 %10956, %v5122_v34   ;;  %v18237_v58 = vld [vmem:[#allocation14_spill] sm:$0xff]  ;;  %v7463_v11 = vld [vmem:[%s17315_s7 + $0x18] sm:$0xff] }
 0x537   : > { %v14577_v21 = vadd.f32 %v3369_v52, %v14405_v16 }
 0x538   : > { %v10374_v3 = vpop.f32.mrf.mxu1 }
 0x539   : > { %v14580_v45 = vadd.f32 %v10374_v3, %v14408_v20  ;;  %v7462_v3 = vld [vmem:[%s17315_s7 + $0x10] sm:$0xff] }
 0x53a   : > { %v3372_v30 = vpop.f32.mrf.mxu1  ;;  %5228 = vperm.xlu1 %10957, %v5123_v7   ;;  %5233 = vperm.xlu0 %10956, %v5124_v56  }
 0x53b   : > { %v14589_v32 = vadd.f32 %v3372_v30, %v14411_v0 }
 0x53c   : > { %v10377_v16 = vpop.f32.mrf.mxu1  ;;  %10484 = vmatmul.mubr.msk.bf16.gmra.mxu1 %vm18184_vm0, %v18228_v13  ;;  %v18241_v13 = vld [vmem:[#allocation8_spill] sm:$0xff] }
 0x53d   : > { %v14594_v20 = vadd.f32 %v10377_v16, %v14417_v50  ;;  %10491 = vmatprep.mubr.msk.bf16.mxu1 %vm18230_vm3, %v18229_v44  ;;  %v18239_v16 = vld [vmem:[#allocation73_spill] sm:$0xff]  ;;  %v7464_v44 = vld [vmem:[%s17315_s7 + $0x20] sm:$0xff]  ;;  %vm18255_vm3 = vmmov %vm18184_vm0 }
 0x53e   : > { %v3385_v0 = vpop.f32.mrf.mxu1  ;;  %5238 = vperm.xlu1 %10957, %v5125_v48   ;;  %5243 = vperm.xlu0 %10956, %v5126_v28  }
 0x53f   : > { %v14605_v1 = vadd.f32 %v3385_v0, %v14421_v19 }
 0x540   : > { %v10378_v37 = vpop.f32.mrf.mxu1 }
 0x541   : > { %v14608_v50 = vadd.f32 %v10378_v37, %v14424_v31  ;;  %v7467_v37 = vld [vmem:[%s17315_s7 + $0x38] sm:$0xff] }
 0x542   : > { %v3388_v49 = vpop.f32.mrf.mxu1  ;;  %5248 = vperm.xlu1 %10957, %v5127_v9  }
 0x543   : > { %v14620_v19 = vadd.f32 %v3388_v49, %v14430_v60  ;;  %v5128_v60 = vld [vmem:[%s17314_s6 + $0xc0] sm:$0xff] }
 0x544   : > { %v10381_v31 = vpop.f32.mrf.mxu1  ;;  %10492 = vmatmul.mubr.msk.bf16.vlgmr.msra.gmra.mxu1 %vm18232_vm2, %v18231_v24  ;;  %5253 = vperm.xlu0 %10956, %v5128_v60   ;;  %v7468_v24 = vld [vmem:[%s17315_s7 + $0x40] sm:$0xff]  ;;  %vm18257_vm2 = vmmov %vm18184_vm0 }
 0x545   : > { %v14625_v47 = vadd.f32 %v10381_v31, %v14435_v18  ;;  %10495 = vmatprep.mubr.msk.bf16.mxu1 %vm18234_vm10, %v18233_v15  ;;  %10520 = vmatpush3.bf16.msra.mxu1 %v14443_v25  ;;  %v14639_v18 = vld [vmem:[%s17310_s2 + $0x88] sm:$0xff]   ;;  %v18245_v31 = vld [vmem:[#allocation17_spill] sm:$0xff]  ;;  %vm18259_vm10 = vmmov %vm18184_vm0 }
 0x546   : > { %v3401_v55 = vpop.f32.mrf.mxu1  ;;  %10521 = vmatprep.subr.bf16.mxu1 %v11032_v2  ;;  %5258 = vperm.xlu1 %10957, %v5129_v42  }
 0x547   : > { %v14642_v63 = vadd.f32 %v3401_v55, %v14446_v6  ;;  %v7470_v55 = vld [vmem:[%s17315_s7 + $0x50] sm:$0xff] }
 0x548   : > { %v10382_v25 = vpop.f32.mrf.mxu1  ;;  %5263 = vperm.xlu0 %10956, %v5130_v51  }
 0x549   : > { %v14651_v14 = vadd.f32 %v10382_v25, %v14449_v4  ;;  %10522 = vmatpush3.bf16.msra.mxu1 %v11032_v2  ;;  %v7460_v4 = vld [vmem:[%s17315_s7] sm:$0xff]  ;;  %v18243_v2 = vld [vmem:[#allocation7_spill] sm:$0xff]  ;;  %v7471_v25 = vld [vmem:[%s17315_s7 + $0x58] sm:$0xff] }
 0x54a   : > { %v3404_v29 = vpop.f32.mrf.mxu1  ;;  %10551 = vmatprep.subr.bf16.mxu1 %v14639_v18  ;;  %7485 = vperm.xlu1 %10957, %v7460_v4  }
 0x54b   : > { %v14655_v6 = vadd.f32 %v3404_v29, %v14453_v5  ;;  %v7461_v5 = vld [vmem:[%s17315_s7 + $0x8] sm:$0xff]  ;;  %v18247_v29 = vld [vmem:[#allocation77_spill] sm:$0xff] }
 0x54c   : > { %v10385_v54 = vpop.f32.mrf.mxu1  ;;  %10496 = vmatmul.mubr.msk.bf16.gmra.mxu1 %vm18236_vm9, %v18235_v8  ;;  %7490 = vperm.xlu0 %10956, %v7461_v5   ;;  %v7472_v8 = vld [vmem:[%s17315_s7 + $0x60] sm:$0xff]  ;;  %vm18261_vm9 = vmmov %vm18184_vm0 }
 0x54d   : > { %v14660_v22 = vadd.f32 %v10385_v54, %v14459_v41  ;;  %10499 = vmatprep.mubr.msk.bf16.mxu1 %vm18238_vm5, %v18237_v58  ;;  %v18249_v54 = vld [vmem:[#allocation92_spill] sm:$0xff]  ;;  %vm18263_vm5 = vmmov %vm18184_vm0 }
 0x54e   : > { %v3417_v12 = vpop.f32.mrf.mxu1  ;;  %7495 = vperm.xlu1 %10957, %v7462_v3  }
 0x54f   : > { %v14671_v36 = vadd.f32 %v3417_v12, %v14468_v61  ;;  %v7474_v12 = vld [vmem:[%s17315_s7 + $0x70] sm:$0xff] }
 0x550   : > { %v10386_v52 = vpop.f32.mrf.mxu1  ;;  %7500 = vperm.xlu0 %10956, %v7463_v11  }
 0x551   : > { %v14674_v41 = vadd.f32 %v10386_v52, %v14471_v27  ;;  %v7475_v52 = vld [vmem:[%s17315_s7 + $0x78] sm:$0xff] }
 0x552   : > { %v3420_v34 = vpop.f32.mrf.mxu1  ;;  %7505 = vperm.xlu1 %10957, %v7464_v44  }
 0x553   : > { %v14683_v30 = vadd.f32 %v3420_v34, %v14480_v26  ;;  %v7465_v26 = vld [vmem:[%s17315_s7 + $0x28] sm:$0xff]  ;;  %v18251_v34 = vld [vmem:[#allocation12_spill] sm:$0xff] }
 0x554   : > { %v10389_v61 = vpop.f32.mrf.mxu1  ;;  %10500 = vmatmul.mubr.msk.bf16.gmra.mxu1 %vm18240_vm15, %v18239_v16  ;;  %7510 = vperm.xlu0 %10956, %v7465_v26   ;;  %v7476_v16 = vld [vmem:[%s17315_s7 + $0x80] sm:$0xff]  ;;  %vm18265_vm15 = vmmov %vm18184_vm0 }
 0x555   : > { %v14688_v27 = vadd.f32 %v10389_v61, %v14485_v53  ;;  %10503 = vmatprep.mubr.msk.bf16.mxu1 %vm18242_vm8, %v18241_v13  ;;  %v7466_v53 = vld [vmem:[%s17315_s7 + $0x30] sm:$0xff]  ;;  %v18253_v61 = vld [vmem:[#allocation13_spill] sm:$0xff]  ;;  %vm18267_vm8 = vmmov %vm18184_vm0 }
 0x556   : > { %v3433_v7 = vpop.f32.mrf.mxu1  ;;  %7515 = vperm.xlu1 %10957, %v7466_v53  }
 0x557   : > { %v14699_v56 = vadd.f32 %v3433_v7, %v14496_v43  ;;  %v7478_v7 = vld [vmem:[%s17315_s7 + $0x90] sm:$0xff] }
 0x558   : > { %v10390_v0 = vpop.f32.mrf.mxu1  ;;  %7520 = vperm.xlu0 %10956, %v7467_v37  }
 0x559   : > { %v7479_v0 = vld [vmem:[%s17315_s7 + $0x98] sm:$0xff] }
 0x55a   : > { %v3436_v48 = vpop.f32.mrf.mxu1  ;;  %7525 = vperm.xlu1 %10957, %v7468_v24  }
 0x55b   : > { %v14708_v28 = vadd.f32 %v3436_v48, %v14505_v35  ;;  %v7469_v35 = vld [vmem:[%s17315_s7 + $0x48] sm:$0xff]  ;;  %v18254_v48 = vld [vmem:[#allocation36_spill] sm:$0xff] }
 0x55c   : > { %v10397_v49 = vpop.f32.mrf.mxu1  ;;  %10504 = vmatmul.mubr.msk.bf16.gmra.mxu1 %vm18244_vm4, %v18243_v2  ;;  %7530 = vperm.xlu0 %10956, %v7469_v35   ;;  %v7480_v2 = vld [vmem:[%s17315_s7 + $0xa0] sm:$0xff]  ;;  %vm18269_vm4 = vmmov %vm18184_vm0 }
 0x55d   : > { %v14713_v43 = vadd.f32 %v10397_v49, %v14510_v38  ;;  %10507 = vmatprep.mubr.msk.bf16.mxu1 %vm18246_vm12, %v18245_v31  ;;  %v18256_v49 = vld [vmem:[#allocation5_spill] sm:$0xff]  ;;  %vm18271_vm12 = vmmov %vm18184_vm0 }
 0x55e   : > { %v3604_v15 = vpop.f32.mrf.mxu1  ;;  %7535 = vperm.xlu1 %10957, %v7470_v55  }
 0x55f   : > { %v14724_v9 = vadd.f32 %v3604_v15, %v14521_v62  ;;  %v7482_v15 = vld [vmem:[%s17315_s7 + $0xb0] sm:$0x1] }
 0x560   : > { %v10398_v60 = vpop.f32.mrf.mxu1  ;;  %7540 = vperm.xlu0 %10956, %v7471_v25   ;;  %v11035_v25 = vld [vmem:[%s17310_s2 + $0x80] sm:$0xff]  }
 0x561   : > { %v14727_v38 = vadd.f32 %v10398_v60, %v14524_v23  ;;  %v9056_v60 = vld [vmem:[%s17316_s8] sm:$0xff] }
 0x562   : > { %v3607_v42 = vpop.f32.mrf.mxu1  ;;  %7545 = vperm.xlu1 %10957, %v7472_v8  }
 0x563   : > { %v14736_v51 = vadd.f32 %v3607_v42, %v14533_v40  ;;  %v7473_v40 = vld [vmem:[%s17315_s7 + $0x68] sm:$0xff]  ;;  %v18258_v42 = vld [vmem:[#allocation6_spill] sm:$0xff] }
 0x564   : > { %v10401_v62 = vpop.f32.mrf.mxu1  ;;  %10508 = vmatmul.mubr.msk.bf16.gmra.mxu1 %vm18248_vm11, %v18247_v29  ;;  %7550 = vperm.xlu0 %10956, %v7473_v40   ;;  %v18260_v29 = vld [vmem:[#allocation87_spill] sm:$0xff]  ;;  %vm18273_vm11 = vmmov %vm18184_vm0 }
 0x565   : > { %v14741_v23 = vadd.f32 %v10401_v62, %v14538_v10  ;;  %10511 = vmatprep.mubr.msk.bf16.mxu1 %vm18250_vm1, %v18249_v54  ;;  %v9057_v54 = vld [vmem:[%s17316_s8 + $0x8] sm:$0xff]  ;;  %vm18275_vm1 = vmmov %vm18184_vm0 }
 0x566   : > { %v3620_v58 = vpop.f32.mrf.mxu1  ;;  %7555 = vperm.xlu1 %10957, %v7474_v12  }
 0x567   : > { %v14752_v4 = vadd.f32 %v3620_v58, %v14549_v17 }
 0x568   : > { %v10402_v5 = vpop.f32.mrf.mxu1  ;;  %7560 = vperm.xlu0 %10956, %v7475_v52  }
 0x569   : > { %v14755_v10 = vadd.f32 %v10402_v5, %v14552_v33 }
 0x56a   : > { %v3623_v3 = vpop.f32.mrf.mxu1  ;;  %7565 = vperm.xlu1 %10957, %v7476_v16  }
 0x56b   : > { %v14764_v11 = vadd.f32 %v3623_v3, %v14561_v46  ;;  %v7477_v46 = vld [vmem:[%s17315_s7 + $0x88] sm:$0xff] }
 0x56c   : > { %v10405_v17 = vpop.f32.mrf.mxu1  ;;  %10512 = vmatmul.mubr.msk.bf16.gmra.mxu1 %vm18252_vm13, %v18251_v34  ;;  %7570 = vperm.xlu0 %10956, %v7477_v46   ;;  %v18262_v3 = vld [vmem:[#allocation11_spill] sm:$0xff]  ;;  %vm18277_vm13 = vmmov %vm18184_vm0 }
 0x56d   : > { %v14769_v33 = vadd.f32 %v10405_v17, %v14566_v57  ;;  %10515 = vmatprep.mubr.msk.bf16.mxu1 %vm18184_vm0, %v18253_v61  ;;  %v18264_v17 = vld [vmem:[#allocation89_spill] sm:$0xff] }
 0x56e   : > { %v3636_v13 = vpop.f32.mrf.mxu1  ;;  %7575 = vperm.xlu1 %10957, %v7478_v7   ;;  %v18268_v7 = vld [vmem:[#allocation16_spill] sm:$0xff] }
 0x56f   : > { %v14780_v44 = vadd.f32 %v3636_v13, %v14577_v21 }
 0x570   : > { %v10406_v26 = vpop.f32.mrf.mxu1  ;;  %7580 = vperm.xlu0 %10956, %v7479_v0  }
 0x571   : > { %v14783_v57 = vadd.f32 %v10406_v26, %v14580_v45  ;;  %v18266_v26 = vld [vmem:[#allocation90_spill] sm:$0xff] }
 0x572   : > { %v3639_v53 = vpop.f32.mrf.mxu1  ;;  %7585 = vperm.xlu1 %10957, %v7480_v2  }
 0x573   : > { %v14792_v37 = vadd.f32 %v3639_v53, %v14589_v32  ;;  %v7481_v32 = vld [vmem:[%s17315_s7 + $0xa8] sm:$0xff] }
 0x574   : > { %v10409_v21 = vpop.f32.mrf.mxu1  ;;  %10516 = vmatmul.mubr.msk.bf16.gmra.mxu1 %vm18255_vm3, %v18254_v48  ;;  %7590 = vperm.xlu0 %10956, %v7481_v32   ;;  %v18270_v48 = vld [vmem:[#allocation18_spill] sm:$0xff]  ;;  %vm18280_vm3 = vmmov %vm18184_vm0 }
 0x575   : > { %v14797_v45 = vadd.f32 %v10409_v21, %v14594_v20  ;;  %10523 = vmatprep.mubr.msk.bf16.mxu1 %vm18257_vm2, %v18256_v49  ;;  %vm18281_vm2 = vmmov %vm18184_vm0 }
 0x576   : > { %v3652_v31 = vpop.f32.mrf.mxu1  ;;  %7595 = vperm.xlu1 %10957, %v7482_v15  }
 0x577   : > { %v14808_v24 = vadd.f32 %v3652_v31, %v14605_v1 }
 0x578   : > { %v10410_v35 = vpop.f32.mrf.mxu1  ;;  %9062 = vperm.xlu0 %10956, %v9056_v60   ;;  %v18274_v60 = vld [vmem:[#allocation24_spill] sm:$0xff] }
 0x579   : > { %v14811_v20 = vadd.f32 %v10410_v35, %v14608_v50 }
 0x57a   : > { %v3655_v55 = vpop.f32.mrf.mxu1  ;;  %9067 = vperm.xlu1 %10957, %v9057_v54   ;;  %v18278_v54 = vld [vmem:[#allocation39_spill] sm:$0xff] }
 0x57b   : > { %v14823_v1 = vadd.f32 %v3655_v55, %v14620_v19  ;;  %v9058_v19 = vld [vmem:[%s17316_s8 + $0x10] sm:$0xff]  ;;  %v18276_v55 = vld [vmem:[#allocation35_spill] sm:$0xff] }
 0x57c   : > { %v10413_v50 = vpop.f32.mrf.mxu1  ;;  %10524 = vmatmul.mubr.msk.bf16.vlgmr.msra.gmra.mxu1 %vm18259_vm10, %v18258_v42  ;;  %9072 = vperm.xlu0 %10956, %v9058_v19   ;;  %v18279_v19 = vld [vmem:[#allocation10_spill] sm:$0xff]  ;;  %vm18283_vm10 = vmmov %vm18184_vm0 }
 0x57d   : > { %v14828_v62 = vadd.f32 %v10413_v50, %v14625_v47  ;;  %10527 = vmatprep.mubr.msk.bf16.mxu1 %vm18261_vm9, %v18260_v29  ;;  %10552 = vmatpush3.bf16.msra.mxu1 %v14639_v18  ;;  %v9059_v18 = vld [vmem:[%s17316_s8 + $0x18] sm:$0x1f]  ;;  %vm18285_vm9 = vmmov %vm18184_vm0 }
 0x57e   : > { %v3668_v8 = vpop.f32.mrf.mxu1  ;;  %10553 = vmatprep.subr.bf16.mxu1 %v11035_v25  ;;  %9077 = vperm.xlu1 %10957, %v9059_v18  }
 0x57f   : > { %v14840_v40 = vadd.f32 %v3668_v8, %v14642_v63 }
 0x580   : > { %v10414_v47 = vpop.f32.mrf.mxu1 }
 0x581   : > { %v14846_v58 = vadd.f32 %v10414_v47, %v14651_v14  ;;  %10554 = vmatpush3.bf16.msra.mxu1 %v11035_v25 }
 0x582   : > { %v3671_v5 = vpop.f32.mrf.mxu1 }
 0x583   : > { %v14849_v12 = vadd.f32 %v3671_v5, %v14655_v6 }
 0x584   : > { %v10417_v52 = vpop.f32.mrf.mxu1  ;;  %10528 = vmatmul.mubr.msk.bf16.gmra.mxu1 %vm18263_vm5, %v18262_v3  ;;  %vm18287_vm5 = vmmov %vm18184_vm0 }
 0x585   : > { %v14854_v63 = vadd.f32 %v10417_v52, %v14660_v22  ;;  %10531 = vmatprep.mubr.msk.bf16.mxu1 %vm18265_vm15, %v18264_v17  ;;  %v18282_v52 = vld [vmem:[#allocation40_spill] sm:$0xff]  ;;  %vm18289_vm15 = vmmov %vm18184_vm0 }
 0x586   : > { %v3684_v34 = vpop.f32.mrf.mxu1 }
 0x587   : > { %v14859_v14 = vadd.f32 %v3684_v34, %v14671_v36 }
 0x588   : > { %v10418_v61 = vpop.f32.mrf.mxu1 }
 0x589   : > { %v14862_v16 = vadd.f32 %v10418_v61, %v14674_v41 }
 0x58a   : > { %v3687_v6 = vpop.f32.mrf.mxu1 }
 0x58b   : > { %v14865_v46 = vadd.f32 %v3687_v6, %v14683_v30  ;;  %v18286_v6 = vld [vmem:[#allocation43_spill] sm:$0xff] }
 0x58c   : > { %v10421_v13 = vpop.f32.mrf.mxu1  ;;  %10532 = vmatmul.mubr.msk.bf16.gmra.mxu1 %vm18267_vm8, %v18266_v26  ;;  %vm18291_vm8 = vmmov %vm18184_vm0 }
 0x58d   : > { %v14870_v22 = vadd.f32 %v10421_v13, %v14688_v27  ;;  %10535 = vmatprep.mubr.msk.bf16.mxu1 %vm18269_vm4, %v18268_v7  ;;  %v18272_v27 = vld [vmem:[#allocation21_spill] sm:$0xff]  ;;  %vm18293_vm4 = vmmov %vm18184_vm0 }
 0x58e   : > { %v3700_v36 = vpop.f32.mrf.mxu1 }
 0x58f   : > { %v14875_v0 = vadd.f32 %v3700_v36, %v14699_v56 }
 0x590   : > { %v10422_v41 = vpop.f32.mrf.mxu1 }
 0x591   : > { %v18288_v41 = vld [vmem:[#allocation41_spill] sm:$0xff] }
 0x592   : > { %v3703_v53 = vpop.f32.mrf.mxu1 }
 0x593   : > { %v14878_v21 = vadd.f32 %v3703_v53, %v14708_v28  ;;  %v18290_v53 = vld [vmem:[#allocation75_spill] sm:$0xff] }
 0x594   : > { %v10429_v30 = vpop.f32.mrf.mxu1  ;;  %10536 = vmatmul.mubr.msk.bf16.gmra.mxu1 %vm18271_vm12, %v18270_v48  ;;  %vm18295_vm12 = vmmov %vm18184_vm0 }
 0x595   : > { %v14883_v49 = vadd.f32 %v10429_v30, %v14713_v43  ;;  %10539 = vmatprep.mubr.msk.bf16.mxu1 %vm18273_vm11, %v18272_v27  ;;  %vm18297_vm11 = vmmov %vm18184_vm0 }
 0x596   : > { %v3955_v2 = vpop.f32.mrf.mxu1 }
 0x597   : > { %v14888_v32 = vadd.f32 %v3955_v2, %v14724_v9 }
 0x598   : > { %v10430_v56 = vpop.f32.mrf.mxu1 }
 0x599   : > { %v14891_v31 = vadd.f32 %v10430_v56, %v14727_v38  ;;  %v18292_v56 = vld [vmem:[#allocation42_spill] sm:$0xff] }
 0x59a   : > { %v3958_v28 = vpop.f32.mrf.mxu1 }
 0x59b   : > { %v14894_v35 = vadd.f32 %v3958_v28, %v14736_v51  ;;  %v18294_v28 = vld [vmem:[#allocation44_spill] sm:$0xff] }
 0x59c   : > { %v10433_v15 = vpop.f32.mrf.mxu1  ;;  %10540 = vmatmul.mubr.msk.bf16.gmra.mxu1 %vm18275_vm1, %v18274_v60  ;;  %vm18299_vm1 = vmmov %vm18184_vm0 }
 0x59d   : > { %v14899_v43 = vadd.f32 %v10433_v15, %v14741_v23  ;;  %10543 = vmatprep.mubr.msk.bf16.mxu1 %vm18277_vm13, %v18276_v55  ;;  %vm18301_vm13 = vmmov %vm18184_vm0 }
 0x59e   : > { %v3971_v9 = vpop.f32.mrf.mxu1 }
 0x59f   : > { %v14904_v25 = vadd.f32 %v3971_v9, %v14752_v4 }
 0x5a0   : > { %v10434_v38 = vpop.f32.mrf.mxu1 }
 0x5a1   : > { %v14907_v50 = vadd.f32 %v10434_v38, %v14755_v10  ;;  %v18296_v38 = vld [vmem:[#allocation2_spill] sm:$0xff] }
 0x5a2   : > { %v3974_v51 = vpop.f32.mrf.mxu1 }
 0x5a3   : > { %v14910_v42 = vadd.f32 %v3974_v51, %v14764_v11  ;;  %v18298_v51 = vld [vmem:[#allocation76_spill] sm:$0xff] }
 0x5a4   : > { %v10437_v29 = vpop.f32.mrf.mxu1  ;;  %10544 = vmatmul.mubr.msk.bf16.gmra.mxu1 %vm18184_vm0, %v18278_v54 }
 0x5a5   : > { %v14915_v23 = vadd.f32 %v10437_v29, %v14769_v33  ;;  %10547 = vmatprep.mubr.msk.bf16.mxu1 %vm18280_vm3, %v18279_v19  ;;  %vm18304_vm3 = vmmov %vm18184_vm0 }
 0x5a6   : > { %v3987_v4 = vpop.f32.mrf.mxu1 }
 0x5a7   : > { %v14920_v8 = vadd.f32 %v3987_v4, %v14780_v44 }
 0x5a8   : > { %v10438_v10 = vpop.f32.mrf.mxu1 }
 0x5a9   : > { %v14923_v47 = vadd.f32 %v10438_v10, %v14783_v57 }
 0x5aa   : > { %v3990_v11 = vpop.f32.mrf.mxu1 }
 0x5ab   : > { %v14926_v18 = vadd.f32 %v3990_v11, %v14792_v37 }
 0x5ac   : > { %v10441_v5 = vpop.f32.mrf.mxu1  ;;  %10548 = vmatmul.mubr.msk.bf16.gmra.mxu1 %vm18281_vm2, %v14155_v39  ;;  %v18284_v39 = vld [vmem:[#allocation19_spill] sm:$0xff]  ;;  %vm18306_vm2 = vmmov %vm18184_vm0 }
 0x5ad   : > { %v14931_v33 = vadd.f32 %v10441_v5, %v14797_v45  ;;  %10555 = vmatprep.mubr.msk.bf16.mxu1 %vm18283_vm10, %v18282_v52  ;;  %v18302_v5 = vld [vmem:[#allocation45_spill] sm:$0xff]  ;;  %vm18308_vm10 = vmmov %vm18184_vm0 }
 0x5ae   : > { %v4003_v44 = vpop.f32.mrf.mxu1 }
 0x5af   : > { %v14936_v3 = vadd.f32 %v4003_v44, %v14808_v24 }
 0x5b0   : > { %v10442_v57 = vpop.f32.mrf.mxu1 }
 0x5b1   : > { %v14939_v17 = vadd.f32 %v10442_v57, %v14811_v20 }
 0x5b2   : > { %v4006_v37 = vpop.f32.mrf.mxu1 }
 0x5b3   : > { %v14942_v34 = vadd.f32 %v4006_v37, %v14823_v1  ;;  %v18303_v37 = vld [vmem:[#allocation22_spill] sm:$0xff] }
 0x5b4   : > { %v10445_v61 = vpop.f32.mrf.mxu1  ;;  %10556 = vmatmul.mubr.msk.bf16.vlgmr.msra.gmra.mxu1 %vm18285_vm9, %v18284_v39  ;;  %v18305_v39 = vld [vmem:[#allocation82_spill] sm:$0xff]  ;;  %vm18316_vm9 = vmmov %vm18184_vm0 }
 0x5b5   : > { %v14947_v45 = vadd.f32 %v10445_v61, %v14828_v62  ;;  %10559 = vmatprep.mubr.msk.bf16.mxu1 %vm18287_vm5, %v18286_v6  ;;  %vm18317_vm5 = vmmov %vm18184_vm0 }
 0x5b6   : > { %v4019_v24 = vpop.f32.mrf.mxu1 }
 0x5b7   : > { %v14952_v13 = vadd.f32 %v4019_v24, %v14840_v40 }
 0x5b8   : > { %v10446_v20 = vpop.f32.mrf.mxu1 }
 0x5b9   : > { %v14955_v26 = vadd.f32 %v10446_v20, %v14846_v58 }
 0x5ba   : > { %v4022_v1 = vpop.f32.mrf.mxu1 }
 0x5bb   : > { %v14958_v7 = vadd.f32 %v4022_v1, %v14849_v12  ;;  %v18307_v1 = vld [vmem:[#allocation4_spill] sm:$0xff] }
 0x5bc   : > { %v10449_v36 = vpop.f32.mrf.mxu1  ;;  %10560 = vmatmul.mubr.msk.bf16.gmra.mxu1 %vm18289_vm15, %v18288_v41  ;;  %vm18318_vm15 = vmmov %vm18184_vm0 }
 0x5bd   : > { %v14963_v62 = vadd.f32 %v10449_v36, %v14854_v63  ;;  %10563 = vmatprep.mubr.msk.bf16.mxu1 %vm18291_vm8, %v18290_v53  ;;  %vm18319_vm8 = vmmov %vm18184_vm0 }
 0x5be   : > { %v4035_v40 = vpop.f32.mrf.mxu1 }
 0x5bf   : > { %v4085_v30 = vadd.f32 %v4035_v40, %v14859_v14  ;;  %v11036_v14 = vld [vmem:[%s17311_s3 + $0x10] sm:$0xff]  }
 0x5c0   : > { %v10450_v48 = vpop.f32.mrf.mxu1  ;;  %10585 = vmatprep.subr.bf16.mxu0 %v11036_v14 }
 0x5c1   : > { %v4088_v58 = vadd.f32 %v10450_v48, %v14862_v16  ;;  %10586 = vmatpush3.bf16.msra.mxu0 %v11036_v14 }
 0x5c2   : > { %v4038_v27 = vpop.f32.mrf.mxu1 }
 0x5c3   : > { %v14970_v12 = vadd.f32 %v4038_v27, %v14865_v46 }
 0x5c4   : > { %v10453_v2 = vpop.f32.mrf.mxu1  ;;  %10564 = vmatmul.mubr.msk.bf16.gmra.mxu1 %vm18293_vm4, %v18292_v56  ;;  %vm18320_vm4 = vmmov %vm18184_vm0 }
 0x5c5   : > { %v4091_v63 = vadd.f32 %v10453_v2, %v14870_v22  ;;  %10567 = vmatprep.mubr.msk.bf16.mxu1 %vm18295_vm12, %v18294_v28  ;;  %vm18321_vm12 = vmmov %vm18184_vm0 }
 0x5c6   : > { %v4051_v15 = vpop.f32.mrf.mxu1 }
 0x5c7   : > { %v4089_v60 = vadd.f32 %v4051_v15, %v14875_v0 }
 0x5c8   : > { %v10454_v16 = vpop.f32.mrf.mxu1 }
 0x5ca   : > { %v4054_v46 = vpop.f32.mrf.mxu1 }
 0x5cb   : > { %v14982_v55 = vadd.f32 %v4054_v46, %v14878_v21  ;;  %v18300_v21 = vld [vmem:[#allocation3_spill] sm:$0xff] }
 0x5cc   : > { %v10461_v9 = vpop.f32.mrf.mxu1  ;;  %10568 = vmatmul.mubr.msk.bf16.gmra.mxu1 %vm18297_vm11, %v18296_v38  ;;  %vm18322_vm11 = vmmov %vm18184_vm0 }
 0x5cd   : > { %v4417_v22 = vadd.f32 %v10461_v9, %v14883_v49  ;;  %10571 = vmatprep.mubr.msk.bf16.mxu1 %vm18299_vm1, %v18298_v51  ;;  %vm18323_vm1 = vmmov %vm18184_vm0 }
 0x5ce   : > { %v4305_v0 = vpop.f32.mrf.mxu1 }
 0x5cf   : > { %v4415_v29 = vadd.f32 %v4305_v0, %v14888_v32 }
 0x5d0   : > { %v10462_v54 = vpop.f32.mrf.mxu1 }
 0x5d1   : > { %v4418_v19 = vadd.f32 %v10462_v54, %v14891_v31 }
 0x5d2   : > { %v14991_v4 = vpop.f32.mrf.mxu1 }
 0x5d4   : > { %v10465_v10 = vpop.f32.mrf.mxu1  ;;  %10572 = vmatmul.mubr.msk.bf16.gmra.mxu1 %vm18301_vm13, %v18300_v21  ;;  %vm18324_vm13 = vmmov %vm18184_vm0 }
 0x5d5   : > { %v4421_v11 = vadd.f32 %v10465_v10, %v14899_v43  ;;  %10575 = vmatprep.mubr.msk.bf16.mxu1 %vm18184_vm0, %v18302_v5 }
 0x5d6   : > { %v4321_v49 = vpop.f32.mrf.mxu1 }
 0x5d7   : > { %v4419_v52 = vadd.f32 %v4321_v49, %v14904_v25 }
 0x5d8   : > { %v10466_v44 = vpop.f32.mrf.mxu1 }
 0x5d9   : > { %v4422_v32 = vadd.f32 %v10466_v44, %v14907_v50 }
 0x5da   : > { %v15000_v57 = vpop.f32.mrf.mxu1 }
 0x5dc   : > { %v10469_v31 = vpop.f32.mrf.mxu1  ;;  %10576 = vmatmul.mubr.msk.bf16.gmra.mxu1 %vm18304_vm3, %v18303_v37  ;;  %vm18325_vm3 = vmmov %vm18184_vm0 }
 0x5dd   : > { %v4425_v61 = vadd.f32 %v10469_v31, %v14915_v23  ;;  %10579 = vmatprep.mubr.msk.bf16.mxu1 %vm18306_vm2, %v18305_v39  ;;  %vm18326_vm2 = vmmov %vm18184_vm0 }
 0x5de   : > { %v4337_v43 = vpop.f32.mrf.mxu1 }
 0x5df   : > { %v4423_v6 = vadd.f32 %v4337_v43, %v14920_v8 }
 0x5e0   : > { %v10470_v24 = vpop.f32.mrf.mxu1 }
 0x5e1   : > { %v4426_v25 = vadd.f32 %v10470_v24, %v14923_v47 }
 0x5e2   : > { %v15009_v20 = vpop.f32.mrf.mxu1 }
 0x5e4   : > { %v10473_v50 = vpop.f32.mrf.mxu1  ;;  %10580 = vmatmul.mubr.msk.bf16.gmra.mxu1 %vm18308_vm10, %v18307_v1  ;;  %vm18327_vm10 = vmmov %vm18184_vm0 }
 0x5e5   : > { %v4429_v36 = vadd.f32 %v10473_v50, %v14931_v33 }
 0x5e6   : > { %v4353_v41 = vpop.f32.mrf.mxu1 }
 0x5e7   : > { %v4427_v23 = vadd.f32 %v4353_v41, %v14936_v3 }
 0x5e8   : > { %v10474_v53 = vpop.f32.mrf.mxu1 }
 0x5e9   : > { %v4430_v40 = vadd.f32 %v10474_v53, %v14939_v17 }
 0x5ea   : > { %v15016_v48 = vpop.f32.mrf.mxu1 }
 0x5ec   : > { %v10477_v8 = vpop.f32.mrf.mxu1 }
 0x5ed   : > { %v4433_v27 = vadd.f32 %v10477_v8, %v14947_v45 }
 0x5ee   : > { %v4369_v47 = vpop.f32.mrf.mxu1 }
 0x5ef   : > { %v4431_v2 = vadd.f32 %v4369_v47, %v14952_v13 }
 0x5f0   : > { %v10478_v56 = vpop.f32.mrf.mxu1 }
 0x5f1   : > { %v4434_v28 = vadd.f32 %v10478_v56, %v14955_v26 }
 0x5f2   : > { %v15021_v15 = vpop.f32.mrf.mxu1 }
 0x5f4   : > { %v10481_v33 = vpop.f32.mrf.mxu1 }
 0x5f5   : > { %v4437_v14 = vadd.f32 %v10481_v33, %v14963_v62 }
 0x5f6   : > { %v4385_v3 = vpop.f32.mrf.mxu1 }
 0x5f7   : > { %v4435_v16 = vadd.f32 %v4385_v3, %v4085_v30 }
 0x5f8   : > { %v10482_v46 = vpop.f32.mrf.mxu1 }
 0x5f9   : > { %v4438_v17 = vadd.f32 %v10482_v46, %v4088_v58 }
 0x5fa   : > { %v15024_v9 = vpop.f32.mrf.mxu1 }
 0x5fc   : > { %v10485_v38 = vpop.f32.mrf.mxu1 }
 0x5fd   : > { %v4441_v51 = vadd.f32 %v10485_v38, %v4091_v63 }
 0x5fe   : > { %v4401_v45 = vpop.f32.mrf.mxu1 }
 0x5ff   : > { %v4439_v0 = vadd.f32 %v4401_v45, %v4089_v60 }
 0x600   : > { %v10486_v54 = vpop.f32.mrf.mxu1 }
 0x602   : > { %v15026_v13 = vpop.f32.mrf.mxu1 }
 0x604   : > { %v10493_v10 = vpop.f32.mrf.mxu1 }
 0x605   : > { %v4683_v26 = vadd.f32 %v10493_v10, %v4417_v22 }
 0x606   : > { %v4571_v21 = vpop.f32.mrf.mxu1 }
 0x607   : > { %v4681_v5 = vadd.f32 %v4571_v21, %v4415_v29 }
 0x608   : > { %v10494_v49 = vpop.f32.mrf.mxu1 }
 0x609   : > { %v4684_v44 = vadd.f32 %v10494_v49, %v4418_v19 }
 0x60a   : > { %v15028_v62 = vpop.f32.mrf.mxu1 }
 0x60c   : > { %v10497_v30 = vpop.f32.mrf.mxu1 }
 0x60d   : > { %v4687_v31 = vadd.f32 %v10497_v30, %v4421_v11 }
 0x60e   : > { %v4587_v58 = vpop.f32.mrf.mxu1 }
 0x60f   : > { %v4685_v37 = vadd.f32 %v4587_v58, %v4419_v52 }
 0x610   : > { %v10498_v39 = vpop.f32.mrf.mxu1 }
 0x611   : > { %v4688_v43 = vadd.f32 %v10498_v39, %v4422_v32 }
 0x612   : > { %v15030_v63 = vpop.f32.mrf.mxu1 }
 0x614   : > { %v10501_v60 = vpop.f32.mrf.mxu1 }
 0x615   : > { %v4691_v24 = vadd.f32 %v10501_v60, %v4425_v61 }
 0x616   : > { %v4603_v50 = vpop.f32.mrf.mxu1 }
 0x617   : > { %v4689_v1 = vadd.f32 %v4603_v50, %v4423_v6 }
 0x618   : > { %v10502_v41 = vpop.f32.mrf.mxu1 }
 0x619   : > { %v4692_v22 = vadd.f32 %v10502_v41, %v4426_v25 }
 0x61a   : > { %v15032_v53 = vpop.f32.mrf.mxu1 }
 0x61c   : > { %v10505_v29 = vpop.f32.mrf.mxu1 }
 0x61d   : > { %v4695_v19 = vadd.f32 %v10505_v29, %v4429_v36 }
 0x61e   : > { %v4619_v8 = vpop.f32.mrf.mxu1 }
 0x61f   : > { %v4693_v47 = vadd.f32 %v4619_v8, %v4427_v23 }
 0x620   : > { %v10506_v56 = vpop.f32.mrf.mxu1 }
 0x621   : > { %v4696_v11 = vadd.f32 %v10506_v56, %v4430_v40 }
 0x622   : > { %v15034_v33 = vpop.f32.mrf.mxu1 }
 0x624   : > { %v10509_v52 = vpop.f32.mrf.mxu1 }
 0x625   : > { %v4699_v32 = vadd.f32 %v10509_v52, %v4433_v27 }
 0x626   : > { %v4635_v3 = vpop.f32.mrf.mxu1 }
 0x627   : > { %v4697_v46 = vadd.f32 %v4635_v3, %v4431_v2 }
 0x628   : > { %v10510_v38 = vpop.f32.mrf.mxu1 }
 0x629   : > { %v4700_v61 = vadd.f32 %v10510_v38, %v4434_v28 }
 0x62a   : > { %v15036_v45 = vpop.f32.mrf.mxu1 }
 0x62c   : > { %v10513_v6 = vpop.f32.mrf.mxu1 }
 0x62d   : > { %v4703_v25 = vadd.f32 %v10513_v6, %v4437_v14 }
 0x62e   : > { %v4651_v54 = vpop.f32.mrf.mxu1 }
 0x62f   : > { %v4701_v10 = vadd.f32 %v4651_v54, %v4435_v16 }
 0x630   : > { %v10514_v21 = vpop.f32.mrf.mxu1 }
 0x631   : > { %v4704_v36 = vadd.f32 %v10514_v21, %v4438_v17 }
 0x632   : > { %v15038_v49 = vpop.f32.mrf.mxu1 }
 0x634   : > { %v10517_v23 = vpop.f32.mrf.mxu1 }
 0x635   : > { %v4707_v40 = vadd.f32 %v10517_v23, %v4441_v51 }
 0x636   : > { %v4667_v30 = vpop.f32.mrf.mxu1 }
 0x637   : > { %v4705_v58 = vadd.f32 %v4667_v30, %v4439_v0 }
 0x638   : > { %v10518_v39 = vpop.f32.mrf.mxu1 }
 0x63a   : > { %v15040_v27 = vpop.f32.mrf.mxu1 }
 0x63b   : > { %18309 = vst [vmem:[#allocation78_spill] sm:$0xff] %v15040_v27 }
 0x63c   : > { %v10525_v2 = vpop.f32.mrf.mxu1 }
 0x63d   : > { %v15042_v60 = vadd.f32 %v10525_v2, %v4683_v26 }
 0x63e   : > { %v4782_v28 = vpop.f32.mrf.mxu1 }
 0x63f   : > { %v4892_v50 = vadd.f32 %v4782_v28, %v4681_v5 }
 0x640   : > { %v10526_v41 = vpop.f32.mrf.mxu1 }
 0x641   : > { %v15044_v14 = vadd.f32 %v10526_v41, %v4684_v44 }
 0x642   : > { %v4785_v16 = vpop.f32.mrf.mxu1 }
 0x644   : > { %v10529_v29 = vpop.f32.mrf.mxu1 }
 0x645   : > { %v15046_v17 = vadd.f32 %v10529_v29, %v4687_v31 }
 0x646   : > { %v4798_v8 = vpop.f32.mrf.mxu1 }
 0x647   : > { %v15048_v56 = vadd.f32 %v4798_v8, %v4685_v37 }
 0x648   : > { %v10530_v51 = vpop.f32.mrf.mxu1 }
 0x649   : > { %v15050_v0 = vadd.f32 %v10530_v51, %v4688_v43 }
 0x64a   : > { %v15052_v52 = vpop.f32.mrf.mxu1 }
 0x64c   : > { %v10533_v3 = vpop.f32.mrf.mxu1 }
 0x64d   : > { %v15054_v26 = vadd.f32 %v10533_v3, %v4691_v24 }
 0x64e   : > { %v4814_v38 = vpop.f32.mrf.mxu1 }
 0x64f   : > { %v15056_v5 = vadd.f32 %v4814_v38, %v4689_v1  ;;  %v15072_v1 = vpop.permute.xlu0 %5133 }
 0x650   : > { %v10534_v44 = vpop.f32.mrf.mxu1 }
 0x651   : > { %v15058_v6 = vadd.f32 %v10534_v44, %v4692_v22 }
 0x652   : > { %v15060_v54 = vpop.f32.mrf.mxu1 }
 0x653   : > { %v15082_v8 = vpop.permute.xlu0 %5138 }
 0x654   : > { %v10537_v31 = vpop.f32.mrf.mxu1  ;;  %18311 = vst [vmem:[#allocation26_spill] sm:$0xff] %v15082_v8 }
 0x655   : > { %v15062_v21 = vadd.f32 %v10537_v31, %v4695_v19 }
 0x656   : > { %v4830_v37 = vpop.f32.mrf.mxu1 }
 0x657   : > { %v15064_v23 = vadd.f32 %v4830_v37, %v4693_v47  ;;  %v15080_v47 = vpop.permute.xlu1 %5143  ;;  %v15092_v31 = vpop.permute.xlu0 %5153 }
 0x658   : > { %v10538_v43 = vpop.f32.mrf.mxu1  ;;  %18310 = vst [vmem:[#allocation81_spill] sm:$0xff] %v15080_v47 }
 0x659   : > { %v15066_v30 = vadd.f32 %v10538_v43, %v4696_v11 }
 0x65a   : > { %v15068_v39 = vpop.f32.mrf.mxu1 }
 0x65b   : > { %v15088_v44 = vpop.permute.xlu1 %5148 }
 0x65c   : > { %v10541_v24 = vpop.f32.mrf.mxu1  ;;  %18312 = vst [vmem:[#allocation84_spill] sm:$0xff] %v15088_v44 }
 0x65d   : > { %v15070_v2 = vadd.f32 %v10541_v24, %v4699_v32 }
 0x65e   : > { %v4846_v22 = vpop.f32.mrf.mxu1 }
 0x65f   : > { %v15074_v28 = vadd.f32 %v4846_v22, %v4697_v46  ;;  %v15098_v22 = vpop.permute.xlu1 %5158 }
 0x660   : > { %v10542_v41 = vpop.f32.mrf.mxu1 }
 0x661   : > { %v15076_v29 = vadd.f32 %v10542_v41, %v4700_v61  ;;  %v15102_v41 = vpop.permute.xlu0 %5163 }
 0x662   : > { %v15078_v19 = vpop.f32.mrf.mxu1 }
 0x664   : > { %v10545_v11 = vpop.f32.mrf.mxu1 }
 0x665   : > { %v15084_v51 = vadd.f32 %v10545_v11, %v4703_v25  ;;  %v15110_v59 = vpop.permute.xlu0 %5173 }
 0x666   : > { %v4862_v3 = vpop.f32.mrf.mxu1 }
 0x667   : > { %v15086_v32 = vadd.f32 %v4862_v3, %v4701_v10 }
 0x668   : > { %v10546_v38 = vpop.f32.mrf.mxu1 }
 0x669   : > { %v15090_v46 = vadd.f32 %v10546_v38, %v4704_v36  ;;  %v4416_v36 = vadd.f32 %v14991_v4, %v14894_v35  ;;  %v15108_v38 = vpop.permute.xlu1 %5168 }
 0x66a   : > { %v15094_v61 = vpop.f32.mrf.mxu1 }
 0x66c   : > { %v10549_v37 = vpop.f32.mrf.mxu1 }
 0x66d   : > { %v15096_v43 = vadd.f32 %v10549_v37, %v4707_v40  ;;  %v4682_v37 = vadd.f32 %v15028_v62, %v4416_v36  ;;  %v4420_v62 = vadd.f32 %v15000_v57, %v14910_v42 }
 0x66e   : > { %v4878_v24 = vpop.f32.mrf.mxu1 }
 0x66f   : > { %18313 = vst [vmem:[#allocation38_spill] sm:$0xff] %v15096_v43  ;;  %v15100_v25 = vadd.f32 %v4878_v24, %v4705_v58  ;;  %v4893_v24 = vadd.f32 %v4785_v16, %v4682_v37  ;;  %v4686_v36 = vadd.f32 %v15030_v63, %v4420_v62 }
 0x670   : > { %v10550_v10 = vpop.f32.mrf.mxu1 }
 0x671   : > { %18314 = vst [vmem:[#allocation91_spill] sm:$0xff] %v15100_v25 }
 0x672   : > { %v15104_v11 = vpop.f32.mrf.mxu1 }
 0x673   : > { %18315 = vst [vmem:[#allocation25_spill] sm:$0xff] %v15104_v11  ;;  %v15118_v11 = vpop.permute.xlu1 %5178 }
 0x674   : > { %v10557_v3 = vpop.f32.mrf.mxu1 }
 0x675   : > { %v15116_v25 = vadd.f32 %v10557_v3, %v15042_v60 }
 0x676   : > { %v4967_v40 = vpop.f32.mrf.mxu1 }
 0x677   : > { %v15113_v43 = vadd.f32 %v4967_v40, %v4892_v50  ;;  %v15129_v50 = vpop.permute.xlu0 %5183  ;;  %v5268_v60 = vmul.f32 %v15080_v47, %v15116_v25  ;;  %v4897_v47 = vadd.f32 %v15052_v52, %v4686_v36 }
 0x678   : > { %v10558_v58 = vpop.f32.mrf.mxu1 }
 0x679   : > { %v5266_v35 = vmul.f32 %v15072_v1, %v15113_v43  ;;  %v15123_v4 = vadd.f32 %v10558_v58, %v15044_v14 }
 0x67a   : > { %v4970_v10 = vpop.f32.mrf.mxu1 }
 0x67b   : > { %v15125_v27 = vadd.f32 %v4970_v10, %v4893_v24  ;;  %v5293_v14 = vsel %vm18316_vm9, %v5266_v35, 0.0  ;;  %v5269_v37 = vmul.f32 %v15088_v44, %v15123_v4  ;;  %v15143_v10 = vpop.permute.xlu1 %5188  ;;  %v15152_v62 = vpop.permute.xlu0 %5193  ;;  %vm18328_vm9 = vmmov %vm18184_vm0 }
 0x67c   : > { %v10561_v16 = vpop.f32.mrf.mxu1 }
 0x67d   : > { %v5267_v3 = vmul.f32 %v15082_v8, %v15125_v27  ;;  %v5296_v8 = vsel %vm18318_vm15, %v5268_v60, 0.0  ;;  %v15148_v63 = vadd.f32 %v10561_v16, %v15046_v17  ;;  %v4424_v17 = vadd.f32 %v15009_v20, %v14926_v18  ;;  %vm18332_vm15 = vmmov %vm18184_vm0 }
 0x67e   : > { %v4983_v40 = vpop.f32.mrf.mxu1 }
 0x67f   : > { %v5294_v58 = vsel %vm18317_vm5, %v5267_v3, 0.0  ;;  %v15141_v42 = vadd.f32 %v4983_v40, %v15048_v56  ;;  %v5298_v56 = vsel %vm18319_vm8, %v5269_v37, 0.0  ;;  %v5272_v16 = vmul.f32 %v15102_v41, %v15148_v63  ;;  %v15176_v20 = vpop.permute.xlu0 %5203  ;;  %vm18330_vm5 = vmmov %vm18184_vm0 }
 0x680   : > { %v5295_v57 = vadd.f32 %v5294_v58, %v5293_v14  ;;  %v10562_v24 = vpop.f32.mrf.mxu1  ;;  %vm18333_vm8 = vmmov %vm18184_vm0 }
 0x681   : > { %v5270_v35 = vmul.f32 %v15092_v31, %v15141_v42  ;;  %v15156_v40 = vadd.f32 %v10562_v24, %v15050_v0  ;;  %v4690_v0 = vadd.f32 %v15032_v53, %v4424_v17 }
 0x682   : > { %v5297_v3 = vadd.f32 %v5296_v8, %v5295_v57  ;;  %v4986_v44 = vpop.f32.mrf.mxu1  ;;  %v15168_v57 = vpop.permute.xlu1 %5198 }
 0x683   : > { %v15158_v14 = vadd.f32 %v4986_v44, %v4897_v47  ;;  %v5300_v60 = vsel %vm18320_vm4, %v5270_v35, 0.0  ;;  %v5273_v47 = vmul.f32 %v15108_v38, %v15156_v40  ;;  %vm18335_vm4 = vmmov %vm18184_vm0 }
 0x684   : > { %v5299_v52 = vadd.f32 %v5298_v56, %v5297_v3  ;;  %v10565_v36 = vpop.f32.mrf.mxu1  ;;  %v4901_v3 = vadd.f32 %v15060_v54, %v4690_v0  ;;  %v5304_v56 = vsel %vm18322_vm11, %v5272_v16, 0.0  ;;  %v4428_v54 = vadd.f32 %v15016_v48, %v14942_v34  ;;  %vm18338_vm11 = vmmov %vm18184_vm0 }
 0x685   : > { %v5271_v8 = vmul.f32 %v15098_v22, %v15158_v14  ;;  %v15181_v53 = vadd.f32 %v10565_v36, %v15054_v26 }
 0x686   : > { %v5301_v58 = vadd.f32 %v5300_v60, %v5299_v52  ;;  %v4999_v37 = vpop.f32.mrf.mxu1  ;;  %v15193_v16 = vpop.permute.xlu1 %5208 }
 0x687   : > { %v5302_v44 = vsel %vm18321_vm12, %v5271_v8, 0.0  ;;  %v15174_v18 = vadd.f32 %v4999_v37, %v15056_v5  ;;  %v5306_v8 = vsel %vm18323_vm1, %v5273_v47, 0.0  ;;  %v5276_v26 = vmul.f32 %v15129_v50, %v15181_v53  ;;  %v15200_v47 = vpop.permute.xlu0 %5213  ;;  %vm18337_vm12 = vmmov %vm18184_vm0 }
 0x688   : > { %v5303_v24 = vadd.f32 %v5302_v44, %v5301_v58  ;;  %v10566_v35 = vpop.f32.mrf.mxu1  ;;  %vm18340_vm1 = vmmov %vm18184_vm0 }
 0x689   : > { %v5274_v52 = vmul.f32 %v15110_v59, %v15174_v18  ;;  %v15187_v5 = vadd.f32 %v10566_v35, %v15058_v6  ;;  %v4694_v35 = vadd.f32 %v15034_v33, %v4428_v54 }
 0x68a   : > { %v5305_v17 = vadd.f32 %v5304_v56, %v5303_v24  ;;  %v5002_v60 = vpop.f32.mrf.mxu1 }
 0x68b   : > { %v15189_v37 = vadd.f32 %v5002_v60, %v4901_v3  ;;  %v5308_v36 = vsel %vm18324_vm13, %v5274_v52, 0.0  ;;  %v5277_v3 = vmul.f32 %v15143_v10, %v15187_v5  ;;  %v4905_v52 = vadd.f32 %v15068_v39, %v4694_v35  ;;  %v15224_v39 = vpop.permute.xlu0 %5223  ;;  %vm18342_vm13 = vmmov %vm18184_vm0 }
 0x68c   : > { %v5307_v58 = vadd.f32 %v5306_v8, %v5305_v17  ;;  %v10569_v44 = vpop.f32.mrf.mxu1  ;;  %v5312_v60 = vsel %vm18325_vm3, %v5276_v26, 0.0  ;;  %vm18346_vm3 = vmmov %vm18184_vm0 }
 0x68d   : > { %v5275_v0 = vmul.f32 %v15118_v11, %v15189_v37  ;;  %v15212_v8 = vadd.f32 %v10569_v44, %v15062_v21  ;;  %v4432_v21 = vadd.f32 %v15021_v15, %v14958_v7 }
 0x68e   : > { %v5309_v6 = vadd.f32 %v5308_v36, %v5307_v58  ;;  %v5015_v24 = vpop.f32.mrf.mxu1  ;;  %v15216_v36 = vpop.permute.xlu1 %5218 }
 0x68f   : > { %v5310_v34 = vsel %vm18184_vm0, %v5275_v0, 0.0  ;;  %v15207_v48 = vadd.f32 %v5015_v24, %v15064_v23  ;;  %v5314_v0 = vsel %vm18326_vm2, %v5277_v3, 0.0  ;;  %v5280_v44 = vmul.f32 %v15176_v20, %v15212_v8  ;;  %vm18347_vm2 = vmmov %vm18184_vm0 }
 0x690   : > { %v5311_v56 = vadd.f32 %v5310_v34, %v5309_v6  ;;  %v10570_v17 = vpop.f32.mrf.mxu1 }
 0x691   : > { %v5278_v33 = vmul.f32 %v15152_v62, %v15207_v48  ;;  %v15220_v23 = vadd.f32 %v10570_v17, %v15066_v30 }
 0x692   : > { %v5313_v58 = vadd.f32 %v5312_v60, %v5311_v56  ;;  %v5018_v54 = vpop.f32.mrf.mxu1  ;;  %v4698_v56 = vadd.f32 %v15036_v45, %v4432_v21 }
 0x693   : > { %v15222_v6 = vadd.f32 %v5018_v54, %v4905_v52  ;;  %v5316_v35 = vsel %vm18327_vm10, %v5278_v33, 0.0  ;;  %v5281_v17 = vmul.f32 %v15193_v16, %v15220_v23  ;;  %v5320_v54 = vsel %vm18330_vm5, %v5280_v44, 0.0  ;;  %vm18352_vm5 = vmmov %vm18184_vm0 }
 0x694   : > { %v5315_v26 = vadd.f32 %v5314_v0, %v5313_v58  ;;  %v10573_v24 = vpop.f32.mrf.mxu1  ;;  %v15240_v58 = vpop.permute.xlu1 %5228  ;;  %v4909_v33 = vadd.f32 %v15078_v19, %v4698_v56  ;;  %vm5344_vm10 = vcmask 253952  }
 0x695   : > { %v5279_v3 = vmul.f32 %v15168_v57, %v15222_v6  ;;  %18329 = vst [vmem:[#allocation23_spill] sm:$0xff] %v15240_v58  ;;  %v15245_v0 = vadd.f32 %v10573_v24, %v15070_v2  ;;  %v4436_v2 = vadd.f32 %v15024_v9, %v14970_v12 }
 0x696   : > { %v5317_v34 = vadd.f32 %v5316_v35, %v5315_v26  ;;  %v5031_v30 = vpop.f32.mrf.mxu1  ;;  %v15249_v26 = vpop.permute.xlu0 %5233 }
 0x697   : > { %v5318_v52 = vsel %vm18328_vm9, %v5279_v3, 0.0  ;;  %v15238_v60 = vadd.f32 %v5031_v30, %v15074_v28  ;;  %18331 = vst [vmem:[#allocation32_spill] sm:$0xff] %v15249_v26  ;;  %v5322_v28 = vsel %vm18332_vm15, %v5281_v17, 0.0  ;;  %v5284_v24 = vmul.f32 %v15224_v39, %v15245_v0  ;;  %vm18348_vm9 = vmmov %vm18184_vm0 }
 0x698   : > { %v5319_v7 = vadd.f32 %v5318_v52, %v5317_v34  ;;  %v10574_v15 = vpop.f32.mrf.mxu1  ;;  %vm18353_vm15 = vmmov %vm18184_vm0 }
 0x699   : > { %v5282_v45 = vmul.f32 %v15200_v47, %v15238_v60  ;;  %v15253_v3 = vadd.f32 %v10574_v15, %v15076_v29  ;;  %v4702_v29 = vadd.f32 %v15038_v49, %v4436_v2 }
 0x69a   : > { %v5321_v21 = vadd.f32 %v5320_v54, %v5319_v7  ;;  %v5034_v35 = vpop.f32.mrf.mxu1  ;;  %v15265_v7 = vpop.permute.xlu1 %5238 }
 0x69b   : > { %v15255_v34 = vadd.f32 %v5034_v35, %v4909_v33  ;;  %v5324_v44 = vsel %vm18333_vm8, %v5282_v45, 0.0  ;;  %18334 = vst [vmem:[#allocation74_spill] sm:$0xff] %v15265_v7  ;;  %v5285_v15 = vmul.f32 %v15240_v58, %v15253_v3  ;;  %v15273_v9 = vpop.permute.xlu0 %5243  ;;  %v5328_v35 = vsel %vm18337_vm12, %v5284_v24, 0.0  ;;  %vm18354_vm8 = vmmov %vm18184_vm0 }
 0x69c   : > { %v5323_v19 = vadd.f32 %v5322_v28, %v5321_v21  ;;  %v10577_v30 = vpop.f32.mrf.mxu1  ;;  %18336 = vst [vmem:[#allocation34_spill] sm:$0xff] %v15273_v9  ;;  %v4913_v21 = vadd.f32 %v15094_v61, %v4702_v29  ;;  %v4440_v61 = vadd.f32 %v15026_v13, %v14982_v55  ;;  %v18343_v13 = vld [vmem:[#allocation91_spill] sm:$0xff]  ;;  %vm18356_vm12 = vmmov %vm18184_vm0 }
 0x69d   : > { %v5283_v56 = vmul.f32 %v15216_v36, %v15255_v34  ;;  %v15278_v49 = vadd.f32 %v10577_v30, %v15084_v51 }
 0x69e   : > { %v5325_v52 = vadd.f32 %v5324_v44, %v5323_v19  ;;  %v5047_v17 = vpop.f32.mrf.mxu1  ;;  %v5330_v44 = vsel %vm18338_vm11, %v5285_v15, 0.0  ;;  %v15290_v24 = vpop.permute.xlu1 %5248  ;;  %vm18357_vm11 = vmmov %vm18184_vm0 }
 0x69f   : > { %v5326_v33 = vsel %vm18335_vm4, %v5283_v56, 0.0  ;;  %v15271_v12 = vadd.f32 %v5047_v17, %v15086_v32  ;;  %18339 = vst [vmem:[#allocation46_spill] sm:$0xff] %v15290_v24  ;;  %v5288_v51 = vmul.f32 %v15273_v9, %v15278_v49  ;;  %v15297_v15 = vpop.permute.xlu0 %5253  ;;  %vm18355_vm4 = vmmov %vm18184_vm0 }
 0x6a0   : > { %v5327_v54 = vadd.f32 %v5326_v33, %v5325_v52  ;;  %v10578_v45 = vpop.f32.mrf.mxu1 }
 0x6a1   : > { %v5286_v28 = vmul.f32 %v15249_v26, %v15271_v12  ;;  %v15284_v32 = vadd.f32 %v10578_v45, %v15090_v46  ;;  %v5336_v9 = vsel %vm18184_vm0, %v5288_v51, 0.0 }
 0x6a2   : > { %v5329_v19 = vadd.f32 %v5328_v35, %v5327_v54  ;;  %v5050_v2 = vpop.f32.mrf.mxu1  ;;  %v18341_v54 = vld [vmem:[#allocation78_spill] sm:$0xff] }
 0x6a3   : > { %v15286_v56 = vadd.f32 %v5050_v2, %v4913_v21  ;;  %v5332_v30 = vsel %vm18340_vm1, %v5286_v28, 0.0  ;;  %v4706_v45 = vadd.f32 %v18341_v54, %v4440_v61  ;;  %v5289_v21 = vmul.f32 %v15290_v24, %v15284_v32  ;;  %v15309_v24 = vpop.permute.xlu1 %5258  ;;  %vm18358_vm1 = vmmov %vm18184_vm0 }
 0x6a4   : > { %v5331_v52 = vadd.f32 %v5330_v44, %v5329_v19  ;;  %v10581_v17 = vpop.f32.mrf.mxu1  ;;  %v18344_v44 = vld [vmem:[#allocation25_spill] sm:$0xff] }
 0x6a5   : > { %v5287_v29 = vmul.f32 %v15265_v7, %v15286_v56  ;;  %v4917_v28 = vadd.f32 %v18344_v44, %v4706_v45  ;;  %v18345_v7 = vld [vmem:[#allocation38_spill] sm:$0xff]  ;;  %v5338_v61 = vsel %vm18346_vm3, %v5289_v21, 0.0  ;;  %vm18360_vm3 = vmmov %vm18184_vm0 }
 0x6a6   : > { %v5333_v46 = vadd.f32 %v5332_v30, %v5331_v52  ;;  %v5063_v33 = vpop.f32.mrf.mxu1  ;;  %v5103_v26 = vadd.f32 %v10581_v17, %v18345_v7 }
 0x6a7   : > { %v5334_v55 = vsel %vm18342_vm13, %v5287_v29, 0.0  ;;  %v5101_v35 = vadd.f32 %v5063_v33, %v18343_v13  ;;  %v15311_v29 = vpop.permute.xlu0 %5263  ;;  %v11038_v13 = vld [vmem:[%s17311_s3 + $0x20] sm:$0xff]   ;;  %vm18359_vm13 = vmmov %vm18184_vm0 }
 0x6a8   : > { %v5335_v19 = vadd.f32 %v5334_v55, %v5333_v46  ;;  %v10582_v2 = vpop.f32.mrf.mxu1  ;;  %v5292_v46 = vmul.f32 %v15311_v29, %v5103_v26 }
 0x6a9   : > { %v5290_v52 = vmul.f32 %v15297_v15, %v5101_v35 }
 0x6aa   : > { %v5337_v30 = vadd.f32 %v5336_v9, %v5335_v19  ;;  %v5066_v58 = vpop.f32.mrf.mxu1  ;;  %v5345_v55 = vsel %vm5344_vm10, %v5292_v46, 0.0 }
 0x6ab   : > { %v5102_v54 = vadd.f32 %v5066_v58, %v4917_v28  ;;  %v5340_v45 = vsel %vm18347_vm2, %v5290_v52, 0.0  ;;  %v11037_v58 = vld [vmem:[%s17311_s3 + $0x28] sm:$0xff]   ;;  %vm18361_vm2 = vmmov %vm18184_vm0 }
 0x6ac   : > { %v5339_v33 = vadd.f32 %v5338_v61, %v5337_v30  ;;  %10639 = vmatprep.subr.bf16.mxu1 %v11037_v58 }
 0x6ad   : > { %v5291_v51 = vmul.f32 %v15309_v24, %v5102_v54  ;;  %10640 = vmatpush3.bf16.msra.mxu1 %v11037_v58 }
 0x6ae   : > { %v5341_v7 = vadd.f32 %v5340_v45, %v5339_v33  ;;  %10641 = vmatprep.subr.bf16.mxu1 %v11038_v13  ;;  %v15327_v33 = vld [vmem:[%s17311_s3 + $0x8] sm:$0xff]  }
 0x6af   : > { %v5342_v17 = vsel %vm18348_vm9, %v5291_v51, 0.0  ;;  %10611 = vmatprep.subr.bf16.mxu0 %v15327_v33  ;;  %vm18362_vm9 = vmmov %vm18184_vm0 }
 0x6b0   : > { %v5343_v9 = vadd.f32 %v5342_v17, %v5341_v7 }
 0x6b1   : > { %10642 = vmatpush3.bf16.msra.mxu1 %v11038_v13 }
 0x6b2   : > { %v5346_v21 = vadd.f32 %v5345_v55, %v5343_v9 }
 0x6b4   : > { %v5347_v19 = vrot.slane %v5346_v21, 4 }
 0x6b6   : > { %v5348_v2 = vadd.f32 %v5347_v19, %v5346_v21  ;;  %v18350_v19 = vld [vmem:[#allocation81_spill] sm:$0xff] }
 0x6b8   : > { %v5349_v44 = vrot.slane %v5348_v2, 2 }
 0x6ba   : > { %v5350_v28 = vadd.f32 %v5349_v44, %v5348_v2  ;;  %v18351_v44 = vld [vmem:[#allocation84_spill] sm:$0xff] }
 0x6bc   : > { %v5351_v52 = vrot.slane %v5350_v28, 1 }
 0x6be   : > { %v5352_v30 = vadd.f32 %v5351_v52, %v5350_v28 }
 0x6c0   : > { %v5353_v61 = vmul.f32 0.0051020407, %v5352_v30 }
 0x6c2   : > { %v15330_v46 = vsub.f32 %v15158_v14, %v5353_v61  ;;  %v15333_v45 = vsub.f32 %v15156_v40, %v5353_v61  ;;  %v15336_v51 = vsub.f32 %v15174_v18, %v5353_v61  ;;  %v15339_v7 = vsub.f32 %v15189_v37, %v5353_v61 }
 0x6c3   : > { %v15342_v17 = vsub.f32 %v15181_v53, %v5353_v61  ;;  %v15345_v9 = vsub.f32 %v15187_v5, %v5353_v61  ;;  %v15349_v14 = vsub.f32 %v15207_v48, %v5353_v61  ;;  %v15352_v40 = vsub.f32 %v15222_v6, %v5353_v61 }
 0x6c4   : > { %v15355_v18 = vsub.f32 %v15212_v8, %v5353_v61  ;;  %v15358_v37 = vsub.f32 %v15220_v23, %v5353_v61  ;;  %v15361_v53 = vsub.f32 %v15238_v60, %v5353_v61  ;;  %v15364_v5 = vsub.f32 %v15255_v34, %v5353_v61 }
 0x6c5   : > { %v15367_v55 = vsub.f32 %v15245_v0, %v5353_v61  ;;  %v15370_v48 = vsub.f32 %v15253_v3, %v5353_v61  ;;  %v15373_v6 = vsub.f32 %v15271_v12, %v5353_v61  ;;  %v15376_v8 = vsub.f32 %v15286_v56, %v5353_v61 }
 0x6c6   : > { %v15379_v23 = vsub.f32 %v15278_v49, %v5353_v61  ;;  %v15382_v60 = vsub.f32 %v15284_v32, %v5353_v61  ;;  %v15384_v34 = vsub.f32 %v5101_v35, %v5353_v61  ;;  %v15386_v21 = vsub.f32 %v5102_v54, %v5353_v61  ;;  %v18349_v54 = vld [vmem:[#allocation26_spill] sm:$0xff] }
 0x6c7   : > { %v15388_v0 = vsub.f32 %v5103_v26, %v5353_v61  ;;  %v15391_v3 = vsub.f32 %v15113_v43, %v5353_v61  ;;  %v15394_v12 = vsub.f32 %v15125_v27, %v5353_v61  ;;  %v15397_v56 = vsub.f32 %v15116_v25, %v5353_v61 }
 0x6c8   : > { %v15400_v49 = vsub.f32 %v15123_v4, %v5353_v61  ;;  %v15407_v26 = vsub.f32 %v15141_v42, %v5353_v61  ;;  %v15416_v58 = vsub.f32 %v15148_v63, %v5353_v61  ;;  %v5386_v42 = vmul.f32 %v15330_v46, %v15330_v46 }
 0x6c9   : > { %v5381_v32 = vmul.f32 %v15391_v3, %v15391_v3  ;;  %v5382_v35 = vmul.f32 %v15394_v12, %v15394_v12  ;;  %v5383_v43 = vmul.f32 %v15397_v56, %v15397_v56 }
 0x6ca   : > { %v5384_v27 = vmul.f32 %v15400_v49, %v15400_v49  ;;  %v5385_v13 = vmul.f32 %v15407_v26, %v15407_v26 }
 0x6cb   : > { %v5408_v25 = vmul.f32 %v5381_v32, %v15072_v1  ;;  %v5409_v4 = vmul.f32 %v5382_v35, %v18349_v54  ;;  %v5410_v2 = vmul.f32 %v5383_v43, %v18350_v19  ;;  %v5387_v32 = vmul.f32 %v15416_v58, %v15416_v58 }
 0x6cc   : > { %v5411_v28 = vmul.f32 %v5384_v27, %v18351_v44  ;;  %v5412_v63 = vmul.f32 %v5385_v13, %v15092_v31  ;;  %v5388_v43 = vmul.f32 %v15333_v45, %v15333_v45  ;;  %v5413_v54 = vmul.f32 %v5386_v42, %v15098_v22 }
 0x6cd   : > { %v5435_v52 = vsel %vm18352_vm5, %v5408_v25, 0.0  ;;  %v5436_v30 = vsel %vm18353_vm15, %v5409_v4, 0.0  ;;  %v5438_v61 = vsel %vm18354_vm8, %v5410_v2, 0.0  ;;  %v5389_v25 = vmul.f32 %v15336_v51, %v15336_v51  ;;  %vm18363_vm5 = vmmov %vm18184_vm0 }
 0x6ce   : > { %v5437_v1 = vadd.f32 %v5436_v30, %v5435_v52  ;;  %v5440_v27 = vsel %vm18355_vm4, %v5411_v28, 0.0  ;;  %v5414_v4 = vmul.f32 %v5387_v32, %v15102_v41  ;;  %v5442_v44 = vsel %vm18356_vm12, %v5412_v63, 0.0  ;;  %vm18364_vm15 = vmmov %vm18184_vm0 }
 0x6cf   : > { %v5390_v31 = vmul.f32 %v15339_v7, %v15339_v7  ;;  %v5415_v13 = vmul.f32 %v5388_v43, %v15108_v38  ;;  %v5444_v2 = vsel %vm18357_vm11, %v5413_v54, 0.0  ;;  %v5391_v22 = vmul.f32 %v15342_v17, %v15342_v17  ;;  %vm18365_vm8 = vmmov %vm18184_vm0 }
 0x6d0   : > { %v5439_v35 = vadd.f32 %v5438_v61, %v5437_v1  ;;  %v5416_v42 = vmul.f32 %v5389_v25, %v15110_v59  ;;  %v5446_v28 = vsel %vm18358_vm1, %v5414_v4, 0.0  ;;  %v5392_v41 = vmul.f32 %v15345_v9, %v15345_v9  ;;  %vm18366_vm4 = vmmov %vm18184_vm0 }
 0x6d1   : > { %v5417_v32 = vmul.f32 %v5390_v31, %v15118_v11  ;;  %v5448_v63 = vsel %vm18359_vm13, %v5415_v13, 0.0  ;;  %v5393_v38 = vmul.f32 %v15349_v14, %v15349_v14  ;;  %v5394_v59 = vmul.f32 %v15352_v40, %v15352_v40  ;;  %vm18367_vm12 = vmmov %vm18184_vm0 }
 0x6d2   : > { %v5441_v19 = vadd.f32 %v5440_v27, %v5439_v35  ;;  %v5418_v35 = vmul.f32 %v5391_v22, %v15129_v50  ;;  %v5450_v43 = vsel %vm18184_vm0, %v5416_v42, 0.0  ;;  %v5419_v27 = vmul.f32 %v5392_v41, %v15143_v10  ;;  %v15465_v50 = vld [vmem:[%s17311_s3 + $0x48] sm:$0xff]   ;;  %vm18369_vm11 = vmmov %vm18184_vm0 }
 0x6d3   : > { %v5395_v11 = vmul.f32 %v15355_v18, %v15355_v18  ;;  %v5420_v4 = vmul.f32 %v5393_v38, %v15152_v62  ;;  %v5396_v31 = vmul.f32 %v15358_v37, %v15358_v37  ;;  %v5421_v10 = vmul.f32 %v5394_v59, %v15168_v57  ;;  %10695 = vmatprep.subr.bf16.mxu1 %v15465_v50  ;;  %vm18371_vm1 = vmmov %vm18184_vm0 }
 0x6d4   : > { %v5443_v52 = vadd.f32 %v5442_v44, %v5441_v19  ;;  %v5452_v19 = vsel %vm18360_vm3, %v5417_v32, 0.0  ;;  %v5454_v44 = vsel %vm18361_vm2, %v5418_v35, 0.0  ;;  %v5456_v13 = vsel %vm18362_vm9, %v5419_v27, 0.0  ;;  %vm18373_vm13 = vmmov %vm18184_vm0 }
 0x6d5   : > { %v5397_v62 = vmul.f32 %v15361_v53, %v15361_v53  ;;  %v5458_v22 = vsel %vm18363_vm5, %v5420_v4, 0.0  ;;  %v5460_v57 = vsel %vm18364_vm15, %v5421_v10, 0.0  ;;  %v5399_v32 = vmul.f32 %v15367_v55, %v15367_v55  ;;  %vm18376_vm3 = vmmov %vm18184_vm0 }
 0x6d6   : > { %v5445_v30 = vadd.f32 %v5444_v2, %v5443_v52  ;;  %vm18377_vm2 = vmmov %vm18184_vm0 }
 0x6d7   : > { %v5426_v59 = vmul.f32 %v5399_v32, %v15224_v39  ;;  %v5404_v39 = vmul.f32 %v15382_v60, %v15382_v60  ;;  %v5406_v32 = vmul.f32 %v15386_v21, %v15386_v21  ;;  %vm18378_vm9 = vmmov %vm18184_vm0 }
 0x6d8   : > { %v5447_v1 = vadd.f32 %v5446_v28, %v5445_v30  ;;  %v5422_v30 = vmul.f32 %v5395_v11, %v15176_v20  ;;  %v5398_v28 = vmul.f32 %v15364_v5, %v15364_v5  ;;  %v5400_v20 = vmul.f32 %v15370_v48, %v15370_v48  ;;  %vm18379_vm5 = vmmov %vm18184_vm0 }
 0x6d9   : > { %v5470_v10 = vsel %vm18371_vm1, %v5426_v59, 0.0  ;;  %v5433_v59 = vmul.f32 %v5406_v32, %v15309_v24  ;;  %vm18380_vm15 = vmmov %vm18184_vm0 }
 0x6da   : > { %v5449_v61 = vadd.f32 %v5448_v63, %v5447_v1  ;;  %v5423_v1 = vmul.f32 %v5396_v31, %v15193_v16  ;;  %v5424_v63 = vmul.f32 %v5397_v62, %v15200_v47  ;;  %v5425_v35 = vmul.f32 %v5398_v28, %v15216_v36  ;;  %v18374_v28 = vld [vmem:[#allocation34_spill] sm:$0xff] }
 0x6db   : > { %v5401_v16 = vmul.f32 %v15373_v6, %v15373_v6  ;;  %v5402_v47 = vmul.f32 %v15376_v8, %v15376_v8  ;;  %v5403_v36 = vmul.f32 %v15379_v23, %v15379_v23 }
 0x6dc   : > { %v5451_v54 = vadd.f32 %v5450_v43, %v5449_v61  ;;  %v5462_v61 = vsel %vm18365_vm8, %v5422_v30, 0.0  ;;  %v5464_v43 = vsel %vm18366_vm4, %v5423_v1, 0.0  ;;  %v5466_v27 = vsel %vm18367_vm12, %v5424_v63, 0.0  ;;  %v18375_v63 = vld [vmem:[#allocation46_spill] sm:$0xff] }
 0x6dd   : > { %v5468_v4 = vsel %vm18369_vm11, %v5425_v35, 0.0  ;;  %v5430_v1 = vmul.f32 %v5403_v36, %v18374_v28  ;;  %v5407_v35 = vmul.f32 %v15388_v0, %v15388_v0 }
 0x6de   : > { %v5453_v25 = vadd.f32 %v5452_v19, %v5451_v54 }
 0x6e0   : > { %v5455_v52 = vadd.f32 %v5454_v44, %v5453_v25  ;;  %v18368_v25 = vld [vmem:[#allocation23_spill] sm:$0xff] }
 0x6e1   : > { %v5427_v11 = vmul.f32 %v5400_v20, %v18368_v25 }
 0x6e2   : > { %v5457_v2 = vadd.f32 %v5456_v13, %v5455_v52  ;;  %v18370_v52 = vld [vmem:[#allocation32_spill] sm:$0xff] }
 0x6e3   : > { %v5428_v31 = vmul.f32 %v5401_v16, %v18370_v52  ;;  %v5472_v30 = vsel %vm18373_vm13, %v5427_v11, 0.0 }
 0x6e4   : > { %v5459_v42 = vadd.f32 %v5458_v22, %v5457_v2  ;;  %v18372_v2 = vld [vmem:[#allocation74_spill] sm:$0xff] }
 0x6e5   : > { %v5429_v62 = vmul.f32 %v5402_v47, %v18372_v2  ;;  %v5434_v47 = vmul.f32 %v5407_v35, %v15311_v29 }
 0x6e6   : > { %v5461_v41 = vadd.f32 %v5460_v57, %v5459_v42  ;;  %v5405_v42 = vmul.f32 %v15384_v34, %v15384_v34  ;;  %v5474_v57 = vsel %vm18184_vm0, %v5428_v31, 0.0 }
 0x6e7   : > { %v5486_v36 = vsel %vm5344_vm10, %v5434_v47, 0.0 }
 0x6e8   : > { %v5463_v38 = vadd.f32 %v5462_v61, %v5461_v41  ;;  %v5431_v61 = vmul.f32 %v5404_v39, %v18375_v63 }
 0x6ea   : > { %v5465_v54 = vadd.f32 %v5464_v43, %v5463_v38  ;;  %v5476_v38 = vsel %vm18376_vm3, %v5429_v62, 0.0  ;;  %v5432_v43 = vmul.f32 %v5405_v42, %v15297_v15 }
 0x6ec   : > { %v5467_v19 = vadd.f32 %v5466_v27, %v5465_v54  ;;  %v5478_v54 = vsel %vm18377_vm2, %v5430_v1, 0.0  ;;  %v5480_v27 = vsel %vm18378_vm9, %v5431_v61, 0.0  ;;  %v5482_v25 = vsel %vm18379_vm5, %v5432_v43, 0.0  ;;  %vm18381_vm5 = vmmov %vm18377_vm2 }
 0x6ee   : > { %v5469_v44 = vadd.f32 %v5468_v4, %v5467_v19  ;;  %v5484_v4 = vsel %vm18380_vm15, %v5433_v59, 0.0 }
 0x6f0   : > { %v5471_v13 = vadd.f32 %v5470_v10, %v5469_v44 }
 0x6f2   : > { %v5473_v22 = vadd.f32 %v5472_v30, %v5471_v13 }
 0x6f4   : > { %v5475_v41 = vadd.f32 %v5474_v57, %v5473_v22 }
 0x6f6   : > { %v5477_v20 = vadd.f32 %v5476_v38, %v5475_v41 }
 0x6f8   : > { %v5479_v16 = vadd.f32 %v5478_v54, %v5477_v20 }
 0x6fa   : > { %v5481_v19 = vadd.f32 %v5480_v27, %v5479_v16 }
 0x6fc   : > { %v5483_v11 = vadd.f32 %v5482_v25, %v5481_v19 }
 0x6fe   : > { %v5485_v44 = vadd.f32 %v5484_v4, %v5483_v11 }
 0x700   : > { %v5487_v52 = vadd.f32 %v5486_v36, %v5485_v44 }
 0x702   : > { %v5488_v15 = vrot.slane %v5487_v52, 4 }
 0x704   : > { %v5489_v31 = vadd.f32 %v5488_v15, %v5487_v52 }
 0x706   : > { %v5490_v10 = vrot.slane %v5489_v31, 2 }
 0x708   : > { %v5491_v13 = vadd.f32 %v5490_v10, %v5489_v31 }
 0x70a   : > { %v5492_v39 = vrot.slane %v5491_v13, 1 }
 0x70c   : > { %v5493_v24 = vadd.f32 %v5492_v39, %v5491_v13 }
 0x70e   : > { %v5494_v2 = vmul.f32 0.0051020407, %v5493_v24 }
 0x710   : > { %v5495_v62 = vadd.f32 1e-05, %v5494_v2 }
 0x712   : > { %11118 = vrsqrt.f32 %v5495_v62 }
 0x71f   : > { %v15522_v30 = vpop.eup %11118 }
 0x720   : > { %v15526_v29 = vmul.f32 %v15522_v30, %v15370_v48  ;;  %v15530_v22 = vmul.f32 %v15522_v30, %v15373_v6  ;;  %v15534_v42 = vmul.f32 %v15522_v30, %v15376_v8  ;;  %v5497_v28 = vmul.f32 %v15522_v30, %v15391_v3 }
 0x721   : > { %v15540_v1 = vmul.f32 %v15522_v30, %v15379_v23  ;;  %v5498_v57 = vmul.f32 %v15522_v30, %v15394_v12  ;;  %v15546_v48 = vmul.f32 %v15522_v30, %v15361_v53  ;;  %v5499_v6 = vmul.f32 %v15522_v30, %v15397_v56 }
 0x722   : > { %v15552_v8 = vmul.f32 %v15522_v30, %v15364_v5  ;;  %v15556_v3 = vmul.f32 %v15522_v30, %v15367_v55  ;;  %v15560_v23 = vmul.f32 %v15522_v30, %v15382_v60  ;;  %v15563_v12 = vmul.f32 0.01, %v15526_v29 }
 0x723   : > { %v15566_v53 = vmul.f32 0.01, %v15530_v22  ;;  %v15569_v56 = vmul.f32 0.01, %v15534_v42  ;;  %v5500_v5 = vmul.f32 %v15522_v30, %v15400_v49  ;;  %vm5524_vm10 = vcmp.ge.f32.partialorder %v5497_v28, 0.0 }
 0x724   : > { %v15574_v55 = vmul.f32 0.01, %v15540_v1  ;;  %vm5525_vm8 = vcmp.ge.f32.partialorder %v5498_v57, 0.0  ;;  %vm5526_vm4 = vcmp.ge.f32.partialorder %v5499_v6, 0.0  ;;  %v5551_v60 = vmul.f32 0.01, %v5497_v28 }
 0x725   : > { %vm5527_vm12 = vcmp.ge.f32.partialorder %v5500_v5, 0.0  ;;  %v5552_v41 = vmul.f32 0.01, %v5498_v57  ;;  %v5553_v32 = vmul.f32 0.01, %v5499_v6  ;;  %v5501_v63 = vmul.f32 %v15522_v30, %v15407_v26 }
 0x726   : > { %v5554_v61 = vmul.f32 0.01, %v5500_v5  ;;  %v5578_v38 = vsel %vm5524_vm10, %v5497_v28, %v5551_v60  ;;  %v5502_v20 = vmul.f32 %v15522_v30, %v15330_v46  ;;  %v5503_v49 = vmul.f32 %v15522_v30, %v15416_v58  ;;  %vm18382_vm10 = vmmov %vm18377_vm2 }
 0x727   : > { %v5579_v35 = vsel %vm5525_vm8, %v5498_v57, %v5552_v41  ;;  %v5580_v43 = vsel %vm5526_vm4, %v5499_v6, %v5553_v32  ;;  %vm5528_vm11 = vcmp.ge.f32.partialorder %v5501_v63, 0.0  ;;  %v5555_v54 = vmul.f32 0.01, %v5501_v63  ;;  %v11042_v6 = vld [vmem:[%s17311_s3 + $0x40] sm:$0xff]   ;;  %vm18383_vm8 = vmmov %vm18377_vm2 }
 0x728   : > { %v5581_v16 = vsel %vm5527_vm12, %v5500_v5, %v5554_v61  ;;  %v15582_v59 = vpack.c.bf16 %v5579_v35, %v5578_v38  ;;  %vm5529_vm1 = vcmp.ge.f32.partialorder %v5502_v20, 0.0  ;;  %v5556_v27 = vmul.f32 0.01, %v5502_v20  ;;  %vm18384_vm12 = vmmov %vm18377_vm2 }
 0x729   : > { %vm5544_vm13 = vcmp.ge.f32.partialorder %v15530_v22, 0.0  ;;  %v15585_v26 = vpack.c.bf16 %v5581_v16, %v5580_v43  ;;  %v5582_v19 = vsel %vm5528_vm11, %v5501_v63, %v5555_v54  ;;  %v5504_v46 = vmul.f32 %v15522_v30, %v15333_v45  ;;  %vm18385_vm11 = vmmov %vm18377_vm2 }
 0x72a   : > { %vm5530_vm0 = vcmp.ge.f32.partialorder %v5503_v49, 0.0  ;;  %v6101_v58 = vrot.slane %v15582_v59, 1  ;;  %v5583_v47 = vsel %vm5529_vm1, %v5502_v20, %v5556_v27  ;;  %v5557_v25 = vmul.f32 0.01, %v5503_v49  ;;  %v11040_v27 = vld [vmem:[%s17311_s3] sm:$0xff]  }
 0x72b   : > { %v5656_v11 = vshrl.u32 %v15582_v59, 16  ;;  %v6102_v4 = vrot.slane %v15585_v26, 1  ;;  %v15592_v44 = vpack.c.bf16 %v5583_v47, %v5582_v19  ;;  %vm5531_vm3 = vcmp.ge.f32.partialorder %v5504_v46, 0.0 }
 0x72c   : > { %v5558_v36 = vmul.f32 0.01, %v5504_v46  ;;  %v5584_v52 = vsel %vm5530_vm0, %v5503_v49, %v5557_v25  ;;  %v5658_v15 = vshll.u32 %v15582_v59, 16  ;;  %v5663_v31 = vshll.u32 %v15585_v26, 16 }
 0x72d   : > { %v5667_v45 = vshrl.u32 %v15585_v26, 16  ;;  %v6103_v10 = vsel %vm3488_vm7, %v6101_v58, %v6102_v4  ;;  %v6104_v13 = vrot.slane %v15592_v44, 1  ;;  %v5671_v24 = vshll.u32 %v15592_v44, 16  ;;  %v15646_v58 = vld [vmem:[%s17311_s3 + $0x68] sm:$0xff]  }
 0x72e   : > { %v5585_v39 = vsel %vm5531_vm3, %v5504_v46, %v5558_v36  ;;  %10643 = vmatprep.mubr.msk.bf16.mxu1 %vm18377_vm2, %v6103_v10  ;;  %v5660_v62 = vrot.slane %v5658_v15, 1  ;;  %v5665_v28 = vrot.slane %v5663_v31, 1  ;;  %v5675_v57 = vshrl.u32 %v15592_v44, 16 }
 0x72f   : > { %v15601_v2 = vpack.c.bf16 %v5585_v39, %v5584_v52  ;;  %v6105_v5 = vsel %vm3488_vm7, %v6102_v4, %v6104_v13  ;;  %v5673_v60 = vrot.slane %v5671_v24, 1  ;;  %v5505_v41 = vmul.f32 %v15522_v30, %v15336_v51 }
 0x730   : > { %v5506_v32 = vmul.f32 %v15522_v30, %v15339_v7  ;;  %vm5545_vm9 = vcmp.ge.f32.partialorder %v15534_v42, 0.0  ;;  %10644 = vmatmul.mubr.msk.bf16.vlgmr.msra.gmra.mxu1 %vm18381_vm5, %v6105_v5  ;;  %v5661_v61 = vor.u32 %v5660_v62, %v5656_v11  ;;  %v5669_v38 = vor.u32 %v5667_v45, %v5665_v28 }
 0x731   : > { %v6106_v63 = vrot.slane %v15601_v2, 1  ;;  %v5679_v20 = vshll.u32 %v15601_v2, 16  ;;  %v15623_v49 = vmul.f32 0.01, %v15560_v23  ;;  %v5677_v51 = vor.u32 %v5675_v57, %v5673_v60  ;;  %10696 = vmatpush3.bf16.msra.mxu1 %v15465_v50 }
 0x732   : > { %v15625_v35 = vrot.slane %v5675_v57, 7  ;;  %vm5532_vm15 = vcmp.ge.f32.partialorder %v5505_v41, 0.0  ;;  %v5666_v43 = vsel %vm2646_vm14, %v5661_v61, %v5665_v28  ;;  %v15631_v54 = vsel %vm2646_vm14, %v5669_v38, %v5673_v60  ;;  %10697 = vmatprep.subr.bf16.mxu1 %v11042_v6 }
 0x733   : > { %v6107_v7 = vsel %vm3488_vm7, %v6104_v13, %v6106_v63  ;;  %v5681_v16 = vrot.slane %v5679_v20, 1  ;;  %10587 = vmatprep.mubr.msk.bf16.mxu0 %vm18383_vm8, %v5666_v43  ;;  %vm5533_vm4 = vcmp.ge.f32.partialorder %v5506_v32, 0.0  ;;  %v5559_v19 = vmul.f32 0.01, %v5505_v41 }
 0x734   : > { %10647 = vmatprep.mubr.msk.bf16.mxu1 %vm18382_vm10, %v6107_v7  ;;  %v15641_v50 = vor.u32 %v15625_v35, %v5671_v24  ;;  %v5560_v46 = vmul.f32 0.01, %v5506_v32  ;;  %v15652_v47 = vsel %vm5544_vm13, %v15530_v22, %v15566_v53  ;;  %10588 = vmatmul.mubr.msk.bf16.vlgmr.msra.gmra.mxu0 %vm18384_vm12, %v15631_v54  ;;  %v5507_v4 = vmul.f32 %v15522_v30, %v15342_v17 }
 0x735   : > { %v15657_v25 = vsel %vm2646_vm14, %v5677_v51, %v5681_v16  ;;  %v5508_v36 = vmul.f32 %v15522_v30, %v15345_v9  ;;  %v5683_v52 = vshrl.u32 %v15601_v2, 16  ;;  %10612 = vmatpush3.bf16.msra.mxu0 %v15327_v33  ;;  %v5586_v22 = vsel %vm5532_vm15, %v5505_v41, %v5559_v19  ;;  %10698 = vmatpush3.bf16.msra.mxu1 %v11042_v6  ;;  %v15675_v9 = vld [vmem:[%s17311_s3 + $0x38] sm:$0xff]  }
 0x736   : > { %10591 = vmatprep.mubr.msk.bf16.mxu0 %vm18385_vm11, %v15657_v25  ;;  %v5587_v53 = vsel %vm5533_vm4, %v5506_v32, %v5560_v46  ;;  %v5509_v15 = vmul.f32 %v15522_v30, %v15349_v14  ;;  %vm5534_vm1 = vcmp.ge.f32.partialorder %v5507_v4, 0.0  ;;  %v5561_v17 = vmul.f32 0.01, %v5507_v4  ;;  %10613 = vmatprep.subr.bf16.mxu0 %v11040_v27  ;;  %vm18387_vm4 = vmmov %vm18381_vm5 }
 0x737   : > { %v15670_v10 = vpack.c.bf16 %v5587_v53, %v5586_v22  ;;  %vm5535_vm13 = vcmp.ge.f32.partialorder %v5508_v36, 0.0  ;;  %v5562_v13 = vmul.f32 0.01, %v5508_v36  ;;  %v5510_v33 = vmul.f32 %v15522_v30, %v15352_v40  ;;  %10751 = vmatprep.subr.bf16.mxu1 %v15646_v58  ;;  %vm18388_vm11 = vmmov %vm18387_vm4 }
 0x738   : > { %vm5536_vm0 = vcmp.ge.f32.partialorder %v5509_v15, 0.0  ;;  %v5563_v39 = vmul.f32 0.01, %v5509_v15  ;;  %v5685_v14 = vor.u32 %v5683_v52, %v5681_v16  ;;  %v5588_v62 = vsel %vm5534_vm1, %v5507_v4, %v5561_v17 }
 0x739   : > { %v6108_v24 = vrot.slane %v15670_v10, 1  ;;  %v5687_v28 = vshll.u32 %v15670_v10, 16  ;;  %v5589_v57 = vsel %vm5535_vm13, %v5508_v36, %v5562_v13  ;;  %v5691_v6 = vshrl.u32 %v15670_v10, 16  ;;  %10614 = vmatpush3.bf16.msra.mxu0 %v11040_v27 }
 0x73a   : > { %vm5537_vm3 = vcmp.ge.f32.partialorder %v5510_v33, 0.0  ;;  %v5564_v5 = vmul.f32 0.01, %v5510_v33  ;;  %v15686_v60 = vpack.c.bf16 %v5589_v57, %v5588_v62  ;;  %v5590_v32 = vsel %vm5536_vm0, %v5509_v15, %v5563_v39  ;;  %10667 = vmatprep.subr.bf16.mxu0 %v15675_v9  ;;  %vm18389_vm0 = vmmov %vm18387_vm4 }
 0x73b   : > { %v6109_v40 = vsel %vm3488_vm7, %v6106_v63, %v6108_v24  ;;  %v5689_v41 = vrot.slane %v5687_v28, 1  ;;  %vm5546_vm2 = vcmp.ge.f32.partialorder %v15540_v1, 0.0  ;;  %v5599_v61 = vsel %vm5545_vm9, %v15534_v42, %v15569_v56  ;;  %vm18386_vm9 = vmmov %vm18381_vm5 }
 0x73c   : > { %10648 = vmatmul.mubr.msk.bf16.gmra.mxu1 %vm18381_vm5, %v6109_v40  ;;  %v5591_v38 = vsel %vm5537_vm3, %v5510_v33, %v5564_v5  ;;  %v5511_v63 = vmul.f32 %v15522_v30, %v15355_v18  ;;  %v5512_v51 = vmul.f32 %v15522_v30, %v15358_v37  ;;  %vm5547_vm15 = vcmp.ge.f32.partialorder %v15560_v23, 0.0  ;;  %vm18390_vm5 = vmmov %vm18389_vm0 }
 0x73d   : > { %v6110_v7 = vrot.slane %v15686_v60, 1  ;;  %v15704_v43 = vsel %vm2646_vm14, %v5685_v14, %v5689_v41  ;;  %v5693_v16 = vor.u32 %v5691_v6, %v5689_v41  ;;  %v5695_v42 = vshll.u32 %v15686_v60, 16 }
 0x73e   : > { %10592 = vmatmul.mubr.msk.bf16.gmra.mxu0 %vm18386_vm9, %v15704_v43  ;;  %v5699_v18 = vshrl.u32 %v15686_v60, 16  ;;  %v15712_v56 = vpack.c.bf16 %v5591_v38, %v5590_v32  ;;  %vm5538_vm10 = vcmp.ge.f32.partialorder %v5511_v63, 0.0  ;;  %vm5539_vm8 = vcmp.ge.f32.partialorder %v5512_v51, 0.0  ;;  %vm18391_vm9 = vmmov %vm18389_vm0 }
 0x73f   : > { %v6111_v37 = vsel %vm3488_vm7, %v6108_v24, %v6110_v7  ;;  %v5697_v27 = vrot.slane %v5695_v42, 1  ;;  %v5565_v19 = vmul.f32 0.01, %v5511_v63  ;;  %v5566_v46 = vmul.f32 0.01, %v5512_v51 }
 0x740   : > { %10651 = vmatprep.mubr.msk.bf16.mxu1 %vm18387_vm4, %v6111_v37  ;;  %v6112_v4 = vrot.slane %v15712_v56, 1  ;;  %v5703_v36 = vshll.u32 %v15712_v56, 16  ;;  %vm5540_vm12 = vcmp.ge.f32.partialorder %v15546_v48, 0.0  ;;  %v5567_v22 = vmul.f32 0.01, %v15546_v48  ;;  %vm18396_vm4 = vmmov %vm18389_vm0 }
 0x741   : > { %v15723_v53 = vsel %vm2646_vm14, %v5693_v16, %v5697_v27  ;;  %v5701_v15 = vor.u32 %v5699_v18, %v5697_v27  ;;  %v5592_v17 = vsel %vm5538_vm10, %v5511_v63, %v5565_v19  ;;  %v5593_v13 = vsel %vm5539_vm8, %v5512_v51, %v5566_v46  ;;  %vm18394_vm10 = vmmov %vm18389_vm0 }
 0x742   : > { %10595 = vmatprep.mubr.msk.bf16.mxu0 %vm18388_vm11, %v15723_v53  ;;  %v15729_v33 = vpack.c.bf16 %v5593_v13, %v5592_v17  ;;  %v5705_v39 = vrot.slane %v5703_v36, 1  ;;  %v5707_v14 = vshrl.u32 %v15712_v56, 16  ;;  %vm5541_vm1 = vcmp.ge.f32.partialorder %v15552_v8, 0.0  ;;  %vm18395_vm8 = vmmov %vm18389_vm0 }
 0x743   : > { %v6113_v24 = vsel %vm3488_vm7, %v6110_v7, %v6112_v4  ;;  %v5568_v62 = vmul.f32 0.01, %v15552_v8  ;;  %v5594_v57 = vsel %vm5540_vm12, %v15546_v48, %v5567_v22  ;;  %vm5543_vm13 = vcmp.ge.f32.partialorder %v15526_v29, 0.0  ;;  %vm18397_vm12 = vmmov %vm18389_vm0 }
 0x744   : > { %10652 = vmatmul.mubr.msk.bf16.gmra.mxu1 %vm18389_vm0, %v6113_v24  ;;  %v6114_v5 = vrot.slane %v15729_v33, 1  ;;  %v5709_v40 = vor.u32 %v5707_v14, %v5705_v39  ;;  %v5711_v41 = vshll.u32 %v15729_v33, 16  ;;  %vm5542_vm3 = vcmp.ge.f32.partialorder %v15556_v3, 0.0  ;;  %vm18398_vm11 = vmmov %vm18389_vm0 }
 0x745   : > { %v15744_v32 = vsel %vm2646_vm14, %v5701_v15, %v5705_v39  ;;  %v5595_v38 = vsel %vm5541_vm1, %v15552_v8, %v5568_v62  ;;  %v5569_v63 = vmul.f32 0.01, %v15556_v3  ;;  %v5597_v48 = vsel %vm5543_vm13, %v15526_v29, %v15563_v12  ;;  %vm18400_vm1 = vmmov %vm18389_vm0 }
 0x746   : > { %v15751_v51 = vpack.c.bf16 %v5599_v61, %v15652_v47  ;;  %v6115_v7 = vsel %vm3488_vm7, %v6112_v4, %v6114_v5  ;;  %10596 = vmatmul.mubr.msk.bf16.gmra.mxu0 %vm18390_vm5, %v15744_v32  ;;  %v5713_v16 = vrot.slane %v5711_v41, 1  ;;  %v15758_v37 = vpack.c.bf16 %v5595_v38, %v5594_v57  ;;  %vm18401_vm13 = vmmov %vm18389_vm0 }
 0x747   : > { %v5600_v8 = vsel %vm5546_vm2, %v15540_v1, %v15574_v55  ;;  %10655 = vmatprep.mubr.msk.bf16.mxu1 %vm18391_vm9, %v6115_v7  ;;  %v5715_v29 = vshrl.u32 %v15729_v33, 16  ;;  %v5596_v12 = vsel %vm5542_vm3, %v15556_v3, %v5569_v63  ;;  %v5601_v47 = vsel %vm5547_vm15, %v15560_v23, %v15623_v49  ;;  %vm18392_vm2 = vmmov %vm18389_vm0 }
 0x748   : > { %v15772_v61 = vsel %vm2646_vm14, %v5709_v40, %v5713_v16  ;;  %v6116_v27 = vrot.slane %v15758_v37, 1  ;;  %v15775_v19 = vpack.c.bf16 %v5597_v48, %v5596_v12  ;;  %v5719_v1 = vshll.u32 %v15758_v37, 16  ;;  %vm18393_vm15 = vmmov %vm18389_vm0 }
 0x749   : > { %v5717_v46 = vor.u32 %v5715_v29, %v5713_v16  ;;  %10599 = vmatprep.mubr.msk.bf16.mxu0 %vm18392_vm2, %v15772_v61  ;;  %v5735_v4 = vshll.u32 %v15751_v51, 16  ;;  %v15783_v23 = vpack.c.bf16 %v5601_v47, %v5600_v8  ;;  %v5723_v15 = vshrl.u32 %v15758_v37, 16  ;;  %vm18402_vm3 = vmmov %vm18389_vm0 }
 0x74a   : > { %v6118_v3 = vrot.slane %v15775_v19, 1  ;;  %v5727_v55 = vshll.u32 %v15775_v19, 16  ;;  %v6117_v49 = vsel %vm3488_vm7, %v6114_v5, %v6116_v27  ;;  %v5721_v22 = vrot.slane %v5719_v1, 1  ;;  %vm18403_vm5 = vmmov %vm18389_vm0 }
 0x74b   : > { %v6333_v62 = vrot.slane %v5691_v6, 7  ;;  %v6120_v57 = vrot.slane %v15751_v51, 1  ;;  %v5737_v5 = vrot.slane %v5735_v4, 1  ;;  %v5731_v38 = vshrl.u32 %v15775_v19, 16  ;;  %vm18404_vm9 = vmmov %vm18389_vm0 }
 0x74c   : > { %10656 = vmatmul.mubr.msk.bf16.gmra.mxu1 %vm18393_vm15, %v6117_v49  ;;  %v6119_v17 = vsel %vm3488_vm7, %v6116_v27, %v6118_v3  ;;  %v15791_v13 = vsel %vm2646_vm14, %v5717_v46, %v5721_v22  ;;  %v5725_v39 = vor.u32 %v5723_v15, %v5721_v22  ;;  %v5729_v24 = vrot.slane %v5727_v55, 1  ;;  %vm18405_vm2 = vmmov %vm18389_vm0 }
 0x74d   : > { %10659 = vmatprep.mubr.msk.bf16.mxu1 %vm18394_vm10, %v6119_v17  ;;  %v6122_v63 = vrot.slane %v15783_v23, 1  ;;  %v6324_v48 = vrot.slane %v5667_v45, 7  ;;  %v6339_v7 = vrot.slane %v5707_v14, 7  ;;  %v5739_v6 = vshrl.u32 %v15751_v51, 16  ;;  %vm18406_vm15 = vmmov %vm18389_vm0 }
 0x74e   : > { %10600 = vmatmul.mubr.msk.bf16.gmra.mxu0 %vm18395_vm8, %v15791_v13  ;;  %v15799_v40 = vsel %vm2646_vm14, %v5725_v39, %v5729_v24  ;;  %v5743_v16 = vshll.u32 %v15783_v23, 16  ;;  %v6330_v8 = vrot.slane %v5683_v52, 7  ;;  %v5733_v12 = vor.u32 %v5731_v38, %v5729_v24  ;;  %vm18407_vm10 = vmmov %vm18389_vm0 }
 0x74f   : > { %10603 = vmatprep.mubr.msk.bf16.mxu0 %vm18396_vm4, %v15799_v40  ;;  %v6323_v47 = vrot.slane %v5656_v11, 7  ;;  %v6325_v27 = vor.u32 %v6324_v48, %v5663_v31  ;;  %v15817_v45 = vsel %vm4442_vm6, %v6324_v48, %v15641_v50  ;;  %v6345_v14 = vrot.slane %v5723_v15, 7  ;;  %vm18408_vm8 = vmmov %vm18389_vm0 }
 0x750   : > { %v5741_v46 = vor.u32 %v5739_v6, %v5737_v5  ;;  %v6331_v49 = vor.u32 %v6330_v8, %v5679_v20  ;;  %v6334_v22 = vor.u32 %v6333_v62, %v5687_v28  ;;  %v6121_v52 = vsel %vm3488_vm7, %v6118_v3, %v6120_v57  ;;  %vm18409_vm4 = vmmov %vm18389_vm0 }
 0x751   : > { %v6123_v17 = vsel %vm3488_vm7, %v6120_v57, %v6122_v63  ;;  %v15826_v11 = vsel %vm4442_vm6, %v6323_v47, %v6325_v27  ;;  %v6336_v31 = vrot.slane %v5699_v18, 7  ;;  %v15831_v50 = vrot.slane %v5743_v16, 1  ;;  %vm18399_vm7 = vmmov %vm18389_vm0 }
 0x752   : > { %v6351_v15 = vrot.slane %v5739_v6, 7  ;;  %v15835_v20 = vsel %vm4442_vm6, %v15625_v35, %v6331_v49  ;;  %v15838_v28 = vsel %vm4442_vm6, %v6330_v8, %v6334_v22  ;;  %v15842_v3 = vsel %vm2646_vm14, %v5733_v12, %v5737_v5 }
 0x753   : > { %v6337_v18 = vor.u32 %v6336_v31, %v5695_v42  ;;  %v6340_v39 = vor.u32 %v6339_v7, %v5703_v36  ;;  %v6342_v24 = vrot.slane %v5715_v29, 7  ;;  %v15852_v35 = vsel %vm2646_vm14, %v5741_v46, %v15831_v50 }
 0x754   : > { %10660 = vmatmul.mubr.msk.bf16.gmra.mxu1 %vm18397_vm12, %v6121_v52  ;;  %v15855_v57 = vshrl.u32 %v15783_v23, 16  ;;  %v6346_v48 = vor.u32 %v6345_v14, %v5719_v1  ;;  %v6348_v5 = vrot.slane %v5731_v38, 7  ;;  %v6352_v12 = vor.u32 %v6351_v15, %v5735_v4  ;;  %v11046_v4 = vld [vmem:[%s17311_s3 + $0x60] sm:$0xff]   ;;  %vm18410_vm12 = vmmov %vm18389_vm0 }
 0x755   : > { %10663 = vmatprep.mubr.msk.bf16.mxu1 %vm18398_vm11, %v6123_v17  ;;  %v15860_v42 = vsel %vm4442_vm6, %v6333_v62, %v6337_v18  ;;  %v15863_v36 = vsel %vm4442_vm6, %v6336_v31, %v6340_v39  ;;  %v6343_v29 = vor.u32 %v6342_v24, %v5711_v41  ;;  %vm18411_vm11 = vmmov %vm18389_vm0  ;;  %v6901_v49 = vrot.slane %v15592_v44, 7  ;;  %v11050_v31 = vld [vmem:[%s17311_s3 + $0x80] sm:$0xff]   ;;  %v11048_v39 = vld [vmem:[%s17311_s3 + $0x50] sm:$0xff]  }
 0x756   : > { %10604 = vmatmul.mubr.msk.bf16.gmra.mxu0 %vm18399_vm7, %v15842_v3  ;;  %v15868_v6 = vsel %vm4442_vm6, %v6342_v24, %v6346_v48  ;;  %v6349_v1 = vor.u32 %v6348_v5, %v5727_v55  ;;  %v15874_v47 = vrot.slane %v15855_v57, 7  ;;  %v6722_v62 = vor.u32 %v15855_v57, %v15831_v50  ;;  %vm18412_vm7 = vmmov %vm18389_vm0  ;;  %v11051_v48 = vld [vmem:[%s17311_s3 + $0x78] sm:$0xff]  }
 0x757   : > { %10607 = vmatprep.mubr.msk.bf16.mxu0 %vm18400_vm1, %v15852_v35  ;;  %v15871_v8 = vsel %vm4442_vm6, %v6339_v7, %v6343_v29  ;;  %v15882_v41 = vsel %vm4442_vm6, %v6348_v5, %v6352_v12  ;;  %v11047_v7 = vld [vmem:[%s17311_s3 + $0x58] sm:$0xff]   ;;  %vm18413_vm1 = vmmov %vm18389_vm0  ;;  %v6905_v17 = vrot.slane %v15670_v10, 7  ;;  %v6909_v24 = vrot.slane %v15712_v56, 7 }
 0x758   : > { %v15879_v27 = vsel %vm4442_vm6, %v6345_v14, %v6349_v1  ;;  %v6355_v38 = vor.u32 %v15874_v47, %v5743_v16  ;;  %v6911_v1 = vrot.slane %v15729_v33, 7  ;;  %v6913_v12 = vrot.slane %v15758_v37, 7 }
 0x75a   : > { %v15891_v55 = vsel %vm4442_vm6, %v6351_v15, %v6355_v38 }
 0x75c   : > { %10664 = vmatmul.mubr.msk.bf16.gmra.mxu1 %vm18401_vm13, %v6122_v63  ;;  %v11044_v63 = vld [vmem:[%s17311_s3 + $0x30] sm:$0xff]   ;;  %vm18414_vm13 = vmmov %vm18389_vm0 }
 0x75d   : > { %10699 = vmatprep.mubr.msk.bf16.mxu1 %vm18389_vm0, %v15585_v26 }
 0x75e   : > { %10608 = vmatmul.mubr.msk.bf16.gmra.mxu0 %vm18402_vm3, %v15855_v57  ;;  %vm18415_vm3 = vmmov %vm18389_vm0 }
 0x75f   : > { %10615 = vmatprep.mubr.msk.bf16.mxu0 %vm18403_vm5, %v15582_v59  ;;  %v11049_v59 = vld [vmem:[%s17311_s3 + $0x88] sm:$0xff]   ;;  %vm18416_vm5 = vmmov %vm18389_vm0 }
 0x764   : > { %10700 = vmatmul.mubr.msk.bf16.vlgmr.msra.gmra.mxu1 %vm18404_vm9, %v15592_v44  ;;  %vm18417_vm9 = vmmov %vm18389_vm0 }
 0x765   : > { %10703 = vmatprep.mubr.msk.bf16.mxu1 %vm18405_vm2, %v15601_v2  ;;  %10752 = vmatpush3.bf16.msra.mxu1 %v15646_v58  ;;  %v5521_v58 = vmul.f32 %v15522_v30, %v15384_v34  ;;  %vm18418_vm2 = vmmov %vm18389_vm0 }
 0x766   : > { %10616 = vmatmul.mubr.msk.bf16.vlgmr.msra.gmra.mxu0 %vm18406_vm15, %v15585_v26  ;;  %10753 = vmatprep.subr.bf16.mxu1 %v11046_v4 }
 0x767   : > { %10619 = vmatprep.mubr.msk.bf16.mxu0 %vm18407_vm10, %v15592_v44  ;;  %10668 = vmatpush3.bf16.msra.mxu0 %v15675_v9  ;;  %v5522_v9 = vmul.f32 %v15522_v30, %v15386_v21  ;;  %v5575_v16 = vmul.f32 0.01, %v5521_v58  ;;  %vm5548_vm15 = vcmp.ge.f32.partialorder %v5521_v58, 0.0  ;;  %v6900_v21 = vrot.slane %v15585_v26, 7 }
 0x768   : > { %10669 = vmatprep.subr.bf16.mxu0 %v11044_v63  ;;  %v6903_v26 = vrot.slane %v15601_v2, 7 }
 0x769   : > { %10754 = vmatpush3.bf16.msra.mxu1 %v11046_v4  ;;  %v5576_v14 = vmul.f32 0.01, %v5522_v9  ;;  %vm5549_vm10 = vcmp.ge.f32.partialorder %v5522_v9, 0.0  ;;  %v5602_v34 = vsel %vm5548_vm15, %v5521_v58, %v5575_v16  ;;  %vm18429_vm15 = vmmov %vm18389_vm0 }
 0x76a   : > { %10807 = vmatprep.subr.bf16.mxu1 %v11049_v59 }
 0x76b   : > { %10670 = vmatpush3.bf16.msra.mxu0 %v11044_v63  ;;  %v5603_v46 = vsel %vm5549_vm10, %v5522_v9, %v5576_v14  ;;  %vm18430_vm10 = vmmov %vm18389_vm0  ;;  %v6915_v63 = vrot.slane %v15775_v19, 7  ;;  %v6919_v9 = vrot.slane %v15783_v23, 7 }
 0x76c   : > { %10704 = vmatmul.mubr.msk.bf16.gmra.mxu1 %vm18408_vm8, %v15670_v10  ;;  %10723 = vmatprep.subr.bf16.mxu0 %v11047_v7  ;;  %vm18419_vm8 = vmmov %vm18389_vm0  ;;  %v15955_v22 = vpack.c.bf16 %v5603_v46, %v5602_v34  ;;  %v11052_v46 = vld [vmem:[%s17311_s3 + $0x70] sm:$0xff]  }
 0x76d   : > { %10707 = vmatprep.mubr.msk.bf16.mxu1 %vm18409_vm4, %v15686_v60  ;;  %vm18420_vm4 = vmmov %vm18389_vm0 }
 0x76e   : > { %10620 = vmatmul.mubr.msk.bf16.gmra.mxu0 %vm18410_vm12, %v15601_v2  ;;  %vm18421_vm12 = vmmov %vm18389_vm0  ;;  %v6921_v16 = vrot.slane %v15955_v22, 7 }
 0x76f   : > { %10623 = vmatprep.mubr.msk.bf16.mxu0 %vm18411_vm11, %v15670_v10  ;;  %vm18422_vm11 = vmmov %vm18389_vm0 }
 0x774   : > { %10708 = vmatmul.mubr.msk.bf16.gmra.mxu1 %vm18412_vm7, %v15712_v56  ;;  %vm6899_vm7 = vcmask 1040384  }
 0x775   : > { %10711 = vmatprep.mubr.msk.bf16.mxu1 %vm18413_vm1, %v15729_v33  ;;  %vm18423_vm1 = vmmov %vm18389_vm0  ;;  %v6902_v52 = vsel %vm6899_vm7, %v6900_v21, %v6901_v49  ;;  %v6904_v15 = vsel %vm6899_vm7, %v6901_v49, %v6903_v26  ;;  %v6906_v18 = vsel %vm6899_vm7, %v6903_v26, %v6905_v17  ;;  %v6912_v38 = vsel %vm6899_vm7, %v6909_v24, %v6911_v1 }
 0x776   : > { %10624 = vmatmul.mubr.msk.bf16.gmra.mxu0 %vm18414_vm13, %v15686_v60  ;;  %vm18424_vm13 = vmmov %vm18389_vm0  ;;  %v6914_v4 = vsel %vm6899_vm7, %v6911_v1, %v6913_v12  ;;  %v6922_v34 = vsel %vm6899_vm7, %v6919_v9, %v6921_v16 }
 0x777   : > { %10627 = vmatprep.mubr.msk.bf16.mxu0 %vm18389_vm0, %v15712_v56 }
 0x77c   : > { %10712 = vmatmul.mubr.msk.bf16.gmra.mxu1 %vm18415_vm3, %v15758_v37  ;;  %vm18425_vm3 = vmmov %vm18389_vm0 }
 0x77d   : > { %10715 = vmatprep.mubr.msk.bf16.mxu1 %vm18416_vm5, %v15775_v19  ;;  %vm18426_vm5 = vmmov %vm18389_vm0 }
 0x77e   : > { %10628 = vmatmul.mubr.msk.bf16.gmra.mxu0 %vm18417_vm9, %v15729_v33  ;;  %vm18427_vm9 = vmmov %vm18389_vm0 }
 0x77f   : > { %10631 = vmatprep.mubr.msk.bf16.mxu0 %vm18418_vm2, %v15758_v37  ;;  %vm18428_vm2 = vmmov %vm18389_vm0 }
 0x784   : > { %10716 = vmatmul.mubr.msk.bf16.gmra.mxu1 %vm18419_vm8, %v15751_v51  ;;  %vm18431_vm8 = vmmov %vm18389_vm0 }
 0x785   : > { %10719 = vmatprep.mubr.msk.bf16.mxu1 %vm18420_vm4, %v15783_v23  ;;  %vm18432_vm4 = vmmov %vm18389_vm0 }
 0x786   : > { %10632 = vmatmul.mubr.msk.bf16.gmra.mxu0 %vm18421_vm12, %v15775_v19  ;;  %vm18433_vm12 = vmmov %vm18389_vm0 }
 0x787   : > { %10635 = vmatprep.mubr.msk.bf16.mxu0 %vm18422_vm11, %v15751_v51  ;;  %vm18434_vm11 = vmmov %vm18389_vm0 }
 0x78c   : > { %10720 = vmatmul.mubr.msk.bf16.gmra.mxu1 %vm18423_vm1, %v15955_v22  ;;  %vm18435_vm1 = vmmov %vm18389_vm0 }
 0x78d   : > { %10755 = vmatprep.mubr.msk.bf16.mxu1 %vm18424_vm13, %v6902_v52  ;;  %vm18436_vm13 = vmmov %vm18389_vm0 }
 0x78e   : > { %10636 = vmatmul.mubr.msk.bf16.gmra.mxu0 %vm18389_vm0, %v15783_v23 }
 0x78f   : > { %10671 = vmatprep.mubr.msk.bf16.mxu0 %vm18425_vm3, %v15826_v11  ;;  %v6907_v11 = vrot.slane %v15686_v60, 7  ;;  %vm18437_vm3 = vmmov %vm18389_vm0 }
 0x791   : > { %v6908_v29 = vsel %vm6899_vm7, %v6905_v17, %v6907_v11  ;;  %v6910_v5 = vsel %vm6899_vm7, %v6907_v11, %v6909_v24 }
 0x794   : > { %10756 = vmatmul.mubr.msk.bf16.vlgmr.msra.gmra.mxu1 %vm18426_vm5, %v6904_v15  ;;  %vm18438_vm5 = vmmov %vm18389_vm0 }
 0x795   : > { %10759 = vmatprep.mubr.msk.bf16.mxu1 %vm18427_vm9, %v6906_v18  ;;  %10808 = vmatpush3.bf16.msra.mxu1 %v11049_v59  ;;  %v6917_v59 = vrot.slane %v15751_v51, 7  ;;  %vm18439_vm9 = vmmov %vm18389_vm0 }
 0x796   : > { %10672 = vmatmul.mubr.msk.bf16.vlgmr.msra.gmra.mxu0 %vm18428_vm2, %v15817_v45  ;;  %10809 = vmatprep.subr.bf16.mxu1 %v11050_v31  ;;  %vm18440_vm2 = vmmov %vm18389_vm0 }
 0x797   : > { %10675 = vmatprep.mubr.msk.bf16.mxu0 %vm18429_vm15, %v15835_v20  ;;  %10724 = vmatpush3.bf16.msra.mxu0 %v11047_v7  ;;  %v6916_v7 = vsel %vm6899_vm7, %v6913_v12, %v6915_v63  ;;  %v6918_v58 = vsel %vm6899_vm7, %v6915_v63, %v6917_v59  ;;  %v6920_v14 = vsel %vm6899_vm7, %v6917_v59, %v6919_v9  ;;  %vm18441_vm15 = vmmov %vm18389_vm0 }
 0x798   : > { %10725 = vmatprep.subr.bf16.mxu0 %v11048_v39 }
 0x799   : > { %10810 = vmatpush3.bf16.msra.mxu1 %v11050_v31 }
 0x79b   : > { %10726 = vmatpush3.bf16.msra.mxu0 %v11048_v39 }
 0x79c   : > { %10760 = vmatmul.mubr.msk.bf16.gmra.mxu1 %vm18430_vm10, %v6908_v29  ;;  %10779 = vmatprep.subr.bf16.mxu0 %v11051_v48  ;;  %vm18442_vm10 = vmmov %vm18389_vm0 }
 0x79d   : > { %10763 = vmatprep.mubr.msk.bf16.mxu1 %vm18431_vm8, %v6910_v5  ;;  %vm18443_vm8 = vmmov %vm18389_vm0 }
 0x79e   : > { %10676 = vmatmul.mubr.msk.bf16.gmra.mxu0 %vm18432_vm4, %v15838_v28  ;;  %vm18444_vm4 = vmmov %vm18389_vm0 }
 0x79f   : > { %10679 = vmatprep.mubr.msk.bf16.mxu0 %vm18433_vm12, %v15860_v42  ;;  %vm18445_vm12 = vmmov %vm18389_vm0 }
 0x7a4   : > { %10764 = vmatmul.mubr.msk.bf16.gmra.mxu1 %vm18434_vm11, %v6912_v38  ;;  %vm18446_vm11 = vmmov %vm18389_vm0 }
 0x7a5   : > { %10767 = vmatprep.mubr.msk.bf16.mxu1 %vm18435_vm1, %v6914_v4  ;;  %vm18447_vm1 = vmmov %vm18389_vm0 }
 0x7a6   : > { %10680 = vmatmul.mubr.msk.bf16.gmra.mxu0 %vm18436_vm13, %v15863_v36  ;;  %vm18448_vm13 = vmmov %vm18389_vm0 }
 0x7a7   : > { %10683 = vmatprep.mubr.msk.bf16.mxu0 %vm18389_vm0, %v15871_v8 }
 0x7ac   : > { %10768 = vmatmul.mubr.msk.bf16.gmra.mxu1 %vm18437_vm3, %v6916_v7  ;;  %vm18449_vm3 = vmmov %vm18389_vm0 }
 0x7ad   : > { %10771 = vmatprep.mubr.msk.bf16.mxu1 %vm18438_vm5, %v6918_v58  ;;  %vm18450_vm5 = vmmov %vm18389_vm0 }
 0x7ae   : > { %10684 = vmatmul.mubr.msk.bf16.gmra.mxu0 %vm18439_vm9, %v15868_v6  ;;  %vm18451_vm9 = vmmov %vm18389_vm0 }
 0x7af   : > { %10687 = vmatprep.mubr.msk.bf16.mxu0 %vm18440_vm2, %v15879_v27  ;;  %vm18452_vm2 = vmmov %vm18389_vm0 }
 0x7b4   : > { %10772 = vmatmul.mubr.msk.bf16.gmra.mxu1 %vm18441_vm15, %v6920_v14  ;;  %vm18454_vm15 = vmmov %vm18389_vm0 }
 0x7b5   : > { %10775 = vmatprep.mubr.msk.bf16.mxu1 %vm18442_vm10, %v6922_v34  ;;  %vm18455_vm10 = vmmov %vm18389_vm0 }
 0x7b6   : > { %10688 = vmatmul.mubr.msk.bf16.gmra.mxu0 %vm18443_vm8, %v15882_v41  ;;  %vm18456_vm8 = vmmov %vm18389_vm0 }
 0x7b7   : > { %10691 = vmatprep.mubr.msk.bf16.mxu0 %vm18444_vm4, %v15891_v55  ;;  %vm18457_vm4 = vmmov %vm18389_vm0 }
 0x7bc   : > { %10776 = vmatmul.mubr.msk.bf16.gmra.mxu1 %vm18445_vm12, %v6921_v16  ;;  %vm18458_vm12 = vmmov %vm18389_vm0 }
 0x7bd   : > { %10811 = vmatprep.mubr.msk.bf16.mxu1 %vm18446_vm11, %v15592_v44  ;;  %v18453_v44 = vmov 0   ;;  %vm18459_vm11 = vmmov %vm18389_vm0 }
 0x7be   : > { %10692 = vmatmul.mubr.msk.bf16.gmra.mxu0 %vm18447_vm1, %v15874_v47  ;;  %vm18460_vm1 = vmmov %vm18389_vm0 }
 0x7bf   : > { %10727 = vmatprep.mubr.msk.bf16.mxu0 %vm18448_vm13, %v15631_v54  ;;  %vm18461_vm13 = vmmov %vm18389_vm0  ;;  %v6723_v54 = vshll.u32 %v15955_v22, 16 }
 0x7c4   : > { %10812 = vmatmul.mubr.msk.bf16.vlgmr.msra.gmra.mxu1 %vm18389_vm0, %v15601_v2  ;;  %v5523_v2 = vmul.f32 %v15522_v30, %v15388_v0 }
 0x7c5   : > { %10815 = vmatprep.mubr.msk.bf16.mxu1 %vm18449_vm3, %v15670_v10  ;;  %vm18462_vm3 = vmmov %vm18389_vm0  ;;  %v6725_v10 = vrot.slane %v6723_v54, 1 }
 0x7c6   : > { %10728 = vmatmul.mubr.msk.bf16.vlgmr.msra.gmra.mxu0 %vm18450_vm5, %v15657_v25  ;;  %vm18463_vm5 = vmmov %vm18389_vm0  ;;  %v5577_v25 = vmul.f32 0.01, %v5523_v2 }
 0x7c7   : > { %10731 = vmatprep.mubr.msk.bf16.mxu0 %vm18451_vm9, %v15704_v43  ;;  %10780 = vmatpush3.bf16.msra.mxu0 %v11051_v48  ;;  %vm18464_vm9 = vmmov %vm18389_vm0  ;;  %v6727_v43 = vshrl.u32 %v15955_v22, 16 }
 0x7c8   : > { %10781 = vmatprep.subr.bf16.mxu0 %v11052_v46 }
 0x7cb   : > { %10782 = vmatpush3.bf16.msra.mxu0 %v11052_v46 }
 0x7cc   : > { %10816 = vmatmul.mubr.msk.bf16.gmra.mxu1 %vm18452_vm2, %v15686_v60  ;;  %8035 = vmatprep.subr.bf16.mxu0 %v18453_v44  ;;  %vm5550_vm2 = vcmp.ge.f32.partialorder %v5523_v2, 0.0  ;;  %v6726_v60 = vsel %vm2646_vm14, %v6722_v62, %v6725_v10 }
 0x7cd   : > { %10819 = vmatprep.mubr.msk.bf16.mxu1 %vm18454_vm15, %v15712_v56  ;;  %vm18465_vm15 = vmmov %vm18389_vm0  ;;  %v5604_v0 = vsel %vm5550_vm2, %v5523_v2, %v5577_v25 }
 0x7ce   : > { %10732 = vmatmul.mubr.msk.bf16.gmra.mxu0 %vm18455_vm10, %v15723_v53  ;;  %vm18466_vm10 = vmmov %vm18389_vm0  ;;  %v5618_v30 = vpack.c.bf16 %v5604_v0, %v5604_v0 }
 0x7cf   : > { %10735 = vmatprep.mubr.msk.bf16.mxu0 %vm18456_vm8, %v15744_v32  ;;  %vm18467_vm8 = vmmov %vm18389_vm0 }
 0x7d0   : > { %vm18476_vm2 = vmmov %vm18389_vm0 }
 0x7d4   : > { %10820 = vmatmul.mubr.msk.bf16.gmra.mxu1 %vm18457_vm4, %v15729_v33  ;;  %vm18468_vm4 = vmmov %vm18389_vm0 }
 0x7d5   : > { %10823 = vmatprep.mubr.msk.bf16.mxu1 %vm18458_vm12, %v15758_v37  ;;  %vm18469_vm12 = vmmov %vm18389_vm0 }
 0x7d6   : > { %10736 = vmatmul.mubr.msk.bf16.gmra.mxu0 %vm18459_vm11, %v15772_v61  ;;  %vm18470_vm11 = vmmov %vm18389_vm0 }
 0x7d7   : > { %10739 = vmatprep.mubr.msk.bf16.mxu0 %vm18460_vm1, %v15791_v13  ;;  %vm18471_vm1 = vmmov %vm18389_vm0 }
 0x7dc   : > { %10824 = vmatmul.mubr.msk.bf16.gmra.mxu1 %vm18461_vm13, %v15775_v19  ;;  %vm18472_vm13 = vmmov %vm18389_vm0 }
 0x7dd   : > { %10827 = vmatprep.mubr.msk.bf16.mxu1 %vm18389_vm0, %v15751_v51 }
 0x7de   : > { %10740 = vmatmul.mubr.msk.bf16.gmra.mxu0 %vm18462_vm3, %v15799_v40  ;;  %vm18473_vm3 = vmmov %vm18389_vm0 }
 0x7df   : > { %10743 = vmatprep.mubr.msk.bf16.mxu0 %vm18463_vm5, %v15842_v3  ;;  %vm18474_vm5 = vmmov %vm18389_vm0 }
 0x7e4   : > { %10828 = vmatmul.mubr.msk.bf16.gmra.mxu1 %vm18464_vm9, %v15783_v23  ;;  %vm18475_vm9 = vmmov %vm18389_vm0 }
 0x7e5   : > { %10831 = vmatprep.mubr.msk.bf16.mxu1 %vm18465_vm15, %v15955_v22  ;;  %vm18477_vm15 = vmmov %vm18389_vm0 }
 0x7e6   : > { %10744 = vmatmul.mubr.msk.bf16.gmra.mxu0 %vm18466_vm10, %v15852_v35  ;;  %vm18478_vm10 = vmmov %vm18389_vm0 }
 0x7e7   : > { %10747 = vmatprep.mubr.msk.bf16.mxu0 %vm18467_vm8, %v6726_v60  ;;  %vm18479_vm8 = vmmov %vm18389_vm0 }
 0x7ec   : > { %10832 = vmatmul.mubr.msk.bf16.gmra.mxu1 %vm18468_vm4, %v5618_v30  ;;  %vm18481_vm4 = vmmov %vm18389_vm0 }
 0x7ee   : > { %10748 = vmatmul.mubr.msk.bf16.gmra.mxu0 %vm18469_vm12, %v6727_v43  ;;  %vm7665_vm12 = vcmask 516096  }
 0x7ef   : > { %10783 = vmatprep.mubr.msk.bf16.mxu0 %vm18470_vm11, %v15817_v45  ;;  %vm8001_vm11 = vcmask 400384  }
 0x7f0   : > { %v16086_v56 = vpop.f32.mrf.mxu1 }
 0x7f2   : > { %v16088_v53 = vpop.f32.mrf.mxu1 }
 0x7f4   : > { %v16090_v33 = vpop.f32.mrf.mxu0  ;;  %v16092_v32 = vpop.f32.mrf.mxu1 }
 0x7f6   : > { %10784 = vmatmul.mubr.msk.bf16.vlgmr.msra.gmra.mxu0 %vm18471_vm1, %v15835_v20  ;;  %v5831_v51 = vpop.f32.mrf.mxu0  ;;  %v16098_v37 = vpop.f32.mrf.mxu1 }
 0x7f7   : > { %10787 = vmatprep.mubr.msk.bf16.mxu0 %vm18472_vm13, %v15838_v28 }
 0x7f8   : > { %v16100_v61 = vpop.f32.mrf.mxu0 }
 0x7fa   : > { %v16102_v19 = vpop.f32.mrf.mxu0 }
 0x7fc   : > { %v16104_v23 = vpop.f32.mrf.mxu1 }
 0x7fe   : > { %v16106_v13 = vpop.f32.mrf.mxu1  ;;  %v16108_v40 = vpop.f32.mrf.mxu0  ;;  %10788 = vmatmul.mubr.msk.bf16.gmra.mxu0 %vm18389_vm0, %v15860_v42 }
 0x7ff   : > { %10791 = vmatprep.mubr.msk.bf16.mxu0 %vm18473_vm3, %v15863_v36 }
 0x800   : > { %v16114_v45 = vpop.f32.mrf.mxu1  ;;  %v16116_v50 = vpop.f32.mrf.mxu0 }
 0x802   : > { %v16118_v20 = vpop.f32.mrf.mxu1  ;;  %v16120_v28 = vpop.f32.mrf.mxu0 }
 0x804   : > { %v16122_v3 = vpop.f32.mrf.mxu1  ;;  %v16124_v35 = vpop.f32.mrf.mxu0 }
 0x806   : > { %v16126_v57 = vpop.f32.mrf.mxu1  ;;  %v16128_v62 = vpop.f32.mrf.mxu0  ;;  %10792 = vmatmul.mubr.msk.bf16.gmra.mxu0 %vm18474_vm5, %v15871_v8 }
 0x807   : > { %10795 = vmatprep.mubr.msk.bf16.mxu0 %vm18475_vm9, %v15868_v6  ;;  %v7122_v6 = vrot.slane %v6727_v43, 7 }
 0x808   : > { %v16134_v42 = vpop.f32.mrf.mxu1  ;;  %v16136_v36 = vpop.f32.mrf.mxu0 }
 0x809   : > { %v7123_v39 = vor.u32 %v7122_v6, %v6723_v54 }
 0x80a   : > { %v16138_v21 = vpop.f32.mrf.mxu1  ;;  %v16140_v49 = vpop.f32.mrf.mxu0 }
 0x80c   : > { %v16142_v22 = vpop.f32.mrf.mxu1  ;;  %v16144_v52 = vpop.f32.mrf.mxu0 }
 0x80e   : > { %v16146_v26 = vpop.f32.mrf.mxu1  ;;  %v16148_v17 = vpop.f32.mrf.mxu0  ;;  %10796 = vmatmul.mubr.msk.bf16.gmra.mxu0 %vm18476_vm2, %v15879_v27 }
 0x80f   : > { %10799 = vmatprep.mubr.msk.bf16.mxu0 %vm18477_vm15, %v15882_v41  ;;  %v7124_v41 = vsel %vm4442_vm6, %v15874_v47, %v7123_v39  ;;  %vm7621_vm6 = vcmask 523264  }
 0x810   : > { %v16154_v8 = vpop.f32.mrf.mxu1  ;;  %v16156_v31 = vpop.f32.mrf.mxu0 }
 0x812   : > { %v16158_v15 = vpop.f32.mrf.mxu1  ;;  %v16160_v18 = vpop.f32.mrf.mxu0 }
 0x814   : > { %v16162_v11 = vpop.f32.mrf.mxu1  ;;  %v16164_v24 = vpop.f32.mrf.mxu0 }
 0x816   : > { %v16166_v48 = vpop.f32.mrf.mxu1  ;;  %v16168_v27 = vpop.f32.mrf.mxu0  ;;  %10800 = vmatmul.mubr.msk.bf16.gmra.mxu0 %vm18478_vm10, %v15891_v55 }
 0x817   : > { %10803 = vmatprep.mubr.msk.bf16.mxu0 %vm18479_vm8, %v7124_v41 }
 0x818   : > { %v16175_v29 = vpop.f32.mrf.mxu1  ;;  %v16177_v5 = vpop.f32.mrf.mxu0 }
 0x81a   : > { %v16179_v1 = vpop.f32.mrf.mxu1  ;;  %v16181_v12 = vpop.f32.mrf.mxu0 }
 0x81b   : > { %18480 = vst [vmem:[#allocation47_spill] sm:$0xff] %v16179_v1 }
 0x81c   : > { %v16183_v38 = vpop.f32.mrf.mxu1  ;;  %v16185_v4 = vpop.f32.mrf.mxu0 }
 0x81e   : > { %v16187_v63 = vpop.f32.mrf.mxu1  ;;  %v16189_v55 = vpop.f32.mrf.mxu0  ;;  %10804 = vmatmul.mubr.msk.bf16.gmra.mxu0 %vm18481_vm4, %v7122_v6 }
 0x820   : > { %v10666_v47 = vpop.f32.mrf.mxu1  ;;  %v16192_v59 = vpop.f32.mrf.mxu0 }
 0x822   : > { %v16194_v7 = vpop.f32.mrf.mxu1  ;;  %v10610_v58 = vpop.f32.mrf.mxu0 }
 0x823   : > { %18482 = vst [vmem:[#allocation33_spill] sm:$0xff] %v16194_v7 }
 0x824   : > { %v16196_v9 = vpop.f32.mrf.mxu1  ;;  %v16198_v16 = vpop.f32.mrf.mxu0 }
 0x825   : > { %18483 = vst [vmem:[#allocation48_spill] sm:$0xff] %v16198_v16 }
 0x826   : > { %v16200_v14 = vpop.f32.mrf.mxu1  ;;  %v10617_v34 = vpop.f32.mrf.mxu0 }
 0x827   : > { %v6004_v46 = vadd.f32 %v10617_v34, %v16090_v33 }
 0x828   : > { %v16203_v2 = vpop.f32.mrf.mxu1  ;;  %v5995_v54 = vpop.f32.mrf.mxu0 }
 0x829   : > { %v5996_v25 = vadd.f32 %v5995_v54, %v5831_v51  ;;  %v16206_v10 = vadd.f32 %v16086_v56, %v6004_v46 }
 0x82a   : > { %v16208_v60 = vpop.f32.mrf.mxu1  ;;  %v10618_v0 = vpop.f32.mrf.mxu0 }
 0x82b   : > { %v6007_v30 = vadd.f32 %v10618_v0, %v16100_v61  ;;  %v16212_v43 = vadd.f32 %v16088_v53, %v5996_v25 }
 0x82c   : > { %v16214_v6 = vpop.f32.mrf.mxu1  ;;  %v16216_v39 = vpop.f32.mrf.mxu0 }
 0x82d   : > { %v16219_v33 = vadd.f32 %v16092_v32, %v6007_v30 }
 0x82e   : > { %v16221_v41 = vpop.f32.mrf.mxu1  ;;  %v10621_v51 = vpop.f32.mrf.mxu0 }
 0x82f   : > { %v6020_v56 = vadd.f32 %v10621_v51, %v16108_v40 }
 0x830   : > { %v16224_v47 = vpop.f32.mrf.mxu1  ;;  %v6011_v58 = vpop.f32.mrf.mxu0 }
 0x831   : > { %v6012_v61 = vadd.f32 %v6011_v58, %v16116_v50  ;;  %v16228_v53 = vadd.f32 %v16104_v23, %v6020_v56 }
 0x832   : > { %v16230_v34 = vpop.f32.mrf.mxu1  ;;  %v10622_v46 = vpop.f32.mrf.mxu0 }
 0x833   : > { %v6023_v54 = vadd.f32 %v10622_v46, %v16120_v28  ;;  %v16234_v32 = vadd.f32 %v16106_v13, %v6012_v61 }
 0x834   : > { %v16236_v25 = vpop.f32.mrf.mxu1  ;;  %v16238_v0 = vpop.f32.mrf.mxu0 }
 0x835   : > { %v16241_v40 = vadd.f32 %v16114_v45, %v6023_v54 }
 0x836   : > { %v16243_v30 = vpop.f32.mrf.mxu1  ;;  %v10625_v50 = vpop.f32.mrf.mxu0 }
 0x837   : > { %v6036_v23 = vadd.f32 %v10625_v50, %v16128_v62 }
 0x838   : > { %v16246_v51 = vpop.f32.mrf.mxu1  ;;  %v6027_v56 = vpop.f32.mrf.mxu0 }
 0x839   : > { %v6028_v28 = vadd.f32 %v6027_v56, %v16136_v36  ;;  %v16250_v13 = vadd.f32 %v16122_v3, %v6036_v23 }
 0x83a   : > { %v16252_v58 = vpop.f32.mrf.mxu1  ;;  %v10626_v61 = vpop.f32.mrf.mxu0 }
 0x83b   : > { %v6039_v46 = vadd.f32 %v10626_v61, %v16140_v49  ;;  %v16256_v45 = vadd.f32 %v16126_v57, %v6028_v28 }
 0x83c   : > { %v16258_v54 = vpop.f32.mrf.mxu1  ;;  %v16260_v44 = vpop.f32.mrf.mxu0 }
 0x83d   : > { %v16263_v62 = vadd.f32 %v16134_v42, %v6039_v46 }
 0x83e   : > { %v16265_v50 = vpop.f32.mrf.mxu1  ;;  %v10629_v36 = vpop.f32.mrf.mxu0 }
 0x83f   : > { %v6052_v3 = vadd.f32 %v10629_v36, %v16148_v17 }
 0x840   : > { %v16268_v23 = vpop.f32.mrf.mxu1  ;;  %v6043_v56 = vpop.f32.mrf.mxu0 }
 0x841   : > { %v6044_v49 = vadd.f32 %v6043_v56, %v16156_v31  ;;  %v16272_v57 = vadd.f32 %v16142_v22, %v6052_v3 }
 0x842   : > { %v16274_v28 = vpop.f32.mrf.mxu1  ;;  %v10630_v61 = vpop.f32.mrf.mxu0 }
 0x843   : > { %v6055_v7 = vadd.f32 %v10630_v61, %v16160_v18  ;;  %v16278_v42 = vadd.f32 %v16146_v26, %v6044_v49 }
 0x844   : > { %v16280_v46 = vpop.f32.mrf.mxu1  ;;  %v16282_v16 = vpop.f32.mrf.mxu0 }
 0x845   : > { %v16285_v17 = vadd.f32 %v16154_v8, %v6055_v7 }
 0x846   : > { %v16287_v36 = vpop.f32.mrf.mxu1  ;;  %v10633_v31 = vpop.f32.mrf.mxu0 }
 0x847   : > { %18484 = vst [vmem:[#allocation49_spill] sm:$0xff] %v16287_v36  ;;  %v6068_v22 = vadd.f32 %v10633_v31, %v16168_v27 }
 0x848   : > { %v16290_v3 = vpop.f32.mrf.mxu1  ;;  %v6059_v56 = vpop.f32.mrf.mxu0 }
 0x849   : > { %v6060_v18 = vadd.f32 %v6059_v56, %v16177_v5  ;;  %v16294_v26 = vadd.f32 %v16162_v11, %v6068_v22 }
 0x84a   : > { %v16296_v49 = vpop.f32.mrf.mxu1  ;;  %v10634_v61 = vpop.f32.mrf.mxu0 }
 0x84b   : > { %18485 = vst [vmem:[#allocation50_spill] sm:$0xff] %v16296_v49  ;;  %v6071_v1 = vadd.f32 %v10634_v61, %v16181_v12  ;;  %v16300_v8 = vadd.f32 %v16166_v48, %v6060_v18 }
 0x84c   : > { %v16302_v7 = vpop.f32.mrf.mxu1  ;;  %v16304_v36 = vpop.f32.mrf.mxu0 }
 0x84d   : > { %v16307_v27 = vadd.f32 %v16175_v29, %v6071_v1 }
 0x84e   : > { %v16309_v31 = vpop.f32.mrf.mxu1  ;;  %v10637_v5 = vpop.f32.mrf.mxu0 }
 0x84f   : > { %18486 = vst [vmem:[#allocation51_spill] sm:$0xff] %v16309_v31  ;;  %v6084_v11 = vadd.f32 %v10637_v5, %v16189_v55  ;;  %v5999_v5 = vadd.f32 %v16216_v39, %v16102_v19 }
 0x850   : > { %v10722_v22 = vpop.f32.mrf.mxu1  ;;  %v6075_v56 = vpop.f32.mrf.mxu0 }
 0x851   : > { %v6076_v49 = vadd.f32 %v6075_v56, %v16192_v59  ;;  %v16314_v12 = vadd.f32 %v16183_v38, %v6084_v11 }
 0x852   : > { %v16316_v48 = vpop.f32.mrf.mxu1  ;;  %v10638_v18 = vpop.f32.mrf.mxu0 }
 0x853   : > { %v16319_v61 = vadd.f32 %v16187_v63, %v6076_v49 }
 0x854   : > { %v16321_v29 = vpop.f32.mrf.mxu1  ;;  %v16323_v1 = vpop.f32.mrf.mxu0 }
 0x855   : > { %18487 = vst [vmem:[#allocation52_spill] sm:$0xff] %v16321_v29 }
 0x856   : > { %v16325_v31 = vpop.f32.mrf.mxu1  ;;  %v10673_v55 = vpop.f32.mrf.mxu0 }
 0x857   : > { %18488 = vst [vmem:[#allocation53_spill] sm:$0xff] %v16325_v31  ;;  %v6535_v59 = vadd.f32 %v10673_v55, %v16206_v10  ;;  %v6301_v31 = vadd.f32 %v16098_v37, %v5999_v5 }
 0x858   : > { %v16330_v38 = vpop.f32.mrf.mxu1  ;;  %v6439_v11 = vpop.f32.mrf.mxu0 }
 0x859   : > { %v6533_v22 = vadd.f32 %v6439_v11, %v16212_v43  ;;  %v16334_v63 = vadd.f32 %v16196_v9, %v6535_v59  ;;  %v6015_v59 = vadd.f32 %v16238_v0, %v16124_v35 }
 0x85a   : > { %v16336_v49 = vpop.f32.mrf.mxu1  ;;  %v10674_v56 = vpop.f32.mrf.mxu0 }
 0x85b   : > { %v6536_v18 = vadd.f32 %v10674_v56, %v16219_v33  ;;  %v16341_v29 = vadd.f32 %v16200_v14, %v6533_v22  ;;  %v6305_v35 = vadd.f32 %v16118_v20, %v6015_v59 }
 0x85c   : > { %v16343_v19 = vpop.f32.mrf.mxu1  ;;  %v6442_v10 = vpop.f32.mrf.mxu0 }
 0x85d   : > { %v6534_v39 = vadd.f32 %v6442_v10, %v6301_v31  ;;  %v16346_v55 = vadd.f32 %v16203_v2, %v6536_v18 }
 0x85e   : > { %v16348_v43 = vpop.f32.mrf.mxu1  ;;  %v10677_v9 = vpop.f32.mrf.mxu0 }
 0x85f   : > { %v6539_v33 = vadd.f32 %v10677_v9, %v16228_v53  ;;  %v16354_v37 = vadd.f32 %v16208_v60, %v6534_v39  ;;  %v6031_v39 = vadd.f32 %v16260_v44, %v16144_v52 }
 0x860   : > { %v16356_v14 = vpop.f32.mrf.mxu1  ;;  %v6455_v5 = vpop.f32.mrf.mxu0 }
 0x861   : > { %v6537_v11 = vadd.f32 %v6455_v5, %v16234_v32  ;;  %v16360_v31 = vadd.f32 %v16214_v6, %v6539_v33  ;;  %v6309_v44 = vadd.f32 %v16138_v21, %v6031_v39 }
 0x862   : > { %v16362_v2 = vpop.f32.mrf.mxu1  ;;  %v10678_v22 = vpop.f32.mrf.mxu0 }
 0x863   : > { %v6540_v56 = vadd.f32 %v10678_v22, %v16241_v40  ;;  %v16367_v53 = vadd.f32 %v16221_v41, %v6537_v11 }
 0x864   : > { %v16369_v60 = vpop.f32.mrf.mxu1  ;;  %v6458_v0 = vpop.f32.mrf.mxu0 }
 0x865   : > { %v6538_v18 = vadd.f32 %v6458_v0, %v6305_v35  ;;  %v16372_v10 = vadd.f32 %v16224_v47, %v6540_v56  ;;  %v6047_v35 = vadd.f32 %v16282_v16, %v16164_v24 }
 0x866   : > { %v16374_v32 = vpop.f32.mrf.mxu1  ;;  %v10681_v6 = vpop.f32.mrf.mxu0 }
 0x867   : > { %v6543_v40 = vadd.f32 %v10681_v6, %v16250_v13  ;;  %v16380_v20 = vadd.f32 %v16230_v34, %v6538_v18  ;;  %v6313_v24 = vadd.f32 %v16158_v15, %v6047_v35  ;;  %v18489_v35 = vld [vmem:[#allocation47_spill] sm:$0xff] }
 0x868   : > { %v16382_v41 = vpop.f32.mrf.mxu1  ;;  %v6471_v9 = vpop.f32.mrf.mxu0 }
 0x869   : > { %v6541_v59 = vadd.f32 %v6471_v9, %v16256_v45  ;;  %v16386_v33 = vadd.f32 %v16236_v25, %v6543_v40 }
 0x86a   : > { %v16388_v47 = vpop.f32.mrf.mxu1  ;;  %v10682_v5 = vpop.f32.mrf.mxu0 }
 0x86b   : > { %v6544_v11 = vadd.f32 %v10682_v5, %v16263_v62  ;;  %v16393_v52 = vadd.f32 %v16243_v30, %v6541_v59  ;;  %v6063_v5 = vadd.f32 %v16304_v36, %v16185_v4  ;;  %v18490_v36 = vld [vmem:[#allocation49_spill] sm:$0xff] }
 0x86c   : > { %v16395_v34 = vpop.f32.mrf.mxu1  ;;  %v6474_v13 = vpop.f32.mrf.mxu0 }
 0x86d   : > { %v6542_v22 = vadd.f32 %v6474_v13, %v6309_v44  ;;  %v16398_v56 = vadd.f32 %v16246_v51, %v6544_v11  ;;  %v6317_v4 = vadd.f32 %v18489_v35, %v6063_v5 }
 0x86e   : > { %v16400_v45 = vpop.f32.mrf.mxu1  ;;  %v10685_v25 = vpop.f32.mrf.mxu0 }
 0x86f   : > { %v6547_v62 = vadd.f32 %v10685_v25, %v16272_v57  ;;  %v16406_v21 = vadd.f32 %v16252_v58, %v6542_v22 }
 0x870   : > { %v16408_v30 = vpop.f32.mrf.mxu1  ;;  %v6487_v0 = vpop.f32.mrf.mxu0 }
 0x871   : > { %v6545_v18 = vadd.f32 %v6487_v0, %v16278_v42  ;;  %v16412_v6 = vadd.f32 %v16258_v54, %v6547_v62 }
 0x872   : > { %v16414_v51 = vpop.f32.mrf.mxu1  ;;  %v10686_v39 = vpop.f32.mrf.mxu0 }
 0x873   : > { %v6548_v40 = vadd.f32 %v10686_v39, %v16285_v17  ;;  %v16419_v16 = vadd.f32 %v16265_v50, %v6545_v18  ;;  %v18491_v39 = vld [vmem:[#allocation48_spill] sm:$0xff] }
 0x874   : > { %v16421_v58 = vpop.f32.mrf.mxu1  ;;  %v6490_v57 = vpop.f32.mrf.mxu0 }
 0x875   : > { %v6546_v9 = vadd.f32 %v6490_v57, %v6313_v24  ;;  %v16424_v59 = vadd.f32 %v16268_v23, %v6548_v40  ;;  %v6079_v40 = vadd.f32 %v16323_v1, %v18491_v39  ;;  %v18492_v24 = vld [vmem:[#allocation50_spill] sm:$0xff] }
 0x876   : > { %v16426_v42 = vpop.f32.mrf.mxu1  ;;  %v10689_v54 = vpop.f32.mrf.mxu0 }
 0x877   : > { %v6551_v17 = vadd.f32 %v10689_v54, %v16294_v26  ;;  %v16432_v15 = vadd.f32 %v16274_v28, %v6546_v9 }
 0x878   : > { %v16434_v50 = vpop.f32.mrf.mxu1  ;;  %v6503_v11 = vpop.f32.mrf.mxu0 }
 0x879   : > { %v6549_v44 = vadd.f32 %v6503_v11, %v16300_v8  ;;  %v16438_v13 = vadd.f32 %v16280_v46, %v6551_v17 }
 0x87a   : > { %v16440_v23 = vpop.f32.mrf.mxu1  ;;  %v10690_v22 = vpop.f32.mrf.mxu0 }
 0x87b   : > { %v6552_v25 = vadd.f32 %v10690_v22, %v16307_v27  ;;  %v16445_v26 = vadd.f32 %v18490_v36, %v6549_v44  ;;  %v18493_v44 = vld [vmem:[#allocation33_spill] sm:$0xff] }
 0x87c   : > { %v16447_v28 = vpop.f32.mrf.mxu1  ;;  %v6506_v62 = vpop.f32.mrf.mxu0  ;;  %v6321_v22 = vadd.f32 %v18493_v44, %v6079_v40  ;;  %v18495_v40 = vld [vmem:[#allocation52_spill] sm:$0xff] }
 0x87d   : > { %v6550_v0 = vadd.f32 %v6506_v62, %v6317_v4  ;;  %v16450_v18 = vadd.f32 %v16290_v3, %v6552_v25  ;;  %v18494_v25 = vld [vmem:[#allocation51_spill] sm:$0xff] }
 0x87e   : > { %v16452_v8 = vpop.f32.mrf.mxu1  ;;  %v10693_v46 = vpop.f32.mrf.mxu0 }
 0x87f   : > { %v6555_v27 = vadd.f32 %v10693_v46, %v16314_v12  ;;  %v16458_v57 = vadd.f32 %v18492_v24, %v6550_v0 }
 0x880   : > { %v10778_v9 = vpop.f32.mrf.mxu1  ;;  %v6519_v54 = vpop.f32.mrf.mxu0 }
 0x881   : > { %v6553_v5 = vadd.f32 %v6519_v54, %v16319_v61  ;;  %v16462_v17 = vadd.f32 %v16302_v7, %v6555_v27 }
 0x882   : > { %v16464_v3 = vpop.f32.mrf.mxu1  ;;  %v10694_v11 = vpop.f32.mrf.mxu0 }
 0x883   : > { %v16468_v35 = vadd.f32 %v18494_v25, %v6553_v5  ;;  %v18496_v5 = vld [vmem:[#allocation53_spill] sm:$0xff] }
 0x884   : > { %v16470_v1 = vpop.f32.mrf.mxu1  ;;  %v6522_v12 = vpop.f32.mrf.mxu0 }
 0x885   : > { %v6554_v4 = vadd.f32 %v6522_v12, %v6321_v22 }
 0x886   : > { %v16472_v36 = vpop.f32.mrf.mxu1  ;;  %v10729_v62 = vpop.f32.mrf.mxu0 }
 0x887   : > { %v6877_v61 = vadd.f32 %v10729_v62, %v16334_v63  ;;  %v16476_v7 = vadd.f32 %v16316_v48, %v6554_v4 }
 0x888   : > { %v16478_v0 = vpop.f32.mrf.mxu1  ;;  %v6781_v46 = vpop.f32.mrf.mxu0 }
 0x889   : > { %v6875_v39 = vadd.f32 %v6781_v46, %v16341_v29  ;;  %v16482_v27 = vadd.f32 %v18495_v40, %v6877_v61 }
 0x88a   : > { %v16484_v24 = vpop.f32.mrf.mxu1  ;;  %v10730_v9 = vpop.f32.mrf.mxu0 }
 0x88b   : > { %v6878_v54 = vadd.f32 %v10730_v9, %v16346_v55  ;;  %v16488_v11 = vadd.f32 %v18496_v5, %v6875_v39 }
 0x88c   : > { %v16490_v63 = vpop.f32.mrf.mxu1  ;;  %v6784_v48 = vpop.f32.mrf.mxu0 }
 0x88d   : > { %v6876_v44 = vadd.f32 %v6784_v48, %v16354_v37  ;;  %v16494_v22 = vadd.f32 %v16330_v38, %v6878_v54 }
 0x88e   : > { %v16496_v29 = vpop.f32.mrf.mxu1  ;;  %v10733_v25 = vpop.f32.mrf.mxu0 }
 0x88f   : > { %v6881_v12 = vadd.f32 %v10733_v25, %v16360_v31  ;;  %v16500_v4 = vadd.f32 %v16336_v49, %v6876_v44 }
 0x890   : > { %v16502_v55 = vpop.f32.mrf.mxu1  ;;  %v6797_v62 = vpop.f32.mrf.mxu0 }
 0x891   : > { %v6879_v61 = vadd.f32 %v6797_v62, %v16367_v53  ;;  %v16506_v46 = vadd.f32 %v16343_v19, %v6881_v12 }
 0x892   : > { %v16508_v37 = vpop.f32.mrf.mxu1  ;;  %v10734_v38 = vpop.f32.mrf.mxu0 }
 0x893   : > { %v6882_v39 = vadd.f32 %v10734_v38, %v16372_v10  ;;  %v16512_v40 = vadd.f32 %v16348_v43, %v6879_v61 }
 0x894   : > { %v16514_v31 = vpop.f32.mrf.mxu1  ;;  %v6800_v49 = vpop.f32.mrf.mxu0 }
 0x895   : > { %v6880_v9 = vadd.f32 %v6800_v49, %v16380_v20  ;;  %v16518_v54 = vadd.f32 %v16356_v14, %v6882_v39 }
 0x896   : > { %v16520_v53 = vpop.f32.mrf.mxu1  ;;  %v10737_v19 = vpop.f32.mrf.mxu0 }
 0x897   : > { %v6885_v5 = vadd.f32 %v10737_v19, %v16386_v33  ;;  %v16524_v48 = vadd.f32 %v16362_v2, %v6880_v9 }
 0x898   : > { %v16526_v10 = vpop.f32.mrf.mxu1  ;;  %v6813_v43 = vpop.f32.mrf.mxu0 }
 0x899   : > { %v6883_v44 = vadd.f32 %v6813_v43, %v16393_v52  ;;  %v16530_v25 = vadd.f32 %v16369_v60, %v6885_v5 }
 0x89a   : > { %v16532_v20 = vpop.f32.mrf.mxu1  ;;  %v10738_v14 = vpop.f32.mrf.mxu0 }
 0x89b   : > { %v6886_v12 = vadd.f32 %v10738_v14, %v16398_v56  ;;  %v16536_v62 = vadd.f32 %v16374_v32, %v6883_v44  ;;  %v16564_v44 = vpop.permute.xlu1 %7485 }
 0x89c   : > { %v16538_v33 = vpop.f32.mrf.mxu1  ;;  %v6816_v2 = vpop.f32.mrf.mxu0 }
 0x89d   : > { %v6884_v61 = vadd.f32 %v6816_v2, %v16406_v21  ;;  %v16542_v38 = vadd.f32 %v16382_v41, %v6886_v12 }
 0x89e   : > { %v16544_v52 = vpop.f32.mrf.mxu1  ;;  %v10741_v60 = vpop.f32.mrf.mxu0 }
 0x89f   : > { %v6889_v39 = vadd.f32 %v10741_v60, %v16412_v6  ;;  %v16548_v49 = vadd.f32 %v16388_v47, %v6884_v61 }
 0x8a0   : > { %v16550_v56 = vpop.f32.mrf.mxu1  ;;  %v6829_v32 = vpop.f32.mrf.mxu0 }
 0x8a1   : > { %v6887_v9 = vadd.f32 %v6829_v32, %v16419_v16  ;;  %v16554_v19 = vadd.f32 %v16395_v34, %v6889_v39  ;;  %v16584_v32 = vpop.permute.xlu0 %7490 }
 0x8a2   : > { %v16556_v21 = vpop.f32.mrf.mxu1  ;;  %v10742_v41 = vpop.f32.mrf.mxu0 }
 0x8a3   : > { %v6890_v5 = vadd.f32 %v10742_v41, %v16424_v59  ;;  %v16560_v43 = vadd.f32 %v16400_v45, %v6887_v9  ;;  %v16586_v9 = vpop.permute.xlu1 %7495 }
 0x8a4   : > { %v16562_v6 = vpop.f32.mrf.mxu1  ;;  %v6832_v47 = vpop.f32.mrf.mxu0  ;;  %18497 = vst [vmem:[#allocation54_spill] sm:$0xff] %v16586_v9 }
 0x8a5   : > { %v6888_v14 = vadd.f32 %v6832_v47, %v16432_v15  ;;  %v16568_v16 = vadd.f32 %v16408_v30, %v6890_v5 }
 0x8a6   : > { %v16570_v34 = vpop.f32.mrf.mxu1  ;;  %v10745_v12 = vpop.f32.mrf.mxu0 }
 0x8a7   : > { %v6893_v2 = vadd.f32 %v10745_v12, %v16438_v13  ;;  %v16574_v59 = vadd.f32 %v16414_v51, %v6888_v14 }
 0x8a8   : > { %v16576_v45 = vpop.f32.mrf.mxu1  ;;  %v6845_v61 = vpop.f32.mrf.mxu0 }
 0x8a9   : > { %v6891_v60 = vadd.f32 %v6845_v61, %v16445_v26  ;;  %v16580_v39 = vadd.f32 %v16421_v58, %v6893_v2 }
 0x8aa   : > { %v16582_v15 = vpop.f32.mrf.mxu1  ;;  %v10746_v30 = vpop.f32.mrf.mxu0 }
 0x8ab   : > { %v6894_v13 = vadd.f32 %v10746_v30, %v16450_v18  ;;  %v16590_v51 = vadd.f32 %v16426_v42, %v6891_v60  ;;  %v16604_v42 = vpop.permute.xlu0 %7500 }
 0x8ac   : > { %v16592_v41 = vpop.f32.mrf.mxu1  ;;  %v6848_v5 = vpop.f32.mrf.mxu0  ;;  %18498 = vst [vmem:[#allocation55_spill] sm:$0xff] %v16604_v42 }
 0x8ad   : > { %v6892_v26 = vadd.f32 %v6848_v5, %v16458_v57  ;;  %v16596_v58 = vadd.f32 %v16434_v50, %v6894_v13  ;;  %v16610_v57 = vpop.permute.xlu1 %7505 }
 0x8ae   : > { %v16598_v47 = vpop.f32.mrf.mxu1  ;;  %v10749_v14 = vpop.f32.mrf.mxu0 }
 0x8af   : > { %v6897_v12 = vadd.f32 %v10749_v14, %v16462_v17  ;;  %v16602_v2 = vadd.f32 %v16440_v23, %v6892_v26  ;;  %v16616_v26 = vpop.permute.xlu0 %7510 }
 0x8b0   : > { %v10834_v18 = vpop.f32.mrf.mxu1  ;;  %v6861_v61 = vpop.f32.mrf.mxu0 }
 0x8b1   : > { %v6895_v60 = vadd.f32 %v6861_v61, %v16468_v35  ;;  %v16608_v30 = vadd.f32 %v16447_v28, %v6897_v12  ;;  %v16622_v35 = vpop.permute.xlu1 %7515 }
 0x8b2   : > { %v10750_v50 = vpop.f32.mrf.mxu0 }
 0x8b3   : > { %v16613_v13 = vadd.f32 %v16452_v8, %v6895_v60 }
 0x8b4   : > { %v6864_v5 = vpop.f32.mrf.mxu0 }
 0x8b5   : > { %v6896_v17 = vadd.f32 %v6864_v5, %v16476_v7  ;;  %v16632_v5 = vpop.permute.xlu0 %7520 }
 0x8b6   : > { %v10785_v23 = vpop.f32.mrf.mxu0 }
 0x8b7   : > { %v7273_v14 = vadd.f32 %v10785_v23, %v16482_v27  ;;  %v16620_v18 = vadd.f32 %v16464_v3, %v6896_v17  ;;  %v16638_v17 = vpop.permute.xlu1 %7525 }
 0x8b8   : > { %v7177_v28 = vpop.f32.mrf.mxu0 }
 0x8b9   : > { %v16625_v12 = vadd.f32 %v16470_v1, %v7273_v14  ;;  %v7271_v8 = vadd.f32 %v7177_v28, %v16488_v11 }
 0x8ba   : > { %v10786_v61 = vpop.f32.mrf.mxu0 }
 0x8bb   : > { %v16629_v60 = vadd.f32 %v16472_v36, %v7271_v8  ;;  %v7274_v7 = vadd.f32 %v10786_v61, %v16494_v22  ;;  %v7600_v14 = vmul.f32 %v16586_v9, %v16625_v12 }
 0x8bc   : > { %v7180_v50 = vpop.f32.mrf.mxu0 }
 0x8bd   : > { %v16635_v3 = vadd.f32 %v16478_v0, %v7274_v7  ;;  %v7272_v27 = vadd.f32 %v7180_v50, %v16500_v4  ;;  %v7598_v1 = vmul.f32 %v16564_v44, %v16629_v60 }
 0x8be   : > { %v10789_v11 = vpop.f32.mrf.mxu0 }
 0x8bf   : > { %v16643_v23 = vadd.f32 %v16484_v24, %v7272_v27  ;;  %v7277_v36 = vadd.f32 %v10789_v11, %v16506_v46  ;;  %v7622_v8 = vsel %vm7621_vm6, %v7598_v1, 0.0  ;;  %v16655_v24 = vpop.permute.xlu0 %7530  ;;  %v7601_v46 = vmul.f32 %v16604_v42, %v16635_v3  ;;  %v16664_v11 = vpop.permute.xlu1 %7535 }
 0x8c0   : > { %v7193_v22 = vpop.f32.mrf.mxu0 }
 0x8c1   : > { %v7599_v0 = vmul.f32 %v16584_v32, %v16643_v23  ;;  %v16651_v4 = vadd.f32 %v16490_v63, %v7277_v36  ;;  %v7275_v28 = vadd.f32 %v7193_v22, %v16512_v40  ;;  %v7625_v40 = vsel %vm7621_vm6, %v7600_v14, 0.0 }
 0x8c2   : > { %v10790_v61 = vpop.f32.mrf.mxu0 }
 0x8c3   : > { %v7623_v7 = vsel %vm7621_vm6, %v7599_v0, 0.0  ;;  %v16661_v50 = vadd.f32 %v16496_v29, %v7275_v28  ;;  %v7278_v27 = vadd.f32 %v10790_v61, %v16518_v54  ;;  %v7627_v29 = vsel %vm7621_vm6, %v7601_v46, 0.0 }
 0x8c4   : > { %v7624_v63 = vadd.f32 %v7623_v7, %v7622_v8  ;;  %v7196_v36 = vpop.f32.mrf.mxu0  ;;  %v7604_v14 = vmul.f32 %v16622_v35, %v16651_v4  ;;  %v16680_v7 = vpop.permute.xlu0 %7540 }
 0x8c5   : > { %v7602_v1 = vmul.f32 %v16610_v57, %v16661_v50  ;;  %v16670_v22 = vadd.f32 %v16502_v55, %v7278_v27  ;;  %v7276_v42 = vadd.f32 %v7196_v36, %v16524_v48 }
 0x8c6   : > { %v7626_v0 = vadd.f32 %v7625_v40, %v7624_v63  ;;  %v10793_v9 = vpop.f32.mrf.mxu0 }
 0x8c7   : > { %v16675_v54 = vadd.f32 %v16508_v37, %v7276_v42  ;;  %v7281_v28 = vadd.f32 %v10793_v9, %v16530_v25  ;;  %v7629_v55 = vsel %vm7621_vm6, %v7602_v1, 0.0  ;;  %v16689_v42 = vpop.permute.xlu1 %7545  ;;  %v7605_v46 = vmul.f32 %v16632_v5, %v16670_v22 }
 0x8c8   : > { %v7628_v8 = vadd.f32 %v7627_v29, %v7626_v0  ;;  %v7209_v61 = vpop.f32.mrf.mxu0 }
 0x8c9   : > { %v7603_v48 = vmul.f32 %v16616_v26, %v16675_v54  ;;  %v16686_v27 = vadd.f32 %v16514_v31, %v7281_v28  ;;  %v7279_v37 = vadd.f32 %v7209_v61, %v16536_v62  ;;  %v7633_v31 = vsel %vm7621_vm6, %v7604_v14, 0.0 }
 0x8ca   : > { %v7630_v25 = vadd.f32 %v7629_v55, %v7628_v8  ;;  %v10794_v9 = vpop.f32.mrf.mxu0  ;;  %v16705_v55 = vpop.permute.xlu0 %7550 }
 0x8cb   : > { %v7631_v63 = vsel %vm7621_vm6, %v7603_v48, 0.0  ;;  %v16695_v36 = vadd.f32 %v16520_v53, %v7279_v37  ;;  %v7282_v40 = vadd.f32 %v10794_v9, %v16542_v38  ;;  %v7635_v53 = vsel %vm7621_vm6, %v7605_v46, 0.0  ;;  %v16712_v14 = vpop.permute.xlu1 %7555 }
 0x8cc   : > { %v7632_v1 = vadd.f32 %v7631_v63, %v7630_v25  ;;  %v7212_v0 = vpop.f32.mrf.mxu0  ;;  %v7608_v37 = vmul.f32 %v16664_v11, %v16686_v27 }
 0x8cd   : > { %v7606_v62 = vmul.f32 %v16638_v17, %v16695_v36  ;;  %v16702_v29 = vadd.f32 %v16526_v10, %v7282_v40  ;;  %v7280_v28 = vadd.f32 %v7212_v0, %v16548_v49 }
 0x8ce   : > { %v7634_v8 = vadd.f32 %v7633_v31, %v7632_v1  ;;  %v10797_v61 = vpop.f32.mrf.mxu0 }
 0x8cf   : > { %v16709_v38 = vadd.f32 %v16532_v20, %v7280_v28  ;;  %v7285_v48 = vadd.f32 %v10797_v61, %v16554_v19  ;;  %v7637_v49 = vsel %vm7621_vm6, %v7606_v62, 0.0  ;;  %v7609_v19 = vmul.f32 %v16680_v7, %v16702_v29 }
 0x8d0   : > { %v7636_v10 = vadd.f32 %v7635_v53, %v7634_v8  ;;  %v7225_v25 = vpop.f32.mrf.mxu0  ;;  %v16730_v8 = vpop.permute.xlu0 %7560 }
 0x8d1   : > { %v7607_v9 = vmul.f32 %v16655_v24, %v16709_v38  ;;  %v16720_v63 = vadd.f32 %v16538_v33, %v7285_v48  ;;  %v7283_v20 = vadd.f32 %v7225_v25, %v16560_v43  ;;  %v7641_v33 = vsel %vm7621_vm6, %v7608_v37, 0.0  ;;  %v16739_v48 = vpop.permute.xlu1 %7565 }
 0x8d2   : > { %v7638_v46 = vadd.f32 %v7637_v49, %v7636_v10  ;;  %v10798_v40 = vpop.f32.mrf.mxu0 }
 0x8d3   : > { %v7639_v1 = vsel %vm7621_vm6, %v7607_v9, 0.0  ;;  %v16727_v0 = vadd.f32 %v16544_v52, %v7283_v20  ;;  %v7286_v31 = vadd.f32 %v10798_v40, %v16568_v16  ;;  %v7643_v16 = vsel %vm7621_vm6, %v7609_v19, 0.0 }
 0x8d4   : > { %v7640_v62 = vadd.f32 %v7639_v1, %v7638_v46  ;;  %v7228_v28 = vpop.f32.mrf.mxu0  ;;  %v7612_v37 = vmul.f32 %v16712_v14, %v16720_v63  ;;  %v16755_v1 = vpop.permute.xlu0 %7570 }
 0x8d5   : > { %v7610_v43 = vmul.f32 %v16689_v42, %v16727_v0  ;;  %v16736_v61 = vadd.f32 %v16550_v56, %v7286_v31  ;;  %v7284_v53 = vadd.f32 %v7228_v28, %v16574_v59 }
 0x8d6   : > { %v7642_v52 = vadd.f32 %v7641_v33, %v7640_v62  ;;  %v10801_v10 = vpop.f32.mrf.mxu0  ;;  %v16764_v33 = vpop.permute.xlu1 %7575 }
 0x8d7   : > { %v16743_v25 = vadd.f32 %v16556_v21, %v7284_v53  ;;  %v7289_v49 = vadd.f32 %v10801_v10, %v16580_v39  ;;  %v7645_v56 = vsel %vm7621_vm6, %v7610_v43, 0.0  ;;  %v7613_v39 = vmul.f32 %v16730_v8, %v16736_v61 }
 0x8d8   : > { %v7644_v9 = vadd.f32 %v7643_v16, %v7642_v52  ;;  %v7241_v20 = vpop.f32.mrf.mxu0 }
 0x8d9   : > { %v7611_v59 = vmul.f32 %v16705_v55, %v16743_v25  ;;  %v16752_v46 = vadd.f32 %v16562_v6, %v7289_v49  ;;  %v7287_v40 = vadd.f32 %v7241_v20, %v16590_v51  ;;  %v7649_v51 = vsel %vm7621_vm6, %v7612_v37, 0.0 }
 0x8da   : > { %v7646_v19 = vadd.f32 %v7645_v56, %v7644_v9  ;;  %v10802_v21 = vpop.f32.mrf.mxu0 }
 0x8db   : > { %v7647_v31 = vsel %vm7621_vm6, %v7611_v59, 0.0  ;;  %v16761_v62 = vadd.f32 %v16570_v34, %v7287_v40  ;;  %v7290_v28 = vadd.f32 %v10802_v21, %v16596_v58  ;;  %v7651_v34 = vsel %vm7621_vm6, %v7613_v39, 0.0  ;;  %v16778_v59 = vpop.permute.xlu0 %7580  ;;  %v16784_v21 = vpop.permute.xlu1 %7585 }
 0x8dc   : > { %v7648_v6 = vadd.f32 %v7647_v31, %v7646_v19  ;;  %v7244_v43 = vpop.f32.mrf.mxu0  ;;  %v7616_v20 = vmul.f32 %v16764_v33, %v16752_v46 }
 0x8dd   : > { %v7614_v53 = vmul.f32 %v16739_v48, %v16761_v62  ;;  %v16770_v52 = vadd.f32 %v16576_v45, %v7290_v28  ;;  %v7288_v10 = vadd.f32 %v7244_v43, %v16602_v2 }
 0x8de   : > { %v7650_v16 = vadd.f32 %v7649_v51, %v7648_v6  ;;  %v10805_v49 = vpop.f32.mrf.mxu0  ;;  %v7657_v51 = vsel %vm7621_vm6, %v7616_v20, 0.0 }
 0x8df   : > { %v7454_v58 = vadd.f32 %v16582_v15, %v7288_v10  ;;  %v7293_v9 = vadd.f32 %v10805_v49, %v16608_v30  ;;  %v7653_v45 = vsel %vm7621_vm6, %v7614_v53, 0.0  ;;  %v7617_v30 = vmul.f32 %v16778_v59, %v16770_v52 }
 0x8e0   : > { %v7652_v37 = vadd.f32 %v7651_v34, %v7650_v16  ;;  %v7257_v56 = vpop.f32.mrf.mxu0  ;;  %v16794_v34 = vpop.permute.xlu0 %7590 }
 0x8e1   : > { %v7615_v40 = vmul.f32 %v16755_v1, %v7454_v58  ;;  %v7459_v2 = vadd.f32 %v16592_v41, %v7293_v9  ;;  %v7291_v19 = vadd.f32 %v7257_v56, %v16613_v13  ;;  %v7426_v13 = vpop.f32.mrf.mxu1  ;;  %v7659_v16 = vsel %vm7621_vm6, %v7617_v30, 0.0  ;;  %v16796_v9 = vpop.permute.xlu1 %7595 }
 0x8e2   : > { %v7654_v15 = vadd.f32 %v7653_v45, %v7652_v37  ;;  %v10806_v39 = vpop.f32.mrf.mxu0 }
 0x8e3   : > { %v7655_v31 = vsel %vm7621_vm6, %v7615_v40, 0.0  ;;  %v7457_v28 = vadd.f32 %v16598_v47, %v7291_v19  ;;  %v7620_v47 = vmul.f32 %v16796_v9, %v7459_v2 }
 0x8e4   : > { %v7656_v6 = vadd.f32 %v7655_v31, %v7654_v15  ;;  %v7260_v43 = vpop.f32.mrf.mxu0 }
 0x8e5   : > { %v7618_v53 = vmul.f32 %v16784_v21, %v7457_v28  ;;  %v7292_v41 = vadd.f32 %v7260_v43, %v16620_v18  ;;  %v7666_v19 = vsel %vm7665_vm12, %v7620_v47, 0.0 }
 0x8e6   : > { %v7658_v10 = vadd.f32 %v7657_v51, %v7656_v6 }
 0x8e7   : > { %v7458_v49 = vadd.f32 %v7426_v13, %v7292_v41  ;;  %v7661_v56 = vsel %vm7621_vm6, %v7618_v53, 0.0 }
 0x8e8   : > { %v7660_v37 = vadd.f32 %v7659_v16, %v7658_v10 }
 0x8e9   : > { %v7619_v20 = vmul.f32 %v16794_v34, %v7458_v49 }
 0x8ea   : > { %v7662_v45 = vadd.f32 %v7661_v56, %v7660_v37 }
 0x8eb   : > { %v7663_v18 = vsel %vm7621_vm6, %v7619_v20, 0.0 }
 0x8ec   : > { %v7664_v40 = vadd.f32 %v7663_v18, %v7662_v45 }
 0x8ee   : > { %v7667_v15 = vadd.f32 %v7666_v19, %v7664_v40  ;;  %v18500_v40 = vld [vmem:[#allocation55_spill] sm:$0xff] }
 0x8f0   : > { %v7668_v39 = vrot.slane %v7667_v15, 4 }
 0x8f2   : > { %v7669_v30 = vadd.f32 %v7668_v39, %v7667_v15 }
 0x8f4   : > { %v7670_v31 = vrot.slane %v7669_v30, 2 }
 0x8f6   : > { %v7671_v6 = vadd.f32 %v7670_v31, %v7669_v30 }
 0x8f8   : > { %v7672_v43 = vrot.slane %v7671_v6, 1 }
 0x8fa   : > { %v7673_v51 = vadd.f32 %v7672_v43, %v7671_v6 }
 0x8fc   : > { %v7674_v41 = vmul.f32 0.0069444445, %v7673_v51 }
 0x8fe   : > { %v16804_v13 = vsub.f32 %v16629_v60, %v7674_v41  ;;  %v16807_v53 = vsub.f32 %v16643_v23, %v7674_v41  ;;  %v16810_v10 = vsub.f32 %v16625_v12, %v7674_v41  ;;  %v16813_v16 = vsub.f32 %v16635_v3, %v7674_v41 }
 0x8ff   : > { %v16816_v37 = vsub.f32 %v16661_v50, %v7674_v41  ;;  %v16819_v47 = vsub.f32 %v16675_v54, %v7674_v41  ;;  %v16822_v56 = vsub.f32 %v16651_v4, %v7674_v41  ;;  %v16825_v60 = vsub.f32 %v16670_v22, %v7674_v41 }
 0x900   : > { %v16828_v23 = vsub.f32 %v16695_v36, %v7674_v41  ;;  %v16831_v12 = vsub.f32 %v16709_v38, %v7674_v41  ;;  %v16834_v3 = vsub.f32 %v16686_v27, %v7674_v41  ;;  %v16837_v50 = vsub.f32 %v16702_v29, %v7674_v41 }
 0x901   : > { %v16840_v54 = vsub.f32 %v16727_v0, %v7674_v41  ;;  %v16843_v4 = vsub.f32 %v16743_v25, %v7674_v41  ;;  %v16846_v22 = vsub.f32 %v16720_v63, %v7674_v41  ;;  %v16849_v36 = vsub.f32 %v16736_v61, %v7674_v41 }
 0x902   : > { %v16852_v38 = vsub.f32 %v16761_v62, %v7674_v41  ;;  %v16854_v27 = vsub.f32 %v7454_v58, %v7674_v41  ;;  %v16857_v29 = vsub.f32 %v16752_v46, %v7674_v41  ;;  %v16860_v0 = vsub.f32 %v16770_v52, %v7674_v41 }
 0x903   : > { %v16862_v20 = vsub.f32 %v7457_v28, %v7674_v41  ;;  %v16864_v25 = vsub.f32 %v7458_v49, %v7674_v41  ;;  %v16866_v63 = vsub.f32 %v7459_v2, %v7674_v41  ;;  %v7698_v61 = vmul.f32 %v16804_v13, %v16804_v13  ;;  %v18499_v49 = vld [vmem:[#allocation54_spill] sm:$0xff] }
 0x904   : > { %v7699_v62 = vmul.f32 %v16807_v53, %v16807_v53  ;;  %v7700_v58 = vmul.f32 %v16810_v10, %v16810_v10  ;;  %v7701_v46 = vmul.f32 %v16813_v16, %v16813_v16  ;;  %v7702_v2 = vmul.f32 %v16816_v37, %v16816_v37 }
 0x905   : > { %v7721_v52 = vmul.f32 %v7698_v61, %v16564_v44  ;;  %v7703_v18 = vmul.f32 %v16819_v47, %v16819_v47  ;;  %v7704_v44 = vmul.f32 %v16822_v56, %v16822_v56  ;;  %v7705_v43 = vmul.f32 %v16825_v60, %v16825_v60  ;;  %v11055_v61 = vld [vmem:[%s17313_s5 + $0x4] ss:$8 sps:$4 sm:$0xff]  }
 0x906   : > { %v7722_v28 = vmul.f32 %v7699_v62, %v16584_v32  ;;  %v7723_v45 = vmul.f32 %v7700_v58, %v18499_v49  ;;  %v7724_v19 = vmul.f32 %v7701_v46, %v18500_v40  ;;  %v7725_v32 = vmul.f32 %v7702_v2, %v16610_v57  ;;  %9614 = vmatprep.mubr.msk.bf16.mxu0 %vm8001_vm11, %v11055_v61 }
 0x907   : > { %v7744_v15 = vsel %vm7621_vm6, %v7721_v52, 0.0  ;;  %v7726_v51 = vmul.f32 %v7703_v18, %v16616_v26  ;;  %v7706_v58 = vmul.f32 %v16828_v23, %v16828_v23  ;;  %v7727_v57 = vmul.f32 %v7704_v44, %v16622_v35 }
 0x908   : > { %v7745_v39 = vsel %vm7621_vm6, %v7722_v28, 0.0  ;;  %v7747_v31 = vsel %vm7621_vm6, %v7723_v45, 0.0  ;;  %v7749_v41 = vsel %vm7621_vm6, %v7724_v19, 0.0  ;;  %v7751_v46 = vsel %vm7621_vm6, %v7725_v32, 0.0 }
 0x909   : > { %v7746_v30 = vadd.f32 %v7745_v39, %v7744_v15  ;;  %v7707_v28 = vmul.f32 %v16831_v12, %v16831_v12  ;;  %v7728_v26 = vmul.f32 %v7705_v43, %v16632_v5  ;;  %v7753_v2 = vsel %vm7621_vm6, %v7726_v51, 0.0 }
 0x90a   : > { %v7708_v45 = vmul.f32 %v16834_v3, %v16834_v3  ;;  %v7729_v18 = vmul.f32 %v7706_v58, %v16638_v17  ;;  %v7755_v35 = vsel %vm7621_vm6, %v7727_v57, 0.0  ;;  %v7709_v19 = vmul.f32 %v16837_v50, %v16837_v50 }
 0x90b   : > { %v7748_v6 = vadd.f32 %v7747_v31, %v7746_v30  ;;  %v7730_v15 = vmul.f32 %v7707_v28, %v16655_v24  ;;  %v7757_v5 = vsel %vm7621_vm6, %v7728_v26, 0.0  ;;  %v7710_v30 = vmul.f32 %v16840_v54, %v16840_v54 }
 0x90c   : > { %v7731_v44 = vmul.f32 %v7708_v45, %v16664_v11  ;;  %v7759_v32 = vsel %vm7621_vm6, %v7729_v18, 0.0  ;;  %v7711_v17 = vmul.f32 %v16843_v4, %v16843_v4  ;;  %v7712_v24 = vmul.f32 %v16846_v22, %v16846_v22 }
 0x90d   : > { %v7750_v62 = vadd.f32 %v7749_v41, %v7748_v6  ;;  %v7732_v6 = vmul.f32 %v7709_v19, %v16680_v7  ;;  %v7761_v43 = vsel %vm7621_vm6, %v7730_v15, 0.0  ;;  %v7733_v41 = vmul.f32 %v7710_v30, %v16689_v42 }
 0x90e   : > { %v7763_v61 = vsel %vm7621_vm6, %v7731_v44, 0.0  ;;  %v7713_v11 = vmul.f32 %v16849_v36, %v16849_v36  ;;  %v7734_v58 = vmul.f32 %v7711_v17, %v16705_v55  ;;  %v7714_v7 = vmul.f32 %v16852_v38, %v16852_v38 }
 0x90f   : > { %v7752_v52 = vadd.f32 %v7751_v46, %v7750_v62  ;;  %v7765_v57 = vsel %vm7621_vm6, %v7732_v6, 0.0  ;;  %v7767_v28 = vsel %vm7621_vm6, %v7733_v41, 0.0  ;;  %v7715_v42 = vmul.f32 %v16854_v27, %v16854_v27 }
 0x910   : > { %v7716_v55 = vmul.f32 %v16857_v29, %v16857_v29  ;;  %v7737_v18 = vmul.f32 %v7714_v7, %v16739_v48  ;;  %v7719_v48 = vmul.f32 %v16864_v25, %v16864_v25 }
 0x911   : > { %v7754_v49 = vadd.f32 %v7753_v2, %v7752_v52  ;;  %v7735_v52 = vmul.f32 %v7712_v24, %v16712_v14  ;;  %v7736_v2 = vmul.f32 %v7713_v11, %v16730_v8  ;;  %v7717_v14 = vmul.f32 %v16860_v0, %v16860_v0 }
 0x912   : > { %v7738_v19 = vmul.f32 %v7715_v42, %v16755_v1  ;;  %v7718_v8 = vmul.f32 %v16862_v20, %v16862_v20  ;;  %v7775_v30 = vsel %vm7621_vm6, %v7737_v18, 0.0  ;;  %v7720_v1 = vmul.f32 %v16866_v63, %v16866_v63 }
 0x913   : > { %v7756_v40 = vadd.f32 %v7755_v35, %v7754_v49  ;;  %v7769_v49 = vsel %vm7621_vm6, %v7734_v58, 0.0  ;;  %v7771_v35 = vsel %vm7621_vm6, %v7735_v52, 0.0  ;;  %v7773_v15 = vsel %vm7621_vm6, %v7736_v2, 0.0 }
 0x914   : > { %v7741_v6 = vmul.f32 %v7718_v8, %v16784_v21 }
 0x915   : > { %v7758_v39 = vadd.f32 %v7757_v5, %v7756_v40 }
 0x917   : > { %v7760_v31 = vadd.f32 %v7759_v32, %v7758_v39  ;;  %v7739_v39 = vmul.f32 %v7716_v55, %v16764_v33  ;;  %v7740_v32 = vmul.f32 %v7717_v14, %v16778_v59  ;;  %v7742_v33 = vmul.f32 %v7719_v48, %v16794_v34 }
 0x918   : > { %v7783_v59 = vsel %vm7621_vm6, %v7741_v6, 0.0 }
 0x919   : > { %v7762_v51 = vadd.f32 %v7761_v43, %v7760_v31  ;;  %v7777_v31 = vsel %vm7621_vm6, %v7738_v19, 0.0  ;;  %v7779_v43 = vsel %vm7621_vm6, %v7739_v39, 0.0  ;;  %v7781_v24 = vsel %vm7621_vm6, %v7740_v32, 0.0 }
 0x91a   : > { %v7785_v11 = vsel %vm7621_vm6, %v7742_v33, 0.0  ;;  %v18501_v32 = vmov 0  }
 0x91b   : > { %v7764_v62 = vadd.f32 %v7763_v61, %v7762_v51  ;;  %v7743_v61 = vmul.f32 %v7720_v1, %v16796_v9  ;;  %v11080_v9 = vld [vmem:[%s17312_s4 + $0x38] sm:$0xff]  }
 0x91c   : > { %10835 = vmatprep.subr.bf16.mxu1 %v11080_v9 }
 0x91d   : > { %v7766_v46 = vadd.f32 %v7765_v57, %v7764_v62  ;;  %v7787_v57 = vsel %vm7665_vm12, %v7743_v61, 0.0  ;;  %10836 = vmatpush3.bf16.msra.mxu1 %v11080_v9 }
 0x91f   : > { %v7768_v26 = vadd.f32 %v7767_v28, %v7766_v46 }
 0x921   : > { %v7770_v45 = vadd.f32 %v7769_v49, %v7768_v26 }
 0x923   : > { %v7772_v40 = vadd.f32 %v7771_v35, %v7770_v45 }
 0x925   : > { %v7774_v5 = vadd.f32 %v7773_v15, %v7772_v40 }
 0x927   : > { %v7776_v44 = vadd.f32 %v7775_v30, %v7774_v5 }
 0x929   : > { %v7778_v17 = vadd.f32 %v7777_v31, %v7776_v44 }
 0x92b   : > { %v7780_v51 = vadd.f32 %v7779_v43, %v7778_v17 }
 0x92d   : > { %v7782_v41 = vadd.f32 %v7781_v24, %v7780_v51 }
 0x92f   : > { %v7784_v62 = vadd.f32 %v7783_v59, %v7782_v41 }
 0x931   : > { %v7786_v58 = vadd.f32 %v7785_v11, %v7784_v62 }
 0x933   : > { %v7788_v46 = vadd.f32 %v7787_v57, %v7786_v58 }
 0x935   : > { %v7789_v21 = vrot.slane %v7788_v46, 4 }
 0x937   : > { %v7790_v7 = vadd.f32 %v7789_v21, %v7788_v46 }
 0x939   : > { %v7791_v52 = vrot.slane %v7790_v7, 2 }
 0x93b   : > { %v7792_v28 = vadd.f32 %v7791_v52, %v7790_v7 }
 0x93d   : > { %v7793_v26 = vrot.slane %v7792_v28, 1 }
 0x93f   : > { %v7794_v34 = vadd.f32 %v7793_v26, %v7792_v28 }
 0x941   : > { %v7795_v42 = vmul.f32 0.0069444445, %v7794_v34 }
 0x943   : > { %v7796_v2 = vadd.f32 1e-05, %v7795_v42 }
 0x945   : > { %11120 = vrsqrt.f32 %v7796_v2 }
 0x952   : > { %v16967_v49 = vpop.eup %11120 }
 0x953   : > { %v7812_v45 = vmul.f32 %v16967_v49, %v16846_v22  ;;  %v7813_v55 = vmul.f32 %v16967_v49, %v16849_v36  ;;  %v7810_v18 = vmul.f32 %v16967_v49, %v16840_v54  ;;  %v7811_v35 = vmul.f32 %v16967_v49, %v16843_v4 }
 0x954   : > { %v7808_v40 = vmul.f32 %v16967_v49, %v16834_v3  ;;  %v7809_v19 = vmul.f32 %v16967_v49, %v16837_v50  ;;  %v7806_v4 = vmul.f32 %v16967_v49, %v16828_v23  ;;  %v7807_v50 = vmul.f32 %v16967_v49, %v16831_v12 }
 0x955   : > { %vm7835_vm1 = vcmp.ge.f32.partialorder %v7812_v45, 0.0  ;;  %vm7836_vm13 = vcmp.ge.f32.partialorder %v7813_v55, 0.0  ;;  %v7858_v14 = vmul.f32 0.01, %v7812_v45  ;;  %v7859_v15 = vmul.f32 0.01, %v7813_v55 }
 0x956   : > { %vm7833_vm0 = vcmp.ge.f32.partialorder %v7810_v18, 0.0  ;;  %vm7834_vm3 = vcmp.ge.f32.partialorder %v7811_v35, 0.0  ;;  %v7856_v22 = vmul.f32 0.01, %v7810_v18  ;;  %v7857_v5 = vmul.f32 0.01, %v7811_v35 }
 0x957   : > { %v7881_v36 = vsel %vm7835_vm1, %v7812_v45, %v7858_v14  ;;  %v7882_v8 = vsel %vm7836_vm13, %v7813_v55, %v7859_v15  ;;  %v7854_v3 = vmul.f32 0.01, %v7808_v40  ;;  %v7855_v44 = vmul.f32 0.01, %v7809_v19 }
 0x958   : > { %v7879_v54 = vsel %vm7833_vm0, %v7810_v18, %v7856_v22  ;;  %v7897_v39 = vpack.c.bf16 %v7882_v8, %v7881_v36  ;;  %v7880_v30 = vsel %vm7834_vm3, %v7811_v35, %v7857_v5  ;;  %vm7831_vm5 = vcmp.ge.f32.partialorder %v7808_v40, 0.0 }
 0x959   : > { %v7896_v48 = vpack.c.bf16 %v7880_v30, %v7879_v54  ;;  %vm7832_vm9 = vcmp.ge.f32.partialorder %v7809_v19, 0.0  ;;  %v7877_v31 = vsel %vm7831_vm5, %v7808_v40, %v7854_v3  ;;  %v7852_v1 = vmul.f32 0.01, %v7806_v4 }
 0x95a   : > { %8036 = vmatpush1.bf16.msra.mxu0 %v7897_v39  ;;  %v7878_v17 = vsel %vm7832_vm9, %v7809_v19, %v7855_v44  ;;  %v7853_v6 = vmul.f32 0.01, %v7807_v50  ;;  %v7804_v23 = vmul.f32 %v16967_v49, %v16822_v56  ;;  %v7805_v43 = vmul.f32 %v16967_v49, %v16825_v60 }
 0x95b   : > { %8037 = vmatprep.subr.bf16.mxu0 %v18501_v32  ;;  %vm7829_vm2 = vcmp.ge.f32.partialorder %v7806_v4, 0.0  ;;  %vm7830_vm15 = vcmp.ge.f32.partialorder %v7807_v50, 0.0  ;;  %v7895_v51 = vpack.c.bf16 %v7878_v17, %v7877_v31  ;;  %v7802_v12 = vmul.f32 %v16967_v49, %v16816_v37  ;;  %v11056_v17 = vld [vmem:[%s17313_s5 + $0x14] ss:$8 sps:$4 sm:$0xff]  }
 0x95c   : > { %v7803_v33 = vmul.f32 %v16967_v49, %v16819_v47  ;;  %v7875_v24 = vsel %vm7829_vm2, %v7806_v4, %v7852_v1  ;;  %v7876_v41 = vsel %vm7830_vm15, %v7807_v50, %v7853_v6  ;;  %v7850_v61 = vmul.f32 0.01, %v7804_v23  ;;  %v11058_v1 = vld [vmem:[%s17313_s5 + $0x10] ss:$8 sps:$4 sm:$0xff]   ;;  %v11061_v6 = vld [vmem:[%s17313_s5 + $0x20] ss:$8 sps:$4 sm:$0xff]  }
 0x95d   : > { %v7851_v59 = vmul.f32 0.01, %v7805_v43  ;;  %vm7827_vm10 = vcmp.ge.f32.partialorder %v7804_v23, 0.0  ;;  %vm7828_vm8 = vcmp.ge.f32.partialorder %v7805_v43, 0.0  ;;  %v7800_v56 = vmul.f32 %v16967_v49, %v16810_v10 }
 0x95e   : > { %8038 = vmatpush1.bf16.msra.mxu0 %v7896_v48  ;;  %v7894_v60 = vpack.c.bf16 %v7876_v41, %v7875_v24  ;;  %vm7825_vm4 = vcmp.ge.f32.partialorder %v7802_v12, 0.0  ;;  %v7848_v62 = vmul.f32 0.01, %v7802_v12  ;;  %v7849_v11 = vmul.f32 0.01, %v7803_v33 }
 0x95f   : > { %8039 = vmatprep.subr.bf16.mxu0 %v18501_v32  ;;  %v7873_v37 = vsel %vm7827_vm10, %v7804_v23, %v7850_v61  ;;  %v7874_v58 = vsel %vm7828_vm8, %v7805_v43, %v7851_v59  ;;  %vm7826_vm12 = vcmp.ge.f32.partialorder %v7803_v33, 0.0  ;;  %v7801_v47 = vmul.f32 %v16967_v49, %v16813_v16  ;;  %v11062_v23 = vld [vmem:[%s17313_s5 + $0x34] ss:$8 sps:$4 sm:$0xff]   ;;  %v11064_v43 = vld [vmem:[%s17313_s5 + $0x30] ss:$8 sps:$4 sm:$0xff]  }
 0x960   : > { %vm7823_vm1 = vcmp.ge.f32.partialorder %v7800_v56, 0.0  ;;  %v7893_v57 = vpack.c.bf16 %v7874_v58, %v7873_v37  ;;  %v7871_v46 = vsel %vm7825_vm4, %v7802_v12, %v7848_v62  ;;  %v7872_v21 = vsel %vm7826_vm12, %v7803_v33, %v7849_v11  ;;  %v11067_v12 = vld [vmem:[%s17313_s5 + $0x40] ss:$8 sps:$4 sm:$0xff]   ;;  %v11068_v33 = vld [vmem:[%s17313_s5 + $0x54] ss:$8 sps:$4 sm:$0xff]  }
 0x961   : > { %v7846_v7 = vmul.f32 0.01, %v7800_v56  ;;  %v7847_v52 = vmul.f32 0.01, %v7801_v47  ;;  %v7798_v10 = vmul.f32 %v16967_v49, %v16804_v13  ;;  %v7799_v28 = vmul.f32 %v16967_v49, %v16807_v53  ;;  %v11070_v24 = vld [vmem:[%s17313_s5 + $0x50] ss:$8 sps:$4 sm:$0xff]  }
 0x962   : > { %8040 = vmatpush1.bf16.msra.mxu0 %v7895_v51  ;;  %v7820_v26 = vmul.f32 %v16967_v49, %v16866_v63  ;;  %vm7824_vm13 = vcmp.ge.f32.partialorder %v7801_v47, 0.0  ;;  %v7892_v16 = vpack.c.bf16 %v7872_v21, %v7871_v46  ;;  %v7819_v13 = vmul.f32 %v16967_v49, %v16864_v25  ;;  %v11065_v51 = vld [vmem:[%s17313_s5 + $0x44] ss:$8 sps:$4 sm:$0xff]   ;;  %v11073_v61 = vld [vmem:[%s17313_s5 + $0x60] ss:$8 sps:$4 sm:$0xff]   ;;  %v11081_v11 = vld [vmem:[%s17312_s4 + $0x30] sm:$0xff]  }
 0x963   : > { %8041 = vmatprep.subr.bf16.mxu0 %v18501_v32  ;;  %v7869_v34 = vsel %vm7823_vm1, %v7800_v56, %v7846_v7  ;;  %v7870_v42 = vsel %vm7824_vm13, %v7801_v47, %v7847_v52  ;;  %v7844_v2 = vmul.f32 0.01, %v7798_v10  ;;  %v7845_v9 = vmul.f32 0.01, %v7799_v28  ;;  %v11071_v41 = vld [vmem:[%s17313_s5 + $0x64] ss:$8 sps:$4 sm:$0xff]   ;;  %10837 = vmatprep.subr.bf16.mxu1 %v11081_v11 }
 0x964   : > { %v7866_v45 = vmul.f32 0.01, %v7820_v26  ;;  %vm7821_vm0 = vcmp.ge.f32.partialorder %v7798_v10, 0.0  ;;  %vm7822_vm3 = vcmp.ge.f32.partialorder %v7799_v28, 0.0  ;;  %vm7843_vm5 = vcmp.ge.f32.partialorder %v7820_v26, 0.0  ;;  %10838 = vmatpush3.bf16.msra.mxu1 %v11081_v11  ;;  %v11082_v37 = vld [vmem:[%s17312_s4 + $0x28] sm:$0xff]  }
 0x965   : > { %v7891_v53 = vpack.c.bf16 %v7870_v42, %v7869_v34  ;;  %v7818_v63 = vmul.f32 %v16967_v49, %v16862_v20  ;;  %v7867_v55 = vsel %vm7821_vm0, %v7798_v10, %v7844_v2  ;;  %v7868_v18 = vsel %vm7822_vm3, %v7799_v28, %v7845_v9  ;;  %v11074_v59 = vld [vmem:[%s17313_s5 + $0x74] ss:$8 sps:$4 sm:$0xff]   ;;  %v11076_v56 = vld [vmem:[%s17313_s5 + $0x70] ss:$8 sps:$4 sm:$0xff]   ;;  %v11079_v62 = vld [vmem:[%s17313_s5 + $0x80] ss:$8 sps:$4 sm:$0xff]   ;;  %10839 = vmatprep.subr.bf16.mxu1 %v11082_v37 }
 0x966   : > { %8042 = vmatpush1.bf16.msra.mxu0 %v7894_v60  ;;  %v7889_v35 = vsel %vm7843_vm5, %v7820_v26, %v7866_v45  ;;  %v8031_v40 = vsel %vm6899_vm7, 65535, %v18501_v32  ;;  %v7865_v14 = vmul.f32 0.01, %v7819_v13  ;;  %v7890_v19 = vpack.c.bf16 %v7868_v18, %v7867_v55  ;;  %v11077_v60 = vld [vmem:[%s17313_s5 + $0x84] ss:$8 sps:$4 sm:$0xff]   ;;  %v11084_v47 = vld [vmem:[%s17312_s4 + $0x18] sm:$0xff]  }
 0x967   : > { %8043 = vmatprep.subr.bf16.mxu0 %v18501_v32  ;;  %v7901_v15 = vpack.c.bf16 %v7889_v35, %v7889_v35  ;;  %v7864_v22 = vmul.f32 0.01, %v7818_v63  ;;  %vm7841_vm9 = vcmp.ge.f32.partialorder %v7818_v63, 0.0  ;;  %vm7842_vm2 = vcmp.ge.f32.partialorder %v7819_v13, 0.0  ;;  %v11083_v58 = vld [vmem:[%s17312_s4 + $0x20] sm:$0xff]   ;;  %v11088_v46 = vld [vmem:[%s17312_s4 + $0xb0] sm:$0xff]  }
 0x968   : > { %v7816_v25 = vmul.f32 %v16967_v49, %v16857_v29  ;;  %v7817_v20 = vmul.f32 %v16967_v49, %v16860_v0  ;;  %v7888_v8 = vsel %vm7842_vm2, %v7819_v13, %v7865_v14  ;;  %v7814_v39 = vmul.f32 %v16967_v49, %v16852_v38  ;;  %10840 = vmatpush3.bf16.msra.mxu1 %v11082_v37  ;;  %v11090_v21 = vld [vmem:[%s17312_s4 + $0xa8] sm:$0xff]   ;;  %v11092_v7 = vld [vmem:[%s17312_s4 + $0xa0] sm:$0xff]   ;;  %v17114_v52 = vld [vmem:[%s17312_s4 + $0xf8] sm:$0xff]  }
 0x969   : > { %v8033_v36 = vand.u32 %v8031_v40, %v7901_v15  ;;  %v7887_v5 = vsel %vm7841_vm9, %v7818_v63, %v7864_v22  ;;  %v7815_v30 = vmul.f32 %v16967_v49, %v16854_v27  ;;  %v11053_v49 = vld [vmem:[%s17313_s5] ss:$8 sps:$4 sm:$0xff]   ;;  %10841 = vmatprep.subr.bf16.mxu1 %v11083_v58  ;;  %vm8666_vm12 = vsmask.f32 3328 }
 0x96a   : > { %8044 = vmatpush1.bf16.msra.mxu0 %v7893_v57  ;;  %v7862_v54 = vmul.f32 0.01, %v7816_v25  ;;  %v7863_v4 = vmul.f32 0.01, %v7817_v20  ;;  %vm7839_vm7 = vcmp.ge.f32.partialorder %v7816_v25, 0.0  ;;  %vm7840_vm15 = vcmp.ge.f32.partialorder %v7817_v20, 0.0 }
 0x96b   : > { %8045 = vmatprep.subr.bf16.mxu0 %v18501_v32  ;;  %v7900_v29 = vpack.c.bf16 %v7888_v8, %v7887_v5  ;;  %v7860_v44 = vmul.f32 0.01, %v7814_v39  ;;  %v7861_v48 = vmul.f32 0.01, %v7815_v30  ;;  %vm7837_vm10 = vcmp.ge.f32.partialorder %v7814_v39, 0.0  ;;  %v11086_v57 = vld [vmem:[%s17312_s4 + $0xb8] sm:$0xff]  }
 0x96c   : > { %v7885_v0 = vsel %vm7839_vm7, %v7816_v25, %v7862_v54  ;;  %v7886_v3 = vsel %vm7840_vm15, %v7817_v20, %v7863_v4  ;;  %vm7838_vm8 = vcmp.ge.f32.partialorder %v7815_v30, 0.0  ;;  %10842 = vmatpush3.bf16.msra.mxu1 %v11083_v58  ;;  %vm8867_vm1 = vcmask 1042432  }
 0x96d   : > { %v7899_v50 = vpack.c.bf16 %v7886_v3, %v7885_v0  ;;  %v7883_v38 = vsel %vm7837_vm10, %v7814_v39, %v7860_v44  ;;  %v7884_v31 = vsel %vm7838_vm8, %v7815_v30, %v7861_v48  ;;  %10847 = vmatprep.subr.bf16.mxu1 %v11084_v47  ;;  %v11085_v30 = vld [vmem:[%s17312_s4 + $0x10] sm:$0xff]   ;;  %vm8577_vm13 = vcmask 1041408  }
 0x96e   : > { %8046 = vmatpush1.bf16.msra.mxu0 %v7892_v16  ;;  %v7898_v27 = vpack.c.bf16 %v7884_v31, %v7883_v38  ;;  %v11087_v38 = vld [vmem:[%s17312_s4 + $0x8] sm:$0xff]   ;;  %vm18504_vm0 = vcmask 1044480   ;;  %vm8956_vm3 = vsmask.f32 4352  ;;  %vm9089_vm9 = vcmask 520192  }
 0x96f   : > { %8047 = vmatprep.subr.bf16.mxu0 %v18501_v32  ;;  %vm18505_vm5 = vmmov %vm18504_vm0 }
 0x972   : > { %8048 = vmatpush1.bf16.msra.mxu0 %v7891_v53 }
 0x973   : > { %8049 = vmatprep.subr.bf16.mxu0 %v18501_v32 }
 0x976   : > { %8050 = vmatpush1.bf16.msra.mxu0 %v7890_v19 }
 0x977   : > { %8059 = vmatprep.subr.bf16.mxu0 %v18501_v32 }
 0x97a   : > { %8060 = vmatpush2.bf16.msra.mxu0 %v8033_v36 }
 0x97b   : > { %8061 = vmatprep.subr.bf16.mxu0 %v18501_v32 }
 0x97e   : > { %8062 = vmatpush2.bf16.msra.mxu0 %v7900_v29 }
 0x97f   : > { %8063 = vmatprep.subr.bf16.mxu0 %v18501_v32 }
 0x982   : > { %8064 = vmatpush2.bf16.msra.mxu0 %v7899_v50 }
 0x983   : > { %8065 = vmatprep.subr.bf16.mxu0 %v18501_v32  ;;  %v11059_v32 = vld [vmem:[%s17313_s5 + $0x24] ss:$8 sps:$4 sm:$0xff]  }
 0x986   : > { %8066 = vmatpush2.bf16.msra.mxu0 %v7898_v27 }
 0x987   : > { %10895 = vmatprep.subr.bf16.mxu0 %v11086_v57 }
 0x989   : > { %8068 = vmatmul.mubr.bf16.vlgmr.msra.gmra.mxu0 %v11053_v49 }
 0x98a   : > { %9615 = vmatprep.mubr.msk.bf16.mxu0 %vm8001_vm11, %v11056_v17  ;;  %10896 = vmatpush3.bf16.msra.mxu0 %v11086_v57 }
 0x98b   : > { %10897 = vmatprep.subr.bf16.mxu0 %v11088_v46 }
 0x98e   : > { %10898 = vmatpush3.bf16.msra.mxu0 %v11088_v46 }
 0x98f   : > { %10899 = vmatprep.subr.bf16.mxu0 %v11090_v21 }
 0x991   : > { %8076 = vmatmul.mubr.bf16.gmra.mxu0 %v11058_v1 }
 0x992   : > { %9616 = vmatprep.mubr.msk.bf16.mxu0 %vm8001_vm11, %v11059_v32  ;;  %10900 = vmatpush3.bf16.msra.mxu0 %v11090_v21 }
 0x993   : > { %10901 = vmatprep.subr.bf16.mxu0 %v11092_v7 }
 0x996   : > { %10902 = vmatpush3.bf16.msra.mxu0 %v11092_v7 }
 0x997   : > { %10919 = vmatprep.subr.bf16.mxu0 %v17114_v52 }
 0x999   : > { %8084 = vmatmul.mubr.bf16.gmra.mxu0 %v11061_v6 }
 0x99a   : > { %9617 = vmatprep.mubr.msk.bf16.mxu0 %vm8001_vm11, %v11062_v23 }
 0x9a1   : > { %8092 = vmatmul.mubr.bf16.gmra.mxu0 %v11064_v43 }
 0x9a2   : > { %9618 = vmatprep.mubr.msk.bf16.mxu0 %vm8001_vm11, %v11065_v51  ;;  %v11089_v51 = vld [vmem:[%s17312_s4] sm:$0xff]  }
 0x9a9   : > { %8100 = vmatmul.mubr.bf16.gmra.mxu0 %v11067_v12 }
 0x9aa   : > { %9619 = vmatprep.mubr.msk.bf16.mxu0 %vm8001_vm11, %v11068_v33 }
 0x9b1   : > { %8108 = vmatmul.mubr.bf16.gmra.mxu0 %v11070_v24 }
 0x9b2   : > { %9620 = vmatprep.mubr.msk.bf16.mxu0 %vm8001_vm11, %v11071_v41 }
 0x9b9   : > { %8116 = vmatmul.mubr.bf16.gmra.mxu0 %v11073_v61 }
 0x9ba   : > { %9621 = vmatprep.mubr.msk.bf16.mxu0 %vm8001_vm11, %v11074_v59 }
 0x9c1   : > { %8124 = vmatmul.mubr.bf16.gmra.mxu0 %v11076_v56 }
 0x9c2   : > { %9622 = vmatprep.mubr.msk.bf16.mxu0 %vm8001_vm11, %v11077_v60  ;;  %vm18502_vm11 = vcmask 1045504   ;;  %v11091_v60 = vld [vmem:[%s17312_s4 + $0x58] sm:$0xff]  }
 0x9c3   : > { %vm18503_vm4 = vmmov %vm18502_vm11 }
 0x9c9   : > { %8132 = vmatmul.mubr.bf16.gmra.mxu0 %v11079_v62 }
 0xa49   : > { %v8069_v10 = vpop.f32.mrf.mxu0 }
 0xa4b   : > { %v8071_v28 = vpop.f32.mrf.mxu0 }
 0xa4d   : > { %v8072_v26 = vpop.f32.mrf.mxu0 }
 0xa4e   : > { %v17131_v29 = vpack.c.bf16 %v8072_v26, %v8069_v10  ;;  %v11093_v10 = vld [vmem:[%s17312_s4 + $0x50] sm:$0xff]  }
 0xa4f   : > { %v8074_v16 = vpop.f32.mrf.mxu0 }
 0xa50   : > { %v8390_v23 = vshll.u32 %v17131_v29, 16  ;;  %v8388_v58 = vshrl.u32 %v17131_v29, 16 }
 0xa51   : > { %v8077_v34 = vpop.f32.mrf.mxu0 }
 0xa52   : > { %v8392_v62 = vrot.slane %v8390_v23, 1 }
 0xa53   : > { %v8079_v42 = vpop.f32.mrf.mxu0 }
 0xa54   : > { %v8393_v7 = vor.u32 %v8392_v62, %v8388_v58 }
 0xa55   : > { %v8080_v2 = vpop.f32.mrf.mxu0 }
 0xa56   : > { %v17144_v27 = vpack.c.bf16 %v8080_v2, %v8077_v34 }
 0xa57   : > { %v8082_v9 = vpop.f32.mrf.mxu0 }
 0xa58   : > { %v8394_v24 = vshll.u32 %v17144_v27, 16 }
 0xa59   : > { %v8085_v45 = vpop.f32.mrf.mxu0 }
 0xa5b   : > { %v8087_v13 = vpop.f32.mrf.mxu0 }
 0xa5d   : > { %v8088_v53 = vpop.f32.mrf.mxu0 }
 0xa5e   : > { %v17117_v35 = vpack.c.bf16 %v8088_v53, %v8085_v45  ;;  %v11095_v45 = vld [vmem:[%s17312_s4 + $0x48] sm:$0xff]  }
 0xa5f   : > { %v8090_v63 = vpop.f32.mrf.mxu0 }
 0xa60   : > { %v8225_v22 = vrot.slane %v17117_v35, 2  ;;  %v8868_v63 = vrot.slane %v17117_v35, 5 }
 0xa61   : > { %v8093_v55 = vpop.f32.mrf.mxu0 }
 0xa63   : > { %v8095_v18 = vpop.f32.mrf.mxu0 }
 0xa65   : > { %v8096_v40 = vpop.f32.mrf.mxu0 }
 0xa66   : > { %v17119_v14 = vpack.c.bf16 %v8096_v40, %v8093_v55  ;;  %v11096_v55 = vld [vmem:[%s17312_s4 + $0xf0] sm:$0xff]  }
 0xa67   : > { %v8098_v19 = vpop.f32.mrf.mxu0 }
 0xa68   : > { %v8226_v15 = vrot.slane %v17119_v14, 2  ;;  %v8869_v2 = vrot.slane %v17119_v14, 5  ;;  %v11097_v14 = vld [vmem:[%s17312_s4 + $0x40] sm:$0xff]   ;;  %v11098_v19 = vld [vmem:[%s17312_s4 + $0xe8] sm:$0xff]  }
 0xa69   : > { %v8101_v25 = vpop.f32.mrf.mxu0 }
 0xa6a   : > { %v8227_v20 = vsel %vm18502_vm11, %v8225_v22, %v8226_v15  ;;  %v8870_v40 = vsel %vm8867_vm1, %v8868_v63, %v8869_v2 }
 0xa6b   : > { %v8103_v36 = vpop.f32.mrf.mxu0  ;;  %10843 = vmatprep.mubr.msk.bf16.mxu1 %vm7621_vm6, %v8227_v20 }
 0xa6c   : > { %v8398_v36 = vshrl.u32 %v17144_v27, 16 }
 0xa6d   : > { %v8104_v5 = vpop.f32.mrf.mxu0 }
 0xa6e   : > { %v17125_v8 = vpack.c.bf16 %v8104_v5, %v8101_v25  ;;  %v11100_v25 = vld [vmem:[%s17312_s4 + $0xe0] sm:$0xff]  }
 0xa6f   : > { %v8106_v54 = vpop.f32.mrf.mxu0 }
 0xa70   : > { %v8228_v4 = vrot.slane %v17125_v8, 2  ;;  %v8668_v44 = vshrl.u32 %v17125_v8, 16  ;;  %v8671_v48 = vshll.u32 %v17125_v8, 16 }
 0xa71   : > { %v8109_v39 = vpop.f32.mrf.mxu0 }
 0xa72   : > { %v8229_v0 = vsel %vm18503_vm4, %v8226_v15, %v8228_v4  ;;  %v8670_v32 = vrot.slane %v8668_v44, 4  ;;  %v8673_v6 = vrot.slane %v8671_v48, 5  ;;  %v11102_v44 = vld [vmem:[%s17312_s4 + $0x68] sm:$0xff]  }
 0xa73   : > { %v8111_v3 = vpop.f32.mrf.mxu0  ;;  %10844 = vmatmul.mubr.msk.bf16.vlgmr.msra.gmra.mxu1 %vm7621_vm6, %v8229_v0  ;;  %v8871_v0 = vrot.slane %v17125_v8, 5 }
 0xa74   : > { %10848 = vmatpush3.bf16.msra.mxu1 %v11084_v47  ;;  %10855 = vmatprep.mubr.msk.bf16.mxu1 %vm7621_vm6, %v17131_v29  ;;  %v8674_v59 = vor.u32 %v8673_v6, %v8670_v32  ;;  %v8396_v47 = vrot.slane %v8394_v24, 1 }
 0xa75   : > { %v8112_v50 = vpop.f32.mrf.mxu0  ;;  %10849 = vmatprep.subr.bf16.mxu1 %v11085_v30  ;;  %v8872_v48 = vsel %vm8867_vm1, %v8869_v2, %v8871_v0 }
 0xa76   : > { %v17142_v31 = vpack.c.bf16 %v8112_v50, %v8109_v39  ;;  %v8397_v34 = vsel %vm2646_vm14, %v8393_v7, %v8396_v47  ;;  %vm8486_vm14 = vcmask 1043456   ;;  %v8400_v4 = vor.u32 %v8398_v36, %v8396_v47 }
 0xa77   : > { %v8114_v49 = vpop.f32.mrf.mxu0  ;;  %v8487_v39 = vrot.slane %v17125_v8, 4  ;;  %v11103_v8 = vld [vmem:[%s17312_s4 + $0x60] sm:$0xff]   ;;  %v8960_v47 = vrot.slane %v8398_v36, 3  ;;  %v8958_v7 = vrot.slane %v8390_v23, 4  ;;  %v8965_v23 = vshrl.u32 %v17117_v35, 16 }
 0xa78   : > { %v8676_v17 = vshrl.u32 %v17142_v31, 16  ;;  %v8679_v1 = vshll.u32 %v17142_v31, 16  ;;  %10850 = vmatpush3.bf16.msra.mxu1 %v11085_v30  ;;  %v8488_v5 = vrot.slane %v17142_v31, 4  ;;  %v11101_v30 = vld [vmem:[%s17312_s4 + $0x70] sm:$0xff]  }
 0xa79   : > { %v8117_v43 = vpop.f32.mrf.mxu0  ;;  %10851 = vmatprep.subr.bf16.mxu1 %v11087_v38 }
 0xa7a   : > { %v8678_v12 = vrot.slane %v8676_v17, 4  ;;  %v8681_v33 = vrot.slane %v8679_v1, 5  ;;  %v8489_v3 = vsel %vm8486_vm14, %v8487_v39, %v8488_v5  ;;  %v11105_v1 = vld [vmem:[%s17312_s4 + $0x90] sm:$0xff]  }
 0xa7b   : > { %v8119_v41 = vpop.f32.mrf.mxu0 }
 0xa7c   : > { %v8682_v61 = vor.u32 %v8681_v33, %v8678_v12  ;;  %10852 = vmatpush3.bf16.msra.mxu1 %v11087_v38  ;;  %v11104_v38 = vld [vmem:[%s17312_s4 + $0x98] sm:$0xff]  }
 0xa7d   : > { %v8120_v56 = vpop.f32.mrf.mxu0  ;;  %10853 = vmatprep.subr.bf16.mxu1 %v11089_v51  ;;  %v11108_v33 = vld [vmem:[%s17312_s4 + $0xd8] sm:$0xff]  }
 0xa7e   : > { %v17158_v11 = vpack.c.bf16 %v8120_v56, %v8117_v43  ;;  %v8683_v37 = vsel %vm8666_vm12, %v8674_v59, %v8682_v61  ;;  %v11106_v43 = vld [vmem:[%s17312_s4 + $0x88] sm:$0xff]   ;;  %v8779_v59 = vrot.slane %v17131_v29, 3  ;;  %v11109_v56 = vld [vmem:[%s17312_s4 + $0xd0] sm:$0xff]  }
 0xa7f   : > { %10903 = vmatprep.mubr.msk.bf16.mxu0 %vm7621_vm6, %v8683_v37  ;;  %v8122_v57 = vpop.f32.mrf.mxu0  ;;  %v11111_v37 = vld [vmem:[%s17312_s4 + $0xc0] sm:$0xff]   ;;  %v11114_v29 = vld [vmem:[%s17312_s4 + $0x108] sm:$0xff]  }
 0xa80   : > { %v8685_v46 = vshrl.u32 %v17158_v11, 16  ;;  %v8688_v21 = vshll.u32 %v17158_v11, 16  ;;  %10854 = vmatpush3.bf16.msra.mxu1 %v11089_v51  ;;  %v8490_v31 = vrot.slane %v17158_v11, 4  ;;  %v8578_v17 = vrot.slane %v17158_v11, 6  ;;  %v11107_v51 = vld [vmem:[%s17312_s4 + $0x80] sm:$0xff]   ;;  %v11110_v11 = vld [vmem:[%s17312_s4 + $0xc8] sm:$0xff]  }
 0xa81   : > { %10859 = vmatprep.subr.bf16.mxu1 %v11091_v60  ;;  %v17172_v28 = vpop.f32.mrf.mxu0  ;;  %v8961_v57 = vrot.slane %v8394_v24, 4  ;;  %v11113_v24 = vld [vmem:[%s17312_s4 + $0x110] sm:$0xff]  }
 0xa82   : > { %v8687_v26 = vrot.slane %v8685_v46, 4  ;;  %v8690_v16 = vrot.slane %v8688_v21, 5  ;;  %v8491_v32 = vsel %vm8486_vm14, %v8488_v5, %v8490_v31  ;;  %v11112_v46 = vld [vmem:[%s17312_s4 + $0x118] sm:$0xff]   ;;  %v8957_v21 = vrot.slane %v8388_v58, 3 }
 0xa83   : > { %10856 = vmatmul.mubr.msk.bf16.vlgmr.msra.gmra.mxu1 %vm7621_vm6, %v17144_v27  ;;  %v8127_v42 = vpop.f32.mrf.mxu0 }
 0xa84   : > { %v8691_v9 = vor.u32 %v8690_v16, %v8687_v26  ;;  %10860 = vmatpush3.bf16.msra.mxu1 %v11091_v60  ;;  %10867 = vmatprep.mubr.msk.bf16.mxu1 %vm7621_vm6, %v8397_v34  ;;  %v8968_v16 = vshll.u32 %v17117_v35, 16  ;;  %v11115_v34 = vld [vmem:[%s17312_s4 + $0x100] sm:$0xff]   ;;  %v8967_v42 = vrot.slane %v8965_v23, 3  ;;  %v9063_v23 = vpop.permute.xlu0 %9062 }
 0xa85   : > { %10861 = vmatprep.subr.bf16.mxu1 %v11093_v10  ;;  %v8128_v13 = vpop.f32.mrf.mxu0 }
 0xa86   : > { %v8692_v53 = vsel %vm8666_vm12, %v8682_v61, %v8691_v9  ;;  %v8147_v50 = vpack.c.bf16 %v8128_v13, %v17172_v28  ;;  %v8780_v61 = vrot.slane %v17144_v27, 3  ;;  %v8962_v28 = vor.u32 %v8961_v57, %v8960_v47 }
 0xa87   : > { %10904 = vmatmul.mubr.msk.bf16.vlgmr.msra.gmra.mxu0 %vm7621_vm6, %v8692_v53  ;;  %v8130_v18 = vpop.f32.mrf.mxu0  ;;  %v8959_v27 = vor.u32 %v8958_v7, %v8957_v21  ;;  %v8970_v2 = vrot.slane %v8968_v16, 4 }
 0xa88   : > { %10862 = vmatpush3.bf16.msra.mxu1 %v11093_v10  ;;  %10920 = vmatpush3.bf16.msra.mxu0 %v17114_v52  ;;  %v11099_v52 = vld [vmem:[%s17312_s4 + $0x78] sm:$0xff]   ;;  %v8579_v49 = vrot.slane %v8147_v50, 6  ;;  %v8781_v62 = vsel %vm18504_vm0, %v8779_v59, %v8780_v61  ;;  %v8782_v10 = vrot.slane %v17117_v35, 3 }
 0xa89   : > { %10927 = vmatprep.mubr.msk.bf16.mxu0 %vm7621_vm6, %v8870_v40  ;;  %10863 = vmatprep.subr.bf16.mxu1 %v11095_v45  ;;  %v8133_v15 = vpop.f32.mrf.mxu0  ;;  %v8963_v58 = vsel %vm8956_vm3, %v8959_v27, %v8962_v28  ;;  %v8971_v9 = vor.u32 %v8970_v2, %v8967_v42 }
 0xa8a   : > { %10921 = vmatprep.subr.bf16.mxu0 %v11096_v55  ;;  %v8580_v6 = vsel %vm8577_vm13, %v8578_v17, %v8579_v49  ;;  %v8783_v26 = vsel %vm18505_vm5, %v8780_v61, %v8782_v10 }
 0xa8b   : > { %v8135_v22 = vpop.f32.mrf.mxu0 }
 0xa8c   : > { %10864 = vmatpush3.bf16.msra.mxu1 %v11095_v45  ;;  %10922 = vmatpush3.bf16.msra.mxu0 %v11096_v55  ;;  %v8972_v45 = vsel %vm8956_vm3, %v8962_v28, %v8971_v9 }
 0xa8d   : > { %10865 = vmatprep.subr.bf16.mxu1 %v11097_v14  ;;  %10923 = vmatprep.subr.bf16.mxu0 %v11098_v19  ;;  %v8136_v20 = vpop.f32.mrf.mxu0 }
 0xa8e   : > { %v8148_v12 = vpack.c.bf16 %v8136_v20, %v8133_v15 }
 0xa8f   : > { %v8138_v54 = vpop.f32.mrf.mxu0 }
 0xa90   : > { %10866 = vmatpush3.bf16.msra.mxu1 %v11097_v14  ;;  %10924 = vmatpush3.bf16.msra.mxu0 %v11098_v19  ;;  %v8581_v41 = vrot.slane %v8148_v12, 6 }
 0xa91   : > { %10871 = vmatprep.subr.bf16.mxu1 %v11099_v52  ;;  %10925 = vmatprep.subr.bf16.mxu0 %v11100_v25 }
 0xa92   : > { %v8582_v60 = vsel %vm8577_vm13, %v8579_v49, %v8581_v41 }
 0xa93   : > { %10868 = vmatmul.mubr.msk.bf16.vlgmr.msra.gmra.mxu1 %vm7621_vm6, %v8400_v4 }
 0xa94   : > { %10872 = vmatpush3.bf16.msra.mxu1 %v11099_v52  ;;  %10879 = vmatprep.mubr.msk.bf16.mxu1 %vm7621_vm6, %v8489_v3 }
 0xa95   : > { %10926 = vmatpush3.bf16.msra.mxu0 %v11100_v25  ;;  %10873 = vmatprep.subr.bf16.mxu1 %v11101_v30 }
 0xa98   : > { %10928 = vmatmul.mubr.msk.bf16.vlgmr.msra.gmra.mxu0 %vm7621_vm6, %v8872_v48  ;;  %10874 = vmatpush3.bf16.msra.mxu1 %v11101_v30 }
 0xa99   : > { %10875 = vmatprep.subr.bf16.mxu1 %v11102_v44 }
 0xa9c   : > { %10876 = vmatpush3.bf16.msra.mxu1 %v11102_v44 }
 0xa9d   : > { %10877 = vmatprep.subr.bf16.mxu1 %v11103_v8 }
 0xaa0   : > { %10878 = vmatpush3.bf16.msra.mxu1 %v11103_v8 }
 0xaa1   : > { %10883 = vmatprep.subr.bf16.mxu1 %v11104_v38 }
 0xaa3   : > { %10880 = vmatmul.mubr.msk.bf16.vlgmr.msra.gmra.mxu1 %vm7621_vm6, %v8491_v32 }
 0xaa4   : > { %10884 = vmatpush3.bf16.msra.mxu1 %v11104_v38  ;;  %10891 = vmatprep.mubr.msk.bf16.mxu1 %vm7621_vm6, %v8580_v6 }
 0xaa5   : > { %10885 = vmatprep.subr.bf16.mxu1 %v11105_v1 }
 0xaa8   : > { %10886 = vmatpush3.bf16.msra.mxu1 %v11105_v1 }
 0xaa9   : > { %10887 = vmatprep.subr.bf16.mxu1 %v11106_v43 }
 0xaac   : > { %10888 = vmatpush3.bf16.msra.mxu1 %v11106_v43 }
 0xaad   : > { %10889 = vmatprep.subr.bf16.mxu1 %v11107_v51 }
 0xab0   : > { %10890 = vmatpush3.bf16.msra.mxu1 %v11107_v51 }
 0xab1   : > { %10907 = vmatprep.subr.bf16.mxu1 %v11108_v33 }
 0xab3   : > { %10892 = vmatmul.mubr.msk.bf16.vlgmr.msra.gmra.mxu1 %vm7621_vm6, %v8582_v60 }
 0xab4   : > { %10908 = vmatpush3.bf16.msra.mxu1 %v11108_v33  ;;  %10915 = vmatprep.mubr.msk.bf16.mxu1 %vm7621_vm6, %v8781_v62 }
 0xab5   : > { %10909 = vmatprep.subr.bf16.mxu1 %v11109_v56 }
 0xab8   : > { %10910 = vmatpush3.bf16.msra.mxu1 %v11109_v56 }
 0xab9   : > { %10911 = vmatprep.subr.bf16.mxu1 %v11110_v11 }
 0xabc   : > { %10912 = vmatpush3.bf16.msra.mxu1 %v11110_v11 }
 0xabd   : > { %10913 = vmatprep.subr.bf16.mxu1 %v11111_v37 }
 0xac0   : > { %10914 = vmatpush3.bf16.msra.mxu1 %v11111_v37 }
 0xac1   : > { %10931 = vmatprep.subr.bf16.mxu1 %v11112_v46 }
 0xac3   : > { %10916 = vmatmul.mubr.msk.bf16.vlgmr.msra.gmra.mxu1 %vm7621_vm6, %v8783_v26 }
 0xac4   : > { %10932 = vmatpush3.bf16.msra.mxu1 %v11112_v46  ;;  %10939 = vmatprep.mubr.msk.bf16.mxu1 %vm7621_vm6, %v8963_v58 }
 0xac5   : > { %10933 = vmatprep.subr.bf16.mxu1 %v11113_v24 }
 0xac8   : > { %10934 = vmatpush3.bf16.msra.mxu1 %v11113_v24 }
 0xac9   : > { %10935 = vmatprep.subr.bf16.mxu1 %v11114_v29 }
 0xacc   : > { %10936 = vmatpush3.bf16.msra.mxu1 %v11114_v29 }
 0xacd   : > { %10937 = vmatprep.subr.bf16.mxu1 %v11115_v34 }
 0xad0   : > { %10938 = vmatpush3.bf16.msra.mxu1 %v11115_v34  ;;  %v9068_v34 = vpop.permute.xlu1 %9067 }
 0xad3   : > { %10940 = vmatmul.mubr.msk.bf16.vlgmr.msra.gmra.mxu1 %vm7621_vm6, %v8972_v45 }
 0xb33   : > { %v10845_v13 = vpop.f32.mrf.mxu1 }
 0xb35   : > { %v8294_v53 = vpop.f32.mrf.mxu1 }
 0xb37   : > { %v10846_v63 = vpop.f32.mrf.mxu1 }
 0xb39   : > { %v8297_v35 = vpop.f32.mrf.mxu1 }
 0xb43   : > { %v10857_v55 = vpop.f32.mrf.mxu1 }
 0xb44   : > { %v8382_v50 = vadd.f32 %v10857_v55, %v10845_v13 }
 0xb45   : > { %v8373_v18 = vpop.f32.mrf.mxu1 }
 0xb46   : > { %v8374_v48 = vadd.f32 %v8373_v18, %v8294_v53 }
 0xb47   : > { %v10858_v40 = vpop.f32.mrf.mxu1  ;;  %v10905_v4 = vpop.f32.mrf.mxu0 }
 0xb48   : > { %v8385_v49 = vadd.f32 %v10858_v40, %v10846_v63 }
 0xb49   : > { %v8376_v14 = vpop.f32.mrf.mxu1  ;;  %v8757_v30 = vpop.f32.mrf.mxu0 }
 0xb4a   : > { %v8377_v17 = vadd.f32 %v8376_v14, %v8297_v35  ;;  %v9073_v14 = vpop.permute.xlu0 %9072 }
 0xb4b   : > { %v10906_v3 = vpop.f32.mrf.mxu0 }
 0xb4d   : > { %v8760_v31 = vpop.f32.mrf.mxu0 }
 0xb53   : > { %v10869_v19 = vpop.f32.mrf.mxu1 }
 0xb54   : > { %v8482_v1 = vadd.f32 %v10869_v19, %v8382_v50 }
 0xb55   : > { %v8465_v15 = vpop.f32.mrf.mxu1 }
 0xb56   : > { %v8480_v38 = vadd.f32 %v8465_v15, %v8374_v48 }
 0xb57   : > { %v10870_v22 = vpop.f32.mrf.mxu1 }
 0xb58   : > { %v8483_v43 = vadd.f32 %v10870_v22, %v8385_v49  ;;  %v10929_v41 = vpop.f32.mrf.mxu0  ;;  %v9078_v22 = vpop.permute.xlu1 %9077 }
 0xb59   : > { %v8468_v52 = vpop.f32.mrf.mxu1 }
 0xb5a   : > { %v8481_v51 = vadd.f32 %v8468_v52, %v8377_v17  ;;  %v8937_v47 = vpop.f32.mrf.mxu0 }
 0xb5c   : > { %v10930_v27 = vpop.f32.mrf.mxu0 }
 0xb5e   : > { %v8940_v9 = vpop.f32.mrf.mxu0 }
 0xb63   : > { %v10881_v25 = vpop.f32.mrf.mxu1 }
 0xb64   : > { %v8573_v12 = vadd.f32 %v10881_v25, %v8482_v1 }
 0xb65   : > { %v8556_v20 = vpop.f32.mrf.mxu1 }
 0xb66   : > { %v8571_v32 = vadd.f32 %v8556_v20, %v8480_v38 }
 0xb67   : > { %v10882_v36 = vpop.f32.mrf.mxu1 }
 0xb68   : > { %v8574_v61 = vadd.f32 %v10882_v36, %v8483_v43 }
 0xb69   : > { %v8559_v5 = vpop.f32.mrf.mxu1 }
 0xb6a   : > { %v8572_v59 = vadd.f32 %v8559_v5, %v8481_v51 }
 0xb73   : > { %v10893_v54 = vpop.f32.mrf.mxu1 }
 0xb74   : > { %v8664_v56 = vadd.f32 %v10893_v54, %v8573_v12 }
 0xb75   : > { %v8647_v39 = vpop.f32.mrf.mxu1 }
 0xb76   : > { %v8662_v33 = vadd.f32 %v8647_v39, %v8571_v32  ;;  %v8774_v57 = vadd.f32 %v10905_v4, %v8664_v56 }
 0xb77   : > { %v10894_v0 = vpop.f32.mrf.mxu1 }
 0xb78   : > { %v8665_v62 = vadd.f32 %v10894_v0, %v8574_v61  ;;  %v8772_v37 = vadd.f32 %v8757_v30, %v8662_v33 }
 0xb79   : > { %v8650_v44 = vpop.f32.mrf.mxu1 }
 0xb7a   : > { %v8663_v11 = vadd.f32 %v8650_v44, %v8572_v59  ;;  %v8775_v10 = vadd.f32 %v10906_v3, %v8665_v62 }
 0xb7c   : > { %v8773_v28 = vadd.f32 %v8760_v31, %v8663_v11 }
 0xb83   : > { %v10917_v8 = vpop.f32.mrf.mxu1 }
 0xb84   : > { %v8865_v7 = vadd.f32 %v10917_v8, %v8774_v57 }
 0xb85   : > { %v8848_v6 = vpop.f32.mrf.mxu1 }
 0xb86   : > { %v8863_v46 = vadd.f32 %v8848_v6, %v8772_v37  ;;  %v8954_v42 = vadd.f32 %v10929_v41, %v8865_v7 }
 0xb87   : > { %v10918_v60 = vpop.f32.mrf.mxu1 }
 0xb88   : > { %v8866_v26 = vadd.f32 %v10918_v60, %v8775_v10  ;;  %v8952_v29 = vadd.f32 %v8937_v47, %v8863_v46 }
 0xb89   : > { %v8851_v21 = vpop.f32.mrf.mxu1 }
 0xb8a   : > { %v8864_v58 = vadd.f32 %v8851_v21, %v8773_v28  ;;  %v8955_v53 = vadd.f32 %v10930_v27, %v8866_v26 }
 0xb8c   : > { %v8953_v63 = vadd.f32 %v8940_v9, %v8864_v58 }
 0xb93   : > { %v10941_v24 = vpop.f32.mrf.mxu1 }
 0xb94   : > { %v9054_v13 = vadd.f32 %v10941_v24, %v8954_v42 }
 0xb95   : > { %v9037_v16 = vpop.f32.mrf.mxu1 }
 0xb96   : > { %v9052_v2 = vadd.f32 %v9037_v16, %v8952_v29  ;;  %v9082_v19 = vmul.f32 %v9073_v14, %v9054_v13 }
 0xb97   : > { %v10942_v45 = vpop.f32.mrf.mxu1 }
 0xb98   : > { %v9080_v55 = vmul.f32 %v9063_v23, %v9052_v2  ;;  %v9055_v18 = vadd.f32 %v10942_v45, %v8955_v53  ;;  %v9087_v5 = vsel %vm7621_vm6, %v9082_v19, 0.0 }
 0xb99   : > { %v9040_v35 = vpop.f32.mrf.mxu1 }
 0xb9a   : > { %v9053_v40 = vadd.f32 %v9040_v35, %v8953_v63  ;;  %v9084_v52 = vsel %vm7621_vm6, %v9080_v55, 0.0  ;;  %v9083_v25 = vmul.f32 %v9078_v22, %v9055_v18 }
 0xb9c   : > { %v9081_v15 = vmul.f32 %v9068_v34, %v9053_v40  ;;  %v9090_v4 = vsel %vm9089_vm9, %v9083_v25, 0.0 }
 0xb9e   : > { %v9085_v20 = vsel %vm7621_vm6, %v9081_v15, 0.0 }
 0xb9f   : > { %v9086_v36 = vadd.f32 %v9085_v20, %v9084_v52 }
 0xba1   : > { %v9088_v54 = vadd.f32 %v9087_v5, %v9086_v36 }
 0xba3   : > { %v9091_v39 = vadd.f32 %v9090_v4, %v9088_v54 }
 0xba5   : > { %v9092_v30 = vrot.slane %v9091_v39, 4 }
 0xba7   : > { %v9093_v0 = vadd.f32 %v9092_v30, %v9091_v39 }
 0xba9   : > { %v9094_v3 = vrot.slane %v9093_v0, 2 }
 0xbab   : > { %v9095_v44 = vadd.f32 %v9094_v3, %v9093_v0 }
 0xbad   : > { %v9096_v48 = vrot.slane %v9095_v44, 1 }
 0xbaf   : > { %v9097_v8 = vadd.f32 %v9096_v48, %v9095_v44 }
 0xbb1   : > { %v9098_v50 = vmul.f32 0.04, %v9097_v8 }
 0xbb3   : > { %v9099_v38 = vsub.f32 %v9052_v2, %v9098_v50  ;;  %v9100_v31 = vsub.f32 %v9053_v40, %v9098_v50  ;;  %v9101_v49 = vsub.f32 %v9054_v13, %v9098_v50  ;;  %v9102_v17 = vsub.f32 %v9055_v18, %v9098_v50 }
 0xbb5   : > { %v9103_v1 = vmul.f32 %v9099_v38, %v9099_v38  ;;  %v9104_v32 = vmul.f32 %v9100_v31, %v9100_v31  ;;  %v9105_v6 = vmul.f32 %v9101_v49, %v9101_v49  ;;  %v9106_v43 = vmul.f32 %v9102_v17, %v9102_v17 }
 0xbb7   : > { %v9107_v51 = vmul.f32 %v9103_v1, %v9063_v23  ;;  %v9108_v12 = vmul.f32 %v9104_v32, %v9068_v34  ;;  %v9109_v33 = vmul.f32 %v9105_v6, %v9073_v14  ;;  %v9110_v41 = vmul.f32 %v9106_v43, %v9078_v22 }
 0xbb9   : > { %v9111_v61 = vsel %vm7621_vm6, %v9107_v51, 0.0  ;;  %v9112_v59 = vsel %vm7621_vm6, %v9108_v12, 0.0  ;;  %v9114_v60 = vsel %vm7621_vm6, %v9109_v33, 0.0  ;;  %v9116_v11 = vsel %vm9089_vm9, %v9110_v41, 0.0 }
 0xbba   : > { %v9113_v56 = vadd.f32 %v9112_v59, %v9111_v61 }
 0xbbc   : > { %v9115_v62 = vadd.f32 %v9114_v60, %v9113_v56 }
 0xbbe   : > { %v9117_v37 = vadd.f32 %v9116_v11, %v9115_v62 }
 0xbc0   : > { %v9118_v47 = vrot.slane %v9117_v37, 4 }
 0xbc2   : > { %v9119_v57 = vadd.f32 %v9118_v47, %v9117_v37 }
 0xbc4   : > { %v9120_v46 = vrot.slane %v9119_v57, 2 }
 0xbc6   : > { %v9121_v21 = vadd.f32 %v9120_v46, %v9119_v57 }
 0xbc8   : > { %v9122_v7 = vrot.slane %v9121_v21, 1 }
 0xbca   : > { %v9123_v10 = vadd.f32 %v9122_v7, %v9121_v21 }
 0xbcc   : > { %v9124_v28 = vmul.f32 0.04, %v9123_v10 }
 0xbce   : > { %v9125_v27 = vadd.f32 1e-05, %v9124_v28 }
 0xbd0   : > { %11122 = vrsqrt.f32 %v9125_v27 }
 0xbdd   : > { %v11123_v24 = vpop.eup %11122 }
 0xbde   : > { %v9127_v26 = vmul.f32 %v11123_v24, %v9099_v38  ;;  %v9128_v58 = vmul.f32 %v11123_v24, %v9100_v31  ;;  %v9129_v29 = vmul.f32 %v11123_v24, %v9101_v49  ;;  %v9130_v23 = vmul.f32 %v11123_v24, %v9102_v17 }
 0xbe0   : > { %vm9131_vm2 = vcmp.ge.f32.partialorder %v9127_v26, 0.0  ;;  %vm9132_vm7 = vcmp.ge.f32.partialorder %v9128_v58, 0.0  ;;  %vm9133_vm15 = vcmp.ge.f32.partialorder %v9129_v29, 0.0  ;;  %vm9134_vm10 = vcmp.ge.f32.partialorder %v9130_v23, 0.0 }
 0xbe1   : > { %v9135_v16 = vmul.f32 0.01, %v9127_v26  ;;  %v9136_v34 = vmul.f32 0.01, %v9128_v58  ;;  %v9137_v42 = vmul.f32 0.01, %v9129_v29 }
 0xbe2   : > { %v9138_v2 = vmul.f32 0.01, %v9130_v23 }
 0xbe3   : > { %v9139_v9 = vsel %vm9131_vm2, %v9127_v26, %v9135_v16  ;;  %v9140_v45 = vsel %vm9132_vm7, %v9128_v58, %v9136_v34  ;;  %v9141_v13 = vsel %vm9133_vm15, %v9129_v29, %v9137_v42 }
 0xbe4   : > { %v9142_v53 = vsel %vm9134_vm10, %v9130_v23, %v9138_v2  ;;  %9143 = vst.msk [vmem:[%s332_s25] sm:$0xff] %vm7621_vm6, %v9139_v9  ;;  %9144 = vst.msk [vmem:[%s332_s25 + $0x8] sm:$0xff] %vm7621_vm6, %v9140_v45 }
 0xbe5   : > { %9145 = vst.msk [vmem:[%s332_s25 + $0x10] sm:$0xff] %vm7621_vm6, %v9141_v13 }
 0xbe6   : > { %9146 = vst.msk [vmem:[%s332_s25 + $0x18] sm:$0x1f] %vm9089_vm9, %v9142_v53 }
 0xbe7 PF: > { %s19_s30 = sadd.s32 1, %s11130_s30  }
 0xbe8   : > { %p16_p4 = scmp.ge.s32.totalorder %s19_s30, 4  }
 0xbea   :  { %18 = sbr.rel (!%p16_p4) target bundleno = 1 (0x1), region = 86 }

</bundles_post_ra>
